<compile_context>
chip_gen: v5e
topology: v5e:2x2
jax: 0.10.0
libtpu: 0.0.40
codegen_flags: <defaults>
</compile_context>

<pallas_src>
import math
from functools import partial

import jax
import jax.numpy as jnp
import numpy as np
from jax.experimental import pallas as pl
from jax.experimental.pallas import tpu as pltpu  # noqa: F401  (TPU backend)

D_MODEL = 32
NHEAD = 4
DIM_FF = 64
NUM_LAYERS = 2
EPS = 1e-5

# Row layout of the packed per-layer vector slab (all (D,)-sized parameters).
(V_SA_BO, V_CA_BO, V_L2_B,
 V_N1_G, V_N1_B, V_N2_G, V_N2_B, V_N3_G, V_N3_B) = range(9)
NUM_VEC = 9


# ----------------------------- shared small math ------------------------------

def _layer_norm(x, g, b):
    # x: (N, D); g, b broadcastable to (N, D)
    mu = jnp.mean(x, axis=-1, keepdims=True)
    xc = x - mu
    var = jnp.mean(xc * xc, axis=-1, keepdims=True)
    return xc * jax.lax.rsqrt(var + EPS) * g + b


# ------------------------------- Pallas kernel --------------------------------

def decoder_stack_kernel(tgt_ref, mem_ref, w_qkv_ref, b_qkv_ref, w_o_ref,
                         vec_ref, w_ff1_ref, w_ff2_ref, b_ff1_ref, out_ref,
                         *, nhead, num_layers, batch, t_len):
    # Flattened activation (B*T, D), VMEM-resident across the whole layer stack.
    # T is a multiple of 8, so the per-batch row blocks are sublane-tile aligned.
    x = jnp.concatenate([tgt_ref[b] for b in range(batch)], axis=0)
    mem_rows = [mem_ref[b] for b in range(batch)]          # per-batch (S, D)

    def qkv_idx(l, side, j, h):          # flat row into the packed qkv slabs
        return ((l * 2 + side) * 3 + j) * nhead + h

    def o_idx(l, side, h):               # flat row into the packed out-proj slab
        return (l * 2 + side) * nhead + h

    def mha(x_flat, kv_rows, l, side):
        """Multi-head attention: per-head pre-split (and q pre-scaled) weights,
        so no lane-slicing of activations; q projection on the flattened rows."""
        q_heads = [
            jnp.dot(x_flat, w_qkv_ref[qkv_idx(l, side, 0, h)],
                    preferred_element_type=jnp.float32)
            + b_qkv_ref[qkv_idx(l, side, 0, h)]
            for h in range(nhead)]                          # each (B*T, hd)
        rows = []
        for b in range(batch):                              # static batch loop
            kv_b = kv_rows[b]                               # (S_kv, D)
            acc_b = None
            for h in range(nhead):                          # static head loop
                k = (jnp.dot(kv_b, w_qkv_ref[qkv_idx(l, side, 1, h)],
                             preferred_element_type=jnp.float32)
                     + b_qkv_ref[qkv_idx(l, side, 1, h)])   # (S_kv, hd)
                v = (jnp.dot(kv_b, w_qkv_ref[qkv_idx(l, side, 2, h)],
                             preferred_element_type=jnp.float32)
                     + b_qkv_ref[qkv_idx(l, side, 2, h)])   # (S_kv, hd)
                q_b = q_heads[h][b * t_len:(b + 1) * t_len]  # aligned slice
                s = jnp.einsum('td,sd->ts', q_b, k,
                               preferred_element_type=jnp.float32)
                e = jnp.exp(s - jnp.max(s, axis=-1, keepdims=True))
                denom = jnp.sum(e, axis=-1, keepdims=True)
                # EUP approximate reciprocal + one Newton step -> f32 accuracy
                # while keeping the divide off the VALU.
                r = pl.reciprocal(denom, approx=True)
                r = r * (2.0 - denom * r)
                o = jnp.dot(e * r, v, preferred_element_type=jnp.float32)
                c = jnp.dot(o, w_o_ref[o_idx(l, side, h)],
                            preferred_element_type=jnp.float32)  # (T, D)
                acc_b = c if acc_b is None else acc_b + c
            rows.append(acc_b)
        return jnp.concatenate(rows, axis=0)                # (B*T, D)

    for l in range(num_layers):          # static loop: whole stack fused
        V = vec_ref[l]                   # (NUM_VEC, D) packed per-layer vectors
        x_rows = [x[b * t_len:(b + 1) * t_len] for b in range(batch)]
        # ---- self attention + add & norm ----
        sa = mha(x, x_rows, l, 0) + V[V_SA_BO:V_SA_BO + 1]
        x = _layer_norm(x + sa, V[V_N1_G:V_N1_G + 1], V[V_N1_B:V_N1_B + 1])
        # ---- cross attention + add & norm ----
        ca = mha(x, mem_rows, l, 1) + V[V_CA_BO:V_CA_BO + 1]
        x = _layer_norm(x + ca, V[V_N2_G:V_N2_G + 1], V[V_N2_B:V_N2_B + 1])
        # ---- FFN (ReLU) + add & norm ----
        h = jnp.maximum(
            jnp.dot(x, w_ff1_ref[l], preferred_element_type=jnp.float32)
            + b_ff1_ref[l], 0.0)
        ff = (jnp.dot(h, w_ff2_ref[l], preferred_element_type=jnp.float32)
              + V[V_L2_B:V_L2_B + 1])
        x = _layer_norm(x + ff, V[V_N3_G:V_N3_G + 1], V[V_N3_B:V_N3_B + 1])

    for b in range(batch):
        out_ref[b] = x[b * t_len:(b + 1) * t_len].astype(out_ref.dtype)


# ----------------------------- one-time weight packing -------------------------

def pack_params(layer_params, nhead):
    """Pre-transpose, per-head split, and pre-scale the weights ONCE (outside the
    jitted hot path).  The kernel then sees a handful of stacked slabs."""
    d = layer_params[0]["sa_ow"].shape[0]
    hd = d // nhead
    scale = 1.0 / math.sqrt(hd)
    w_qkv, b_qkv, w_o, vecs, w_ff1, w_ff2, b1 = [], [], [], [], [], [], []
    for p in layer_params:
        for side in ("sa", "ca"):
            w_in = p[f"{side}_w"]                 # (3D, D)
            b_in = p[f"{side}_b"].reshape(-1)     # (3D,)
            ow = p[f"{side}_ow"]                  # (D, D)
            blocks = ((w_in[:d], b_in[:d]),
                      (w_in[d:2 * d], b_in[d:2 * d]),
                      (w_in[2 * d:], b_in[2 * d:]))
            for j, (w_blk, b_blk) in enumerate(blocks):
                wt = w_blk.T                      # pre-transposed: x @ wt
                if j == 0:                        # fold 1/sqrt(hd) into q
                    wt = wt * scale
                    b_blk = b_blk * scale
                for h in range(nhead):
                    sl = slice(h * hd, (h + 1) * hd)
                    w_qkv.append(wt[:, sl])               # (D, hd)
                    b_qkv.append(b_blk[sl].reshape(1, hd))
            for h in range(nhead):
                sl = slice(h * hd, (h + 1) * hd)
                w_o.append(ow[:, sl].T)                   # (hd, D)
        w_ff1.append(p["l1_w"].T)
        w_ff2.append(p["l2_w"].T)
        b1.append(p["l1_b"].reshape(1, -1))
        vecs.append(jnp.stack([
            p["sa_ob"].reshape(-1), p["ca_ob"].reshape(-1), p["l2_b"].reshape(-1),
            p["n1_g"].reshape(-1), p["n1_b"].reshape(-1),
            p["n2_g"].reshape(-1), p["n2_b"].reshape(-1),
            p["n3_g"].reshape(-1), p["n3_b"].reshape(-1)]))
    return dict(
        w_qkv=jnp.stack(w_qkv),    # (L*2*3*H, D, hd)  pre-transposed, q pre-scaled
        b_qkv=jnp.stack(b_qkv),    # (L*2*3*H, 1, hd)
        w_o=jnp.stack(w_o),        # (L*2*H, hd, D)
        vecs=jnp.stack(vecs),      # (L, NUM_VEC, D)
        w_ff1=jnp.stack(w_ff1),    # (L, D, FF)        pre-transposed
        w_ff2=jnp.stack(w_ff2),    # (L, FF, D)        pre-transposed
        b_ff1=jnp.stack(b1),       # (L, 1, FF)
    )


# ----------------------------- wrapper ----------------------------------------

def decoder_forward(tgt, memory, packed, *, nhead, num_layers):
    """Decoder.forward: whole stack of decoder layers (norm=None) in a single
    fused pallas_call.  Single grid step; everything VMEM-resident."""
    B, T, D = tgt.shape
    kernel = partial(decoder_stack_kernel, nhead=nhead, num_layers=num_layers,
                     batch=B, t_len=T)
    return pl.pallas_call(
        kernel,
        out_shape=jax.ShapeDtypeStruct((B, T, D), tgt.dtype),
    )(tgt, memory, packed["w_qkv"], packed["b_qkv"], packed["w_o"],
      packed["vecs"], packed["w_ff1"], packed["w_ff2"], packed["b_ff1"])


# ------------------------------- pure-JAX reference ----------------------------
# Independent of the packed layout: consumes the raw (PyTorch-layout) params.

def _ref_softmax(s):
    s = s - jnp.max(s, axis=-1, keepdims=True)
    e = jnp.exp(s)
    return e / jnp.sum(e, axis=-1, keepdims=True)


def _ref_mha(q_in, kv_in, w_in, b_in, w_out, b_out, nhead):
    d = q_in.shape[-1]
    hd = d // nhead
    scale = 1.0 / math.sqrt(hd)
    wq, wk, wv = w_in[:d], w_in[d:2 * d], w_in[2 * d:]
    bq, bk, bv = b_in[:, :d], b_in[:, d:2 * d], b_in[:, 2 * d:]
    q = q_in @ wq.T + bq
    k = kv_in @ wk.T + bk
    v = kv_in @ wv.T + bv
    heads = []
    for h in range(nhead):
        sl = slice(h * hd, (h + 1) * hd)
        p = _ref_softmax((q[:, sl] * scale) @ k[:, sl].T)
        heads.append(p @ v[:, sl])
    return jnp.concatenate(heads, axis=-1) @ w_out.T + b_out


def _ref_layer(x, mem, p, nhead):
    sa = _ref_mha(x, x, p["sa_w"], p["sa_b"], p["sa_ow"], p["sa_ob"], nhead)
    x = _layer_norm(x + sa, p["n1_g"], p["n1_b"])
    ca = _ref_mha(x, mem, p["ca_w"], p["ca_b"], p["ca_ow"], p["ca_ob"], nhead)
    x = _layer_norm(x + ca, p["n2_g"], p["n2_b"])
    h = jnp.maximum(x @ p["l1_w"].T + p["l1_b"], 0.0)
    x = _layer_norm(x + h @ p["l2_w"].T + p["l2_b"], p["n3_g"], p["n3_b"])
    return x


def ref_forward(tgt, memory, layer_params, nhead):
    out = tgt
    for p in layer_params:
        out = jax.vmap(lambda x, m, p=p: _ref_layer(x, m, p, nhead))(out, memory)
    return out


# ------------------------------- parameter init --------------------------------

def init_params(key, num_layers, d_model, nhead, dim_ff):
    def xavier(k, shape):
        fan_out, fan_in = shape
        lim = math.sqrt(6.0 / (fan_in + fan_out))
        return jax.random.uniform(k, shape, jnp.float32, -lim, lim)

    def small(k, shape):
        return jax.random.uniform(k, shape, jnp.float32, -0.1, 0.1)

    layers = []
    for l in range(num_layers):
        ks = jax.random.split(jax.random.fold_in(key, l), 18)
        p = dict(
            sa_w=xavier(ks[0], (3 * d_model, d_model)),
            sa_b=small(ks[1], (1, 3 * d_model)),
            sa_ow=xavier(ks[2], (d_model, d_model)),
            sa_ob=small(ks[3], (1, d_model)),
            ca_w=xavier(ks[4], (3 * d_model, d_model)),
            ca_b=small(ks[5], (1, 3 * d_model)),
            ca_ow=xavier(ks[6], (d_model, d_model)),
            ca_ob=small(ks[7], (1, d_model)),
            l1_w=xavier(ks[8], (dim_ff, d_model)),
            l1_b=small(ks[9], (1, dim_ff)),
            l2_w=xavier(ks[10], (d_model, dim_ff)),
            l2_b=small(ks[11], (1, d_model)),
            n1_g=1.0 + small(ks[12], (1, d_model)),
            n1_b=small(ks[13], (1, d_model)),
            n2_g=1.0 + small(ks[14], (1, d_model)),
            n2_b=small(ks[15], (1, d_model)),
            n3_g=1.0 + small(ks[16], (1, d_model)),
            n3_b=small(ks[17], (1, d_model)),
        )
        layers.append(p)
    return layers


# --------------------------------------- main ----------------------------------

if __name__ == "__main__":
    key = jax.random.PRNGKey(0)
    k1, k2, k3 = jax.random.split(key, 3)

    B, T, S = 2, 8, 10
    tgt = jax.random.normal(k1, (B, T, D_MODEL), jnp.float32)
    memory = jax.random.normal(k2, (B, S, D_MODEL), jnp.float32)
    params = init_params(k3, NUM_LAYERS, D_MODEL, NHEAD, DIM_FF)

    # One-time packing (outside the jitted hot path).
    packed = pack_params(params, NHEAD)
    packed = jax.tree_util.tree_map(jax.block_until_ready, packed)

    fwd = jax.jit(partial(decoder_forward, nhead=NHEAD, num_layers=NUM_LAYERS))
    out = jax.block_until_ready(fwd(tgt, memory, packed))

    ref = ref_forward(tgt, memory, params, NHEAD)
    np.testing.assert_allclose(np.asarray(out), np.asarray(ref),
                               atol=2e-4, rtol=2e-4)

    print("KERNEL_OK")
</pallas_src>

<mosaic_0001>
module attributes {stable_mosaic.version = 11 : i64} {
  func.func @decoder_stack_kernel(%arg0: memref<2x8x32xf32, #tpu.memory_space<vmem>>, %arg1: memref<2x10x32xf32, #tpu.memory_space<vmem>>, %arg2: memref<48x32x8xf32, #tpu.memory_space<vmem>>, %arg3: memref<48x1x8xf32, #tpu.memory_space<vmem>>, %arg4: memref<16x8x32xf32, #tpu.memory_space<vmem>>, %arg5: memref<2x9x32xf32, #tpu.memory_space<vmem>>, %arg6: memref<2x32x64xf32, #tpu.memory_space<vmem>>, %arg7: memref<2x64x32xf32, #tpu.memory_space<vmem>>, %arg8: memref<2x1x64xf32, #tpu.memory_space<vmem>>, %arg9: memref<2x8x32xf32, #tpu.memory_space<vmem>>) attributes {dimension_semantics = [], scalar_prefetch = 0 : i64, scratch_operands = 0 : i64, tpu.core_type = #tpu.core_type<tc>} {
    %c0 = arith.constant 0 : index
    %c0_0 = arith.constant 0 : index
    %c0_1 = arith.constant 0 : index
    %0 = vector.load %arg0[%c0, %c0_0, %c0_1] : memref<2x8x32xf32, #tpu.memory_space<vmem>>, vector<1x8x32xf32>
    %1 = vector.shape_cast %0 : vector<1x8x32xf32> to vector<8x32xf32>
    %c1 = arith.constant 1 : index
    %c0_2 = arith.constant 0 : index
    %c0_3 = arith.constant 0 : index
    %2 = vector.load %arg0[%c1, %c0_2, %c0_3] : memref<2x8x32xf32, #tpu.memory_space<vmem>>, vector<1x8x32xf32>
    %3 = vector.shape_cast %2 : vector<1x8x32xf32> to vector<8x32xf32>
    %4 = tpu.concatenate %1, %3 in 0 : vector<8x32xf32>, vector<8x32xf32> -> vector<16x32xf32>
    %c0_4 = arith.constant 0 : index
    %c0_5 = arith.constant 0 : index
    %c0_6 = arith.constant 0 : index
    %5 = vector.load %arg1[%c0_4, %c0_5, %c0_6] : memref<2x10x32xf32, #tpu.memory_space<vmem>>, vector<1x10x32xf32>
    %6 = vector.shape_cast %5 : vector<1x10x32xf32> to vector<10x32xf32>
    %c1_7 = arith.constant 1 : index
    %c0_8 = arith.constant 0 : index
    %c0_9 = arith.constant 0 : index
    %7 = vector.load %arg1[%c1_7, %c0_8, %c0_9] : memref<2x10x32xf32, #tpu.memory_space<vmem>>, vector<1x10x32xf32>
    %8 = vector.shape_cast %7 : vector<1x10x32xf32> to vector<10x32xf32>
    %c0_10 = arith.constant 0 : index
    %c0_11 = arith.constant 0 : index
    %c0_12 = arith.constant 0 : index
    %9 = vector.load %arg5[%c0_10, %c0_11, %c0_12] : memref<2x9x32xf32, #tpu.memory_space<vmem>>, vector<1x9x32xf32>
    %10 = vector.shape_cast %9 : vector<1x9x32xf32> to vector<9x32xf32>
    %11 = vector.extract_strided_slice %4 {offsets = [0, 0], sizes = [8, 32], strides = [1, 1]} : vector<16x32xf32> to vector<8x32xf32>
    %12 = vector.extract_strided_slice %4 {offsets = [8, 0], sizes = [8, 32], strides = [1, 1]} : vector<16x32xf32> to vector<8x32xf32>
    %c0_13 = arith.constant 0 : index
    %c0_14 = arith.constant 0 : index
    %c0_15 = arith.constant 0 : index
    %13 = vector.load %arg2[%c0_13, %c0_14, %c0_15] : memref<48x32x8xf32, #tpu.memory_space<vmem>>, vector<1x32x8xf32>
    %14 = vector.shape_cast %13 : vector<1x32x8xf32> to vector<32x8xf32>
    %cst = arith.constant dense<0.000000e+00> : vector<16x8xf32>
    %15 = tpu.matmul %4, %14, %cst {dimension_numbers = #tpu.dot_dimension_numbers<[1], [0], [0], [1], [0, 0, 1, 1], [], []>} : vector<16x32xf32>, vector<32x8xf32>, vector<16x8xf32> -> vector<16x8xf32>
    %c0_16 = arith.constant 0 : index
    %c0_17 = arith.constant 0 : index
    %c0_18 = arith.constant 0 : index
    %16 = vector.load %arg3[%c0_16, %c0_17, %c0_18] : memref<48x1x8xf32, #tpu.memory_space<vmem>>, vector<1x1x8xf32>
    %17 = vector.shape_cast %16 : vector<1x1x8xf32> to vector<1x8xf32>
    %18 = vector.broadcast %17 : vector<1x8xf32> to vector<16x8xf32>
    %19 = arith.addf %15, %18 : vector<16x8xf32>
    %c1_19 = arith.constant 1 : index
    %c0_20 = arith.constant 0 : index
    %c0_21 = arith.constant 0 : index
    %20 = vector.load %arg2[%c1_19, %c0_20, %c0_21] : memref<48x32x8xf32, #tpu.memory_space<vmem>>, vector<1x32x8xf32>
    %21 = vector.shape_cast %20 : vector<1x32x8xf32> to vector<32x8xf32>
    %cst_22 = arith.constant dense<0.000000e+00> : vector<16x8xf32>
    %22 = tpu.matmul %4, %21, %cst_22 {dimension_numbers = #tpu.dot_dimension_numbers<[1], [0], [0], [1], [0, 0, 1, 1], [], []>} : vector<16x32xf32>, vector<32x8xf32>, vector<16x8xf32> -> vector<16x8xf32>
    %c1_23 = arith.constant 1 : index
    %c0_24 = arith.constant 0 : index
    %c0_25 = arith.constant 0 : index
    %23 = vector.load %arg3[%c1_23, %c0_24, %c0_25] : memref<48x1x8xf32, #tpu.memory_space<vmem>>, vector<1x1x8xf32>
    %24 = vector.shape_cast %23 : vector<1x1x8xf32> to vector<1x8xf32>
    %25 = vector.broadcast %24 : vector<1x8xf32> to vector<16x8xf32>
    %26 = arith.addf %22, %25 : vector<16x8xf32>
    %c2 = arith.constant 2 : index
    %c0_26 = arith.constant 0 : index
    %c0_27 = arith.constant 0 : index
    %27 = vector.load %arg2[%c2, %c0_26, %c0_27] : memref<48x32x8xf32, #tpu.memory_space<vmem>>, vector<1x32x8xf32>
    %28 = vector.shape_cast %27 : vector<1x32x8xf32> to vector<32x8xf32>
    %cst_28 = arith.constant dense<0.000000e+00> : vector<16x8xf32>
    %29 = tpu.matmul %4, %28, %cst_28 {dimension_numbers = #tpu.dot_dimension_numbers<[1], [0], [0], [1], [0, 0, 1, 1], [], []>} : vector<16x32xf32>, vector<32x8xf32>, vector<16x8xf32> -> vector<16x8xf32>
    %c2_29 = arith.constant 2 : index
    %c0_30 = arith.constant 0 : index
    %c0_31 = arith.constant 0 : index
    %30 = vector.load %arg3[%c2_29, %c0_30, %c0_31] : memref<48x1x8xf32, #tpu.memory_space<vmem>>, vector<1x1x8xf32>
    %31 = vector.shape_cast %30 : vector<1x1x8xf32> to vector<1x8xf32>
    %32 = vector.broadcast %31 : vector<1x8xf32> to vector<16x8xf32>
    %33 = arith.addf %29, %32 : vector<16x8xf32>
    %c3 = arith.constant 3 : index
    %c0_32 = arith.constant 0 : index
    %c0_33 = arith.constant 0 : index
    %34 = vector.load %arg2[%c3, %c0_32, %c0_33] : memref<48x32x8xf32, #tpu.memory_space<vmem>>, vector<1x32x8xf32>
    %35 = vector.shape_cast %34 : vector<1x32x8xf32> to vector<32x8xf32>
    %cst_34 = arith.constant dense<0.000000e+00> : vector<16x8xf32>
    %36 = tpu.matmul %4, %35, %cst_34 {dimension_numbers = #tpu.dot_dimension_numbers<[1], [0], [0], [1], [0, 0, 1, 1], [], []>} : vector<16x32xf32>, vector<32x8xf32>, vector<16x8xf32> -> vector<16x8xf32>
    %c3_35 = arith.constant 3 : index
    %c0_36 = arith.constant 0 : index
    %c0_37 = arith.constant 0 : index
    %37 = vector.load %arg3[%c3_35, %c0_36, %c0_37] : memref<48x1x8xf32, #tpu.memory_space<vmem>>, vector<1x1x8xf32>
    %38 = vector.shape_cast %37 : vector<1x1x8xf32> to vector<1x8xf32>
    %39 = vector.broadcast %38 : vector<1x8xf32> to vector<16x8xf32>
    %40 = arith.addf %36, %39 : vector<16x8xf32>
    %c4 = arith.constant 4 : index
    %c0_38 = arith.constant 0 : index
    %c0_39 = arith.constant 0 : index
    %41 = vector.load %arg2[%c4, %c0_38, %c0_39] : memref<48x32x8xf32, #tpu.memory_space<vmem>>, vector<1x32x8xf32>
    %42 = vector.shape_cast %41 : vector<1x32x8xf32> to vector<32x8xf32>
    %cst_40 = arith.constant dense<0.000000e+00> : vector<8x8xf32>
    %43 = tpu.matmul %11, %42, %cst_40 {dimension_numbers = #tpu.dot_dimension_numbers<[1], [0], [0], [1], [0, 0, 1, 1], [], []>} : vector<8x32xf32>, vector<32x8xf32>, vector<8x8xf32> -> vector<8x8xf32>
    %c4_41 = arith.constant 4 : index
    %c0_42 = arith.constant 0 : index
    %c0_43 = arith.constant 0 : index
    %44 = vector.load %arg3[%c4_41, %c0_42, %c0_43] : memref<48x1x8xf32, #tpu.memory_space<vmem>>, vector<1x1x8xf32>
    %45 = vector.shape_cast %44 : vector<1x1x8xf32> to vector<1x8xf32>
    %46 = vector.broadcast %45 : vector<1x8xf32> to vector<8x8xf32>
    %47 = arith.addf %43, %46 : vector<8x8xf32>
    %c8 = arith.constant 8 : index
    %c0_44 = arith.constant 0 : index
    %c0_45 = arith.constant 0 : index
    %48 = vector.load %arg2[%c8, %c0_44, %c0_45] : memref<48x32x8xf32, #tpu.memory_space<vmem>>, vector<1x32x8xf32>
    %49 = vector.shape_cast %48 : vector<1x32x8xf32> to vector<32x8xf32>
    %cst_46 = arith.constant dense<0.000000e+00> : vector<8x8xf32>
    %50 = tpu.matmul %11, %49, %cst_46 {dimension_numbers = #tpu.dot_dimension_numbers<[1], [0], [0], [1], [0, 0, 1, 1], [], []>} : vector<8x32xf32>, vector<32x8xf32>, vector<8x8xf32> -> vector<8x8xf32>
    %c8_47 = arith.constant 8 : index
    %c0_48 = arith.constant 0 : index
    %c0_49 = arith.constant 0 : index
    %51 = vector.load %arg3[%c8_47, %c0_48, %c0_49] : memref<48x1x8xf32, #tpu.memory_space<vmem>>, vector<1x1x8xf32>
    %52 = vector.shape_cast %51 : vector<1x1x8xf32> to vector<1x8xf32>
    %53 = vector.broadcast %52 : vector<1x8xf32> to vector<8x8xf32>
    %54 = arith.addf %50, %53 : vector<8x8xf32>
    %55 = vector.extract_strided_slice %19 {offsets = [0, 0], sizes = [8, 8], strides = [1, 1]} : vector<16x8xf32> to vector<8x8xf32>
    "tpu.trace_start"() <{level = 10 : i32, message = "td,sd->ts"}> : () -> ()
    %cst_50 = arith.constant dense<0.000000e+00> : vector<8x8xf32>
    %56 = tpu.matmul %55, %47, %cst_50 {dimension_numbers = #tpu.dot_dimension_numbers<[1], [1], [0], [0], [0, 0, 1, 0], [], []>} : vector<8x8xf32>, vector<8x8xf32>, vector<8x8xf32> -> vector<8x8xf32>
    "tpu.trace_stop"() : () -> ()
    %cst_51 = arith.constant dense<0xFF800000> : vector<8xf32>
    %57 = vector.multi_reduction <maximumf>, %56, %cst_51 [1] : vector<8x8xf32> to vector<8xf32>
    %58 = vector.shape_cast %57 : vector<8xf32> to vector<8x1xf32>
    %59 = vector.broadcast %58 : vector<8x1xf32> to vector<8x8xf32>
    %60 = arith.subf %56, %59 : vector<8x8xf32>
    %61 = math.exp %60 : vector<8x8xf32>
    %cst_52 = arith.constant dense<0.000000e+00> : vector<8xf32>
    %62 = vector.multi_reduction <add>, %61, %cst_52 [1] : vector<8x8xf32> to vector<8xf32>
    %63 = vector.shape_cast %62 : vector<8xf32> to vector<8x1xf32>
    %64 = tpu.reciprocal %63 {approx = true} : vector<8x1xf32> -> vector<8x1xf32>
    %65 = arith.mulf %63, %64 : vector<8x1xf32>
    %cst_53 = arith.constant 2.000000e+00 : f32
    %66 = vector.broadcast %cst_53 : f32 to vector<8x1xf32>
    %67 = arith.subf %66, %65 : vector<8x1xf32>
    %68 = arith.mulf %64, %67 : vector<8x1xf32>
    %69 = vector.broadcast %68 : vector<8x1xf32> to vector<8x8xf32>
    %70 = arith.mulf %61, %69 : vector<8x8xf32>
    %cst_54 = arith.constant dense<0.000000e+00> : vector<8x8xf32>
    %71 = tpu.matmul %70, %54, %cst_54 {dimension_numbers = #tpu.dot_dimension_numbers<[1], [0], [0], [1], [0, 0, 1, 1], [], []>} : vector<8x8xf32>, vector<8x8xf32>, vector<8x8xf32> -> vector<8x8xf32>
    %c0_55 = arith.constant 0 : index
    %c0_56 = arith.constant 0 : index
    %c0_57 = arith.constant 0 : index
    %72 = vector.load %arg4[%c0_55, %c0_56, %c0_57] : memref<16x8x32xf32, #tpu.memory_space<vmem>>, vector<1x8x32xf32>
    %73 = vector.shape_cast %72 : vector<1x8x32xf32> to vector<8x32xf32>
    %cst_58 = arith.constant dense<0.000000e+00> : vector<8x32xf32>
    %74 = tpu.matmul %71, %73, %cst_58 {dimension_numbers = #tpu.dot_dimension_numbers<[1], [0], [0], [1], [0, 0, 1, 1], [], []>} : vector<8x8xf32>, vector<8x32xf32>, vector<8x32xf32> -> vector<8x32xf32>
    %c5 = arith.constant 5 : index
    %c0_59 = arith.constant 0 : index
    %c0_60 = arith.constant 0 : index
    %75 = vector.load %arg2[%c5, %c0_59, %c0_60] : memref<48x32x8xf32, #tpu.memory_space<vmem>>, vector<1x32x8xf32>
    %76 = vector.shape_cast %75 : vector<1x32x8xf32> to vector<32x8xf32>
    %cst_61 = arith.constant dense<0.000000e+00> : vector<8x8xf32>
    %77 = tpu.matmul %11, %76, %cst_61 {dimension_numbers = #tpu.dot_dimension_numbers<[1], [0], [0], [1], [0, 0, 1, 1], [], []>} : vector<8x32xf32>, vector<32x8xf32>, vector<8x8xf32> -> vector<8x8xf32>
    %c5_62 = arith.constant 5 : index
    %c0_63 = arith.constant 0 : index
    %c0_64 = arith.constant 0 : index
    %78 = vector.load %arg3[%c5_62, %c0_63, %c0_64] : memref<48x1x8xf32, #tpu.memory_space<vmem>>, vector<1x1x8xf32>
    %79 = vector.shape_cast %78 : vector<1x1x8xf32> to vector<1x8xf32>
    %80 = vector.broadcast %79 : vector<1x8xf32> to vector<8x8xf32>
    %81 = arith.addf %77, %80 : vector<8x8xf32>
    %c9 = arith.constant 9 : index
    %c0_65 = arith.constant 0 : index
    %c0_66 = arith.constant 0 : index
    %82 = vector.load %arg2[%c9, %c0_65, %c0_66] : memref<48x32x8xf32, #tpu.memory_space<vmem>>, vector<1x32x8xf32>
    %83 = vector.shape_cast %82 : vector<1x32x8xf32> to vector<32x8xf32>
    %cst_67 = arith.constant dense<0.000000e+00> : vector<8x8xf32>
    %84 = tpu.matmul %11, %83, %cst_67 {dimension_numbers = #tpu.dot_dimension_numbers<[1], [0], [0], [1], [0, 0, 1, 1], [], []>} : vector<8x32xf32>, vector<32x8xf32>, vector<8x8xf32> -> vector<8x8xf32>
    %c9_68 = arith.constant 9 : index
    %c0_69 = arith.constant 0 : index
    %c0_70 = arith.constant 0 : index
    %85 = vector.load %arg3[%c9_68, %c0_69, %c0_70] : memref<48x1x8xf32, #tpu.memory_space<vmem>>, vector<1x1x8xf32>
    %86 = vector.shape_cast %85 : vector<1x1x8xf32> to vector<1x8xf32>
    %87 = vector.broadcast %86 : vector<1x8xf32> to vector<8x8xf32>
    %88 = arith.addf %84, %87 : vector<8x8xf32>
    %89 = vector.extract_strided_slice %26 {offsets = [0, 0], sizes = [8, 8], strides = [1, 1]} : vector<16x8xf32> to vector<8x8xf32>
    "tpu.trace_start"() <{level = 10 : i32, message = "td,sd->ts"}> : () -> ()
    %cst_71 = arith.constant dense<0.000000e+00> : vector<8x8xf32>
    %90 = tpu.matmul %89, %81, %cst_71 {dimension_numbers = #tpu.dot_dimension_numbers<[1], [1], [0], [0], [0, 0, 1, 0], [], []>} : vector<8x8xf32>, vector<8x8xf32>, vector<8x8xf32> -> vector<8x8xf32>
    "tpu.trace_stop"() : () -> ()
    %cst_72 = arith.constant dense<0xFF800000> : vector<8xf32>
    %91 = vector.multi_reduction <maximumf>, %90, %cst_72 [1] : vector<8x8xf32> to vector<8xf32>
    %92 = vector.shape_cast %91 : vector<8xf32> to vector<8x1xf32>
    %93 = vector.broadcast %92 : vector<8x1xf32> to vector<8x8xf32>
    %94 = arith.subf %90, %93 : vector<8x8xf32>
    %95 = math.exp %94 : vector<8x8xf32>
    %cst_73 = arith.constant dense<0.000000e+00> : vector<8xf32>
    %96 = vector.multi_reduction <add>, %95, %cst_73 [1] : vector<8x8xf32> to vector<8xf32>
    %97 = vector.shape_cast %96 : vector<8xf32> to vector<8x1xf32>
    %98 = tpu.reciprocal %97 {approx = true} : vector<8x1xf32> -> vector<8x1xf32>
    %99 = arith.mulf %97, %98 : vector<8x1xf32>
    %cst_74 = arith.constant 2.000000e+00 : f32
    %100 = vector.broadcast %cst_74 : f32 to vector<8x1xf32>
    %101 = arith.subf %100, %99 : vector<8x1xf32>
    %102 = arith.mulf %98, %101 : vector<8x1xf32>
    %103 = vector.broadcast %102 : vector<8x1xf32> to vector<8x8xf32>
    %104 = arith.mulf %95, %103 : vector<8x8xf32>
    %cst_75 = arith.constant dense<0.000000e+00> : vector<8x8xf32>
    %105 = tpu.matmul %104, %88, %cst_75 {dimension_numbers = #tpu.dot_dimension_numbers<[1], [0], [0], [1], [0, 0, 1, 1], [], []>} : vector<8x8xf32>, vector<8x8xf32>, vector<8x8xf32> -> vector<8x8xf32>
    %c1_76 = arith.constant 1 : index
    %c0_77 = arith.constant 0 : index
    %c0_78 = arith.constant 0 : index
    %106 = vector.load %arg4[%c1_76, %c0_77, %c0_78] : memref<16x8x32xf32, #tpu.memory_space<vmem>>, vector<1x8x32xf32>
    %107 = vector.shape_cast %106 : vector<1x8x32xf32> to vector<8x32xf32>
    %cst_79 = arith.constant dense<0.000000e+00> : vector<8x32xf32>
    %108 = tpu.matmul %105, %107, %cst_79 {dimension_numbers = #tpu.dot_dimension_numbers<[1], [0], [0], [1], [0, 0, 1, 1], [], []>} : vector<8x8xf32>, vector<8x32xf32>, vector<8x32xf32> -> vector<8x32xf32>
    %109 = arith.addf %74, %108 : vector<8x32xf32>
    %c6 = arith.constant 6 : index
    %c0_80 = arith.constant 0 : index
    %c0_81 = arith.constant 0 : index
    %110 = vector.load %arg2[%c6, %c0_80, %c0_81] : memref<48x32x8xf32, #tpu.memory_space<vmem>>, vector<1x32x8xf32>
    %111 = vector.shape_cast %110 : vector<1x32x8xf32> to vector<32x8xf32>
    %cst_82 = arith.constant dense<0.000000e+00> : vector<8x8xf32>
    %112 = tpu.matmul %11, %111, %cst_82 {dimension_numbers = #tpu.dot_dimension_numbers<[1], [0], [0], [1], [0, 0, 1, 1], [], []>} : vector<8x32xf32>, vector<32x8xf32>, vector<8x8xf32> -> vector<8x8xf32>
    %c6_83 = arith.constant 6 : index
    %c0_84 = arith.constant 0 : index
    %c0_85 = arith.constant 0 : index
    %113 = vector.load %arg3[%c6_83, %c0_84, %c0_85] : memref<48x1x8xf32, #tpu.memory_space<vmem>>, vector<1x1x8xf32>
    %114 = vector.shape_cast %113 : vector<1x1x8xf32> to vector<1x8xf32>
    %115 = vector.broadcast %114 : vector<1x8xf32> to vector<8x8xf32>
    %116 = arith.addf %112, %115 : vector<8x8xf32>
    %c10 = arith.constant 10 : index
    %c0_86 = arith.constant 0 : index
    %c0_87 = arith.constant 0 : index
    %117 = vector.load %arg2[%c10, %c0_86, %c0_87] : memref<48x32x8xf32, #tpu.memory_space<vmem>>, vector<1x32x8xf32>
    %118 = vector.shape_cast %117 : vector<1x32x8xf32> to vector<32x8xf32>
    %cst_88 = arith.constant dense<0.000000e+00> : vector<8x8xf32>
    %119 = tpu.matmul %11, %118, %cst_88 {dimension_numbers = #tpu.dot_dimension_numbers<[1], [0], [0], [1], [0, 0, 1, 1], [], []>} : vector<8x32xf32>, vector<32x8xf32>, vector<8x8xf32> -> vector<8x8xf32>
    %c10_89 = arith.constant 10 : index
    %c0_90 = arith.constant 0 : index
    %c0_91 = arith.constant 0 : index
    %120 = vector.load %arg3[%c10_89, %c0_90, %c0_91] : memref<48x1x8xf32, #tpu.memory_space<vmem>>, vector<1x1x8xf32>
    %121 = vector.shape_cast %120 : vector<1x1x8xf32> to vector<1x8xf32>
    %122 = vector.broadcast %121 : vector<1x8xf32> to vector<8x8xf32>
    %123 = arith.addf %119, %122 : vector<8x8xf32>
    %124 = vector.extract_strided_slice %33 {offsets = [0, 0], sizes = [8, 8], strides = [1, 1]} : vector<16x8xf32> to vector<8x8xf32>
    "tpu.trace_start"() <{level = 10 : i32, message = "td,sd->ts"}> : () -> ()
    %cst_92 = arith.constant dense<0.000000e+00> : vector<8x8xf32>
    %125 = tpu.matmul %124, %116, %cst_92 {dimension_numbers = #tpu.dot_dimension_numbers<[1], [1], [0], [0], [0, 0, 1, 0], [], []>} : vector<8x8xf32>, vector<8x8xf32>, vector<8x8xf32> -> vector<8x8xf32>
    "tpu.trace_stop"() : () -> ()
    %cst_93 = arith.constant dense<0xFF800000> : vector<8xf32>
    %126 = vector.multi_reduction <maximumf>, %125, %cst_93 [1] : vector<8x8xf32> to vector<8xf32>
    %127 = vector.shape_cast %126 : vector<8xf32> to vector<8x1xf32>
    %128 = vector.broadcast %127 : vector<8x1xf32> to vector<8x8xf32>
    %129 = arith.subf %125, %128 : vector<8x8xf32>
    %130 = math.exp %129 : vector<8x8xf32>
    %cst_94 = arith.constant dense<0.000000e+00> : vector<8xf32>
    %131 = vector.multi_reduction <add>, %130, %cst_94 [1] : vector<8x8xf32> to vector<8xf32>
    %132 = vector.shape_cast %131 : vector<8xf32> to vector<8x1xf32>
    %133 = tpu.reciprocal %132 {approx = true} : vector<8x1xf32> -> vector<8x1xf32>
    %134 = arith.mulf %132, %133 : vector<8x1xf32>
    %cst_95 = arith.constant 2.000000e+00 : f32
    %135 = vector.broadcast %cst_95 : f32 to vector<8x1xf32>
    %136 = arith.subf %135, %134 : vector<8x1xf32>
    %137 = arith.mulf %133, %136 : vector<8x1xf32>
    %138 = vector.broadcast %137 : vector<8x1xf32> to vector<8x8xf32>
    %139 = arith.mulf %130, %138 : vector<8x8xf32>
    %cst_96 = arith.constant dense<0.000000e+00> : vector<8x8xf32>
    %140 = tpu.matmul %139, %123, %cst_96 {dimension_numbers = #tpu.dot_dimension_numbers<[1], [0], [0], [1], [0, 0, 1, 1], [], []>} : vector<8x8xf32>, vector<8x8xf32>, vector<8x8xf32> -> vector<8x8xf32>
    %c2_97 = arith.constant 2 : index
    %c0_98 = arith.constant 0 : index
    %c0_99 = arith.constant 0 : index
    %141 = vector.load %arg4[%c2_97, %c0_98, %c0_99] : memref<16x8x32xf32, #tpu.memory_space<vmem>>, vector<1x8x32xf32>
    %142 = vector.shape_cast %141 : vector<1x8x32xf32> to vector<8x32xf32>
    %cst_100 = arith.constant dense<0.000000e+00> : vector<8x32xf32>
    %143 = tpu.matmul %140, %142, %cst_100 {dimension_numbers = #tpu.dot_dimension_numbers<[1], [0], [0], [1], [0, 0, 1, 1], [], []>} : vector<8x8xf32>, vector<8x32xf32>, vector<8x32xf32> -> vector<8x32xf32>
    %144 = arith.addf %109, %143 : vector<8x32xf32>
    %c7 = arith.constant 7 : index
    %c0_101 = arith.constant 0 : index
    %c0_102 = arith.constant 0 : index
    %145 = vector.load %arg2[%c7, %c0_101, %c0_102] : memref<48x32x8xf32, #tpu.memory_space<vmem>>, vector<1x32x8xf32>
    %146 = vector.shape_cast %145 : vector<1x32x8xf32> to vector<32x8xf32>
    %cst_103 = arith.constant dense<0.000000e+00> : vector<8x8xf32>
    %147 = tpu.matmul %11, %146, %cst_103 {dimension_numbers = #tpu.dot_dimension_numbers<[1], [0], [0], [1], [0, 0, 1, 1], [], []>} : vector<8x32xf32>, vector<32x8xf32>, vector<8x8xf32> -> vector<8x8xf32>
    %c7_104 = arith.constant 7 : index
    %c0_105 = arith.constant 0 : index
    %c0_106 = arith.constant 0 : index
    %148 = vector.load %arg3[%c7_104, %c0_105, %c0_106] : memref<48x1x8xf32, #tpu.memory_space<vmem>>, vector<1x1x8xf32>
    %149 = vector.shape_cast %148 : vector<1x1x8xf32> to vector<1x8xf32>
    %150 = vector.broadcast %149 : vector<1x8xf32> to vector<8x8xf32>
    %151 = arith.addf %147, %150 : vector<8x8xf32>
    %c11 = arith.constant 11 : index
    %c0_107 = arith.constant 0 : index
    %c0_108 = arith.constant 0 : index
    %152 = vector.load %arg2[%c11, %c0_107, %c0_108] : memref<48x32x8xf32, #tpu.memory_space<vmem>>, vector<1x32x8xf32>
    %153 = vector.shape_cast %152 : vector<1x32x8xf32> to vector<32x8xf32>
    %cst_109 = arith.constant dense<0.000000e+00> : vector<8x8xf32>
    %154 = tpu.matmul %11, %153, %cst_109 {dimension_numbers = #tpu.dot_dimension_numbers<[1], [0], [0], [1], [0, 0, 1, 1], [], []>} : vector<8x32xf32>, vector<32x8xf32>, vector<8x8xf32> -> vector<8x8xf32>
    %c11_110 = arith.constant 11 : index
    %c0_111 = arith.constant 0 : index
    %c0_112 = arith.constant 0 : index
    %155 = vector.load %arg3[%c11_110, %c0_111, %c0_112] : memref<48x1x8xf32, #tpu.memory_space<vmem>>, vector<1x1x8xf32>
    %156 = vector.shape_cast %155 : vector<1x1x8xf32> to vector<1x8xf32>
    %157 = vector.broadcast %156 : vector<1x8xf32> to vector<8x8xf32>
    %158 = arith.addf %154, %157 : vector<8x8xf32>
    %159 = vector.extract_strided_slice %40 {offsets = [0, 0], sizes = [8, 8], strides = [1, 1]} : vector<16x8xf32> to vector<8x8xf32>
    "tpu.trace_start"() <{level = 10 : i32, message = "td,sd->ts"}> : () -> ()
    %cst_113 = arith.constant dense<0.000000e+00> : vector<8x8xf32>
    %160 = tpu.matmul %159, %151, %cst_113 {dimension_numbers = #tpu.dot_dimension_numbers<[1], [1], [0], [0], [0, 0, 1, 0], [], []>} : vector<8x8xf32>, vector<8x8xf32>, vector<8x8xf32> -> vector<8x8xf32>
    "tpu.trace_stop"() : () -> ()
    %cst_114 = arith.constant dense<0xFF800000> : vector<8xf32>
    %161 = vector.multi_reduction <maximumf>, %160, %cst_114 [1] : vector<8x8xf32> to vector<8xf32>
    %162 = vector.shape_cast %161 : vector<8xf32> to vector<8x1xf32>
    %163 = vector.broadcast %162 : vector<8x1xf32> to vector<8x8xf32>
    %164 = arith.subf %160, %163 : vector<8x8xf32>
    %165 = math.exp %164 : vector<8x8xf32>
    %cst_115 = arith.constant dense<0.000000e+00> : vector<8xf32>
    %166 = vector.multi_reduction <add>, %165, %cst_115 [1] : vector<8x8xf32> to vector<8xf32>
    %167 = vector.shape_cast %166 : vector<8xf32> to vector<8x1xf32>
    %168 = tpu.reciprocal %167 {approx = true} : vector<8x1xf32> -> vector<8x1xf32>
    %169 = arith.mulf %167, %168 : vector<8x1xf32>
    %cst_116 = arith.constant 2.000000e+00 : f32
    %170 = vector.broadcast %cst_116 : f32 to vector<8x1xf32>
    %171 = arith.subf %170, %169 : vector<8x1xf32>
    %172 = arith.mulf %168, %171 : vector<8x1xf32>
    %173 = vector.broadcast %172 : vector<8x1xf32> to vector<8x8xf32>
    %174 = arith.mulf %165, %173 : vector<8x8xf32>
    %cst_117 = arith.constant dense<0.000000e+00> : vector<8x8xf32>
    %175 = tpu.matmul %174, %158, %cst_117 {dimension_numbers = #tpu.dot_dimension_numbers<[1], [0], [0], [1], [0, 0, 1, 1], [], []>} : vector<8x8xf32>, vector<8x8xf32>, vector<8x8xf32> -> vector<8x8xf32>
    %c3_118 = arith.constant 3 : index
    %c0_119 = arith.constant 0 : index
    %c0_120 = arith.constant 0 : index
    %176 = vector.load %arg4[%c3_118, %c0_119, %c0_120] : memref<16x8x32xf32, #tpu.memory_space<vmem>>, vector<1x8x32xf32>
    %177 = vector.shape_cast %176 : vector<1x8x32xf32> to vector<8x32xf32>
    %cst_121 = arith.constant dense<0.000000e+00> : vector<8x32xf32>
    %178 = tpu.matmul %175, %177, %cst_121 {dimension_numbers = #tpu.dot_dimension_numbers<[1], [0], [0], [1], [0, 0, 1, 1], [], []>} : vector<8x8xf32>, vector<8x32xf32>, vector<8x32xf32> -> vector<8x32xf32>
    %179 = arith.addf %144, %178 : vector<8x32xf32>
    %c4_122 = arith.constant 4 : index
    %c0_123 = arith.constant 0 : index
    %c0_124 = arith.constant 0 : index
    %180 = vector.load %arg2[%c4_122, %c0_123, %c0_124] : memref<48x32x8xf32, #tpu.memory_space<vmem>>, vector<1x32x8xf32>
    %181 = vector.shape_cast %180 : vector<1x32x8xf32> to vector<32x8xf32>
    %cst_125 = arith.constant dense<0.000000e+00> : vector<8x8xf32>
    %182 = tpu.matmul %12, %181, %cst_125 {dimension_numbers = #tpu.dot_dimension_numbers<[1], [0], [0], [1], [0, 0, 1, 1], [], []>} : vector<8x32xf32>, vector<32x8xf32>, vector<8x8xf32> -> vector<8x8xf32>
    %c4_126 = arith.constant 4 : index
    %c0_127 = arith.constant 0 : index
    %c0_128 = arith.constant 0 : index
    %183 = vector.load %arg3[%c4_126, %c0_127, %c0_128] : memref<48x1x8xf32, #tpu.memory_space<vmem>>, vector<1x1x8xf32>
    %184 = vector.shape_cast %183 : vector<1x1x8xf32> to vector<1x8xf32>
    %185 = vector.broadcast %184 : vector<1x8xf32> to vector<8x8xf32>
    %186 = arith.addf %182, %185 : vector<8x8xf32>
    %c8_129 = arith.constant 8 : index
    %c0_130 = arith.constant 0 : index
    %c0_131 = arith.constant 0 : index
    %187 = vector.load %arg2[%c8_129, %c0_130, %c0_131] : memref<48x32x8xf32, #tpu.memory_space<vmem>>, vector<1x32x8xf32>
    %188 = vector.shape_cast %187 : vector<1x32x8xf32> to vector<32x8xf32>
    %cst_132 = arith.constant dense<0.000000e+00> : vector<8x8xf32>
    %189 = tpu.matmul %12, %188, %cst_132 {dimension_numbers = #tpu.dot_dimension_numbers<[1], [0], [0], [1], [0, 0, 1, 1], [], []>} : vector<8x32xf32>, vector<32x8xf32>, vector<8x8xf32> -> vector<8x8xf32>
    %c8_133 = arith.constant 8 : index
    %c0_134 = arith.constant 0 : index
    %c0_135 = arith.constant 0 : index
    %190 = vector.load %arg3[%c8_133, %c0_134, %c0_135] : memref<48x1x8xf32, #tpu.memory_space<vmem>>, vector<1x1x8xf32>
    %191 = vector.shape_cast %190 : vector<1x1x8xf32> to vector<1x8xf32>
    %192 = vector.broadcast %191 : vector<1x8xf32> to vector<8x8xf32>
    %193 = arith.addf %189, %192 : vector<8x8xf32>
    %194 = vector.extract_strided_slice %19 {offsets = [8, 0], sizes = [8, 8], strides = [1, 1]} : vector<16x8xf32> to vector<8x8xf32>
    "tpu.trace_start"() <{level = 10 : i32, message = "td,sd->ts"}> : () -> ()
    %cst_136 = arith.constant dense<0.000000e+00> : vector<8x8xf32>
    %195 = tpu.matmul %194, %186, %cst_136 {dimension_numbers = #tpu.dot_dimension_numbers<[1], [1], [0], [0], [0, 0, 1, 0], [], []>} : vector<8x8xf32>, vector<8x8xf32>, vector<8x8xf32> -> vector<8x8xf32>
    "tpu.trace_stop"() : () -> ()
    %cst_137 = arith.constant dense<0xFF800000> : vector<8xf32>
    %196 = vector.multi_reduction <maximumf>, %195, %cst_137 [1] : vector<8x8xf32> to vector<8xf32>
    %197 = vector.shape_cast %196 : vector<8xf32> to vector<8x1xf32>
    %198 = vector.broadcast %197 : vector<8x1xf32> to vector<8x8xf32>
    %199 = arith.subf %195, %198 : vector<8x8xf32>
    %200 = math.exp %199 : vector<8x8xf32>
    %cst_138 = arith.constant dense<0.000000e+00> : vector<8xf32>
    %201 = vector.multi_reduction <add>, %200, %cst_138 [1] : vector<8x8xf32> to vector<8xf32>
    %202 = vector.shape_cast %201 : vector<8xf32> to vector<8x1xf32>
    %203 = tpu.reciprocal %202 {approx = true} : vector<8x1xf32> -> vector<8x1xf32>
    %204 = arith.mulf %202, %203 : vector<8x1xf32>
    %cst_139 = arith.constant 2.000000e+00 : f32
    %205 = vector.broadcast %cst_139 : f32 to vector<8x1xf32>
    %206 = arith.subf %205, %204 : vector<8x1xf32>
    %207 = arith.mulf %203, %206 : vector<8x1xf32>
    %208 = vector.broadcast %207 : vector<8x1xf32> to vector<8x8xf32>
    %209 = arith.mulf %200, %208 : vector<8x8xf32>
    %cst_140 = arith.constant dense<0.000000e+00> : vector<8x8xf32>
    %210 = tpu.matmul %209, %193, %cst_140 {dimension_numbers = #tpu.dot_dimension_numbers<[1], [0], [0], [1], [0, 0, 1, 1], [], []>} : vector<8x8xf32>, vector<8x8xf32>, vector<8x8xf32> -> vector<8x8xf32>
    %c0_141 = arith.constant 0 : index
    %c0_142 = arith.constant 0 : index
    %c0_143 = arith.constant 0 : index
    %211 = vector.load %arg4[%c0_141, %c0_142, %c0_143] : memref<16x8x32xf32, #tpu.memory_space<vmem>>, vector<1x8x32xf32>
    %212 = vector.shape_cast %211 : vector<1x8x32xf32> to vector<8x32xf32>
    %cst_144 = arith.constant dense<0.000000e+00> : vector<8x32xf32>
    %213 = tpu.matmul %210, %212, %cst_144 {dimension_numbers = #tpu.dot_dimension_numbers<[1], [0], [0], [1], [0, 0, 1, 1], [], []>} : vector<8x8xf32>, vector<8x32xf32>, vector<8x32xf32> -> vector<8x32xf32>
    %c5_145 = arith.constant 5 : index
    %c0_146 = arith.constant 0 : index
    %c0_147 = arith.constant 0 : index
    %214 = vector.load %arg2[%c5_145, %c0_146, %c0_147] : memref<48x32x8xf32, #tpu.memory_space<vmem>>, vector<1x32x8xf32>
    %215 = vector.shape_cast %214 : vector<1x32x8xf32> to vector<32x8xf32>
    %cst_148 = arith.constant dense<0.000000e+00> : vector<8x8xf32>
    %216 = tpu.matmul %12, %215, %cst_148 {dimension_numbers = #tpu.dot_dimension_numbers<[1], [0], [0], [1], [0, 0, 1, 1], [], []>} : vector<8x32xf32>, vector<32x8xf32>, vector<8x8xf32> -> vector<8x8xf32>
    %c5_149 = arith.constant 5 : index
    %c0_150 = arith.constant 0 : index
    %c0_151 = arith.constant 0 : index
    %217 = vector.load %arg3[%c5_149, %c0_150, %c0_151] : memref<48x1x8xf32, #tpu.memory_space<vmem>>, vector<1x1x8xf32>
    %218 = vector.shape_cast %217 : vector<1x1x8xf32> to vector<1x8xf32>
    %219 = vector.broadcast %218 : vector<1x8xf32> to vector<8x8xf32>
    %220 = arith.addf %216, %219 : vector<8x8xf32>
    %c9_152 = arith.constant 9 : index
    %c0_153 = arith.constant 0 : index
    %c0_154 = arith.constant 0 : index
    %221 = vector.load %arg2[%c9_152, %c0_153, %c0_154] : memref<48x32x8xf32, #tpu.memory_space<vmem>>, vector<1x32x8xf32>
    %222 = vector.shape_cast %221 : vector<1x32x8xf32> to vector<32x8xf32>
    %cst_155 = arith.constant dense<0.000000e+00> : vector<8x8xf32>
    %223 = tpu.matmul %12, %222, %cst_155 {dimension_numbers = #tpu.dot_dimension_numbers<[1], [0], [0], [1], [0, 0, 1, 1], [], []>} : vector<8x32xf32>, vector<32x8xf32>, vector<8x8xf32> -> vector<8x8xf32>
    %c9_156 = arith.constant 9 : index
    %c0_157 = arith.constant 0 : index
    %c0_158 = arith.constant 0 : index
    %224 = vector.load %arg3[%c9_156, %c0_157, %c0_158] : memref<48x1x8xf32, #tpu.memory_space<vmem>>, vector<1x1x8xf32>
    %225 = vector.shape_cast %224 : vector<1x1x8xf32> to vector<1x8xf32>
    %226 = vector.broadcast %225 : vector<1x8xf32> to vector<8x8xf32>
    %227 = arith.addf %223, %226 : vector<8x8xf32>
    %228 = vector.extract_strided_slice %26 {offsets = [8, 0], sizes = [8, 8], strides = [1, 1]} : vector<16x8xf32> to vector<8x8xf32>
    "tpu.trace_start"() <{level = 10 : i32, message = "td,sd->ts"}> : () -> ()
    %cst_159 = arith.constant dense<0.000000e+00> : vector<8x8xf32>
    %229 = tpu.matmul %228, %220, %cst_159 {dimension_numbers = #tpu.dot_dimension_numbers<[1], [1], [0], [0], [0, 0, 1, 0], [], []>} : vector<8x8xf32>, vector<8x8xf32>, vector<8x8xf32> -> vector<8x8xf32>
    "tpu.trace_stop"() : () -> ()
    %cst_160 = arith.constant dense<0xFF800000> : vector<8xf32>
    %230 = vector.multi_reduction <maximumf>, %229, %cst_160 [1] : vector<8x8xf32> to vector<8xf32>
    %231 = vector.shape_cast %230 : vector<8xf32> to vector<8x1xf32>
    %232 = vector.broadcast %231 : vector<8x1xf32> to vector<8x8xf32>
    %233 = arith.subf %229, %232 : vector<8x8xf32>
    %234 = math.exp %233 : vector<8x8xf32>
    %cst_161 = arith.constant dense<0.000000e+00> : vector<8xf32>
    %235 = vector.multi_reduction <add>, %234, %cst_161 [1] : vector<8x8xf32> to vector<8xf32>
    %236 = vector.shape_cast %235 : vector<8xf32> to vector<8x1xf32>
    %237 = tpu.reciprocal %236 {approx = true} : vector<8x1xf32> -> vector<8x1xf32>
    %238 = arith.mulf %236, %237 : vector<8x1xf32>
    %cst_162 = arith.constant 2.000000e+00 : f32
    %239 = vector.broadcast %cst_162 : f32 to vector<8x1xf32>
    %240 = arith.subf %239, %238 : vector<8x1xf32>
    %241 = arith.mulf %237, %240 : vector<8x1xf32>
    %242 = vector.broadcast %241 : vector<8x1xf32> to vector<8x8xf32>
    %243 = arith.mulf %234, %242 : vector<8x8xf32>
    %cst_163 = arith.constant dense<0.000000e+00> : vector<8x8xf32>
    %244 = tpu.matmul %243, %227, %cst_163 {dimension_numbers = #tpu.dot_dimension_numbers<[1], [0], [0], [1], [0, 0, 1, 1], [], []>} : vector<8x8xf32>, vector<8x8xf32>, vector<8x8xf32> -> vector<8x8xf32>
    %c1_164 = arith.constant 1 : index
    %c0_165 = arith.constant 0 : index
    %c0_166 = arith.constant 0 : index
    %245 = vector.load %arg4[%c1_164, %c0_165, %c0_166] : memref<16x8x32xf32, #tpu.memory_space<vmem>>, vector<1x8x32xf32>
    %246 = vector.shape_cast %245 : vector<1x8x32xf32> to vector<8x32xf32>
    %cst_167 = arith.constant dense<0.000000e+00> : vector<8x32xf32>
    %247 = tpu.matmul %244, %246, %cst_167 {dimension_numbers = #tpu.dot_dimension_numbers<[1], [0], [0], [1], [0, 0, 1, 1], [], []>} : vector<8x8xf32>, vector<8x32xf32>, vector<8x32xf32> -> vector<8x32xf32>
    %248 = arith.addf %213, %247 : vector<8x32xf32>
    %c6_168 = arith.constant 6 : index
    %c0_169 = arith.constant 0 : index
    %c0_170 = arith.constant 0 : index
    %249 = vector.load %arg2[%c6_168, %c0_169, %c0_170] : memref<48x32x8xf32, #tpu.memory_space<vmem>>, vector<1x32x8xf32>
    %250 = vector.shape_cast %249 : vector<1x32x8xf32> to vector<32x8xf32>
    %cst_171 = arith.constant dense<0.000000e+00> : vector<8x8xf32>
    %251 = tpu.matmul %12, %250, %cst_171 {dimension_numbers = #tpu.dot_dimension_numbers<[1], [0], [0], [1], [0, 0, 1, 1], [], []>} : vector<8x32xf32>, vector<32x8xf32>, vector<8x8xf32> -> vector<8x8xf32>
    %c6_172 = arith.constant 6 : index
    %c0_173 = arith.constant 0 : index
    %c0_174 = arith.constant 0 : index
    %252 = vector.load %arg3[%c6_172, %c0_173, %c0_174] : memref<48x1x8xf32, #tpu.memory_space<vmem>>, vector<1x1x8xf32>
    %253 = vector.shape_cast %252 : vector<1x1x8xf32> to vector<1x8xf32>
    %254 = vector.broadcast %253 : vector<1x8xf32> to vector<8x8xf32>
    %255 = arith.addf %251, %254 : vector<8x8xf32>
    %c10_175 = arith.constant 10 : index
    %c0_176 = arith.constant 0 : index
    %c0_177 = arith.constant 0 : index
    %256 = vector.load %arg2[%c10_175, %c0_176, %c0_177] : memref<48x32x8xf32, #tpu.memory_space<vmem>>, vector<1x32x8xf32>
    %257 = vector.shape_cast %256 : vector<1x32x8xf32> to vector<32x8xf32>
    %cst_178 = arith.constant dense<0.000000e+00> : vector<8x8xf32>
    %258 = tpu.matmul %12, %257, %cst_178 {dimension_numbers = #tpu.dot_dimension_numbers<[1], [0], [0], [1], [0, 0, 1, 1], [], []>} : vector<8x32xf32>, vector<32x8xf32>, vector<8x8xf32> -> vector<8x8xf32>
    %c10_179 = arith.constant 10 : index
    %c0_180 = arith.constant 0 : index
    %c0_181 = arith.constant 0 : index
    %259 = vector.load %arg3[%c10_179, %c0_180, %c0_181] : memref<48x1x8xf32, #tpu.memory_space<vmem>>, vector<1x1x8xf32>
    %260 = vector.shape_cast %259 : vector<1x1x8xf32> to vector<1x8xf32>
    %261 = vector.broadcast %260 : vector<1x8xf32> to vector<8x8xf32>
    %262 = arith.addf %258, %261 : vector<8x8xf32>
    %263 = vector.extract_strided_slice %33 {offsets = [8, 0], sizes = [8, 8], strides = [1, 1]} : vector<16x8xf32> to vector<8x8xf32>
    "tpu.trace_start"() <{level = 10 : i32, message = "td,sd->ts"}> : () -> ()
    %cst_182 = arith.constant dense<0.000000e+00> : vector<8x8xf32>
    %264 = tpu.matmul %263, %255, %cst_182 {dimension_numbers = #tpu.dot_dimension_numbers<[1], [1], [0], [0], [0, 0, 1, 0], [], []>} : vector<8x8xf32>, vector<8x8xf32>, vector<8x8xf32> -> vector<8x8xf32>
    "tpu.trace_stop"() : () -> ()
    %cst_183 = arith.constant dense<0xFF800000> : vector<8xf32>
    %265 = vector.multi_reduction <maximumf>, %264, %cst_183 [1] : vector<8x8xf32> to vector<8xf32>
    %266 = vector.shape_cast %265 : vector<8xf32> to vector<8x1xf32>
    %267 = vector.broadcast %266 : vector<8x1xf32> to vector<8x8xf32>
    %268 = arith.subf %264, %267 : vector<8x8xf32>
    %269 = math.exp %268 : vector<8x8xf32>
    %cst_184 = arith.constant dense<0.000000e+00> : vector<8xf32>
    %270 = vector.multi_reduction <add>, %269, %cst_184 [1] : vector<8x8xf32> to vector<8xf32>
    %271 = vector.shape_cast %270 : vector<8xf32> to vector<8x1xf32>
    %272 = tpu.reciprocal %271 {approx = true} : vector<8x1xf32> -> vector<8x1xf32>
    %273 = arith.mulf %271, %272 : vector<8x1xf32>
    %cst_185 = arith.constant 2.000000e+00 : f32
    %274 = vector.broadcast %cst_185 : f32 to vector<8x1xf32>
    %275 = arith.subf %274, %273 : vector<8x1xf32>
    %276 = arith.mulf %272, %275 : vector<8x1xf32>
    %277 = vector.broadcast %276 : vector<8x1xf32> to vector<8x8xf32>
    %278 = arith.mulf %269, %277 : vector<8x8xf32>
    %cst_186 = arith.constant dense<0.000000e+00> : vector<8x8xf32>
    %279 = tpu.matmul %278, %262, %cst_186 {dimension_numbers = #tpu.dot_dimension_numbers<[1], [0], [0], [1], [0, 0, 1, 1], [], []>} : vector<8x8xf32>, vector<8x8xf32>, vector<8x8xf32> -> vector<8x8xf32>
    %c2_187 = arith.constant 2 : index
    %c0_188 = arith.constant 0 : index
    %c0_189 = arith.constant 0 : index
    %280 = vector.load %arg4[%c2_187, %c0_188, %c0_189] : memref<16x8x32xf32, #tpu.memory_space<vmem>>, vector<1x8x32xf32>
    %281 = vector.shape_cast %280 : vector<1x8x32xf32> to vector<8x32xf32>
    %cst_190 = arith.constant dense<0.000000e+00> : vector<8x32xf32>
    %282 = tpu.matmul %279, %281, %cst_190 {dimension_numbers = #tpu.dot_dimension_numbers<[1], [0], [0], [1], [0, 0, 1, 1], [], []>} : vector<8x8xf32>, vector<8x32xf32>, vector<8x32xf32> -> vector<8x32xf32>
    %283 = arith.addf %248, %282 : vector<8x32xf32>
    %c7_191 = arith.constant 7 : index
    %c0_192 = arith.constant 0 : index
    %c0_193 = arith.constant 0 : index
    %284 = vector.load %arg2[%c7_191, %c0_192, %c0_193] : memref<48x32x8xf32, #tpu.memory_space<vmem>>, vector<1x32x8xf32>
    %285 = vector.shape_cast %284 : vector<1x32x8xf32> to vector<32x8xf32>
    %cst_194 = arith.constant dense<0.000000e+00> : vector<8x8xf32>
    %286 = tpu.matmul %12, %285, %cst_194 {dimension_numbers = #tpu.dot_dimension_numbers<[1], [0], [0], [1], [0, 0, 1, 1], [], []>} : vector<8x32xf32>, vector<32x8xf32>, vector<8x8xf32> -> vector<8x8xf32>
    %c7_195 = arith.constant 7 : index
    %c0_196 = arith.constant 0 : index
    %c0_197 = arith.constant 0 : index
    %287 = vector.load %arg3[%c7_195, %c0_196, %c0_197] : memref<48x1x8xf32, #tpu.memory_space<vmem>>, vector<1x1x8xf32>
    %288 = vector.shape_cast %287 : vector<1x1x8xf32> to vector<1x8xf32>
    %289 = vector.broadcast %288 : vector<1x8xf32> to vector<8x8xf32>
    %290 = arith.addf %286, %289 : vector<8x8xf32>
    %c11_198 = arith.constant 11 : index
    %c0_199 = arith.constant 0 : index
    %c0_200 = arith.constant 0 : index
    %291 = vector.load %arg2[%c11_198, %c0_199, %c0_200] : memref<48x32x8xf32, #tpu.memory_space<vmem>>, vector<1x32x8xf32>
    %292 = vector.shape_cast %291 : vector<1x32x8xf32> to vector<32x8xf32>
    %cst_201 = arith.constant dense<0.000000e+00> : vector<8x8xf32>
    %293 = tpu.matmul %12, %292, %cst_201 {dimension_numbers = #tpu.dot_dimension_numbers<[1], [0], [0], [1], [0, 0, 1, 1], [], []>} : vector<8x32xf32>, vector<32x8xf32>, vector<8x8xf32> -> vector<8x8xf32>
    %c11_202 = arith.constant 11 : index
    %c0_203 = arith.constant 0 : index
    %c0_204 = arith.constant 0 : index
    %294 = vector.load %arg3[%c11_202, %c0_203, %c0_204] : memref<48x1x8xf32, #tpu.memory_space<vmem>>, vector<1x1x8xf32>
    %295 = vector.shape_cast %294 : vector<1x1x8xf32> to vector<1x8xf32>
    %296 = vector.broadcast %295 : vector<1x8xf32> to vector<8x8xf32>
    %297 = arith.addf %293, %296 : vector<8x8xf32>
    %298 = vector.extract_strided_slice %40 {offsets = [8, 0], sizes = [8, 8], strides = [1, 1]} : vector<16x8xf32> to vector<8x8xf32>
    "tpu.trace_start"() <{level = 10 : i32, message = "td,sd->ts"}> : () -> ()
    %cst_205 = arith.constant dense<0.000000e+00> : vector<8x8xf32>
    %299 = tpu.matmul %298, %290, %cst_205 {dimension_numbers = #tpu.dot_dimension_numbers<[1], [1], [0], [0], [0, 0, 1, 0], [], []>} : vector<8x8xf32>, vector<8x8xf32>, vector<8x8xf32> -> vector<8x8xf32>
    "tpu.trace_stop"() : () -> ()
    %cst_206 = arith.constant dense<0xFF800000> : vector<8xf32>
    %300 = vector.multi_reduction <maximumf>, %299, %cst_206 [1] : vector<8x8xf32> to vector<8xf32>
    %301 = vector.shape_cast %300 : vector<8xf32> to vector<8x1xf32>
    %302 = vector.broadcast %301 : vector<8x1xf32> to vector<8x8xf32>
    %303 = arith.subf %299, %302 : vector<8x8xf32>
    %304 = math.exp %303 : vector<8x8xf32>
    %cst_207 = arith.constant dense<0.000000e+00> : vector<8xf32>
    %305 = vector.multi_reduction <add>, %304, %cst_207 [1] : vector<8x8xf32> to vector<8xf32>
    %306 = vector.shape_cast %305 : vector<8xf32> to vector<8x1xf32>
    %307 = tpu.reciprocal %306 {approx = true} : vector<8x1xf32> -> vector<8x1xf32>
    %308 = arith.mulf %306, %307 : vector<8x1xf32>
    %cst_208 = arith.constant 2.000000e+00 : f32
    %309 = vector.broadcast %cst_208 : f32 to vector<8x1xf32>
    %310 = arith.subf %309, %308 : vector<8x1xf32>
    %311 = arith.mulf %307, %310 : vector<8x1xf32>
    %312 = vector.broadcast %311 : vector<8x1xf32> to vector<8x8xf32>
    %313 = arith.mulf %304, %312 : vector<8x8xf32>
    %cst_209 = arith.constant dense<0.000000e+00> : vector<8x8xf32>
    %314 = tpu.matmul %313, %297, %cst_209 {dimension_numbers = #tpu.dot_dimension_numbers<[1], [0], [0], [1], [0, 0, 1, 1], [], []>} : vector<8x8xf32>, vector<8x8xf32>, vector<8x8xf32> -> vector<8x8xf32>
    %c3_210 = arith.constant 3 : index
    %c0_211 = arith.constant 0 : index
    %c0_212 = arith.constant 0 : index
    %315 = vector.load %arg4[%c3_210, %c0_211, %c0_212] : memref<16x8x32xf32, #tpu.memory_space<vmem>>, vector<1x8x32xf32>
    %316 = vector.shape_cast %315 : vector<1x8x32xf32> to vector<8x32xf32>
    %cst_213 = arith.constant dense<0.000000e+00> : vector<8x32xf32>
    %317 = tpu.matmul %314, %316, %cst_213 {dimension_numbers = #tpu.dot_dimension_numbers<[1], [0], [0], [1], [0, 0, 1, 1], [], []>} : vector<8x8xf32>, vector<8x32xf32>, vector<8x32xf32> -> vector<8x32xf32>
    %318 = arith.addf %283, %317 : vector<8x32xf32>
    %319 = tpu.concatenate %179, %318 in 0 : vector<8x32xf32>, vector<8x32xf32> -> vector<16x32xf32>
    %320 = vector.extract_strided_slice %10 {offsets = [0, 0], sizes = [1, 32], strides = [1, 1]} : vector<9x32xf32> to vector<1x32xf32>
    %321 = vector.broadcast %320 : vector<1x32xf32> to vector<16x32xf32>
    %322 = arith.addf %319, %321 : vector<16x32xf32>
    %323 = arith.addf %4, %322 : vector<16x32xf32>
    %324 = vector.extract_strided_slice %10 {offsets = [3, 0], sizes = [1, 32], strides = [1, 1]} : vector<9x32xf32> to vector<1x32xf32>
    %325 = vector.extract_strided_slice %10 {offsets = [4, 0], sizes = [1, 32], strides = [1, 1]} : vector<9x32xf32> to vector<1x32xf32>
    %cst_214 = arith.constant dense<0.000000e+00> : vector<16xf32>
    %326 = vector.multi_reduction <add>, %323, %cst_214 [1] : vector<16x32xf32> to vector<16xf32>
    %327 = vector.shape_cast %326 : vector<16xf32> to vector<16x1xf32>
    %cst_215 = arith.constant 3.200000e+01 : f32
    %328 = vector.broadcast %cst_215 : f32 to vector<16x1xf32>
    %329 = arith.divf %327, %328 : vector<16x1xf32>
    %330 = vector.broadcast %329 : vector<16x1xf32> to vector<16x32xf32>
    %331 = arith.subf %323, %330 : vector<16x32xf32>
    %332 = arith.mulf %331, %331 : vector<16x32xf32>
    %cst_216 = arith.constant dense<0.000000e+00> : vector<16xf32>
    %333 = vector.multi_reduction <add>, %332, %cst_216 [1] : vector<16x32xf32> to vector<16xf32>
    %334 = vector.shape_cast %333 : vector<16xf32> to vector<16x1xf32>
    %cst_217 = arith.constant 3.200000e+01 : f32
    %335 = vector.broadcast %cst_217 : f32 to vector<16x1xf32>
    %336 = arith.divf %334, %335 : vector<16x1xf32>
    %cst_218 = arith.constant 9.99999974E-6 : f32
    %337 = vector.broadcast %cst_218 : f32 to vector<16x1xf32>
    %338 = arith.addf %336, %337 : vector<16x1xf32>
    %339 = math.rsqrt %338 : vector<16x1xf32>
    %340 = vector.broadcast %339 : vector<16x1xf32> to vector<16x32xf32>
    %341 = arith.mulf %331, %340 : vector<16x32xf32>
    %342 = vector.broadcast %324 : vector<1x32xf32> to vector<16x32xf32>
    %343 = arith.mulf %341, %342 : vector<16x32xf32>
    %344 = vector.broadcast %325 : vector<1x32xf32> to vector<16x32xf32>
    %345 = arith.addf %343, %344 : vector<16x32xf32>
    %c12 = arith.constant 12 : index
    %c0_219 = arith.constant 0 : index
    %c0_220 = arith.constant 0 : index
    %346 = vector.load %arg2[%c12, %c0_219, %c0_220] : memref<48x32x8xf32, #tpu.memory_space<vmem>>, vector<1x32x8xf32>
    %347 = vector.shape_cast %346 : vector<1x32x8xf32> to vector<32x8xf32>
    %cst_221 = arith.constant dense<0.000000e+00> : vector<16x8xf32>
    %348 = tpu.matmul %345, %347, %cst_221 {dimension_numbers = #tpu.dot_dimension_numbers<[1], [0], [0], [1], [0, 0, 1, 1], [], []>} : vector<16x32xf32>, vector<32x8xf32>, vector<16x8xf32> -> vector<16x8xf32>
    %c12_222 = arith.constant 12 : index
    %c0_223 = arith.constant 0 : index
    %c0_224 = arith.constant 0 : index
    %349 = vector.load %arg3[%c12_222, %c0_223, %c0_224] : memref<48x1x8xf32, #tpu.memory_space<vmem>>, vector<1x1x8xf32>
    %350 = vector.shape_cast %349 : vector<1x1x8xf32> to vector<1x8xf32>
    %351 = vector.broadcast %350 : vector<1x8xf32> to vector<16x8xf32>
    %352 = arith.addf %348, %351 : vector<16x8xf32>
    %c13 = arith.constant 13 : index
    %c0_225 = arith.constant 0 : index
    %c0_226 = arith.constant 0 : index
    %353 = vector.load %arg2[%c13, %c0_225, %c0_226] : memref<48x32x8xf32, #tpu.memory_space<vmem>>, vector<1x32x8xf32>
    %354 = vector.shape_cast %353 : vector<1x32x8xf32> to vector<32x8xf32>
    %cst_227 = arith.constant dense<0.000000e+00> : vector<16x8xf32>
    %355 = tpu.matmul %345, %354, %cst_227 {dimension_numbers = #tpu.dot_dimension_numbers<[1], [0], [0], [1], [0, 0, 1, 1], [], []>} : vector<16x32xf32>, vector<32x8xf32>, vector<16x8xf32> -> vector<16x8xf32>
    %c13_228 = arith.constant 13 : index
    %c0_229 = arith.constant 0 : index
    %c0_230 = arith.constant 0 : index
    %356 = vector.load %arg3[%c13_228, %c0_229, %c0_230] : memref<48x1x8xf32, #tpu.memory_space<vmem>>, vector<1x1x8xf32>
    %357 = vector.shape_cast %356 : vector<1x1x8xf32> to vector<1x8xf32>
    %358 = vector.broadcast %357 : vector<1x8xf32> to vector<16x8xf32>
    %359 = arith.addf %355, %358 : vector<16x8xf32>
    %c14 = arith.constant 14 : index
    %c0_231 = arith.constant 0 : index
    %c0_232 = arith.constant 0 : index
    %360 = vector.load %arg2[%c14, %c0_231, %c0_232] : memref<48x32x8xf32, #tpu.memory_space<vmem>>, vector<1x32x8xf32>
    %361 = vector.shape_cast %360 : vector<1x32x8xf32> to vector<32x8xf32>
    %cst_233 = arith.constant dense<0.000000e+00> : vector<16x8xf32>
    %362 = tpu.matmul %345, %361, %cst_233 {dimension_numbers = #tpu.dot_dimension_numbers<[1], [0], [0], [1], [0, 0, 1, 1], [], []>} : vector<16x32xf32>, vector<32x8xf32>, vector<16x8xf32> -> vector<16x8xf32>
    %c14_234 = arith.constant 14 : index
    %c0_235 = arith.constant 0 : index
    %c0_236 = arith.constant 0 : index
    %363 = vector.load %arg3[%c14_234, %c0_235, %c0_236] : memref<48x1x8xf32, #tpu.memory_space<vmem>>, vector<1x1x8xf32>
    %364 = vector.shape_cast %363 : vector<1x1x8xf32> to vector<1x8xf32>
    %365 = vector.broadcast %364 : vector<1x8xf32> to vector<16x8xf32>
    %366 = arith.addf %362, %365 : vector<16x8xf32>
    %c15 = arith.constant 15 : index
    %c0_237 = arith.constant 0 : index
    %c0_238 = arith.constant 0 : index
    %367 = vector.load %arg2[%c15, %c0_237, %c0_238] : memref<48x32x8xf32, #tpu.memory_space<vmem>>, vector<1x32x8xf32>
    %368 = vector.shape_cast %367 : vector<1x32x8xf32> to vector<32x8xf32>
    %cst_239 = arith.constant dense<0.000000e+00> : vector<16x8xf32>
    %369 = tpu.matmul %345, %368, %cst_239 {dimension_numbers = #tpu.dot_dimension_numbers<[1], [0], [0], [1], [0, 0, 1, 1], [], []>} : vector<16x32xf32>, vector<32x8xf32>, vector<16x8xf32> -> vector<16x8xf32>
    %c15_240 = arith.constant 15 : index
    %c0_241 = arith.constant 0 : index
    %c0_242 = arith.constant 0 : index
    %370 = vector.load %arg3[%c15_240, %c0_241, %c0_242] : memref<48x1x8xf32, #tpu.memory_space<vmem>>, vector<1x1x8xf32>
    %371 = vector.shape_cast %370 : vector<1x1x8xf32> to vector<1x8xf32>
    %372 = vector.broadcast %371 : vector<1x8xf32> to vector<16x8xf32>
    %373 = arith.addf %369, %372 : vector<16x8xf32>
    %c16 = arith.constant 16 : index
    %c0_243 = arith.constant 0 : index
    %c0_244 = arith.constant 0 : index
    %374 = vector.load %arg2[%c16, %c0_243, %c0_244] : memref<48x32x8xf32, #tpu.memory_space<vmem>>, vector<1x32x8xf32>
    %375 = vector.shape_cast %374 : vector<1x32x8xf32> to vector<32x8xf32>
    %cst_245 = arith.constant dense<0.000000e+00> : vector<10x8xf32>
    %376 = tpu.matmul %6, %375, %cst_245 {dimension_numbers = #tpu.dot_dimension_numbers<[1], [0], [0], [1], [0, 0, 1, 1], [], []>} : vector<10x32xf32>, vector<32x8xf32>, vector<10x8xf32> -> vector<10x8xf32>
    %c16_246 = arith.constant 16 : index
    %c0_247 = arith.constant 0 : index
    %c0_248 = arith.constant 0 : index
    %377 = vector.load %arg3[%c16_246, %c0_247, %c0_248] : memref<48x1x8xf32, #tpu.memory_space<vmem>>, vector<1x1x8xf32>
    %378 = vector.shape_cast %377 : vector<1x1x8xf32> to vector<1x8xf32>
    %379 = vector.broadcast %378 : vector<1x8xf32> to vector<10x8xf32>
    %380 = arith.addf %376, %379 : vector<10x8xf32>
    %c20 = arith.constant 20 : index
    %c0_249 = arith.constant 0 : index
    %c0_250 = arith.constant 0 : index
    %381 = vector.load %arg2[%c20, %c0_249, %c0_250] : memref<48x32x8xf32, #tpu.memory_space<vmem>>, vector<1x32x8xf32>
    %382 = vector.shape_cast %381 : vector<1x32x8xf32> to vector<32x8xf32>
    %cst_251 = arith.constant dense<0.000000e+00> : vector<10x8xf32>
    %383 = tpu.matmul %6, %382, %cst_251 {dimension_numbers = #tpu.dot_dimension_numbers<[1], [0], [0], [1], [0, 0, 1, 1], [], []>} : vector<10x32xf32>, vector<32x8xf32>, vector<10x8xf32> -> vector<10x8xf32>
    %c20_252 = arith.constant 20 : index
    %c0_253 = arith.constant 0 : index
    %c0_254 = arith.constant 0 : index
    %384 = vector.load %arg3[%c20_252, %c0_253, %c0_254] : memref<48x1x8xf32, #tpu.memory_space<vmem>>, vector<1x1x8xf32>
    %385 = vector.shape_cast %384 : vector<1x1x8xf32> to vector<1x8xf32>
    %386 = vector.broadcast %385 : vector<1x8xf32> to vector<10x8xf32>
    %387 = arith.addf %383, %386 : vector<10x8xf32>
    %388 = vector.extract_strided_slice %352 {offsets = [0, 0], sizes = [8, 8], strides = [1, 1]} : vector<16x8xf32> to vector<8x8xf32>
    "tpu.trace_start"() <{level = 10 : i32, message = "td,sd->ts"}> : () -> ()
    %cst_255 = arith.constant dense<0.000000e+00> : vector<8x10xf32>
    %389 = tpu.matmul %388, %380, %cst_255 {dimension_numbers = #tpu.dot_dimension_numbers<[1], [1], [0], [0], [0, 0, 1, 0], [], []>} : vector<8x8xf32>, vector<10x8xf32>, vector<8x10xf32> -> vector<8x10xf32>
    "tpu.trace_stop"() : () -> ()
    %cst_256 = arith.constant dense<0xFF800000> : vector<8xf32>
    %390 = vector.multi_reduction <maximumf>, %389, %cst_256 [1] : vector<8x10xf32> to vector<8xf32>
    %391 = vector.shape_cast %390 : vector<8xf32> to vector<8x1xf32>
    %392 = vector.broadcast %391 : vector<8x1xf32> to vector<8x10xf32>
    %393 = arith.subf %389, %392 : vector<8x10xf32>
    %394 = math.exp %393 : vector<8x10xf32>
    %cst_257 = arith.constant dense<0.000000e+00> : vector<8xf32>
    %395 = vector.multi_reduction <add>, %394, %cst_257 [1] : vector<8x10xf32> to vector<8xf32>
    %396 = vector.shape_cast %395 : vector<8xf32> to vector<8x1xf32>
    %397 = tpu.reciprocal %396 {approx = true} : vector<8x1xf32> -> vector<8x1xf32>
    %398 = arith.mulf %396, %397 : vector<8x1xf32>
    %cst_258 = arith.constant 2.000000e+00 : f32
    %399 = vector.broadcast %cst_258 : f32 to vector<8x1xf32>
    %400 = arith.subf %399, %398 : vector<8x1xf32>
    %401 = arith.mulf %397, %400 : vector<8x1xf32>
    %402 = vector.broadcast %401 : vector<8x1xf32> to vector<8x10xf32>
    %403 = arith.mulf %394, %402 : vector<8x10xf32>
    %cst_259 = arith.constant dense<0.000000e+00> : vector<8x8xf32>
    %404 = tpu.matmul %403, %387, %cst_259 {dimension_numbers = #tpu.dot_dimension_numbers<[1], [0], [0], [1], [0, 0, 1, 1], [], []>} : vector<8x10xf32>, vector<10x8xf32>, vector<8x8xf32> -> vector<8x8xf32>
    %c4_260 = arith.constant 4 : index
    %c0_261 = arith.constant 0 : index
    %c0_262 = arith.constant 0 : index
    %405 = vector.load %arg4[%c4_260, %c0_261, %c0_262] : memref<16x8x32xf32, #tpu.memory_space<vmem>>, vector<1x8x32xf32>
    %406 = vector.shape_cast %405 : vector<1x8x32xf32> to vector<8x32xf32>
    %cst_263 = arith.constant dense<0.000000e+00> : vector<8x32xf32>
    %407 = tpu.matmul %404, %406, %cst_263 {dimension_numbers = #tpu.dot_dimension_numbers<[1], [0], [0], [1], [0, 0, 1, 1], [], []>} : vector<8x8xf32>, vector<8x32xf32>, vector<8x32xf32> -> vector<8x32xf32>
    %c17 = arith.constant 17 : index
    %c0_264 = arith.constant 0 : index
    %c0_265 = arith.constant 0 : index
    %408 = vector.load %arg2[%c17, %c0_264, %c0_265] : memref<48x32x8xf32, #tpu.memory_space<vmem>>, vector<1x32x8xf32>
    %409 = vector.shape_cast %408 : vector<1x32x8xf32> to vector<32x8xf32>
    %cst_266 = arith.constant dense<0.000000e+00> : vector<10x8xf32>
    %410 = tpu.matmul %6, %409, %cst_266 {dimension_numbers = #tpu.dot_dimension_numbers<[1], [0], [0], [1], [0, 0, 1, 1], [], []>} : vector<10x32xf32>, vector<32x8xf32>, vector<10x8xf32> -> vector<10x8xf32>
    %c17_267 = arith.constant 17 : index
    %c0_268 = arith.constant 0 : index
    %c0_269 = arith.constant 0 : index
    %411 = vector.load %arg3[%c17_267, %c0_268, %c0_269] : memref<48x1x8xf32, #tpu.memory_space<vmem>>, vector<1x1x8xf32>
    %412 = vector.shape_cast %411 : vector<1x1x8xf32> to vector<1x8xf32>
    %413 = vector.broadcast %412 : vector<1x8xf32> to vector<10x8xf32>
    %414 = arith.addf %410, %413 : vector<10x8xf32>
    %c21 = arith.constant 21 : index
    %c0_270 = arith.constant 0 : index
    %c0_271 = arith.constant 0 : index
    %415 = vector.load %arg2[%c21, %c0_270, %c0_271] : memref<48x32x8xf32, #tpu.memory_space<vmem>>, vector<1x32x8xf32>
    %416 = vector.shape_cast %415 : vector<1x32x8xf32> to vector<32x8xf32>
    %cst_272 = arith.constant dense<0.000000e+00> : vector<10x8xf32>
    %417 = tpu.matmul %6, %416, %cst_272 {dimension_numbers = #tpu.dot_dimension_numbers<[1], [0], [0], [1], [0, 0, 1, 1], [], []>} : vector<10x32xf32>, vector<32x8xf32>, vector<10x8xf32> -> vector<10x8xf32>
    %c21_273 = arith.constant 21 : index
    %c0_274 = arith.constant 0 : index
    %c0_275 = arith.constant 0 : index
    %418 = vector.load %arg3[%c21_273, %c0_274, %c0_275] : memref<48x1x8xf32, #tpu.memory_space<vmem>>, vector<1x1x8xf32>
    %419 = vector.shape_cast %418 : vector<1x1x8xf32> to vector<1x8xf32>
    %420 = vector.broadcast %419 : vector<1x8xf32> to vector<10x8xf32>
    %421 = arith.addf %417, %420 : vector<10x8xf32>
    %422 = vector.extract_strided_slice %359 {offsets = [0, 0], sizes = [8, 8], strides = [1, 1]} : vector<16x8xf32> to vector<8x8xf32>
    "tpu.trace_start"() <{level = 10 : i32, message = "td,sd->ts"}> : () -> ()
    %cst_276 = arith.constant dense<0.000000e+00> : vector<8x10xf32>
    %423 = tpu.matmul %422, %414, %cst_276 {dimension_numbers = #tpu.dot_dimension_numbers<[1], [1], [0], [0], [0, 0, 1, 0], [], []>} : vector<8x8xf32>, vector<10x8xf32>, vector<8x10xf32> -> vector<8x10xf32>
    "tpu.trace_stop"() : () -> ()
    %cst_277 = arith.constant dense<0xFF800000> : vector<8xf32>
    %424 = vector.multi_reduction <maximumf>, %423, %cst_277 [1] : vector<8x10xf32> to vector<8xf32>
    %425 = vector.shape_cast %424 : vector<8xf32> to vector<8x1xf32>
    %426 = vector.broadcast %425 : vector<8x1xf32> to vector<8x10xf32>
    %427 = arith.subf %423, %426 : vector<8x10xf32>
    %428 = math.exp %427 : vector<8x10xf32>
    %cst_278 = arith.constant dense<0.000000e+00> : vector<8xf32>
    %429 = vector.multi_reduction <add>, %428, %cst_278 [1] : vector<8x10xf32> to vector<8xf32>
    %430 = vector.shape_cast %429 : vector<8xf32> to vector<8x1xf32>
    %431 = tpu.reciprocal %430 {approx = true} : vector<8x1xf32> -> vector<8x1xf32>
    %432 = arith.mulf %430, %431 : vector<8x1xf32>
    %cst_279 = arith.constant 2.000000e+00 : f32
    %433 = vector.broadcast %cst_279 : f32 to vector<8x1xf32>
    %434 = arith.subf %433, %432 : vector<8x1xf32>
    %435 = arith.mulf %431, %434 : vector<8x1xf32>
    %436 = vector.broadcast %435 : vector<8x1xf32> to vector<8x10xf32>
    %437 = arith.mulf %428, %436 : vector<8x10xf32>
    %cst_280 = arith.constant dense<0.000000e+00> : vector<8x8xf32>
    %438 = tpu.matmul %437, %421, %cst_280 {dimension_numbers = #tpu.dot_dimension_numbers<[1], [0], [0], [1], [0, 0, 1, 1], [], []>} : vector<8x10xf32>, vector<10x8xf32>, vector<8x8xf32> -> vector<8x8xf32>
    %c5_281 = arith.constant 5 : index
    %c0_282 = arith.constant 0 : index
    %c0_283 = arith.constant 0 : index
    %439 = vector.load %arg4[%c5_281, %c0_282, %c0_283] : memref<16x8x32xf32, #tpu.memory_space<vmem>>, vector<1x8x32xf32>
    %440 = vector.shape_cast %439 : vector<1x8x32xf32> to vector<8x32xf32>
    %cst_284 = arith.constant dense<0.000000e+00> : vector<8x32xf32>
    %441 = tpu.matmul %438, %440, %cst_284 {dimension_numbers = #tpu.dot_dimension_numbers<[1], [0], [0], [1], [0, 0, 1, 1], [], []>} : vector<8x8xf32>, vector<8x32xf32>, vector<8x32xf32> -> vector<8x32xf32>
    %442 = arith.addf %407, %441 : vector<8x32xf32>
    %c18 = arith.constant 18 : index
    %c0_285 = arith.constant 0 : index
    %c0_286 = arith.constant 0 : index
    %443 = vector.load %arg2[%c18, %c0_285, %c0_286] : memref<48x32x8xf32, #tpu.memory_space<vmem>>, vector<1x32x8xf32>
    %444 = vector.shape_cast %443 : vector<1x32x8xf32> to vector<32x8xf32>
    %cst_287 = arith.constant dense<0.000000e+00> : vector<10x8xf32>
    %445 = tpu.matmul %6, %444, %cst_287 {dimension_numbers = #tpu.dot_dimension_numbers<[1], [0], [0], [1], [0, 0, 1, 1], [], []>} : vector<10x32xf32>, vector<32x8xf32>, vector<10x8xf32> -> vector<10x8xf32>
    %c18_288 = arith.constant 18 : index
    %c0_289 = arith.constant 0 : index
    %c0_290 = arith.constant 0 : index
    %446 = vector.load %arg3[%c18_288, %c0_289, %c0_290] : memref<48x1x8xf32, #tpu.memory_space<vmem>>, vector<1x1x8xf32>
    %447 = vector.shape_cast %446 : vector<1x1x8xf32> to vector<1x8xf32>
    %448 = vector.broadcast %447 : vector<1x8xf32> to vector<10x8xf32>
    %449 = arith.addf %445, %448 : vector<10x8xf32>
    %c22 = arith.constant 22 : index
    %c0_291 = arith.constant 0 : index
    %c0_292 = arith.constant 0 : index
    %450 = vector.load %arg2[%c22, %c0_291, %c0_292] : memref<48x32x8xf32, #tpu.memory_space<vmem>>, vector<1x32x8xf32>
    %451 = vector.shape_cast %450 : vector<1x32x8xf32> to vector<32x8xf32>
    %cst_293 = arith.constant dense<0.000000e+00> : vector<10x8xf32>
    %452 = tpu.matmul %6, %451, %cst_293 {dimension_numbers = #tpu.dot_dimension_numbers<[1], [0], [0], [1], [0, 0, 1, 1], [], []>} : vector<10x32xf32>, vector<32x8xf32>, vector<10x8xf32> -> vector<10x8xf32>
    %c22_294 = arith.constant 22 : index
    %c0_295 = arith.constant 0 : index
    %c0_296 = arith.constant 0 : index
    %453 = vector.load %arg3[%c22_294, %c0_295, %c0_296] : memref<48x1x8xf32, #tpu.memory_space<vmem>>, vector<1x1x8xf32>
    %454 = vector.shape_cast %453 : vector<1x1x8xf32> to vector<1x8xf32>
    %455 = vector.broadcast %454 : vector<1x8xf32> to vector<10x8xf32>
    %456 = arith.addf %452, %455 : vector<10x8xf32>
    %457 = vector.extract_strided_slice %366 {offsets = [0, 0], sizes = [8, 8], strides = [1, 1]} : vector<16x8xf32> to vector<8x8xf32>
    "tpu.trace_start"() <{level = 10 : i32, message = "td,sd->ts"}> : () -> ()
    %cst_297 = arith.constant dense<0.000000e+00> : vector<8x10xf32>
    %458 = tpu.matmul %457, %449, %cst_297 {dimension_numbers = #tpu.dot_dimension_numbers<[1], [1], [0], [0], [0, 0, 1, 0], [], []>} : vector<8x8xf32>, vector<10x8xf32>, vector<8x10xf32> -> vector<8x10xf32>
    "tpu.trace_stop"() : () -> ()
    %cst_298 = arith.constant dense<0xFF800000> : vector<8xf32>
    %459 = vector.multi_reduction <maximumf>, %458, %cst_298 [1] : vector<8x10xf32> to vector<8xf32>
    %460 = vector.shape_cast %459 : vector<8xf32> to vector<8x1xf32>
    %461 = vector.broadcast %460 : vector<8x1xf32> to vector<8x10xf32>
    %462 = arith.subf %458, %461 : vector<8x10xf32>
    %463 = math.exp %462 : vector<8x10xf32>
    %cst_299 = arith.constant dense<0.000000e+00> : vector<8xf32>
    %464 = vector.multi_reduction <add>, %463, %cst_299 [1] : vector<8x10xf32> to vector<8xf32>
    %465 = vector.shape_cast %464 : vector<8xf32> to vector<8x1xf32>
    %466 = tpu.reciprocal %465 {approx = true} : vector<8x1xf32> -> vector<8x1xf32>
    %467 = arith.mulf %465, %466 : vector<8x1xf32>
    %cst_300 = arith.constant 2.000000e+00 : f32
    %468 = vector.broadcast %cst_300 : f32 to vector<8x1xf32>
    %469 = arith.subf %468, %467 : vector<8x1xf32>
    %470 = arith.mulf %466, %469 : vector<8x1xf32>
    %471 = vector.broadcast %470 : vector<8x1xf32> to vector<8x10xf32>
    %472 = arith.mulf %463, %471 : vector<8x10xf32>
    %cst_301 = arith.constant dense<0.000000e+00> : vector<8x8xf32>
    %473 = tpu.matmul %472, %456, %cst_301 {dimension_numbers = #tpu.dot_dimension_numbers<[1], [0], [0], [1], [0, 0, 1, 1], [], []>} : vector<8x10xf32>, vector<10x8xf32>, vector<8x8xf32> -> vector<8x8xf32>
    %c6_302 = arith.constant 6 : index
    %c0_303 = arith.constant 0 : index
    %c0_304 = arith.constant 0 : index
    %474 = vector.load %arg4[%c6_302, %c0_303, %c0_304] : memref<16x8x32xf32, #tpu.memory_space<vmem>>, vector<1x8x32xf32>
    %475 = vector.shape_cast %474 : vector<1x8x32xf32> to vector<8x32xf32>
    %cst_305 = arith.constant dense<0.000000e+00> : vector<8x32xf32>
    %476 = tpu.matmul %473, %475, %cst_305 {dimension_numbers = #tpu.dot_dimension_numbers<[1], [0], [0], [1], [0, 0, 1, 1], [], []>} : vector<8x8xf32>, vector<8x32xf32>, vector<8x32xf32> -> vector<8x32xf32>
    %477 = arith.addf %442, %476 : vector<8x32xf32>
    %c19 = arith.constant 19 : index
    %c0_306 = arith.constant 0 : index
    %c0_307 = arith.constant 0 : index
    %478 = vector.load %arg2[%c19, %c0_306, %c0_307] : memref<48x32x8xf32, #tpu.memory_space<vmem>>, vector<1x32x8xf32>
    %479 = vector.shape_cast %478 : vector<1x32x8xf32> to vector<32x8xf32>
    %cst_308 = arith.constant dense<0.000000e+00> : vector<10x8xf32>
    %480 = tpu.matmul %6, %479, %cst_308 {dimension_numbers = #tpu.dot_dimension_numbers<[1], [0], [0], [1], [0, 0, 1, 1], [], []>} : vector<10x32xf32>, vector<32x8xf32>, vector<10x8xf32> -> vector<10x8xf32>
    %c19_309 = arith.constant 19 : index
    %c0_310 = arith.constant 0 : index
    %c0_311 = arith.constant 0 : index
    %481 = vector.load %arg3[%c19_309, %c0_310, %c0_311] : memref<48x1x8xf32, #tpu.memory_space<vmem>>, vector<1x1x8xf32>
    %482 = vector.shape_cast %481 : vector<1x1x8xf32> to vector<1x8xf32>
    %483 = vector.broadcast %482 : vector<1x8xf32> to vector<10x8xf32>
    %484 = arith.addf %480, %483 : vector<10x8xf32>
    %c23 = arith.constant 23 : index
    %c0_312 = arith.constant 0 : index
    %c0_313 = arith.constant 0 : index
    %485 = vector.load %arg2[%c23, %c0_312, %c0_313] : memref<48x32x8xf32, #tpu.memory_space<vmem>>, vector<1x32x8xf32>
    %486 = vector.shape_cast %485 : vector<1x32x8xf32> to vector<32x8xf32>
    %cst_314 = arith.constant dense<0.000000e+00> : vector<10x8xf32>
    %487 = tpu.matmul %6, %486, %cst_314 {dimension_numbers = #tpu.dot_dimension_numbers<[1], [0], [0], [1], [0, 0, 1, 1], [], []>} : vector<10x32xf32>, vector<32x8xf32>, vector<10x8xf32> -> vector<10x8xf32>
    %c23_315 = arith.constant 23 : index
    %c0_316 = arith.constant 0 : index
    %c0_317 = arith.constant 0 : index
    %488 = vector.load %arg3[%c23_315, %c0_316, %c0_317] : memref<48x1x8xf32, #tpu.memory_space<vmem>>, vector<1x1x8xf32>
    %489 = vector.shape_cast %488 : vector<1x1x8xf32> to vector<1x8xf32>
    %490 = vector.broadcast %489 : vector<1x8xf32> to vector<10x8xf32>
    %491 = arith.addf %487, %490 : vector<10x8xf32>
    %492 = vector.extract_strided_slice %373 {offsets = [0, 0], sizes = [8, 8], strides = [1, 1]} : vector<16x8xf32> to vector<8x8xf32>
    "tpu.trace_start"() <{level = 10 : i32, message = "td,sd->ts"}> : () -> ()
    %cst_318 = arith.constant dense<0.000000e+00> : vector<8x10xf32>
    %493 = tpu.matmul %492, %484, %cst_318 {dimension_numbers = #tpu.dot_dimension_numbers<[1], [1], [0], [0], [0, 0, 1, 0], [], []>} : vector<8x8xf32>, vector<10x8xf32>, vector<8x10xf32> -> vector<8x10xf32>
    "tpu.trace_stop"() : () -> ()
    %cst_319 = arith.constant dense<0xFF800000> : vector<8xf32>
    %494 = vector.multi_reduction <maximumf>, %493, %cst_319 [1] : vector<8x10xf32> to vector<8xf32>
    %495 = vector.shape_cast %494 : vector<8xf32> to vector<8x1xf32>
    %496 = vector.broadcast %495 : vector<8x1xf32> to vector<8x10xf32>
    %497 = arith.subf %493, %496 : vector<8x10xf32>
    %498 = math.exp %497 : vector<8x10xf32>
    %cst_320 = arith.constant dense<0.000000e+00> : vector<8xf32>
    %499 = vector.multi_reduction <add>, %498, %cst_320 [1] : vector<8x10xf32> to vector<8xf32>
    %500 = vector.shape_cast %499 : vector<8xf32> to vector<8x1xf32>
    %501 = tpu.reciprocal %500 {approx = true} : vector<8x1xf32> -> vector<8x1xf32>
    %502 = arith.mulf %500, %501 : vector<8x1xf32>
    %cst_321 = arith.constant 2.000000e+00 : f32
    %503 = vector.broadcast %cst_321 : f32 to vector<8x1xf32>
    %504 = arith.subf %503, %502 : vector<8x1xf32>
    %505 = arith.mulf %501, %504 : vector<8x1xf32>
    %506 = vector.broadcast %505 : vector<8x1xf32> to vector<8x10xf32>
    %507 = arith.mulf %498, %506 : vector<8x10xf32>
    %cst_322 = arith.constant dense<0.000000e+00> : vector<8x8xf32>
    %508 = tpu.matmul %507, %491, %cst_322 {dimension_numbers = #tpu.dot_dimension_numbers<[1], [0], [0], [1], [0, 0, 1, 1], [], []>} : vector<8x10xf32>, vector<10x8xf32>, vector<8x8xf32> -> vector<8x8xf32>
    %c7_323 = arith.constant 7 : index
    %c0_324 = arith.constant 0 : index
    %c0_325 = arith.constant 0 : index
    %509 = vector.load %arg4[%c7_323, %c0_324, %c0_325] : memref<16x8x32xf32, #tpu.memory_space<vmem>>, vector<1x8x32xf32>
    %510 = vector.shape_cast %509 : vector<1x8x32xf32> to vector<8x32xf32>
    %cst_326 = arith.constant dense<0.000000e+00> : vector<8x32xf32>
    %511 = tpu.matmul %508, %510, %cst_326 {dimension_numbers = #tpu.dot_dimension_numbers<[1], [0], [0], [1], [0, 0, 1, 1], [], []>} : vector<8x8xf32>, vector<8x32xf32>, vector<8x32xf32> -> vector<8x32xf32>
    %512 = arith.addf %477, %511 : vector<8x32xf32>
    %c16_327 = arith.constant 16 : index
    %c0_328 = arith.constant 0 : index
    %c0_329 = arith.constant 0 : index
    %513 = vector.load %arg2[%c16_327, %c0_328, %c0_329] : memref<48x32x8xf32, #tpu.memory_space<vmem>>, vector<1x32x8xf32>
    %514 = vector.shape_cast %513 : vector<1x32x8xf32> to vector<32x8xf32>
    %cst_330 = arith.constant dense<0.000000e+00> : vector<10x8xf32>
    %515 = tpu.matmul %8, %514, %cst_330 {dimension_numbers = #tpu.dot_dimension_numbers<[1], [0], [0], [1], [0, 0, 1, 1], [], []>} : vector<10x32xf32>, vector<32x8xf32>, vector<10x8xf32> -> vector<10x8xf32>
    %c16_331 = arith.constant 16 : index
    %c0_332 = arith.constant 0 : index
    %c0_333 = arith.constant 0 : index
    %516 = vector.load %arg3[%c16_331, %c0_332, %c0_333] : memref<48x1x8xf32, #tpu.memory_space<vmem>>, vector<1x1x8xf32>
    %517 = vector.shape_cast %516 : vector<1x1x8xf32> to vector<1x8xf32>
    %518 = vector.broadcast %517 : vector<1x8xf32> to vector<10x8xf32>
    %519 = arith.addf %515, %518 : vector<10x8xf32>
    %c20_334 = arith.constant 20 : index
    %c0_335 = arith.constant 0 : index
    %c0_336 = arith.constant 0 : index
    %520 = vector.load %arg2[%c20_334, %c0_335, %c0_336] : memref<48x32x8xf32, #tpu.memory_space<vmem>>, vector<1x32x8xf32>
    %521 = vector.shape_cast %520 : vector<1x32x8xf32> to vector<32x8xf32>
    %cst_337 = arith.constant dense<0.000000e+00> : vector<10x8xf32>
    %522 = tpu.matmul %8, %521, %cst_337 {dimension_numbers = #tpu.dot_dimension_numbers<[1], [0], [0], [1], [0, 0, 1, 1], [], []>} : vector<10x32xf32>, vector<32x8xf32>, vector<10x8xf32> -> vector<10x8xf32>
    %c20_338 = arith.constant 20 : index
    %c0_339 = arith.constant 0 : index
    %c0_340 = arith.constant 0 : index
    %523 = vector.load %arg3[%c20_338, %c0_339, %c0_340] : memref<48x1x8xf32, #tpu.memory_space<vmem>>, vector<1x1x8xf32>
    %524 = vector.shape_cast %523 : vector<1x1x8xf32> to vector<1x8xf32>
    %525 = vector.broadcast %524 : vector<1x8xf32> to vector<10x8xf32>
    %526 = arith.addf %522, %525 : vector<10x8xf32>
    %527 = vector.extract_strided_slice %352 {offsets = [8, 0], sizes = [8, 8], strides = [1, 1]} : vector<16x8xf32> to vector<8x8xf32>
    "tpu.trace_start"() <{level = 10 : i32, message = "td,sd->ts"}> : () -> ()
    %cst_341 = arith.constant dense<0.000000e+00> : vector<8x10xf32>
    %528 = tpu.matmul %527, %519, %cst_341 {dimension_numbers = #tpu.dot_dimension_numbers<[1], [1], [0], [0], [0, 0, 1, 0], [], []>} : vector<8x8xf32>, vector<10x8xf32>, vector<8x10xf32> -> vector<8x10xf32>
    "tpu.trace_stop"() : () -> ()
    %cst_342 = arith.constant dense<0xFF800000> : vector<8xf32>
    %529 = vector.multi_reduction <maximumf>, %528, %cst_342 [1] : vector<8x10xf32> to vector<8xf32>
    %530 = vector.shape_cast %529 : vector<8xf32> to vector<8x1xf32>
    %531 = vector.broadcast %530 : vector<8x1xf32> to vector<8x10xf32>
    %532 = arith.subf %528, %531 : vector<8x10xf32>
    %533 = math.exp %532 : vector<8x10xf32>
    %cst_343 = arith.constant dense<0.000000e+00> : vector<8xf32>
    %534 = vector.multi_reduction <add>, %533, %cst_343 [1] : vector<8x10xf32> to vector<8xf32>
    %535 = vector.shape_cast %534 : vector<8xf32> to vector<8x1xf32>
    %536 = tpu.reciprocal %535 {approx = true} : vector<8x1xf32> -> vector<8x1xf32>
    %537 = arith.mulf %535, %536 : vector<8x1xf32>
    %cst_344 = arith.constant 2.000000e+00 : f32
    %538 = vector.broadcast %cst_344 : f32 to vector<8x1xf32>
    %539 = arith.subf %538, %537 : vector<8x1xf32>
    %540 = arith.mulf %536, %539 : vector<8x1xf32>
    %541 = vector.broadcast %540 : vector<8x1xf32> to vector<8x10xf32>
    %542 = arith.mulf %533, %541 : vector<8x10xf32>
    %cst_345 = arith.constant dense<0.000000e+00> : vector<8x8xf32>
    %543 = tpu.matmul %542, %526, %cst_345 {dimension_numbers = #tpu.dot_dimension_numbers<[1], [0], [0], [1], [0, 0, 1, 1], [], []>} : vector<8x10xf32>, vector<10x8xf32>, vector<8x8xf32> -> vector<8x8xf32>
    %c4_346 = arith.constant 4 : index
    %c0_347 = arith.constant 0 : index
    %c0_348 = arith.constant 0 : index
    %544 = vector.load %arg4[%c4_346, %c0_347, %c0_348] : memref<16x8x32xf32, #tpu.memory_space<vmem>>, vector<1x8x32xf32>
    %545 = vector.shape_cast %544 : vector<1x8x32xf32> to vector<8x32xf32>
    %cst_349 = arith.constant dense<0.000000e+00> : vector<8x32xf32>
    %546 = tpu.matmul %543, %545, %cst_349 {dimension_numbers = #tpu.dot_dimension_numbers<[1], [0], [0], [1], [0, 0, 1, 1], [], []>} : vector<8x8xf32>, vector<8x32xf32>, vector<8x32xf32> -> vector<8x32xf32>
    %c17_350 = arith.constant 17 : index
    %c0_351 = arith.constant 0 : index
    %c0_352 = arith.constant 0 : index
    %547 = vector.load %arg2[%c17_350, %c0_351, %c0_352] : memref<48x32x8xf32, #tpu.memory_space<vmem>>, vector<1x32x8xf32>
    %548 = vector.shape_cast %547 : vector<1x32x8xf32> to vector<32x8xf32>
    %cst_353 = arith.constant dense<0.000000e+00> : vector<10x8xf32>
    %549 = tpu.matmul %8, %548, %cst_353 {dimension_numbers = #tpu.dot_dimension_numbers<[1], [0], [0], [1], [0, 0, 1, 1], [], []>} : vector<10x32xf32>, vector<32x8xf32>, vector<10x8xf32> -> vector<10x8xf32>
    %c17_354 = arith.constant 17 : index
    %c0_355 = arith.constant 0 : index
    %c0_356 = arith.constant 0 : index
    %550 = vector.load %arg3[%c17_354, %c0_355, %c0_356] : memref<48x1x8xf32, #tpu.memory_space<vmem>>, vector<1x1x8xf32>
    %551 = vector.shape_cast %550 : vector<1x1x8xf32> to vector<1x8xf32>
    %552 = vector.broadcast %551 : vector<1x8xf32> to vector<10x8xf32>
    %553 = arith.addf %549, %552 : vector<10x8xf32>
    %c21_357 = arith.constant 21 : index
    %c0_358 = arith.constant 0 : index
    %c0_359 = arith.constant 0 : index
    %554 = vector.load %arg2[%c21_357, %c0_358, %c0_359] : memref<48x32x8xf32, #tpu.memory_space<vmem>>, vector<1x32x8xf32>
    %555 = vector.shape_cast %554 : vector<1x32x8xf32> to vector<32x8xf32>
    %cst_360 = arith.constant dense<0.000000e+00> : vector<10x8xf32>
    %556 = tpu.matmul %8, %555, %cst_360 {dimension_numbers = #tpu.dot_dimension_numbers<[1], [0], [0], [1], [0, 0, 1, 1], [], []>} : vector<10x32xf32>, vector<32x8xf32>, vector<10x8xf32> -> vector<10x8xf32>
    %c21_361 = arith.constant 21 : index
    %c0_362 = arith.constant 0 : index
    %c0_363 = arith.constant 0 : index
    %557 = vector.load %arg3[%c21_361, %c0_362, %c0_363] : memref<48x1x8xf32, #tpu.memory_space<vmem>>, vector<1x1x8xf32>
    %558 = vector.shape_cast %557 : vector<1x1x8xf32> to vector<1x8xf32>
    %559 = vector.broadcast %558 : vector<1x8xf32> to vector<10x8xf32>
    %560 = arith.addf %556, %559 : vector<10x8xf32>
    %561 = vector.extract_strided_slice %359 {offsets = [8, 0], sizes = [8, 8], strides = [1, 1]} : vector<16x8xf32> to vector<8x8xf32>
    "tpu.trace_start"() <{level = 10 : i32, message = "td,sd->ts"}> : () -> ()
    %cst_364 = arith.constant dense<0.000000e+00> : vector<8x10xf32>
    %562 = tpu.matmul %561, %553, %cst_364 {dimension_numbers = #tpu.dot_dimension_numbers<[1], [1], [0], [0], [0, 0, 1, 0], [], []>} : vector<8x8xf32>, vector<10x8xf32>, vector<8x10xf32> -> vector<8x10xf32>
    "tpu.trace_stop"() : () -> ()
    %cst_365 = arith.constant dense<0xFF800000> : vector<8xf32>
    %563 = vector.multi_reduction <maximumf>, %562, %cst_365 [1] : vector<8x10xf32> to vector<8xf32>
    %564 = vector.shape_cast %563 : vector<8xf32> to vector<8x1xf32>
    %565 = vector.broadcast %564 : vector<8x1xf32> to vector<8x10xf32>
    %566 = arith.subf %562, %565 : vector<8x10xf32>
    %567 = math.exp %566 : vector<8x10xf32>
    %cst_366 = arith.constant dense<0.000000e+00> : vector<8xf32>
    %568 = vector.multi_reduction <add>, %567, %cst_366 [1] : vector<8x10xf32> to vector<8xf32>
    %569 = vector.shape_cast %568 : vector<8xf32> to vector<8x1xf32>
    %570 = tpu.reciprocal %569 {approx = true} : vector<8x1xf32> -> vector<8x1xf32>
    %571 = arith.mulf %569, %570 : vector<8x1xf32>
    %cst_367 = arith.constant 2.000000e+00 : f32
    %572 = vector.broadcast %cst_367 : f32 to vector<8x1xf32>
    %573 = arith.subf %572, %571 : vector<8x1xf32>
    %574 = arith.mulf %570, %573 : vector<8x1xf32>
    %575 = vector.broadcast %574 : vector<8x1xf32> to vector<8x10xf32>
    %576 = arith.mulf %567, %575 : vector<8x10xf32>
    %cst_368 = arith.constant dense<0.000000e+00> : vector<8x8xf32>
    %577 = tpu.matmul %576, %560, %cst_368 {dimension_numbers = #tpu.dot_dimension_numbers<[1], [0], [0], [1], [0, 0, 1, 1], [], []>} : vector<8x10xf32>, vector<10x8xf32>, vector<8x8xf32> -> vector<8x8xf32>
    %c5_369 = arith.constant 5 : index
    %c0_370 = arith.constant 0 : index
    %c0_371 = arith.constant 0 : index
    %578 = vector.load %arg4[%c5_369, %c0_370, %c0_371] : memref<16x8x32xf32, #tpu.memory_space<vmem>>, vector<1x8x32xf32>
    %579 = vector.shape_cast %578 : vector<1x8x32xf32> to vector<8x32xf32>
    %cst_372 = arith.constant dense<0.000000e+00> : vector<8x32xf32>
    %580 = tpu.matmul %577, %579, %cst_372 {dimension_numbers = #tpu.dot_dimension_numbers<[1], [0], [0], [1], [0, 0, 1, 1], [], []>} : vector<8x8xf32>, vector<8x32xf32>, vector<8x32xf32> -> vector<8x32xf32>
    %581 = arith.addf %546, %580 : vector<8x32xf32>
    %c18_373 = arith.constant 18 : index
    %c0_374 = arith.constant 0 : index
    %c0_375 = arith.constant 0 : index
    %582 = vector.load %arg2[%c18_373, %c0_374, %c0_375] : memref<48x32x8xf32, #tpu.memory_space<vmem>>, vector<1x32x8xf32>
    %583 = vector.shape_cast %582 : vector<1x32x8xf32> to vector<32x8xf32>
    %cst_376 = arith.constant dense<0.000000e+00> : vector<10x8xf32>
    %584 = tpu.matmul %8, %583, %cst_376 {dimension_numbers = #tpu.dot_dimension_numbers<[1], [0], [0], [1], [0, 0, 1, 1], [], []>} : vector<10x32xf32>, vector<32x8xf32>, vector<10x8xf32> -> vector<10x8xf32>
    %c18_377 = arith.constant 18 : index
    %c0_378 = arith.constant 0 : index
    %c0_379 = arith.constant 0 : index
    %585 = vector.load %arg3[%c18_377, %c0_378, %c0_379] : memref<48x1x8xf32, #tpu.memory_space<vmem>>, vector<1x1x8xf32>
    %586 = vector.shape_cast %585 : vector<1x1x8xf32> to vector<1x8xf32>
    %587 = vector.broadcast %586 : vector<1x8xf32> to vector<10x8xf32>
    %588 = arith.addf %584, %587 : vector<10x8xf32>
    %c22_380 = arith.constant 22 : index
    %c0_381 = arith.constant 0 : index
    %c0_382 = arith.constant 0 : index
    %589 = vector.load %arg2[%c22_380, %c0_381, %c0_382] : memref<48x32x8xf32, #tpu.memory_space<vmem>>, vector<1x32x8xf32>
    %590 = vector.shape_cast %589 : vector<1x32x8xf32> to vector<32x8xf32>
    %cst_383 = arith.constant dense<0.000000e+00> : vector<10x8xf32>
    %591 = tpu.matmul %8, %590, %cst_383 {dimension_numbers = #tpu.dot_dimension_numbers<[1], [0], [0], [1], [0, 0, 1, 1], [], []>} : vector<10x32xf32>, vector<32x8xf32>, vector<10x8xf32> -> vector<10x8xf32>
    %c22_384 = arith.constant 22 : index
    %c0_385 = arith.constant 0 : index
    %c0_386 = arith.constant 0 : index
    %592 = vector.load %arg3[%c22_384, %c0_385, %c0_386] : memref<48x1x8xf32, #tpu.memory_space<vmem>>, vector<1x1x8xf32>
    %593 = vector.shape_cast %592 : vector<1x1x8xf32> to vector<1x8xf32>
    %594 = vector.broadcast %593 : vector<1x8xf32> to vector<10x8xf32>
    %595 = arith.addf %591, %594 : vector<10x8xf32>
    %596 = vector.extract_strided_slice %366 {offsets = [8, 0], sizes = [8, 8], strides = [1, 1]} : vector<16x8xf32> to vector<8x8xf32>
    "tpu.trace_start"() <{level = 10 : i32, message = "td,sd->ts"}> : () -> ()
    %cst_387 = arith.constant dense<0.000000e+00> : vector<8x10xf32>
    %597 = tpu.matmul %596, %588, %cst_387 {dimension_numbers = #tpu.dot_dimension_numbers<[1], [1], [0], [0], [0, 0, 1, 0], [], []>} : vector<8x8xf32>, vector<10x8xf32>, vector<8x10xf32> -> vector<8x10xf32>
    "tpu.trace_stop"() : () -> ()
    %cst_388 = arith.constant dense<0xFF800000> : vector<8xf32>
    %598 = vector.multi_reduction <maximumf>, %597, %cst_388 [1] : vector<8x10xf32> to vector<8xf32>
    %599 = vector.shape_cast %598 : vector<8xf32> to vector<8x1xf32>
    %600 = vector.broadcast %599 : vector<8x1xf32> to vector<8x10xf32>
    %601 = arith.subf %597, %600 : vector<8x10xf32>
    %602 = math.exp %601 : vector<8x10xf32>
    %cst_389 = arith.constant dense<0.000000e+00> : vector<8xf32>
    %603 = vector.multi_reduction <add>, %602, %cst_389 [1] : vector<8x10xf32> to vector<8xf32>
    %604 = vector.shape_cast %603 : vector<8xf32> to vector<8x1xf32>
    %605 = tpu.reciprocal %604 {approx = true} : vector<8x1xf32> -> vector<8x1xf32>
    %606 = arith.mulf %604, %605 : vector<8x1xf32>
    %cst_390 = arith.constant 2.000000e+00 : f32
    %607 = vector.broadcast %cst_390 : f32 to vector<8x1xf32>
    %608 = arith.subf %607, %606 : vector<8x1xf32>
    %609 = arith.mulf %605, %608 : vector<8x1xf32>
    %610 = vector.broadcast %609 : vector<8x1xf32> to vector<8x10xf32>
    %611 = arith.mulf %602, %610 : vector<8x10xf32>
    %cst_391 = arith.constant dense<0.000000e+00> : vector<8x8xf32>
    %612 = tpu.matmul %611, %595, %cst_391 {dimension_numbers = #tpu.dot_dimension_numbers<[1], [0], [0], [1], [0, 0, 1, 1], [], []>} : vector<8x10xf32>, vector<10x8xf32>, vector<8x8xf32> -> vector<8x8xf32>
    %c6_392 = arith.constant 6 : index
    %c0_393 = arith.constant 0 : index
    %c0_394 = arith.constant 0 : index
    %613 = vector.load %arg4[%c6_392, %c0_393, %c0_394] : memref<16x8x32xf32, #tpu.memory_space<vmem>>, vector<1x8x32xf32>
    %614 = vector.shape_cast %613 : vector<1x8x32xf32> to vector<8x32xf32>
    %cst_395 = arith.constant dense<0.000000e+00> : vector<8x32xf32>
    %615 = tpu.matmul %612, %614, %cst_395 {dimension_numbers = #tpu.dot_dimension_numbers<[1], [0], [0], [1], [0, 0, 1, 1], [], []>} : vector<8x8xf32>, vector<8x32xf32>, vector<8x32xf32> -> vector<8x32xf32>
    %616 = arith.addf %581, %615 : vector<8x32xf32>
    %c19_396 = arith.constant 19 : index
    %c0_397 = arith.constant 0 : index
    %c0_398 = arith.constant 0 : index
    %617 = vector.load %arg2[%c19_396, %c0_397, %c0_398] : memref<48x32x8xf32, #tpu.memory_space<vmem>>, vector<1x32x8xf32>
    %618 = vector.shape_cast %617 : vector<1x32x8xf32> to vector<32x8xf32>
    %cst_399 = arith.constant dense<0.000000e+00> : vector<10x8xf32>
    %619 = tpu.matmul %8, %618, %cst_399 {dimension_numbers = #tpu.dot_dimension_numbers<[1], [0], [0], [1], [0, 0, 1, 1], [], []>} : vector<10x32xf32>, vector<32x8xf32>, vector<10x8xf32> -> vector<10x8xf32>
    %c19_400 = arith.constant 19 : index
    %c0_401 = arith.constant 0 : index
    %c0_402 = arith.constant 0 : index
    %620 = vector.load %arg3[%c19_400, %c0_401, %c0_402] : memref<48x1x8xf32, #tpu.memory_space<vmem>>, vector<1x1x8xf32>
    %621 = vector.shape_cast %620 : vector<1x1x8xf32> to vector<1x8xf32>
    %622 = vector.broadcast %621 : vector<1x8xf32> to vector<10x8xf32>
    %623 = arith.addf %619, %622 : vector<10x8xf32>
    %c23_403 = arith.constant 23 : index
    %c0_404 = arith.constant 0 : index
    %c0_405 = arith.constant 0 : index
    %624 = vector.load %arg2[%c23_403, %c0_404, %c0_405] : memref<48x32x8xf32, #tpu.memory_space<vmem>>, vector<1x32x8xf32>
    %625 = vector.shape_cast %624 : vector<1x32x8xf32> to vector<32x8xf32>
    %cst_406 = arith.constant dense<0.000000e+00> : vector<10x8xf32>
    %626 = tpu.matmul %8, %625, %cst_406 {dimension_numbers = #tpu.dot_dimension_numbers<[1], [0], [0], [1], [0, 0, 1, 1], [], []>} : vector<10x32xf32>, vector<32x8xf32>, vector<10x8xf32> -> vector<10x8xf32>
    %c23_407 = arith.constant 23 : index
    %c0_408 = arith.constant 0 : index
    %c0_409 = arith.constant 0 : index
    %627 = vector.load %arg3[%c23_407, %c0_408, %c0_409] : memref<48x1x8xf32, #tpu.memory_space<vmem>>, vector<1x1x8xf32>
    %628 = vector.shape_cast %627 : vector<1x1x8xf32> to vector<1x8xf32>
    %629 = vector.broadcast %628 : vector<1x8xf32> to vector<10x8xf32>
    %630 = arith.addf %626, %629 : vector<10x8xf32>
    %631 = vector.extract_strided_slice %373 {offsets = [8, 0], sizes = [8, 8], strides = [1, 1]} : vector<16x8xf32> to vector<8x8xf32>
    "tpu.trace_start"() <{level = 10 : i32, message = "td,sd->ts"}> : () -> ()
    %cst_410 = arith.constant dense<0.000000e+00> : vector<8x10xf32>
    %632 = tpu.matmul %631, %623, %cst_410 {dimension_numbers = #tpu.dot_dimension_numbers<[1], [1], [0], [0], [0, 0, 1, 0], [], []>} : vector<8x8xf32>, vector<10x8xf32>, vector<8x10xf32> -> vector<8x10xf32>
    "tpu.trace_stop"() : () -> ()
    %cst_411 = arith.constant dense<0xFF800000> : vector<8xf32>
    %633 = vector.multi_reduction <maximumf>, %632, %cst_411 [1] : vector<8x10xf32> to vector<8xf32>
    %634 = vector.shape_cast %633 : vector<8xf32> to vector<8x1xf32>
    %635 = vector.broadcast %634 : vector<8x1xf32> to vector<8x10xf32>
    %636 = arith.subf %632, %635 : vector<8x10xf32>
    %637 = math.exp %636 : vector<8x10xf32>
    %cst_412 = arith.constant dense<0.000000e+00> : vector<8xf32>
    %638 = vector.multi_reduction <add>, %637, %cst_412 [1] : vector<8x10xf32> to vector<8xf32>
    %639 = vector.shape_cast %638 : vector<8xf32> to vector<8x1xf32>
    %640 = tpu.reciprocal %639 {approx = true} : vector<8x1xf32> -> vector<8x1xf32>
    %641 = arith.mulf %639, %640 : vector<8x1xf32>
    %cst_413 = arith.constant 2.000000e+00 : f32
    %642 = vector.broadcast %cst_413 : f32 to vector<8x1xf32>
    %643 = arith.subf %642, %641 : vector<8x1xf32>
    %644 = arith.mulf %640, %643 : vector<8x1xf32>
    %645 = vector.broadcast %644 : vector<8x1xf32> to vector<8x10xf32>
    %646 = arith.mulf %637, %645 : vector<8x10xf32>
    %cst_414 = arith.constant dense<0.000000e+00> : vector<8x8xf32>
    %647 = tpu.matmul %646, %630, %cst_414 {dimension_numbers = #tpu.dot_dimension_numbers<[1], [0], [0], [1], [0, 0, 1, 1], [], []>} : vector<8x10xf32>, vector<10x8xf32>, vector<8x8xf32> -> vector<8x8xf32>
    %c7_415 = arith.constant 7 : index
    %c0_416 = arith.constant 0 : index
    %c0_417 = arith.constant 0 : index
    %648 = vector.load %arg4[%c7_415, %c0_416, %c0_417] : memref<16x8x32xf32, #tpu.memory_space<vmem>>, vector<1x8x32xf32>
    %649 = vector.shape_cast %648 : vector<1x8x32xf32> to vector<8x32xf32>
    %cst_418 = arith.constant dense<0.000000e+00> : vector<8x32xf32>
    %650 = tpu.matmul %647, %649, %cst_418 {dimension_numbers = #tpu.dot_dimension_numbers<[1], [0], [0], [1], [0, 0, 1, 1], [], []>} : vector<8x8xf32>, vector<8x32xf32>, vector<8x32xf32> -> vector<8x32xf32>
    %651 = arith.addf %616, %650 : vector<8x32xf32>
    %652 = tpu.concatenate %512, %651 in 0 : vector<8x32xf32>, vector<8x32xf32> -> vector<16x32xf32>
    %653 = vector.extract_strided_slice %10 {offsets = [1, 0], sizes = [1, 32], strides = [1, 1]} : vector<9x32xf32> to vector<1x32xf32>
    %654 = vector.broadcast %653 : vector<1x32xf32> to vector<16x32xf32>
    %655 = arith.addf %652, %654 : vector<16x32xf32>
    %656 = arith.addf %345, %655 : vector<16x32xf32>
    %657 = vector.extract_strided_slice %10 {offsets = [5, 0], sizes = [1, 32], strides = [1, 1]} : vector<9x32xf32> to vector<1x32xf32>
    %658 = vector.extract_strided_slice %10 {offsets = [6, 0], sizes = [1, 32], strides = [1, 1]} : vector<9x32xf32> to vector<1x32xf32>
    %cst_419 = arith.constant dense<0.000000e+00> : vector<16xf32>
    %659 = vector.multi_reduction <add>, %656, %cst_419 [1] : vector<16x32xf32> to vector<16xf32>
    %660 = vector.shape_cast %659 : vector<16xf32> to vector<16x1xf32>
    %cst_420 = arith.constant 3.200000e+01 : f32
    %661 = vector.broadcast %cst_420 : f32 to vector<16x1xf32>
    %662 = arith.divf %660, %661 : vector<16x1xf32>
    %663 = vector.broadcast %662 : vector<16x1xf32> to vector<16x32xf32>
    %664 = arith.subf %656, %663 : vector<16x32xf32>
    %665 = arith.mulf %664, %664 : vector<16x32xf32>
    %cst_421 = arith.constant dense<0.000000e+00> : vector<16xf32>
    %666 = vector.multi_reduction <add>, %665, %cst_421 [1] : vector<16x32xf32> to vector<16xf32>
    %667 = vector.shape_cast %666 : vector<16xf32> to vector<16x1xf32>
    %cst_422 = arith.constant 3.200000e+01 : f32
    %668 = vector.broadcast %cst_422 : f32 to vector<16x1xf32>
    %669 = arith.divf %667, %668 : vector<16x1xf32>
    %cst_423 = arith.constant 9.99999974E-6 : f32
    %670 = vector.broadcast %cst_423 : f32 to vector<16x1xf32>
    %671 = arith.addf %669, %670 : vector<16x1xf32>
    %672 = math.rsqrt %671 : vector<16x1xf32>
    %673 = vector.broadcast %672 : vector<16x1xf32> to vector<16x32xf32>
    %674 = arith.mulf %664, %673 : vector<16x32xf32>
    %675 = vector.broadcast %657 : vector<1x32xf32> to vector<16x32xf32>
    %676 = arith.mulf %674, %675 : vector<16x32xf32>
    %677 = vector.broadcast %658 : vector<1x32xf32> to vector<16x32xf32>
    %678 = arith.addf %676, %677 : vector<16x32xf32>
    %c0_424 = arith.constant 0 : index
    %c0_425 = arith.constant 0 : index
    %c0_426 = arith.constant 0 : index
    %679 = vector.load %arg6[%c0_424, %c0_425, %c0_426] : memref<2x32x64xf32, #tpu.memory_space<vmem>>, vector<1x32x64xf32>
    %680 = vector.shape_cast %679 : vector<1x32x64xf32> to vector<32x64xf32>
    %cst_427 = arith.constant dense<0.000000e+00> : vector<16x64xf32>
    %681 = tpu.matmul %678, %680, %cst_427 {dimension_numbers = #tpu.dot_dimension_numbers<[1], [0], [0], [1], [0, 0, 1, 1], [], []>} : vector<16x32xf32>, vector<32x64xf32>, vector<16x64xf32> -> vector<16x64xf32>
    %c0_428 = arith.constant 0 : index
    %c0_429 = arith.constant 0 : index
    %c0_430 = arith.constant 0 : index
    %682 = vector.load %arg8[%c0_428, %c0_429, %c0_430] : memref<2x1x64xf32, #tpu.memory_space<vmem>>, vector<1x1x64xf32>
    %683 = vector.shape_cast %682 : vector<1x1x64xf32> to vector<1x64xf32>
    %684 = vector.broadcast %683 : vector<1x64xf32> to vector<16x64xf32>
    %685 = arith.addf %681, %684 : vector<16x64xf32>
    %cst_431 = arith.constant 0.000000e+00 : f32
    %686 = vector.broadcast %cst_431 : f32 to vector<16x64xf32>
    %687 = arith.maximumf %685, %686 : vector<16x64xf32>
    %c0_432 = arith.constant 0 : index
    %c0_433 = arith.constant 0 : index
    %c0_434 = arith.constant 0 : index
    %688 = vector.load %arg7[%c0_432, %c0_433, %c0_434] : memref<2x64x32xf32, #tpu.memory_space<vmem>>, vector<1x64x32xf32>
    %689 = vector.shape_cast %688 : vector<1x64x32xf32> to vector<64x32xf32>
    %cst_435 = arith.constant dense<0.000000e+00> : vector<16x32xf32>
    %690 = tpu.matmul %687, %689, %cst_435 {dimension_numbers = #tpu.dot_dimension_numbers<[1], [0], [0], [1], [0, 0, 1, 1], [], []>} : vector<16x64xf32>, vector<64x32xf32>, vector<16x32xf32> -> vector<16x32xf32>
    %691 = vector.extract_strided_slice %10 {offsets = [2, 0], sizes = [1, 32], strides = [1, 1]} : vector<9x32xf32> to vector<1x32xf32>
    %692 = vector.broadcast %691 : vector<1x32xf32> to vector<16x32xf32>
    %693 = arith.addf %690, %692 : vector<16x32xf32>
    %694 = arith.addf %678, %693 : vector<16x32xf32>
    %695 = vector.extract_strided_slice %10 {offsets = [7, 0], sizes = [1, 32], strides = [1, 1]} : vector<9x32xf32> to vector<1x32xf32>
    %696 = vector.extract_strided_slice %10 {offsets = [8, 0], sizes = [1, 32], strides = [1, 1]} : vector<9x32xf32> to vector<1x32xf32>
    %cst_436 = arith.constant dense<0.000000e+00> : vector<16xf32>
    %697 = vector.multi_reduction <add>, %694, %cst_436 [1] : vector<16x32xf32> to vector<16xf32>
    %698 = vector.shape_cast %697 : vector<16xf32> to vector<16x1xf32>
    %cst_437 = arith.constant 3.200000e+01 : f32
    %699 = vector.broadcast %cst_437 : f32 to vector<16x1xf32>
    %700 = arith.divf %698, %699 : vector<16x1xf32>
    %701 = vector.broadcast %700 : vector<16x1xf32> to vector<16x32xf32>
    %702 = arith.subf %694, %701 : vector<16x32xf32>
    %703 = arith.mulf %702, %702 : vector<16x32xf32>
    %cst_438 = arith.constant dense<0.000000e+00> : vector<16xf32>
    %704 = vector.multi_reduction <add>, %703, %cst_438 [1] : vector<16x32xf32> to vector<16xf32>
    %705 = vector.shape_cast %704 : vector<16xf32> to vector<16x1xf32>
    %cst_439 = arith.constant 3.200000e+01 : f32
    %706 = vector.broadcast %cst_439 : f32 to vector<16x1xf32>
    %707 = arith.divf %705, %706 : vector<16x1xf32>
    %cst_440 = arith.constant 9.99999974E-6 : f32
    %708 = vector.broadcast %cst_440 : f32 to vector<16x1xf32>
    %709 = arith.addf %707, %708 : vector<16x1xf32>
    %710 = math.rsqrt %709 : vector<16x1xf32>
    %711 = vector.broadcast %710 : vector<16x1xf32> to vector<16x32xf32>
    %712 = arith.mulf %702, %711 : vector<16x32xf32>
    %713 = vector.broadcast %695 : vector<1x32xf32> to vector<16x32xf32>
    %714 = arith.mulf %712, %713 : vector<16x32xf32>
    %715 = vector.broadcast %696 : vector<1x32xf32> to vector<16x32xf32>
    %716 = arith.addf %714, %715 : vector<16x32xf32>
    %c1_441 = arith.constant 1 : index
    %c0_442 = arith.constant 0 : index
    %c0_443 = arith.constant 0 : index
    %717 = vector.load %arg5[%c1_441, %c0_442, %c0_443] : memref<2x9x32xf32, #tpu.memory_space<vmem>>, vector<1x9x32xf32>
    %718 = vector.shape_cast %717 : vector<1x9x32xf32> to vector<9x32xf32>
    %719 = vector.extract_strided_slice %716 {offsets = [0, 0], sizes = [8, 32], strides = [1, 1]} : vector<16x32xf32> to vector<8x32xf32>
    %720 = vector.extract_strided_slice %716 {offsets = [8, 0], sizes = [8, 32], strides = [1, 1]} : vector<16x32xf32> to vector<8x32xf32>
    %c24 = arith.constant 24 : index
    %c0_444 = arith.constant 0 : index
    %c0_445 = arith.constant 0 : index
    %721 = vector.load %arg2[%c24, %c0_444, %c0_445] : memref<48x32x8xf32, #tpu.memory_space<vmem>>, vector<1x32x8xf32>
    %722 = vector.shape_cast %721 : vector<1x32x8xf32> to vector<32x8xf32>
    %cst_446 = arith.constant dense<0.000000e+00> : vector<16x8xf32>
    %723 = tpu.matmul %716, %722, %cst_446 {dimension_numbers = #tpu.dot_dimension_numbers<[1], [0], [0], [1], [0, 0, 1, 1], [], []>} : vector<16x32xf32>, vector<32x8xf32>, vector<16x8xf32> -> vector<16x8xf32>
    %c24_447 = arith.constant 24 : index
    %c0_448 = arith.constant 0 : index
    %c0_449 = arith.constant 0 : index
    %724 = vector.load %arg3[%c24_447, %c0_448, %c0_449] : memref<48x1x8xf32, #tpu.memory_space<vmem>>, vector<1x1x8xf32>
    %725 = vector.shape_cast %724 : vector<1x1x8xf32> to vector<1x8xf32>
    %726 = vector.broadcast %725 : vector<1x8xf32> to vector<16x8xf32>
    %727 = arith.addf %723, %726 : vector<16x8xf32>
    %c25 = arith.constant 25 : index
    %c0_450 = arith.constant 0 : index
    %c0_451 = arith.constant 0 : index
    %728 = vector.load %arg2[%c25, %c0_450, %c0_451] : memref<48x32x8xf32, #tpu.memory_space<vmem>>, vector<1x32x8xf32>
    %729 = vector.shape_cast %728 : vector<1x32x8xf32> to vector<32x8xf32>
    %cst_452 = arith.constant dense<0.000000e+00> : vector<16x8xf32>
    %730 = tpu.matmul %716, %729, %cst_452 {dimension_numbers = #tpu.dot_dimension_numbers<[1], [0], [0], [1], [0, 0, 1, 1], [], []>} : vector<16x32xf32>, vector<32x8xf32>, vector<16x8xf32> -> vector<16x8xf32>
    %c25_453 = arith.constant 25 : index
    %c0_454 = arith.constant 0 : index
    %c0_455 = arith.constant 0 : index
    %731 = vector.load %arg3[%c25_453, %c0_454, %c0_455] : memref<48x1x8xf32, #tpu.memory_space<vmem>>, vector<1x1x8xf32>
    %732 = vector.shape_cast %731 : vector<1x1x8xf32> to vector<1x8xf32>
    %733 = vector.broadcast %732 : vector<1x8xf32> to vector<16x8xf32>
    %734 = arith.addf %730, %733 : vector<16x8xf32>
    %c26 = arith.constant 26 : index
    %c0_456 = arith.constant 0 : index
    %c0_457 = arith.constant 0 : index
    %735 = vector.load %arg2[%c26, %c0_456, %c0_457] : memref<48x32x8xf32, #tpu.memory_space<vmem>>, vector<1x32x8xf32>
    %736 = vector.shape_cast %735 : vector<1x32x8xf32> to vector<32x8xf32>
    %cst_458 = arith.constant dense<0.000000e+00> : vector<16x8xf32>
    %737 = tpu.matmul %716, %736, %cst_458 {dimension_numbers = #tpu.dot_dimension_numbers<[1], [0], [0], [1], [0, 0, 1, 1], [], []>} : vector<16x32xf32>, vector<32x8xf32>, vector<16x8xf32> -> vector<16x8xf32>
    %c26_459 = arith.constant 26 : index
    %c0_460 = arith.constant 0 : index
    %c0_461 = arith.constant 0 : index
    %738 = vector.load %arg3[%c26_459, %c0_460, %c0_461] : memref<48x1x8xf32, #tpu.memory_space<vmem>>, vector<1x1x8xf32>
    %739 = vector.shape_cast %738 : vector<1x1x8xf32> to vector<1x8xf32>
    %740 = vector.broadcast %739 : vector<1x8xf32> to vector<16x8xf32>
    %741 = arith.addf %737, %740 : vector<16x8xf32>
    %c27 = arith.constant 27 : index
    %c0_462 = arith.constant 0 : index
    %c0_463 = arith.constant 0 : index
    %742 = vector.load %arg2[%c27, %c0_462, %c0_463] : memref<48x32x8xf32, #tpu.memory_space<vmem>>, vector<1x32x8xf32>
    %743 = vector.shape_cast %742 : vector<1x32x8xf32> to vector<32x8xf32>
    %cst_464 = arith.constant dense<0.000000e+00> : vector<16x8xf32>
    %744 = tpu.matmul %716, %743, %cst_464 {dimension_numbers = #tpu.dot_dimension_numbers<[1], [0], [0], [1], [0, 0, 1, 1], [], []>} : vector<16x32xf32>, vector<32x8xf32>, vector<16x8xf32> -> vector<16x8xf32>
    %c27_465 = arith.constant 27 : index
    %c0_466 = arith.constant 0 : index
    %c0_467 = arith.constant 0 : index
    %745 = vector.load %arg3[%c27_465, %c0_466, %c0_467] : memref<48x1x8xf32, #tpu.memory_space<vmem>>, vector<1x1x8xf32>
    %746 = vector.shape_cast %745 : vector<1x1x8xf32> to vector<1x8xf32>
    %747 = vector.broadcast %746 : vector<1x8xf32> to vector<16x8xf32>
    %748 = arith.addf %744, %747 : vector<16x8xf32>
    %c28 = arith.constant 28 : index
    %c0_468 = arith.constant 0 : index
    %c0_469 = arith.constant 0 : index
    %749 = vector.load %arg2[%c28, %c0_468, %c0_469] : memref<48x32x8xf32, #tpu.memory_space<vmem>>, vector<1x32x8xf32>
    %750 = vector.shape_cast %749 : vector<1x32x8xf32> to vector<32x8xf32>
    %cst_470 = arith.constant dense<0.000000e+00> : vector<8x8xf32>
    %751 = tpu.matmul %719, %750, %cst_470 {dimension_numbers = #tpu.dot_dimension_numbers<[1], [0], [0], [1], [0, 0, 1, 1], [], []>} : vector<8x32xf32>, vector<32x8xf32>, vector<8x8xf32> -> vector<8x8xf32>
    %c28_471 = arith.constant 28 : index
    %c0_472 = arith.constant 0 : index
    %c0_473 = arith.constant 0 : index
    %752 = vector.load %arg3[%c28_471, %c0_472, %c0_473] : memref<48x1x8xf32, #tpu.memory_space<vmem>>, vector<1x1x8xf32>
    %753 = vector.shape_cast %752 : vector<1x1x8xf32> to vector<1x8xf32>
    %754 = vector.broadcast %753 : vector<1x8xf32> to vector<8x8xf32>
    %755 = arith.addf %751, %754 : vector<8x8xf32>
    %c32 = arith.constant 32 : index
    %c0_474 = arith.constant 0 : index
    %c0_475 = arith.constant 0 : index
    %756 = vector.load %arg2[%c32, %c0_474, %c0_475] : memref<48x32x8xf32, #tpu.memory_space<vmem>>, vector<1x32x8xf32>
    %757 = vector.shape_cast %756 : vector<1x32x8xf32> to vector<32x8xf32>
    %cst_476 = arith.constant dense<0.000000e+00> : vector<8x8xf32>
    %758 = tpu.matmul %719, %757, %cst_476 {dimension_numbers = #tpu.dot_dimension_numbers<[1], [0], [0], [1], [0, 0, 1, 1], [], []>} : vector<8x32xf32>, vector<32x8xf32>, vector<8x8xf32> -> vector<8x8xf32>
    %c32_477 = arith.constant 32 : index
    %c0_478 = arith.constant 0 : index
    %c0_479 = arith.constant 0 : index
    %759 = vector.load %arg3[%c32_477, %c0_478, %c0_479] : memref<48x1x8xf32, #tpu.memory_space<vmem>>, vector<1x1x8xf32>
    %760 = vector.shape_cast %759 : vector<1x1x8xf32> to vector<1x8xf32>
    %761 = vector.broadcast %760 : vector<1x8xf32> to vector<8x8xf32>
    %762 = arith.addf %758, %761 : vector<8x8xf32>
    %763 = vector.extract_strided_slice %727 {offsets = [0, 0], sizes = [8, 8], strides = [1, 1]} : vector<16x8xf32> to vector<8x8xf32>
    "tpu.trace_start"() <{level = 10 : i32, message = "td,sd->ts"}> : () -> ()
    %cst_480 = arith.constant dense<0.000000e+00> : vector<8x8xf32>
    %764 = tpu.matmul %763, %755, %cst_480 {dimension_numbers = #tpu.dot_dimension_numbers<[1], [1], [0], [0], [0, 0, 1, 0], [], []>} : vector<8x8xf32>, vector<8x8xf32>, vector<8x8xf32> -> vector<8x8xf32>
    "tpu.trace_stop"() : () -> ()
    %cst_481 = arith.constant dense<0xFF800000> : vector<8xf32>
    %765 = vector.multi_reduction <maximumf>, %764, %cst_481 [1] : vector<8x8xf32> to vector<8xf32>
    %766 = vector.shape_cast %765 : vector<8xf32> to vector<8x1xf32>
    %767 = vector.broadcast %766 : vector<8x1xf32> to vector<8x8xf32>
    %768 = arith.subf %764, %767 : vector<8x8xf32>
    %769 = math.exp %768 : vector<8x8xf32>
    %cst_482 = arith.constant dense<0.000000e+00> : vector<8xf32>
    %770 = vector.multi_reduction <add>, %769, %cst_482 [1] : vector<8x8xf32> to vector<8xf32>
    %771 = vector.shape_cast %770 : vector<8xf32> to vector<8x1xf32>
    %772 = tpu.reciprocal %771 {approx = true} : vector<8x1xf32> -> vector<8x1xf32>
    %773 = arith.mulf %771, %772 : vector<8x1xf32>
    %cst_483 = arith.constant 2.000000e+00 : f32
    %774 = vector.broadcast %cst_483 : f32 to vector<8x1xf32>
    %775 = arith.subf %774, %773 : vector<8x1xf32>
    %776 = arith.mulf %772, %775 : vector<8x1xf32>
    %777 = vector.broadcast %776 : vector<8x1xf32> to vector<8x8xf32>
    %778 = arith.mulf %769, %777 : vector<8x8xf32>
    %cst_484 = arith.constant dense<0.000000e+00> : vector<8x8xf32>
    %779 = tpu.matmul %778, %762, %cst_484 {dimension_numbers = #tpu.dot_dimension_numbers<[1], [0], [0], [1], [0, 0, 1, 1], [], []>} : vector<8x8xf32>, vector<8x8xf32>, vector<8x8xf32> -> vector<8x8xf32>
    %c8_485 = arith.constant 8 : index
    %c0_486 = arith.constant 0 : index
    %c0_487 = arith.constant 0 : index
    %780 = vector.load %arg4[%c8_485, %c0_486, %c0_487] : memref<16x8x32xf32, #tpu.memory_space<vmem>>, vector<1x8x32xf32>
    %781 = vector.shape_cast %780 : vector<1x8x32xf32> to vector<8x32xf32>
    %cst_488 = arith.constant dense<0.000000e+00> : vector<8x32xf32>
    %782 = tpu.matmul %779, %781, %cst_488 {dimension_numbers = #tpu.dot_dimension_numbers<[1], [0], [0], [1], [0, 0, 1, 1], [], []>} : vector<8x8xf32>, vector<8x32xf32>, vector<8x32xf32> -> vector<8x32xf32>
    %c29 = arith.constant 29 : index
    %c0_489 = arith.constant 0 : index
    %c0_490 = arith.constant 0 : index
    %783 = vector.load %arg2[%c29, %c0_489, %c0_490] : memref<48x32x8xf32, #tpu.memory_space<vmem>>, vector<1x32x8xf32>
    %784 = vector.shape_cast %783 : vector<1x32x8xf32> to vector<32x8xf32>
    %cst_491 = arith.constant dense<0.000000e+00> : vector<8x8xf32>
    %785 = tpu.matmul %719, %784, %cst_491 {dimension_numbers = #tpu.dot_dimension_numbers<[1], [0], [0], [1], [0, 0, 1, 1], [], []>} : vector<8x32xf32>, vector<32x8xf32>, vector<8x8xf32> -> vector<8x8xf32>
    %c29_492 = arith.constant 29 : index
    %c0_493 = arith.constant 0 : index
    %c0_494 = arith.constant 0 : index
    %786 = vector.load %arg3[%c29_492, %c0_493, %c0_494] : memref<48x1x8xf32, #tpu.memory_space<vmem>>, vector<1x1x8xf32>
    %787 = vector.shape_cast %786 : vector<1x1x8xf32> to vector<1x8xf32>
    %788 = vector.broadcast %787 : vector<1x8xf32> to vector<8x8xf32>
    %789 = arith.addf %785, %788 : vector<8x8xf32>
    %c33 = arith.constant 33 : index
    %c0_495 = arith.constant 0 : index
    %c0_496 = arith.constant 0 : index
    %790 = vector.load %arg2[%c33, %c0_495, %c0_496] : memref<48x32x8xf32, #tpu.memory_space<vmem>>, vector<1x32x8xf32>
    %791 = vector.shape_cast %790 : vector<1x32x8xf32> to vector<32x8xf32>
    %cst_497 = arith.constant dense<0.000000e+00> : vector<8x8xf32>
    %792 = tpu.matmul %719, %791, %cst_497 {dimension_numbers = #tpu.dot_dimension_numbers<[1], [0], [0], [1], [0, 0, 1, 1], [], []>} : vector<8x32xf32>, vector<32x8xf32>, vector<8x8xf32> -> vector<8x8xf32>
    %c33_498 = arith.constant 33 : index
    %c0_499 = arith.constant 0 : index
    %c0_500 = arith.constant 0 : index
    %793 = vector.load %arg3[%c33_498, %c0_499, %c0_500] : memref<48x1x8xf32, #tpu.memory_space<vmem>>, vector<1x1x8xf32>
    %794 = vector.shape_cast %793 : vector<1x1x8xf32> to vector<1x8xf32>
    %795 = vector.broadcast %794 : vector<1x8xf32> to vector<8x8xf32>
    %796 = arith.addf %792, %795 : vector<8x8xf32>
    %797 = vector.extract_strided_slice %734 {offsets = [0, 0], sizes = [8, 8], strides = [1, 1]} : vector<16x8xf32> to vector<8x8xf32>
    "tpu.trace_start"() <{level = 10 : i32, message = "td,sd->ts"}> : () -> ()
    %cst_501 = arith.constant dense<0.000000e+00> : vector<8x8xf32>
    %798 = tpu.matmul %797, %789, %cst_501 {dimension_numbers = #tpu.dot_dimension_numbers<[1], [1], [0], [0], [0, 0, 1, 0], [], []>} : vector<8x8xf32>, vector<8x8xf32>, vector<8x8xf32> -> vector<8x8xf32>
    "tpu.trace_stop"() : () -> ()
    %cst_502 = arith.constant dense<0xFF800000> : vector<8xf32>
    %799 = vector.multi_reduction <maximumf>, %798, %cst_502 [1] : vector<8x8xf32> to vector<8xf32>
    %800 = vector.shape_cast %799 : vector<8xf32> to vector<8x1xf32>
    %801 = vector.broadcast %800 : vector<8x1xf32> to vector<8x8xf32>
    %802 = arith.subf %798, %801 : vector<8x8xf32>
    %803 = math.exp %802 : vector<8x8xf32>
    %cst_503 = arith.constant dense<0.000000e+00> : vector<8xf32>
    %804 = vector.multi_reduction <add>, %803, %cst_503 [1] : vector<8x8xf32> to vector<8xf32>
    %805 = vector.shape_cast %804 : vector<8xf32> to vector<8x1xf32>
    %806 = tpu.reciprocal %805 {approx = true} : vector<8x1xf32> -> vector<8x1xf32>
    %807 = arith.mulf %805, %806 : vector<8x1xf32>
    %cst_504 = arith.constant 2.000000e+00 : f32
    %808 = vector.broadcast %cst_504 : f32 to vector<8x1xf32>
    %809 = arith.subf %808, %807 : vector<8x1xf32>
    %810 = arith.mulf %806, %809 : vector<8x1xf32>
    %811 = vector.broadcast %810 : vector<8x1xf32> to vector<8x8xf32>
    %812 = arith.mulf %803, %811 : vector<8x8xf32>
    %cst_505 = arith.constant dense<0.000000e+00> : vector<8x8xf32>
    %813 = tpu.matmul %812, %796, %cst_505 {dimension_numbers = #tpu.dot_dimension_numbers<[1], [0], [0], [1], [0, 0, 1, 1], [], []>} : vector<8x8xf32>, vector<8x8xf32>, vector<8x8xf32> -> vector<8x8xf32>
    %c9_506 = arith.constant 9 : index
    %c0_507 = arith.constant 0 : index
    %c0_508 = arith.constant 0 : index
    %814 = vector.load %arg4[%c9_506, %c0_507, %c0_508] : memref<16x8x32xf32, #tpu.memory_space<vmem>>, vector<1x8x32xf32>
    %815 = vector.shape_cast %814 : vector<1x8x32xf32> to vector<8x32xf32>
    %cst_509 = arith.constant dense<0.000000e+00> : vector<8x32xf32>
    %816 = tpu.matmul %813, %815, %cst_509 {dimension_numbers = #tpu.dot_dimension_numbers<[1], [0], [0], [1], [0, 0, 1, 1], [], []>} : vector<8x8xf32>, vector<8x32xf32>, vector<8x32xf32> -> vector<8x32xf32>
    %817 = arith.addf %782, %816 : vector<8x32xf32>
    %c30 = arith.constant 30 : index
    %c0_510 = arith.constant 0 : index
    %c0_511 = arith.constant 0 : index
    %818 = vector.load %arg2[%c30, %c0_510, %c0_511] : memref<48x32x8xf32, #tpu.memory_space<vmem>>, vector<1x32x8xf32>
    %819 = vector.shape_cast %818 : vector<1x32x8xf32> to vector<32x8xf32>
    %cst_512 = arith.constant dense<0.000000e+00> : vector<8x8xf32>
    %820 = tpu.matmul %719, %819, %cst_512 {dimension_numbers = #tpu.dot_dimension_numbers<[1], [0], [0], [1], [0, 0, 1, 1], [], []>} : vector<8x32xf32>, vector<32x8xf32>, vector<8x8xf32> -> vector<8x8xf32>
    %c30_513 = arith.constant 30 : index
    %c0_514 = arith.constant 0 : index
    %c0_515 = arith.constant 0 : index
    %821 = vector.load %arg3[%c30_513, %c0_514, %c0_515] : memref<48x1x8xf32, #tpu.memory_space<vmem>>, vector<1x1x8xf32>
    %822 = vector.shape_cast %821 : vector<1x1x8xf32> to vector<1x8xf32>
    %823 = vector.broadcast %822 : vector<1x8xf32> to vector<8x8xf32>
    %824 = arith.addf %820, %823 : vector<8x8xf32>
    %c34 = arith.constant 34 : index
    %c0_516 = arith.constant 0 : index
    %c0_517 = arith.constant 0 : index
    %825 = vector.load %arg2[%c34, %c0_516, %c0_517] : memref<48x32x8xf32, #tpu.memory_space<vmem>>, vector<1x32x8xf32>
    %826 = vector.shape_cast %825 : vector<1x32x8xf32> to vector<32x8xf32>
    %cst_518 = arith.constant dense<0.000000e+00> : vector<8x8xf32>
    %827 = tpu.matmul %719, %826, %cst_518 {dimension_numbers = #tpu.dot_dimension_numbers<[1], [0], [0], [1], [0, 0, 1, 1], [], []>} : vector<8x32xf32>, vector<32x8xf32>, vector<8x8xf32> -> vector<8x8xf32>
    %c34_519 = arith.constant 34 : index
    %c0_520 = arith.constant 0 : index
    %c0_521 = arith.constant 0 : index
    %828 = vector.load %arg3[%c34_519, %c0_520, %c0_521] : memref<48x1x8xf32, #tpu.memory_space<vmem>>, vector<1x1x8xf32>
    %829 = vector.shape_cast %828 : vector<1x1x8xf32> to vector<1x8xf32>
    %830 = vector.broadcast %829 : vector<1x8xf32> to vector<8x8xf32>
    %831 = arith.addf %827, %830 : vector<8x8xf32>
    %832 = vector.extract_strided_slice %741 {offsets = [0, 0], sizes = [8, 8], strides = [1, 1]} : vector<16x8xf32> to vector<8x8xf32>
    "tpu.trace_start"() <{level = 10 : i32, message = "td,sd->ts"}> : () -> ()
    %cst_522 = arith.constant dense<0.000000e+00> : vector<8x8xf32>
    %833 = tpu.matmul %832, %824, %cst_522 {dimension_numbers = #tpu.dot_dimension_numbers<[1], [1], [0], [0], [0, 0, 1, 0], [], []>} : vector<8x8xf32>, vector<8x8xf32>, vector<8x8xf32> -> vector<8x8xf32>
    "tpu.trace_stop"() : () -> ()
    %cst_523 = arith.constant dense<0xFF800000> : vector<8xf32>
    %834 = vector.multi_reduction <maximumf>, %833, %cst_523 [1] : vector<8x8xf32> to vector<8xf32>
    %835 = vector.shape_cast %834 : vector<8xf32> to vector<8x1xf32>
    %836 = vector.broadcast %835 : vector<8x1xf32> to vector<8x8xf32>
    %837 = arith.subf %833, %836 : vector<8x8xf32>
    %838 = math.exp %837 : vector<8x8xf32>
    %cst_524 = arith.constant dense<0.000000e+00> : vector<8xf32>
    %839 = vector.multi_reduction <add>, %838, %cst_524 [1] : vector<8x8xf32> to vector<8xf32>
    %840 = vector.shape_cast %839 : vector<8xf32> to vector<8x1xf32>
    %841 = tpu.reciprocal %840 {approx = true} : vector<8x1xf32> -> vector<8x1xf32>
    %842 = arith.mulf %840, %841 : vector<8x1xf32>
    %cst_525 = arith.constant 2.000000e+00 : f32
    %843 = vector.broadcast %cst_525 : f32 to vector<8x1xf32>
    %844 = arith.subf %843, %842 : vector<8x1xf32>
    %845 = arith.mulf %841, %844 : vector<8x1xf32>
    %846 = vector.broadcast %845 : vector<8x1xf32> to vector<8x8xf32>
    %847 = arith.mulf %838, %846 : vector<8x8xf32>
    %cst_526 = arith.constant dense<0.000000e+00> : vector<8x8xf32>
    %848 = tpu.matmul %847, %831, %cst_526 {dimension_numbers = #tpu.dot_dimension_numbers<[1], [0], [0], [1], [0, 0, 1, 1], [], []>} : vector<8x8xf32>, vector<8x8xf32>, vector<8x8xf32> -> vector<8x8xf32>
    %c10_527 = arith.constant 10 : index
    %c0_528 = arith.constant 0 : index
    %c0_529 = arith.constant 0 : index
    %849 = vector.load %arg4[%c10_527, %c0_528, %c0_529] : memref<16x8x32xf32, #tpu.memory_space<vmem>>, vector<1x8x32xf32>
    %850 = vector.shape_cast %849 : vector<1x8x32xf32> to vector<8x32xf32>
    %cst_530 = arith.constant dense<0.000000e+00> : vector<8x32xf32>
    %851 = tpu.matmul %848, %850, %cst_530 {dimension_numbers = #tpu.dot_dimension_numbers<[1], [0], [0], [1], [0, 0, 1, 1], [], []>} : vector<8x8xf32>, vector<8x32xf32>, vector<8x32xf32> -> vector<8x32xf32>
    %852 = arith.addf %817, %851 : vector<8x32xf32>
    %c31 = arith.constant 31 : index
    %c0_531 = arith.constant 0 : index
    %c0_532 = arith.constant 0 : index
    %853 = vector.load %arg2[%c31, %c0_531, %c0_532] : memref<48x32x8xf32, #tpu.memory_space<vmem>>, vector<1x32x8xf32>
    %854 = vector.shape_cast %853 : vector<1x32x8xf32> to vector<32x8xf32>
    %cst_533 = arith.constant dense<0.000000e+00> : vector<8x8xf32>
    %855 = tpu.matmul %719, %854, %cst_533 {dimension_numbers = #tpu.dot_dimension_numbers<[1], [0], [0], [1], [0, 0, 1, 1], [], []>} : vector<8x32xf32>, vector<32x8xf32>, vector<8x8xf32> -> vector<8x8xf32>
    %c31_534 = arith.constant 31 : index
    %c0_535 = arith.constant 0 : index
    %c0_536 = arith.constant 0 : index
    %856 = vector.load %arg3[%c31_534, %c0_535, %c0_536] : memref<48x1x8xf32, #tpu.memory_space<vmem>>, vector<1x1x8xf32>
    %857 = vector.shape_cast %856 : vector<1x1x8xf32> to vector<1x8xf32>
    %858 = vector.broadcast %857 : vector<1x8xf32> to vector<8x8xf32>
    %859 = arith.addf %855, %858 : vector<8x8xf32>
    %c35 = arith.constant 35 : index
    %c0_537 = arith.constant 0 : index
    %c0_538 = arith.constant 0 : index
    %860 = vector.load %arg2[%c35, %c0_537, %c0_538] : memref<48x32x8xf32, #tpu.memory_space<vmem>>, vector<1x32x8xf32>
    %861 = vector.shape_cast %860 : vector<1x32x8xf32> to vector<32x8xf32>
    %cst_539 = arith.constant dense<0.000000e+00> : vector<8x8xf32>
    %862 = tpu.matmul %719, %861, %cst_539 {dimension_numbers = #tpu.dot_dimension_numbers<[1], [0], [0], [1], [0, 0, 1, 1], [], []>} : vector<8x32xf32>, vector<32x8xf32>, vector<8x8xf32> -> vector<8x8xf32>
    %c35_540 = arith.constant 35 : index
    %c0_541 = arith.constant 0 : index
    %c0_542 = arith.constant 0 : index
    %863 = vector.load %arg3[%c35_540, %c0_541, %c0_542] : memref<48x1x8xf32, #tpu.memory_space<vmem>>, vector<1x1x8xf32>
    %864 = vector.shape_cast %863 : vector<1x1x8xf32> to vector<1x8xf32>
    %865 = vector.broadcast %864 : vector<1x8xf32> to vector<8x8xf32>
    %866 = arith.addf %862, %865 : vector<8x8xf32>
    %867 = vector.extract_strided_slice %748 {offsets = [0, 0], sizes = [8, 8], strides = [1, 1]} : vector<16x8xf32> to vector<8x8xf32>
    "tpu.trace_start"() <{level = 10 : i32, message = "td,sd->ts"}> : () -> ()
    %cst_543 = arith.constant dense<0.000000e+00> : vector<8x8xf32>
    %868 = tpu.matmul %867, %859, %cst_543 {dimension_numbers = #tpu.dot_dimension_numbers<[1], [1], [0], [0], [0, 0, 1, 0], [], []>} : vector<8x8xf32>, vector<8x8xf32>, vector<8x8xf32> -> vector<8x8xf32>
    "tpu.trace_stop"() : () -> ()
    %cst_544 = arith.constant dense<0xFF800000> : vector<8xf32>
    %869 = vector.multi_reduction <maximumf>, %868, %cst_544 [1] : vector<8x8xf32> to vector<8xf32>
    %870 = vector.shape_cast %869 : vector<8xf32> to vector<8x1xf32>
    %871 = vector.broadcast %870 : vector<8x1xf32> to vector<8x8xf32>
    %872 = arith.subf %868, %871 : vector<8x8xf32>
    %873 = math.exp %872 : vector<8x8xf32>
    %cst_545 = arith.constant dense<0.000000e+00> : vector<8xf32>
    %874 = vector.multi_reduction <add>, %873, %cst_545 [1] : vector<8x8xf32> to vector<8xf32>
    %875 = vector.shape_cast %874 : vector<8xf32> to vector<8x1xf32>
    %876 = tpu.reciprocal %875 {approx = true} : vector<8x1xf32> -> vector<8x1xf32>
    %877 = arith.mulf %875, %876 : vector<8x1xf32>
    %cst_546 = arith.constant 2.000000e+00 : f32
    %878 = vector.broadcast %cst_546 : f32 to vector<8x1xf32>
    %879 = arith.subf %878, %877 : vector<8x1xf32>
    %880 = arith.mulf %876, %879 : vector<8x1xf32>
    %881 = vector.broadcast %880 : vector<8x1xf32> to vector<8x8xf32>
    %882 = arith.mulf %873, %881 : vector<8x8xf32>
    %cst_547 = arith.constant dense<0.000000e+00> : vector<8x8xf32>
    %883 = tpu.matmul %882, %866, %cst_547 {dimension_numbers = #tpu.dot_dimension_numbers<[1], [0], [0], [1], [0, 0, 1, 1], [], []>} : vector<8x8xf32>, vector<8x8xf32>, vector<8x8xf32> -> vector<8x8xf32>
    %c11_548 = arith.constant 11 : index
    %c0_549 = arith.constant 0 : index
    %c0_550 = arith.constant 0 : index
    %884 = vector.load %arg4[%c11_548, %c0_549, %c0_550] : memref<16x8x32xf32, #tpu.memory_space<vmem>>, vector<1x8x32xf32>
    %885 = vector.shape_cast %884 : vector<1x8x32xf32> to vector<8x32xf32>
    %cst_551 = arith.constant dense<0.000000e+00> : vector<8x32xf32>
    %886 = tpu.matmul %883, %885, %cst_551 {dimension_numbers = #tpu.dot_dimension_numbers<[1], [0], [0], [1], [0, 0, 1, 1], [], []>} : vector<8x8xf32>, vector<8x32xf32>, vector<8x32xf32> -> vector<8x32xf32>
    %887 = arith.addf %852, %886 : vector<8x32xf32>
    %c28_552 = arith.constant 28 : index
    %c0_553 = arith.constant 0 : index
    %c0_554 = arith.constant 0 : index
    %888 = vector.load %arg2[%c28_552, %c0_553, %c0_554] : memref<48x32x8xf32, #tpu.memory_space<vmem>>, vector<1x32x8xf32>
    %889 = vector.shape_cast %888 : vector<1x32x8xf32> to vector<32x8xf32>
    %cst_555 = arith.constant dense<0.000000e+00> : vector<8x8xf32>
    %890 = tpu.matmul %720, %889, %cst_555 {dimension_numbers = #tpu.dot_dimension_numbers<[1], [0], [0], [1], [0, 0, 1, 1], [], []>} : vector<8x32xf32>, vector<32x8xf32>, vector<8x8xf32> -> vector<8x8xf32>
    %c28_556 = arith.constant 28 : index
    %c0_557 = arith.constant 0 : index
    %c0_558 = arith.constant 0 : index
    %891 = vector.load %arg3[%c28_556, %c0_557, %c0_558] : memref<48x1x8xf32, #tpu.memory_space<vmem>>, vector<1x1x8xf32>
    %892 = vector.shape_cast %891 : vector<1x1x8xf32> to vector<1x8xf32>
    %893 = vector.broadcast %892 : vector<1x8xf32> to vector<8x8xf32>
    %894 = arith.addf %890, %893 : vector<8x8xf32>
    %c32_559 = arith.constant 32 : index
    %c0_560 = arith.constant 0 : index
    %c0_561 = arith.constant 0 : index
    %895 = vector.load %arg2[%c32_559, %c0_560, %c0_561] : memref<48x32x8xf32, #tpu.memory_space<vmem>>, vector<1x32x8xf32>
    %896 = vector.shape_cast %895 : vector<1x32x8xf32> to vector<32x8xf32>
    %cst_562 = arith.constant dense<0.000000e+00> : vector<8x8xf32>
    %897 = tpu.matmul %720, %896, %cst_562 {dimension_numbers = #tpu.dot_dimension_numbers<[1], [0], [0], [1], [0, 0, 1, 1], [], []>} : vector<8x32xf32>, vector<32x8xf32>, vector<8x8xf32> -> vector<8x8xf32>
    %c32_563 = arith.constant 32 : index
    %c0_564 = arith.constant 0 : index
    %c0_565 = arith.constant 0 : index
    %898 = vector.load %arg3[%c32_563, %c0_564, %c0_565] : memref<48x1x8xf32, #tpu.memory_space<vmem>>, vector<1x1x8xf32>
    %899 = vector.shape_cast %898 : vector<1x1x8xf32> to vector<1x8xf32>
    %900 = vector.broadcast %899 : vector<1x8xf32> to vector<8x8xf32>
    %901 = arith.addf %897, %900 : vector<8x8xf32>
    %902 = vector.extract_strided_slice %727 {offsets = [8, 0], sizes = [8, 8], strides = [1, 1]} : vector<16x8xf32> to vector<8x8xf32>
    "tpu.trace_start"() <{level = 10 : i32, message = "td,sd->ts"}> : () -> ()
    %cst_566 = arith.constant dense<0.000000e+00> : vector<8x8xf32>
    %903 = tpu.matmul %902, %894, %cst_566 {dimension_numbers = #tpu.dot_dimension_numbers<[1], [1], [0], [0], [0, 0, 1, 0], [], []>} : vector<8x8xf32>, vector<8x8xf32>, vector<8x8xf32> -> vector<8x8xf32>
    "tpu.trace_stop"() : () -> ()
    %cst_567 = arith.constant dense<0xFF800000> : vector<8xf32>
    %904 = vector.multi_reduction <maximumf>, %903, %cst_567 [1] : vector<8x8xf32> to vector<8xf32>
    %905 = vector.shape_cast %904 : vector<8xf32> to vector<8x1xf32>
    %906 = vector.broadcast %905 : vector<8x1xf32> to vector<8x8xf32>
    %907 = arith.subf %903, %906 : vector<8x8xf32>
    %908 = math.exp %907 : vector<8x8xf32>
    %cst_568 = arith.constant dense<0.000000e+00> : vector<8xf32>
    %909 = vector.multi_reduction <add>, %908, %cst_568 [1] : vector<8x8xf32> to vector<8xf32>
    %910 = vector.shape_cast %909 : vector<8xf32> to vector<8x1xf32>
    %911 = tpu.reciprocal %910 {approx = true} : vector<8x1xf32> -> vector<8x1xf32>
    %912 = arith.mulf %910, %911 : vector<8x1xf32>
    %cst_569 = arith.constant 2.000000e+00 : f32
    %913 = vector.broadcast %cst_569 : f32 to vector<8x1xf32>
    %914 = arith.subf %913, %912 : vector<8x1xf32>
    %915 = arith.mulf %911, %914 : vector<8x1xf32>
    %916 = vector.broadcast %915 : vector<8x1xf32> to vector<8x8xf32>
    %917 = arith.mulf %908, %916 : vector<8x8xf32>
    %cst_570 = arith.constant dense<0.000000e+00> : vector<8x8xf32>
    %918 = tpu.matmul %917, %901, %cst_570 {dimension_numbers = #tpu.dot_dimension_numbers<[1], [0], [0], [1], [0, 0, 1, 1], [], []>} : vector<8x8xf32>, vector<8x8xf32>, vector<8x8xf32> -> vector<8x8xf32>
    %c8_571 = arith.constant 8 : index
    %c0_572 = arith.constant 0 : index
    %c0_573 = arith.constant 0 : index
    %919 = vector.load %arg4[%c8_571, %c0_572, %c0_573] : memref<16x8x32xf32, #tpu.memory_space<vmem>>, vector<1x8x32xf32>
    %920 = vector.shape_cast %919 : vector<1x8x32xf32> to vector<8x32xf32>
    %cst_574 = arith.constant dense<0.000000e+00> : vector<8x32xf32>
    %921 = tpu.matmul %918, %920, %cst_574 {dimension_numbers = #tpu.dot_dimension_numbers<[1], [0], [0], [1], [0, 0, 1, 1], [], []>} : vector<8x8xf32>, vector<8x32xf32>, vector<8x32xf32> -> vector<8x32xf32>
    %c29_575 = arith.constant 29 : index
    %c0_576 = arith.constant 0 : index
    %c0_577 = arith.constant 0 : index
    %922 = vector.load %arg2[%c29_575, %c0_576, %c0_577] : memref<48x32x8xf32, #tpu.memory_space<vmem>>, vector<1x32x8xf32>
    %923 = vector.shape_cast %922 : vector<1x32x8xf32> to vector<32x8xf32>
    %cst_578 = arith.constant dense<0.000000e+00> : vector<8x8xf32>
    %924 = tpu.matmul %720, %923, %cst_578 {dimension_numbers = #tpu.dot_dimension_numbers<[1], [0], [0], [1], [0, 0, 1, 1], [], []>} : vector<8x32xf32>, vector<32x8xf32>, vector<8x8xf32> -> vector<8x8xf32>
    %c29_579 = arith.constant 29 : index
    %c0_580 = arith.constant 0 : index
    %c0_581 = arith.constant 0 : index
    %925 = vector.load %arg3[%c29_579, %c0_580, %c0_581] : memref<48x1x8xf32, #tpu.memory_space<vmem>>, vector<1x1x8xf32>
    %926 = vector.shape_cast %925 : vector<1x1x8xf32> to vector<1x8xf32>
    %927 = vector.broadcast %926 : vector<1x8xf32> to vector<8x8xf32>
    %928 = arith.addf %924, %927 : vector<8x8xf32>
    %c33_582 = arith.constant 33 : index
    %c0_583 = arith.constant 0 : index
    %c0_584 = arith.constant 0 : index
    %929 = vector.load %arg2[%c33_582, %c0_583, %c0_584] : memref<48x32x8xf32, #tpu.memory_space<vmem>>, vector<1x32x8xf32>
    %930 = vector.shape_cast %929 : vector<1x32x8xf32> to vector<32x8xf32>
    %cst_585 = arith.constant dense<0.000000e+00> : vector<8x8xf32>
    %931 = tpu.matmul %720, %930, %cst_585 {dimension_numbers = #tpu.dot_dimension_numbers<[1], [0], [0], [1], [0, 0, 1, 1], [], []>} : vector<8x32xf32>, vector<32x8xf32>, vector<8x8xf32> -> vector<8x8xf32>
    %c33_586 = arith.constant 33 : index
    %c0_587 = arith.constant 0 : index
    %c0_588 = arith.constant 0 : index
    %932 = vector.load %arg3[%c33_586, %c0_587, %c0_588] : memref<48x1x8xf32, #tpu.memory_space<vmem>>, vector<1x1x8xf32>
    %933 = vector.shape_cast %932 : vector<1x1x8xf32> to vector<1x8xf32>
    %934 = vector.broadcast %933 : vector<1x8xf32> to vector<8x8xf32>
    %935 = arith.addf %931, %934 : vector<8x8xf32>
    %936 = vector.extract_strided_slice %734 {offsets = [8, 0], sizes = [8, 8], strides = [1, 1]} : vector<16x8xf32> to vector<8x8xf32>
    "tpu.trace_start"() <{level = 10 : i32, message = "td,sd->ts"}> : () -> ()
    %cst_589 = arith.constant dense<0.000000e+00> : vector<8x8xf32>
    %937 = tpu.matmul %936, %928, %cst_589 {dimension_numbers = #tpu.dot_dimension_numbers<[1], [1], [0], [0], [0, 0, 1, 0], [], []>} : vector<8x8xf32>, vector<8x8xf32>, vector<8x8xf32> -> vector<8x8xf32>
    "tpu.trace_stop"() : () -> ()
    %cst_590 = arith.constant dense<0xFF800000> : vector<8xf32>
    %938 = vector.multi_reduction <maximumf>, %937, %cst_590 [1] : vector<8x8xf32> to vector<8xf32>
    %939 = vector.shape_cast %938 : vector<8xf32> to vector<8x1xf32>
    %940 = vector.broadcast %939 : vector<8x1xf32> to vector<8x8xf32>
    %941 = arith.subf %937, %940 : vector<8x8xf32>
    %942 = math.exp %941 : vector<8x8xf32>
    %cst_591 = arith.constant dense<0.000000e+00> : vector<8xf32>
    %943 = vector.multi_reduction <add>, %942, %cst_591 [1] : vector<8x8xf32> to vector<8xf32>
    %944 = vector.shape_cast %943 : vector<8xf32> to vector<8x1xf32>
    %945 = tpu.reciprocal %944 {approx = true} : vector<8x1xf32> -> vector<8x1xf32>
    %946 = arith.mulf %944, %945 : vector<8x1xf32>
    %cst_592 = arith.constant 2.000000e+00 : f32
    %947 = vector.broadcast %cst_592 : f32 to vector<8x1xf32>
    %948 = arith.subf %947, %946 : vector<8x1xf32>
    %949 = arith.mulf %945, %948 : vector<8x1xf32>
    %950 = vector.broadcast %949 : vector<8x1xf32> to vector<8x8xf32>
    %951 = arith.mulf %942, %950 : vector<8x8xf32>
    %cst_593 = arith.constant dense<0.000000e+00> : vector<8x8xf32>
    %952 = tpu.matmul %951, %935, %cst_593 {dimension_numbers = #tpu.dot_dimension_numbers<[1], [0], [0], [1], [0, 0, 1, 1], [], []>} : vector<8x8xf32>, vector<8x8xf32>, vector<8x8xf32> -> vector<8x8xf32>
    %c9_594 = arith.constant 9 : index
    %c0_595 = arith.constant 0 : index
    %c0_596 = arith.constant 0 : index
    %953 = vector.load %arg4[%c9_594, %c0_595, %c0_596] : memref<16x8x32xf32, #tpu.memory_space<vmem>>, vector<1x8x32xf32>
    %954 = vector.shape_cast %953 : vector<1x8x32xf32> to vector<8x32xf32>
    %cst_597 = arith.constant dense<0.000000e+00> : vector<8x32xf32>
    %955 = tpu.matmul %952, %954, %cst_597 {dimension_numbers = #tpu.dot_dimension_numbers<[1], [0], [0], [1], [0, 0, 1, 1], [], []>} : vector<8x8xf32>, vector<8x32xf32>, vector<8x32xf32> -> vector<8x32xf32>
    %956 = arith.addf %921, %955 : vector<8x32xf32>
    %c30_598 = arith.constant 30 : index
    %c0_599 = arith.constant 0 : index
    %c0_600 = arith.constant 0 : index
    %957 = vector.load %arg2[%c30_598, %c0_599, %c0_600] : memref<48x32x8xf32, #tpu.memory_space<vmem>>, vector<1x32x8xf32>
    %958 = vector.shape_cast %957 : vector<1x32x8xf32> to vector<32x8xf32>
    %cst_601 = arith.constant dense<0.000000e+00> : vector<8x8xf32>
    %959 = tpu.matmul %720, %958, %cst_601 {dimension_numbers = #tpu.dot_dimension_numbers<[1], [0], [0], [1], [0, 0, 1, 1], [], []>} : vector<8x32xf32>, vector<32x8xf32>, vector<8x8xf32> -> vector<8x8xf32>
    %c30_602 = arith.constant 30 : index
    %c0_603 = arith.constant 0 : index
    %c0_604 = arith.constant 0 : index
    %960 = vector.load %arg3[%c30_602, %c0_603, %c0_604] : memref<48x1x8xf32, #tpu.memory_space<vmem>>, vector<1x1x8xf32>
    %961 = vector.shape_cast %960 : vector<1x1x8xf32> to vector<1x8xf32>
    %962 = vector.broadcast %961 : vector<1x8xf32> to vector<8x8xf32>
    %963 = arith.addf %959, %962 : vector<8x8xf32>
    %c34_605 = arith.constant 34 : index
    %c0_606 = arith.constant 0 : index
    %c0_607 = arith.constant 0 : index
    %964 = vector.load %arg2[%c34_605, %c0_606, %c0_607] : memref<48x32x8xf32, #tpu.memory_space<vmem>>, vector<1x32x8xf32>
    %965 = vector.shape_cast %964 : vector<1x32x8xf32> to vector<32x8xf32>
    %cst_608 = arith.constant dense<0.000000e+00> : vector<8x8xf32>
    %966 = tpu.matmul %720, %965, %cst_608 {dimension_numbers = #tpu.dot_dimension_numbers<[1], [0], [0], [1], [0, 0, 1, 1], [], []>} : vector<8x32xf32>, vector<32x8xf32>, vector<8x8xf32> -> vector<8x8xf32>
    %c34_609 = arith.constant 34 : index
    %c0_610 = arith.constant 0 : index
    %c0_611 = arith.constant 0 : index
    %967 = vector.load %arg3[%c34_609, %c0_610, %c0_611] : memref<48x1x8xf32, #tpu.memory_space<vmem>>, vector<1x1x8xf32>
    %968 = vector.shape_cast %967 : vector<1x1x8xf32> to vector<1x8xf32>
    %969 = vector.broadcast %968 : vector<1x8xf32> to vector<8x8xf32>
    %970 = arith.addf %966, %969 : vector<8x8xf32>
    %971 = vector.extract_strided_slice %741 {offsets = [8, 0], sizes = [8, 8], strides = [1, 1]} : vector<16x8xf32> to vector<8x8xf32>
    "tpu.trace_start"() <{level = 10 : i32, message = "td,sd->ts"}> : () -> ()
    %cst_612 = arith.constant dense<0.000000e+00> : vector<8x8xf32>
    %972 = tpu.matmul %971, %963, %cst_612 {dimension_numbers = #tpu.dot_dimension_numbers<[1], [1], [0], [0], [0, 0, 1, 0], [], []>} : vector<8x8xf32>, vector<8x8xf32>, vector<8x8xf32> -> vector<8x8xf32>
    "tpu.trace_stop"() : () -> ()
    %cst_613 = arith.constant dense<0xFF800000> : vector<8xf32>
    %973 = vector.multi_reduction <maximumf>, %972, %cst_613 [1] : vector<8x8xf32> to vector<8xf32>
    %974 = vector.shape_cast %973 : vector<8xf32> to vector<8x1xf32>
    %975 = vector.broadcast %974 : vector<8x1xf32> to vector<8x8xf32>
    %976 = arith.subf %972, %975 : vector<8x8xf32>
    %977 = math.exp %976 : vector<8x8xf32>
    %cst_614 = arith.constant dense<0.000000e+00> : vector<8xf32>
    %978 = vector.multi_reduction <add>, %977, %cst_614 [1] : vector<8x8xf32> to vector<8xf32>
    %979 = vector.shape_cast %978 : vector<8xf32> to vector<8x1xf32>
    %980 = tpu.reciprocal %979 {approx = true} : vector<8x1xf32> -> vector<8x1xf32>
    %981 = arith.mulf %979, %980 : vector<8x1xf32>
    %cst_615 = arith.constant 2.000000e+00 : f32
    %982 = vector.broadcast %cst_615 : f32 to vector<8x1xf32>
    %983 = arith.subf %982, %981 : vector<8x1xf32>
    %984 = arith.mulf %980, %983 : vector<8x1xf32>
    %985 = vector.broadcast %984 : vector<8x1xf32> to vector<8x8xf32>
    %986 = arith.mulf %977, %985 : vector<8x8xf32>
    %cst_616 = arith.constant dense<0.000000e+00> : vector<8x8xf32>
    %987 = tpu.matmul %986, %970, %cst_616 {dimension_numbers = #tpu.dot_dimension_numbers<[1], [0], [0], [1], [0, 0, 1, 1], [], []>} : vector<8x8xf32>, vector<8x8xf32>, vector<8x8xf32> -> vector<8x8xf32>
    %c10_617 = arith.constant 10 : index
    %c0_618 = arith.constant 0 : index
    %c0_619 = arith.constant 0 : index
    %988 = vector.load %arg4[%c10_617, %c0_618, %c0_619] : memref<16x8x32xf32, #tpu.memory_space<vmem>>, vector<1x8x32xf32>
    %989 = vector.shape_cast %988 : vector<1x8x32xf32> to vector<8x32xf32>
    %cst_620 = arith.constant dense<0.000000e+00> : vector<8x32xf32>
    %990 = tpu.matmul %987, %989, %cst_620 {dimension_numbers = #tpu.dot_dimension_numbers<[1], [0], [0], [1], [0, 0, 1, 1], [], []>} : vector<8x8xf32>, vector<8x32xf32>, vector<8x32xf32> -> vector<8x32xf32>
    %991 = arith.addf %956, %990 : vector<8x32xf32>
    %c31_621 = arith.constant 31 : index
    %c0_622 = arith.constant 0 : index
    %c0_623 = arith.constant 0 : index
    %992 = vector.load %arg2[%c31_621, %c0_622, %c0_623] : memref<48x32x8xf32, #tpu.memory_space<vmem>>, vector<1x32x8xf32>
    %993 = vector.shape_cast %992 : vector<1x32x8xf32> to vector<32x8xf32>
    %cst_624 = arith.constant dense<0.000000e+00> : vector<8x8xf32>
    %994 = tpu.matmul %720, %993, %cst_624 {dimension_numbers = #tpu.dot_dimension_numbers<[1], [0], [0], [1], [0, 0, 1, 1], [], []>} : vector<8x32xf32>, vector<32x8xf32>, vector<8x8xf32> -> vector<8x8xf32>
    %c31_625 = arith.constant 31 : index
    %c0_626 = arith.constant 0 : index
    %c0_627 = arith.constant 0 : index
    %995 = vector.load %arg3[%c31_625, %c0_626, %c0_627] : memref<48x1x8xf32, #tpu.memory_space<vmem>>, vector<1x1x8xf32>
    %996 = vector.shape_cast %995 : vector<1x1x8xf32> to vector<1x8xf32>
    %997 = vector.broadcast %996 : vector<1x8xf32> to vector<8x8xf32>
    %998 = arith.addf %994, %997 : vector<8x8xf32>
    %c35_628 = arith.constant 35 : index
    %c0_629 = arith.constant 0 : index
    %c0_630 = arith.constant 0 : index
    %999 = vector.load %arg2[%c35_628, %c0_629, %c0_630] : memref<48x32x8xf32, #tpu.memory_space<vmem>>, vector<1x32x8xf32>
    %1000 = vector.shape_cast %999 : vector<1x32x8xf32> to vector<32x8xf32>
    %cst_631 = arith.constant dense<0.000000e+00> : vector<8x8xf32>
    %1001 = tpu.matmul %720, %1000, %cst_631 {dimension_numbers = #tpu.dot_dimension_numbers<[1], [0], [0], [1], [0, 0, 1, 1], [], []>} : vector<8x32xf32>, vector<32x8xf32>, vector<8x8xf32> -> vector<8x8xf32>
    %c35_632 = arith.constant 35 : index
    %c0_633 = arith.constant 0 : index
    %c0_634 = arith.constant 0 : index
    %1002 = vector.load %arg3[%c35_632, %c0_633, %c0_634] : memref<48x1x8xf32, #tpu.memory_space<vmem>>, vector<1x1x8xf32>
    %1003 = vector.shape_cast %1002 : vector<1x1x8xf32> to vector<1x8xf32>
    %1004 = vector.broadcast %1003 : vector<1x8xf32> to vector<8x8xf32>
    %1005 = arith.addf %1001, %1004 : vector<8x8xf32>
    %1006 = vector.extract_strided_slice %748 {offsets = [8, 0], sizes = [8, 8], strides = [1, 1]} : vector<16x8xf32> to vector<8x8xf32>
    "tpu.trace_start"() <{level = 10 : i32, message = "td,sd->ts"}> : () -> ()
    %cst_635 = arith.constant dense<0.000000e+00> : vector<8x8xf32>
    %1007 = tpu.matmul %1006, %998, %cst_635 {dimension_numbers = #tpu.dot_dimension_numbers<[1], [1], [0], [0], [0, 0, 1, 0], [], []>} : vector<8x8xf32>, vector<8x8xf32>, vector<8x8xf32> -> vector<8x8xf32>
    "tpu.trace_stop"() : () -> ()
    %cst_636 = arith.constant dense<0xFF800000> : vector<8xf32>
    %1008 = vector.multi_reduction <maximumf>, %1007, %cst_636 [1] : vector<8x8xf32> to vector<8xf32>
    %1009 = vector.shape_cast %1008 : vector<8xf32> to vector<8x1xf32>
    %1010 = vector.broadcast %1009 : vector<8x1xf32> to vector<8x8xf32>
    %1011 = arith.subf %1007, %1010 : vector<8x8xf32>
    %1012 = math.exp %1011 : vector<8x8xf32>
    %cst_637 = arith.constant dense<0.000000e+00> : vector<8xf32>
    %1013 = vector.multi_reduction <add>, %1012, %cst_637 [1] : vector<8x8xf32> to vector<8xf32>
    %1014 = vector.shape_cast %1013 : vector<8xf32> to vector<8x1xf32>
    %1015 = tpu.reciprocal %1014 {approx = true} : vector<8x1xf32> -> vector<8x1xf32>
    %1016 = arith.mulf %1014, %1015 : vector<8x1xf32>
    %cst_638 = arith.constant 2.000000e+00 : f32
    %1017 = vector.broadcast %cst_638 : f32 to vector<8x1xf32>
    %1018 = arith.subf %1017, %1016 : vector<8x1xf32>
    %1019 = arith.mulf %1015, %1018 : vector<8x1xf32>
    %1020 = vector.broadcast %1019 : vector<8x1xf32> to vector<8x8xf32>
    %1021 = arith.mulf %1012, %1020 : vector<8x8xf32>
    %cst_639 = arith.constant dense<0.000000e+00> : vector<8x8xf32>
    %1022 = tpu.matmul %1021, %1005, %cst_639 {dimension_numbers = #tpu.dot_dimension_numbers<[1], [0], [0], [1], [0, 0, 1, 1], [], []>} : vector<8x8xf32>, vector<8x8xf32>, vector<8x8xf32> -> vector<8x8xf32>
    %c11_640 = arith.constant 11 : index
    %c0_641 = arith.constant 0 : index
    %c0_642 = arith.constant 0 : index
    %1023 = vector.load %arg4[%c11_640, %c0_641, %c0_642] : memref<16x8x32xf32, #tpu.memory_space<vmem>>, vector<1x8x32xf32>
    %1024 = vector.shape_cast %1023 : vector<1x8x32xf32> to vector<8x32xf32>
    %cst_643 = arith.constant dense<0.000000e+00> : vector<8x32xf32>
    %1025 = tpu.matmul %1022, %1024, %cst_643 {dimension_numbers = #tpu.dot_dimension_numbers<[1], [0], [0], [1], [0, 0, 1, 1], [], []>} : vector<8x8xf32>, vector<8x32xf32>, vector<8x32xf32> -> vector<8x32xf32>
    %1026 = arith.addf %991, %1025 : vector<8x32xf32>
    %1027 = tpu.concatenate %887, %1026 in 0 : vector<8x32xf32>, vector<8x32xf32> -> vector<16x32xf32>
    %1028 = vector.extract_strided_slice %718 {offsets = [0, 0], sizes = [1, 32], strides = [1, 1]} : vector<9x32xf32> to vector<1x32xf32>
    %1029 = vector.broadcast %1028 : vector<1x32xf32> to vector<16x32xf32>
    %1030 = arith.addf %1027, %1029 : vector<16x32xf32>
    %1031 = arith.addf %716, %1030 : vector<16x32xf32>
    %1032 = vector.extract_strided_slice %718 {offsets = [3, 0], sizes = [1, 32], strides = [1, 1]} : vector<9x32xf32> to vector<1x32xf32>
    %1033 = vector.extract_strided_slice %718 {offsets = [4, 0], sizes = [1, 32], strides = [1, 1]} : vector<9x32xf32> to vector<1x32xf32>
    %cst_644 = arith.constant dense<0.000000e+00> : vector<16xf32>
    %1034 = vector.multi_reduction <add>, %1031, %cst_644 [1] : vector<16x32xf32> to vector<16xf32>
    %1035 = vector.shape_cast %1034 : vector<16xf32> to vector<16x1xf32>
    %cst_645 = arith.constant 3.200000e+01 : f32
    %1036 = vector.broadcast %cst_645 : f32 to vector<16x1xf32>
    %1037 = arith.divf %1035, %1036 : vector<16x1xf32>
    %1038 = vector.broadcast %1037 : vector<16x1xf32> to vector<16x32xf32>
    %1039 = arith.subf %1031, %1038 : vector<16x32xf32>
    %1040 = arith.mulf %1039, %1039 : vector<16x32xf32>
    %cst_646 = arith.constant dense<0.000000e+00> : vector<16xf32>
    %1041 = vector.multi_reduction <add>, %1040, %cst_646 [1] : vector<16x32xf32> to vector<16xf32>
    %1042 = vector.shape_cast %1041 : vector<16xf32> to vector<16x1xf32>
    %cst_647 = arith.constant 3.200000e+01 : f32
    %1043 = vector.broadcast %cst_647 : f32 to vector<16x1xf32>
    %1044 = arith.divf %1042, %1043 : vector<16x1xf32>
    %cst_648 = arith.constant 9.99999974E-6 : f32
    %1045 = vector.broadcast %cst_648 : f32 to vector<16x1xf32>
    %1046 = arith.addf %1044, %1045 : vector<16x1xf32>
    %1047 = math.rsqrt %1046 : vector<16x1xf32>
    %1048 = vector.broadcast %1047 : vector<16x1xf32> to vector<16x32xf32>
    %1049 = arith.mulf %1039, %1048 : vector<16x32xf32>
    %1050 = vector.broadcast %1032 : vector<1x32xf32> to vector<16x32xf32>
    %1051 = arith.mulf %1049, %1050 : vector<16x32xf32>
    %1052 = vector.broadcast %1033 : vector<1x32xf32> to vector<16x32xf32>
    %1053 = arith.addf %1051, %1052 : vector<16x32xf32>
    %c36 = arith.constant 36 : index
    %c0_649 = arith.constant 0 : index
    %c0_650 = arith.constant 0 : index
    %1054 = vector.load %arg2[%c36, %c0_649, %c0_650] : memref<48x32x8xf32, #tpu.memory_space<vmem>>, vector<1x32x8xf32>
    %1055 = vector.shape_cast %1054 : vector<1x32x8xf32> to vector<32x8xf32>
    %cst_651 = arith.constant dense<0.000000e+00> : vector<16x8xf32>
    %1056 = tpu.matmul %1053, %1055, %cst_651 {dimension_numbers = #tpu.dot_dimension_numbers<[1], [0], [0], [1], [0, 0, 1, 1], [], []>} : vector<16x32xf32>, vector<32x8xf32>, vector<16x8xf32> -> vector<16x8xf32>
    %c36_652 = arith.constant 36 : index
    %c0_653 = arith.constant 0 : index
    %c0_654 = arith.constant 0 : index
    %1057 = vector.load %arg3[%c36_652, %c0_653, %c0_654] : memref<48x1x8xf32, #tpu.memory_space<vmem>>, vector<1x1x8xf32>
    %1058 = vector.shape_cast %1057 : vector<1x1x8xf32> to vector<1x8xf32>
    %1059 = vector.broadcast %1058 : vector<1x8xf32> to vector<16x8xf32>
    %1060 = arith.addf %1056, %1059 : vector<16x8xf32>
    %c37 = arith.constant 37 : index
    %c0_655 = arith.constant 0 : index
    %c0_656 = arith.constant 0 : index
    %1061 = vector.load %arg2[%c37, %c0_655, %c0_656] : memref<48x32x8xf32, #tpu.memory_space<vmem>>, vector<1x32x8xf32>
    %1062 = vector.shape_cast %1061 : vector<1x32x8xf32> to vector<32x8xf32>
    %cst_657 = arith.constant dense<0.000000e+00> : vector<16x8xf32>
    %1063 = tpu.matmul %1053, %1062, %cst_657 {dimension_numbers = #tpu.dot_dimension_numbers<[1], [0], [0], [1], [0, 0, 1, 1], [], []>} : vector<16x32xf32>, vector<32x8xf32>, vector<16x8xf32> -> vector<16x8xf32>
    %c37_658 = arith.constant 37 : index
    %c0_659 = arith.constant 0 : index
    %c0_660 = arith.constant 0 : index
    %1064 = vector.load %arg3[%c37_658, %c0_659, %c0_660] : memref<48x1x8xf32, #tpu.memory_space<vmem>>, vector<1x1x8xf32>
    %1065 = vector.shape_cast %1064 : vector<1x1x8xf32> to vector<1x8xf32>
    %1066 = vector.broadcast %1065 : vector<1x8xf32> to vector<16x8xf32>
    %1067 = arith.addf %1063, %1066 : vector<16x8xf32>
    %c38 = arith.constant 38 : index
    %c0_661 = arith.constant 0 : index
    %c0_662 = arith.constant 0 : index
    %1068 = vector.load %arg2[%c38, %c0_661, %c0_662] : memref<48x32x8xf32, #tpu.memory_space<vmem>>, vector<1x32x8xf32>
    %1069 = vector.shape_cast %1068 : vector<1x32x8xf32> to vector<32x8xf32>
    %cst_663 = arith.constant dense<0.000000e+00> : vector<16x8xf32>
    %1070 = tpu.matmul %1053, %1069, %cst_663 {dimension_numbers = #tpu.dot_dimension_numbers<[1], [0], [0], [1], [0, 0, 1, 1], [], []>} : vector<16x32xf32>, vector<32x8xf32>, vector<16x8xf32> -> vector<16x8xf32>
    %c38_664 = arith.constant 38 : index
    %c0_665 = arith.constant 0 : index
    %c0_666 = arith.constant 0 : index
    %1071 = vector.load %arg3[%c38_664, %c0_665, %c0_666] : memref<48x1x8xf32, #tpu.memory_space<vmem>>, vector<1x1x8xf32>
    %1072 = vector.shape_cast %1071 : vector<1x1x8xf32> to vector<1x8xf32>
    %1073 = vector.broadcast %1072 : vector<1x8xf32> to vector<16x8xf32>
    %1074 = arith.addf %1070, %1073 : vector<16x8xf32>
    %c39 = arith.constant 39 : index
    %c0_667 = arith.constant 0 : index
    %c0_668 = arith.constant 0 : index
    %1075 = vector.load %arg2[%c39, %c0_667, %c0_668] : memref<48x32x8xf32, #tpu.memory_space<vmem>>, vector<1x32x8xf32>
    %1076 = vector.shape_cast %1075 : vector<1x32x8xf32> to vector<32x8xf32>
    %cst_669 = arith.constant dense<0.000000e+00> : vector<16x8xf32>
    %1077 = tpu.matmul %1053, %1076, %cst_669 {dimension_numbers = #tpu.dot_dimension_numbers<[1], [0], [0], [1], [0, 0, 1, 1], [], []>} : vector<16x32xf32>, vector<32x8xf32>, vector<16x8xf32> -> vector<16x8xf32>
    %c39_670 = arith.constant 39 : index
    %c0_671 = arith.constant 0 : index
    %c0_672 = arith.constant 0 : index
    %1078 = vector.load %arg3[%c39_670, %c0_671, %c0_672] : memref<48x1x8xf32, #tpu.memory_space<vmem>>, vector<1x1x8xf32>
    %1079 = vector.shape_cast %1078 : vector<1x1x8xf32> to vector<1x8xf32>
    %1080 = vector.broadcast %1079 : vector<1x8xf32> to vector<16x8xf32>
    %1081 = arith.addf %1077, %1080 : vector<16x8xf32>
    %c40 = arith.constant 40 : index
    %c0_673 = arith.constant 0 : index
    %c0_674 = arith.constant 0 : index
    %1082 = vector.load %arg2[%c40, %c0_673, %c0_674] : memref<48x32x8xf32, #tpu.memory_space<vmem>>, vector<1x32x8xf32>
    %1083 = vector.shape_cast %1082 : vector<1x32x8xf32> to vector<32x8xf32>
    %cst_675 = arith.constant dense<0.000000e+00> : vector<10x8xf32>
    %1084 = tpu.matmul %6, %1083, %cst_675 {dimension_numbers = #tpu.dot_dimension_numbers<[1], [0], [0], [1], [0, 0, 1, 1], [], []>} : vector<10x32xf32>, vector<32x8xf32>, vector<10x8xf32> -> vector<10x8xf32>
    %c40_676 = arith.constant 40 : index
    %c0_677 = arith.constant 0 : index
    %c0_678 = arith.constant 0 : index
    %1085 = vector.load %arg3[%c40_676, %c0_677, %c0_678] : memref<48x1x8xf32, #tpu.memory_space<vmem>>, vector<1x1x8xf32>
    %1086 = vector.shape_cast %1085 : vector<1x1x8xf32> to vector<1x8xf32>
    %1087 = vector.broadcast %1086 : vector<1x8xf32> to vector<10x8xf32>
    %1088 = arith.addf %1084, %1087 : vector<10x8xf32>
    %c44 = arith.constant 44 : index
    %c0_679 = arith.constant 0 : index
    %c0_680 = arith.constant 0 : index
    %1089 = vector.load %arg2[%c44, %c0_679, %c0_680] : memref<48x32x8xf32, #tpu.memory_space<vmem>>, vector<1x32x8xf32>
    %1090 = vector.shape_cast %1089 : vector<1x32x8xf32> to vector<32x8xf32>
    %cst_681 = arith.constant dense<0.000000e+00> : vector<10x8xf32>
    %1091 = tpu.matmul %6, %1090, %cst_681 {dimension_numbers = #tpu.dot_dimension_numbers<[1], [0], [0], [1], [0, 0, 1, 1], [], []>} : vector<10x32xf32>, vector<32x8xf32>, vector<10x8xf32> -> vector<10x8xf32>
    %c44_682 = arith.constant 44 : index
    %c0_683 = arith.constant 0 : index
    %c0_684 = arith.constant 0 : index
    %1092 = vector.load %arg3[%c44_682, %c0_683, %c0_684] : memref<48x1x8xf32, #tpu.memory_space<vmem>>, vector<1x1x8xf32>
    %1093 = vector.shape_cast %1092 : vector<1x1x8xf32> to vector<1x8xf32>
    %1094 = vector.broadcast %1093 : vector<1x8xf32> to vector<10x8xf32>
    %1095 = arith.addf %1091, %1094 : vector<10x8xf32>
    %1096 = vector.extract_strided_slice %1060 {offsets = [0, 0], sizes = [8, 8], strides = [1, 1]} : vector<16x8xf32> to vector<8x8xf32>
    "tpu.trace_start"() <{level = 10 : i32, message = "td,sd->ts"}> : () -> ()
    %cst_685 = arith.constant dense<0.000000e+00> : vector<8x10xf32>
    %1097 = tpu.matmul %1096, %1088, %cst_685 {dimension_numbers = #tpu.dot_dimension_numbers<[1], [1], [0], [0], [0, 0, 1, 0], [], []>} : vector<8x8xf32>, vector<10x8xf32>, vector<8x10xf32> -> vector<8x10xf32>
    "tpu.trace_stop"() : () -> ()
    %cst_686 = arith.constant dense<0xFF800000> : vector<8xf32>
    %1098 = vector.multi_reduction <maximumf>, %1097, %cst_686 [1] : vector<8x10xf32> to vector<8xf32>
    %1099 = vector.shape_cast %1098 : vector<8xf32> to vector<8x1xf32>
    %1100 = vector.broadcast %1099 : vector<8x1xf32> to vector<8x10xf32>
    %1101 = arith.subf %1097, %1100 : vector<8x10xf32>
    %1102 = math.exp %1101 : vector<8x10xf32>
    %cst_687 = arith.constant dense<0.000000e+00> : vector<8xf32>
    %1103 = vector.multi_reduction <add>, %1102, %cst_687 [1] : vector<8x10xf32> to vector<8xf32>
    %1104 = vector.shape_cast %1103 : vector<8xf32> to vector<8x1xf32>
    %1105 = tpu.reciprocal %1104 {approx = true} : vector<8x1xf32> -> vector<8x1xf32>
    %1106 = arith.mulf %1104, %1105 : vector<8x1xf32>
    %cst_688 = arith.constant 2.000000e+00 : f32
    %1107 = vector.broadcast %cst_688 : f32 to vector<8x1xf32>
    %1108 = arith.subf %1107, %1106 : vector<8x1xf32>
    %1109 = arith.mulf %1105, %1108 : vector<8x1xf32>
    %1110 = vector.broadcast %1109 : vector<8x1xf32> to vector<8x10xf32>
    %1111 = arith.mulf %1102, %1110 : vector<8x10xf32>
    %cst_689 = arith.constant dense<0.000000e+00> : vector<8x8xf32>
    %1112 = tpu.matmul %1111, %1095, %cst_689 {dimension_numbers = #tpu.dot_dimension_numbers<[1], [0], [0], [1], [0, 0, 1, 1], [], []>} : vector<8x10xf32>, vector<10x8xf32>, vector<8x8xf32> -> vector<8x8xf32>
    %c12_690 = arith.constant 12 : index
    %c0_691 = arith.constant 0 : index
    %c0_692 = arith.constant 0 : index
    %1113 = vector.load %arg4[%c12_690, %c0_691, %c0_692] : memref<16x8x32xf32, #tpu.memory_space<vmem>>, vector<1x8x32xf32>
    %1114 = vector.shape_cast %1113 : vector<1x8x32xf32> to vector<8x32xf32>
    %cst_693 = arith.constant dense<0.000000e+00> : vector<8x32xf32>
    %1115 = tpu.matmul %1112, %1114, %cst_693 {dimension_numbers = #tpu.dot_dimension_numbers<[1], [0], [0], [1], [0, 0, 1, 1], [], []>} : vector<8x8xf32>, vector<8x32xf32>, vector<8x32xf32> -> vector<8x32xf32>
    %c41 = arith.constant 41 : index
    %c0_694 = arith.constant 0 : index
    %c0_695 = arith.constant 0 : index
    %1116 = vector.load %arg2[%c41, %c0_694, %c0_695] : memref<48x32x8xf32, #tpu.memory_space<vmem>>, vector<1x32x8xf32>
    %1117 = vector.shape_cast %1116 : vector<1x32x8xf32> to vector<32x8xf32>
    %cst_696 = arith.constant dense<0.000000e+00> : vector<10x8xf32>
    %1118 = tpu.matmul %6, %1117, %cst_696 {dimension_numbers = #tpu.dot_dimension_numbers<[1], [0], [0], [1], [0, 0, 1, 1], [], []>} : vector<10x32xf32>, vector<32x8xf32>, vector<10x8xf32> -> vector<10x8xf32>
    %c41_697 = arith.constant 41 : index
    %c0_698 = arith.constant 0 : index
    %c0_699 = arith.constant 0 : index
    %1119 = vector.load %arg3[%c41_697, %c0_698, %c0_699] : memref<48x1x8xf32, #tpu.memory_space<vmem>>, vector<1x1x8xf32>
    %1120 = vector.shape_cast %1119 : vector<1x1x8xf32> to vector<1x8xf32>
    %1121 = vector.broadcast %1120 : vector<1x8xf32> to vector<10x8xf32>
    %1122 = arith.addf %1118, %1121 : vector<10x8xf32>
    %c45 = arith.constant 45 : index
    %c0_700 = arith.constant 0 : index
    %c0_701 = arith.constant 0 : index
    %1123 = vector.load %arg2[%c45, %c0_700, %c0_701] : memref<48x32x8xf32, #tpu.memory_space<vmem>>, vector<1x32x8xf32>
    %1124 = vector.shape_cast %1123 : vector<1x32x8xf32> to vector<32x8xf32>
    %cst_702 = arith.constant dense<0.000000e+00> : vector<10x8xf32>
    %1125 = tpu.matmul %6, %1124, %cst_702 {dimension_numbers = #tpu.dot_dimension_numbers<[1], [0], [0], [1], [0, 0, 1, 1], [], []>} : vector<10x32xf32>, vector<32x8xf32>, vector<10x8xf32> -> vector<10x8xf32>
    %c45_703 = arith.constant 45 : index
    %c0_704 = arith.constant 0 : index
    %c0_705 = arith.constant 0 : index
    %1126 = vector.load %arg3[%c45_703, %c0_704, %c0_705] : memref<48x1x8xf32, #tpu.memory_space<vmem>>, vector<1x1x8xf32>
    %1127 = vector.shape_cast %1126 : vector<1x1x8xf32> to vector<1x8xf32>
    %1128 = vector.broadcast %1127 : vector<1x8xf32> to vector<10x8xf32>
    %1129 = arith.addf %1125, %1128 : vector<10x8xf32>
    %1130 = vector.extract_strided_slice %1067 {offsets = [0, 0], sizes = [8, 8], strides = [1, 1]} : vector<16x8xf32> to vector<8x8xf32>
    "tpu.trace_start"() <{level = 10 : i32, message = "td,sd->ts"}> : () -> ()
    %cst_706 = arith.constant dense<0.000000e+00> : vector<8x10xf32>
    %1131 = tpu.matmul %1130, %1122, %cst_706 {dimension_numbers = #tpu.dot_dimension_numbers<[1], [1], [0], [0], [0, 0, 1, 0], [], []>} : vector<8x8xf32>, vector<10x8xf32>, vector<8x10xf32> -> vector<8x10xf32>
    "tpu.trace_stop"() : () -> ()
    %cst_707 = arith.constant dense<0xFF800000> : vector<8xf32>
    %1132 = vector.multi_reduction <maximumf>, %1131, %cst_707 [1] : vector<8x10xf32> to vector<8xf32>
    %1133 = vector.shape_cast %1132 : vector<8xf32> to vector<8x1xf32>
    %1134 = vector.broadcast %1133 : vector<8x1xf32> to vector<8x10xf32>
    %1135 = arith.subf %1131, %1134 : vector<8x10xf32>
    %1136 = math.exp %1135 : vector<8x10xf32>
    %cst_708 = arith.constant dense<0.000000e+00> : vector<8xf32>
    %1137 = vector.multi_reduction <add>, %1136, %cst_708 [1] : vector<8x10xf32> to vector<8xf32>
    %1138 = vector.shape_cast %1137 : vector<8xf32> to vector<8x1xf32>
    %1139 = tpu.reciprocal %1138 {approx = true} : vector<8x1xf32> -> vector<8x1xf32>
    %1140 = arith.mulf %1138, %1139 : vector<8x1xf32>
    %cst_709 = arith.constant 2.000000e+00 : f32
    %1141 = vector.broadcast %cst_709 : f32 to vector<8x1xf32>
    %1142 = arith.subf %1141, %1140 : vector<8x1xf32>
    %1143 = arith.mulf %1139, %1142 : vector<8x1xf32>
    %1144 = vector.broadcast %1143 : vector<8x1xf32> to vector<8x10xf32>
    %1145 = arith.mulf %1136, %1144 : vector<8x10xf32>
    %cst_710 = arith.constant dense<0.000000e+00> : vector<8x8xf32>
    %1146 = tpu.matmul %1145, %1129, %cst_710 {dimension_numbers = #tpu.dot_dimension_numbers<[1], [0], [0], [1], [0, 0, 1, 1], [], []>} : vector<8x10xf32>, vector<10x8xf32>, vector<8x8xf32> -> vector<8x8xf32>
    %c13_711 = arith.constant 13 : index
    %c0_712 = arith.constant 0 : index
    %c0_713 = arith.constant 0 : index
    %1147 = vector.load %arg4[%c13_711, %c0_712, %c0_713] : memref<16x8x32xf32, #tpu.memory_space<vmem>>, vector<1x8x32xf32>
    %1148 = vector.shape_cast %1147 : vector<1x8x32xf32> to vector<8x32xf32>
    %cst_714 = arith.constant dense<0.000000e+00> : vector<8x32xf32>
    %1149 = tpu.matmul %1146, %1148, %cst_714 {dimension_numbers = #tpu.dot_dimension_numbers<[1], [0], [0], [1], [0, 0, 1, 1], [], []>} : vector<8x8xf32>, vector<8x32xf32>, vector<8x32xf32> -> vector<8x32xf32>
    %1150 = arith.addf %1115, %1149 : vector<8x32xf32>
    %c42 = arith.constant 42 : index
    %c0_715 = arith.constant 0 : index
    %c0_716 = arith.constant 0 : index
    %1151 = vector.load %arg2[%c42, %c0_715, %c0_716] : memref<48x32x8xf32, #tpu.memory_space<vmem>>, vector<1x32x8xf32>
    %1152 = vector.shape_cast %1151 : vector<1x32x8xf32> to vector<32x8xf32>
    %cst_717 = arith.constant dense<0.000000e+00> : vector<10x8xf32>
    %1153 = tpu.matmul %6, %1152, %cst_717 {dimension_numbers = #tpu.dot_dimension_numbers<[1], [0], [0], [1], [0, 0, 1, 1], [], []>} : vector<10x32xf32>, vector<32x8xf32>, vector<10x8xf32> -> vector<10x8xf32>
    %c42_718 = arith.constant 42 : index
    %c0_719 = arith.constant 0 : index
    %c0_720 = arith.constant 0 : index
    %1154 = vector.load %arg3[%c42_718, %c0_719, %c0_720] : memref<48x1x8xf32, #tpu.memory_space<vmem>>, vector<1x1x8xf32>
    %1155 = vector.shape_cast %1154 : vector<1x1x8xf32> to vector<1x8xf32>
    %1156 = vector.broadcast %1155 : vector<1x8xf32> to vector<10x8xf32>
    %1157 = arith.addf %1153, %1156 : vector<10x8xf32>
    %c46 = arith.constant 46 : index
    %c0_721 = arith.constant 0 : index
    %c0_722 = arith.constant 0 : index
    %1158 = vector.load %arg2[%c46, %c0_721, %c0_722] : memref<48x32x8xf32, #tpu.memory_space<vmem>>, vector<1x32x8xf32>
    %1159 = vector.shape_cast %1158 : vector<1x32x8xf32> to vector<32x8xf32>
    %cst_723 = arith.constant dense<0.000000e+00> : vector<10x8xf32>
    %1160 = tpu.matmul %6, %1159, %cst_723 {dimension_numbers = #tpu.dot_dimension_numbers<[1], [0], [0], [1], [0, 0, 1, 1], [], []>} : vector<10x32xf32>, vector<32x8xf32>, vector<10x8xf32> -> vector<10x8xf32>
    %c46_724 = arith.constant 46 : index
    %c0_725 = arith.constant 0 : index
    %c0_726 = arith.constant 0 : index
    %1161 = vector.load %arg3[%c46_724, %c0_725, %c0_726] : memref<48x1x8xf32, #tpu.memory_space<vmem>>, vector<1x1x8xf32>
    %1162 = vector.shape_cast %1161 : vector<1x1x8xf32> to vector<1x8xf32>
    %1163 = vector.broadcast %1162 : vector<1x8xf32> to vector<10x8xf32>
    %1164 = arith.addf %1160, %1163 : vector<10x8xf32>
    %1165 = vector.extract_strided_slice %1074 {offsets = [0, 0], sizes = [8, 8], strides = [1, 1]} : vector<16x8xf32> to vector<8x8xf32>
    "tpu.trace_start"() <{level = 10 : i32, message = "td,sd->ts"}> : () -> ()
    %cst_727 = arith.constant dense<0.000000e+00> : vector<8x10xf32>
    %1166 = tpu.matmul %1165, %1157, %cst_727 {dimension_numbers = #tpu.dot_dimension_numbers<[1], [1], [0], [0], [0, 0, 1, 0], [], []>} : vector<8x8xf32>, vector<10x8xf32>, vector<8x10xf32> -> vector<8x10xf32>
    "tpu.trace_stop"() : () -> ()
    %cst_728 = arith.constant dense<0xFF800000> : vector<8xf32>
    %1167 = vector.multi_reduction <maximumf>, %1166, %cst_728 [1] : vector<8x10xf32> to vector<8xf32>
    %1168 = vector.shape_cast %1167 : vector<8xf32> to vector<8x1xf32>
    %1169 = vector.broadcast %1168 : vector<8x1xf32> to vector<8x10xf32>
    %1170 = arith.subf %1166, %1169 : vector<8x10xf32>
    %1171 = math.exp %1170 : vector<8x10xf32>
    %cst_729 = arith.constant dense<0.000000e+00> : vector<8xf32>
    %1172 = vector.multi_reduction <add>, %1171, %cst_729 [1] : vector<8x10xf32> to vector<8xf32>
    %1173 = vector.shape_cast %1172 : vector<8xf32> to vector<8x1xf32>
    %1174 = tpu.reciprocal %1173 {approx = true} : vector<8x1xf32> -> vector<8x1xf32>
    %1175 = arith.mulf %1173, %1174 : vector<8x1xf32>
    %cst_730 = arith.constant 2.000000e+00 : f32
    %1176 = vector.broadcast %cst_730 : f32 to vector<8x1xf32>
    %1177 = arith.subf %1176, %1175 : vector<8x1xf32>
    %1178 = arith.mulf %1174, %1177 : vector<8x1xf32>
    %1179 = vector.broadcast %1178 : vector<8x1xf32> to vector<8x10xf32>
    %1180 = arith.mulf %1171, %1179 : vector<8x10xf32>
    %cst_731 = arith.constant dense<0.000000e+00> : vector<8x8xf32>
    %1181 = tpu.matmul %1180, %1164, %cst_731 {dimension_numbers = #tpu.dot_dimension_numbers<[1], [0], [0], [1], [0, 0, 1, 1], [], []>} : vector<8x10xf32>, vector<10x8xf32>, vector<8x8xf32> -> vector<8x8xf32>
    %c14_732 = arith.constant 14 : index
    %c0_733 = arith.constant 0 : index
    %c0_734 = arith.constant 0 : index
    %1182 = vector.load %arg4[%c14_732, %c0_733, %c0_734] : memref<16x8x32xf32, #tpu.memory_space<vmem>>, vector<1x8x32xf32>
    %1183 = vector.shape_cast %1182 : vector<1x8x32xf32> to vector<8x32xf32>
    %cst_735 = arith.constant dense<0.000000e+00> : vector<8x32xf32>
    %1184 = tpu.matmul %1181, %1183, %cst_735 {dimension_numbers = #tpu.dot_dimension_numbers<[1], [0], [0], [1], [0, 0, 1, 1], [], []>} : vector<8x8xf32>, vector<8x32xf32>, vector<8x32xf32> -> vector<8x32xf32>
    %1185 = arith.addf %1150, %1184 : vector<8x32xf32>
    %c43 = arith.constant 43 : index
    %c0_736 = arith.constant 0 : index
    %c0_737 = arith.constant 0 : index
    %1186 = vector.load %arg2[%c43, %c0_736, %c0_737] : memref<48x32x8xf32, #tpu.memory_space<vmem>>, vector<1x32x8xf32>
    %1187 = vector.shape_cast %1186 : vector<1x32x8xf32> to vector<32x8xf32>
    %cst_738 = arith.constant dense<0.000000e+00> : vector<10x8xf32>
    %1188 = tpu.matmul %6, %1187, %cst_738 {dimension_numbers = #tpu.dot_dimension_numbers<[1], [0], [0], [1], [0, 0, 1, 1], [], []>} : vector<10x32xf32>, vector<32x8xf32>, vector<10x8xf32> -> vector<10x8xf32>
    %c43_739 = arith.constant 43 : index
    %c0_740 = arith.constant 0 : index
    %c0_741 = arith.constant 0 : index
    %1189 = vector.load %arg3[%c43_739, %c0_740, %c0_741] : memref<48x1x8xf32, #tpu.memory_space<vmem>>, vector<1x1x8xf32>
    %1190 = vector.shape_cast %1189 : vector<1x1x8xf32> to vector<1x8xf32>
    %1191 = vector.broadcast %1190 : vector<1x8xf32> to vector<10x8xf32>
    %1192 = arith.addf %1188, %1191 : vector<10x8xf32>
    %c47 = arith.constant 47 : index
    %c0_742 = arith.constant 0 : index
    %c0_743 = arith.constant 0 : index
    %1193 = vector.load %arg2[%c47, %c0_742, %c0_743] : memref<48x32x8xf32, #tpu.memory_space<vmem>>, vector<1x32x8xf32>
    %1194 = vector.shape_cast %1193 : vector<1x32x8xf32> to vector<32x8xf32>
    %cst_744 = arith.constant dense<0.000000e+00> : vector<10x8xf32>
    %1195 = tpu.matmul %6, %1194, %cst_744 {dimension_numbers = #tpu.dot_dimension_numbers<[1], [0], [0], [1], [0, 0, 1, 1], [], []>} : vector<10x32xf32>, vector<32x8xf32>, vector<10x8xf32> -> vector<10x8xf32>
    %c47_745 = arith.constant 47 : index
    %c0_746 = arith.constant 0 : index
    %c0_747 = arith.constant 0 : index
    %1196 = vector.load %arg3[%c47_745, %c0_746, %c0_747] : memref<48x1x8xf32, #tpu.memory_space<vmem>>, vector<1x1x8xf32>
    %1197 = vector.shape_cast %1196 : vector<1x1x8xf32> to vector<1x8xf32>
    %1198 = vector.broadcast %1197 : vector<1x8xf32> to vector<10x8xf32>
    %1199 = arith.addf %1195, %1198 : vector<10x8xf32>
    %1200 = vector.extract_strided_slice %1081 {offsets = [0, 0], sizes = [8, 8], strides = [1, 1]} : vector<16x8xf32> to vector<8x8xf32>
    "tpu.trace_start"() <{level = 10 : i32, message = "td,sd->ts"}> : () -> ()
    %cst_748 = arith.constant dense<0.000000e+00> : vector<8x10xf32>
    %1201 = tpu.matmul %1200, %1192, %cst_748 {dimension_numbers = #tpu.dot_dimension_numbers<[1], [1], [0], [0], [0, 0, 1, 0], [], []>} : vector<8x8xf32>, vector<10x8xf32>, vector<8x10xf32> -> vector<8x10xf32>
    "tpu.trace_stop"() : () -> ()
    %cst_749 = arith.constant dense<0xFF800000> : vector<8xf32>
    %1202 = vector.multi_reduction <maximumf>, %1201, %cst_749 [1] : vector<8x10xf32> to vector<8xf32>
    %1203 = vector.shape_cast %1202 : vector<8xf32> to vector<8x1xf32>
    %1204 = vector.broadcast %1203 : vector<8x1xf32> to vector<8x10xf32>
    %1205 = arith.subf %1201, %1204 : vector<8x10xf32>
    %1206 = math.exp %1205 : vector<8x10xf32>
    %cst_750 = arith.constant dense<0.000000e+00> : vector<8xf32>
    %1207 = vector.multi_reduction <add>, %1206, %cst_750 [1] : vector<8x10xf32> to vector<8xf32>
    %1208 = vector.shape_cast %1207 : vector<8xf32> to vector<8x1xf32>
    %1209 = tpu.reciprocal %1208 {approx = true} : vector<8x1xf32> -> vector<8x1xf32>
    %1210 = arith.mulf %1208, %1209 : vector<8x1xf32>
    %cst_751 = arith.constant 2.000000e+00 : f32
    %1211 = vector.broadcast %cst_751 : f32 to vector<8x1xf32>
    %1212 = arith.subf %1211, %1210 : vector<8x1xf32>
    %1213 = arith.mulf %1209, %1212 : vector<8x1xf32>
    %1214 = vector.broadcast %1213 : vector<8x1xf32> to vector<8x10xf32>
    %1215 = arith.mulf %1206, %1214 : vector<8x10xf32>
    %cst_752 = arith.constant dense<0.000000e+00> : vector<8x8xf32>
    %1216 = tpu.matmul %1215, %1199, %cst_752 {dimension_numbers = #tpu.dot_dimension_numbers<[1], [0], [0], [1], [0, 0, 1, 1], [], []>} : vector<8x10xf32>, vector<10x8xf32>, vector<8x8xf32> -> vector<8x8xf32>
    %c15_753 = arith.constant 15 : index
    %c0_754 = arith.constant 0 : index
    %c0_755 = arith.constant 0 : index
    %1217 = vector.load %arg4[%c15_753, %c0_754, %c0_755] : memref<16x8x32xf32, #tpu.memory_space<vmem>>, vector<1x8x32xf32>
    %1218 = vector.shape_cast %1217 : vector<1x8x32xf32> to vector<8x32xf32>
    %cst_756 = arith.constant dense<0.000000e+00> : vector<8x32xf32>
    %1219 = tpu.matmul %1216, %1218, %cst_756 {dimension_numbers = #tpu.dot_dimension_numbers<[1], [0], [0], [1], [0, 0, 1, 1], [], []>} : vector<8x8xf32>, vector<8x32xf32>, vector<8x32xf32> -> vector<8x32xf32>
    %1220 = arith.addf %1185, %1219 : vector<8x32xf32>
    %c40_757 = arith.constant 40 : index
    %c0_758 = arith.constant 0 : index
    %c0_759 = arith.constant 0 : index
    %1221 = vector.load %arg2[%c40_757, %c0_758, %c0_759] : memref<48x32x8xf32, #tpu.memory_space<vmem>>, vector<1x32x8xf32>
    %1222 = vector.shape_cast %1221 : vector<1x32x8xf32> to vector<32x8xf32>
    %cst_760 = arith.constant dense<0.000000e+00> : vector<10x8xf32>
    %1223 = tpu.matmul %8, %1222, %cst_760 {dimension_numbers = #tpu.dot_dimension_numbers<[1], [0], [0], [1], [0, 0, 1, 1], [], []>} : vector<10x32xf32>, vector<32x8xf32>, vector<10x8xf32> -> vector<10x8xf32>
    %c40_761 = arith.constant 40 : index
    %c0_762 = arith.constant 0 : index
    %c0_763 = arith.constant 0 : index
    %1224 = vector.load %arg3[%c40_761, %c0_762, %c0_763] : memref<48x1x8xf32, #tpu.memory_space<vmem>>, vector<1x1x8xf32>
    %1225 = vector.shape_cast %1224 : vector<1x1x8xf32> to vector<1x8xf32>
    %1226 = vector.broadcast %1225 : vector<1x8xf32> to vector<10x8xf32>
    %1227 = arith.addf %1223, %1226 : vector<10x8xf32>
    %c44_764 = arith.constant 44 : index
    %c0_765 = arith.constant 0 : index
    %c0_766 = arith.constant 0 : index
    %1228 = vector.load %arg2[%c44_764, %c0_765, %c0_766] : memref<48x32x8xf32, #tpu.memory_space<vmem>>, vector<1x32x8xf32>
    %1229 = vector.shape_cast %1228 : vector<1x32x8xf32> to vector<32x8xf32>
    %cst_767 = arith.constant dense<0.000000e+00> : vector<10x8xf32>
    %1230 = tpu.matmul %8, %1229, %cst_767 {dimension_numbers = #tpu.dot_dimension_numbers<[1], [0], [0], [1], [0, 0, 1, 1], [], []>} : vector<10x32xf32>, vector<32x8xf32>, vector<10x8xf32> -> vector<10x8xf32>
    %c44_768 = arith.constant 44 : index
    %c0_769 = arith.constant 0 : index
    %c0_770 = arith.constant 0 : index
    %1231 = vector.load %arg3[%c44_768, %c0_769, %c0_770] : memref<48x1x8xf32, #tpu.memory_space<vmem>>, vector<1x1x8xf32>
    %1232 = vector.shape_cast %1231 : vector<1x1x8xf32> to vector<1x8xf32>
    %1233 = vector.broadcast %1232 : vector<1x8xf32> to vector<10x8xf32>
    %1234 = arith.addf %1230, %1233 : vector<10x8xf32>
    %1235 = vector.extract_strided_slice %1060 {offsets = [8, 0], sizes = [8, 8], strides = [1, 1]} : vector<16x8xf32> to vector<8x8xf32>
    "tpu.trace_start"() <{level = 10 : i32, message = "td,sd->ts"}> : () -> ()
    %cst_771 = arith.constant dense<0.000000e+00> : vector<8x10xf32>
    %1236 = tpu.matmul %1235, %1227, %cst_771 {dimension_numbers = #tpu.dot_dimension_numbers<[1], [1], [0], [0], [0, 0, 1, 0], [], []>} : vector<8x8xf32>, vector<10x8xf32>, vector<8x10xf32> -> vector<8x10xf32>
    "tpu.trace_stop"() : () -> ()
    %cst_772 = arith.constant dense<0xFF800000> : vector<8xf32>
    %1237 = vector.multi_reduction <maximumf>, %1236, %cst_772 [1] : vector<8x10xf32> to vector<8xf32>
    %1238 = vector.shape_cast %1237 : vector<8xf32> to vector<8x1xf32>
    %1239 = vector.broadcast %1238 : vector<8x1xf32> to vector<8x10xf32>
    %1240 = arith.subf %1236, %1239 : vector<8x10xf32>
    %1241 = math.exp %1240 : vector<8x10xf32>
    %cst_773 = arith.constant dense<0.000000e+00> : vector<8xf32>
    %1242 = vector.multi_reduction <add>, %1241, %cst_773 [1] : vector<8x10xf32> to vector<8xf32>
    %1243 = vector.shape_cast %1242 : vector<8xf32> to vector<8x1xf32>
    %1244 = tpu.reciprocal %1243 {approx = true} : vector<8x1xf32> -> vector<8x1xf32>
    %1245 = arith.mulf %1243, %1244 : vector<8x1xf32>
    %cst_774 = arith.constant 2.000000e+00 : f32
    %1246 = vector.broadcast %cst_774 : f32 to vector<8x1xf32>
    %1247 = arith.subf %1246, %1245 : vector<8x1xf32>
    %1248 = arith.mulf %1244, %1247 : vector<8x1xf32>
    %1249 = vector.broadcast %1248 : vector<8x1xf32> to vector<8x10xf32>
    %1250 = arith.mulf %1241, %1249 : vector<8x10xf32>
    %cst_775 = arith.constant dense<0.000000e+00> : vector<8x8xf32>
    %1251 = tpu.matmul %1250, %1234, %cst_775 {dimension_numbers = #tpu.dot_dimension_numbers<[1], [0], [0], [1], [0, 0, 1, 1], [], []>} : vector<8x10xf32>, vector<10x8xf32>, vector<8x8xf32> -> vector<8x8xf32>
    %c12_776 = arith.constant 12 : index
    %c0_777 = arith.constant 0 : index
    %c0_778 = arith.constant 0 : index
    %1252 = vector.load %arg4[%c12_776, %c0_777, %c0_778] : memref<16x8x32xf32, #tpu.memory_space<vmem>>, vector<1x8x32xf32>
    %1253 = vector.shape_cast %1252 : vector<1x8x32xf32> to vector<8x32xf32>
    %cst_779 = arith.constant dense<0.000000e+00> : vector<8x32xf32>
    %1254 = tpu.matmul %1251, %1253, %cst_779 {dimension_numbers = #tpu.dot_dimension_numbers<[1], [0], [0], [1], [0, 0, 1, 1], [], []>} : vector<8x8xf32>, vector<8x32xf32>, vector<8x32xf32> -> vector<8x32xf32>
    %c41_780 = arith.constant 41 : index
    %c0_781 = arith.constant 0 : index
    %c0_782 = arith.constant 0 : index
    %1255 = vector.load %arg2[%c41_780, %c0_781, %c0_782] : memref<48x32x8xf32, #tpu.memory_space<vmem>>, vector<1x32x8xf32>
    %1256 = vector.shape_cast %1255 : vector<1x32x8xf32> to vector<32x8xf32>
    %cst_783 = arith.constant dense<0.000000e+00> : vector<10x8xf32>
    %1257 = tpu.matmul %8, %1256, %cst_783 {dimension_numbers = #tpu.dot_dimension_numbers<[1], [0], [0], [1], [0, 0, 1, 1], [], []>} : vector<10x32xf32>, vector<32x8xf32>, vector<10x8xf32> -> vector<10x8xf32>
    %c41_784 = arith.constant 41 : index
    %c0_785 = arith.constant 0 : index
    %c0_786 = arith.constant 0 : index
    %1258 = vector.load %arg3[%c41_784, %c0_785, %c0_786] : memref<48x1x8xf32, #tpu.memory_space<vmem>>, vector<1x1x8xf32>
    %1259 = vector.shape_cast %1258 : vector<1x1x8xf32> to vector<1x8xf32>
    %1260 = vector.broadcast %1259 : vector<1x8xf32> to vector<10x8xf32>
    %1261 = arith.addf %1257, %1260 : vector<10x8xf32>
    %c45_787 = arith.constant 45 : index
    %c0_788 = arith.constant 0 : index
    %c0_789 = arith.constant 0 : index
    %1262 = vector.load %arg2[%c45_787, %c0_788, %c0_789] : memref<48x32x8xf32, #tpu.memory_space<vmem>>, vector<1x32x8xf32>
    %1263 = vector.shape_cast %1262 : vector<1x32x8xf32> to vector<32x8xf32>
    %cst_790 = arith.constant dense<0.000000e+00> : vector<10x8xf32>
    %1264 = tpu.matmul %8, %1263, %cst_790 {dimension_numbers = #tpu.dot_dimension_numbers<[1], [0], [0], [1], [0, 0, 1, 1], [], []>} : vector<10x32xf32>, vector<32x8xf32>, vector<10x8xf32> -> vector<10x8xf32>
    %c45_791 = arith.constant 45 : index
    %c0_792 = arith.constant 0 : index
    %c0_793 = arith.constant 0 : index
    %1265 = vector.load %arg3[%c45_791, %c0_792, %c0_793] : memref<48x1x8xf32, #tpu.memory_space<vmem>>, vector<1x1x8xf32>
    %1266 = vector.shape_cast %1265 : vector<1x1x8xf32> to vector<1x8xf32>
    %1267 = vector.broadcast %1266 : vector<1x8xf32> to vector<10x8xf32>
    %1268 = arith.addf %1264, %1267 : vector<10x8xf32>
    %1269 = vector.extract_strided_slice %1067 {offsets = [8, 0], sizes = [8, 8], strides = [1, 1]} : vector<16x8xf32> to vector<8x8xf32>
    "tpu.trace_start"() <{level = 10 : i32, message = "td,sd->ts"}> : () -> ()
    %cst_794 = arith.constant dense<0.000000e+00> : vector<8x10xf32>
    %1270 = tpu.matmul %1269, %1261, %cst_794 {dimension_numbers = #tpu.dot_dimension_numbers<[1], [1], [0], [0], [0, 0, 1, 0], [], []>} : vector<8x8xf32>, vector<10x8xf32>, vector<8x10xf32> -> vector<8x10xf32>
    "tpu.trace_stop"() : () -> ()
    %cst_795 = arith.constant dense<0xFF800000> : vector<8xf32>
    %1271 = vector.multi_reduction <maximumf>, %1270, %cst_795 [1] : vector<8x10xf32> to vector<8xf32>
    %1272 = vector.shape_cast %1271 : vector<8xf32> to vector<8x1xf32>
    %1273 = vector.broadcast %1272 : vector<8x1xf32> to vector<8x10xf32>
    %1274 = arith.subf %1270, %1273 : vector<8x10xf32>
    %1275 = math.exp %1274 : vector<8x10xf32>
    %cst_796 = arith.constant dense<0.000000e+00> : vector<8xf32>
    %1276 = vector.multi_reduction <add>, %1275, %cst_796 [1] : vector<8x10xf32> to vector<8xf32>
    %1277 = vector.shape_cast %1276 : vector<8xf32> to vector<8x1xf32>
    %1278 = tpu.reciprocal %1277 {approx = true} : vector<8x1xf32> -> vector<8x1xf32>
    %1279 = arith.mulf %1277, %1278 : vector<8x1xf32>
    %cst_797 = arith.constant 2.000000e+00 : f32
    %1280 = vector.broadcast %cst_797 : f32 to vector<8x1xf32>
    %1281 = arith.subf %1280, %1279 : vector<8x1xf32>
    %1282 = arith.mulf %1278, %1281 : vector<8x1xf32>
    %1283 = vector.broadcast %1282 : vector<8x1xf32> to vector<8x10xf32>
    %1284 = arith.mulf %1275, %1283 : vector<8x10xf32>
    %cst_798 = arith.constant dense<0.000000e+00> : vector<8x8xf32>
    %1285 = tpu.matmul %1284, %1268, %cst_798 {dimension_numbers = #tpu.dot_dimension_numbers<[1], [0], [0], [1], [0, 0, 1, 1], [], []>} : vector<8x10xf32>, vector<10x8xf32>, vector<8x8xf32> -> vector<8x8xf32>
    %c13_799 = arith.constant 13 : index
    %c0_800 = arith.constant 0 : index
    %c0_801 = arith.constant 0 : index
    %1286 = vector.load %arg4[%c13_799, %c0_800, %c0_801] : memref<16x8x32xf32, #tpu.memory_space<vmem>>, vector<1x8x32xf32>
    %1287 = vector.shape_cast %1286 : vector<1x8x32xf32> to vector<8x32xf32>
    %cst_802 = arith.constant dense<0.000000e+00> : vector<8x32xf32>
    %1288 = tpu.matmul %1285, %1287, %cst_802 {dimension_numbers = #tpu.dot_dimension_numbers<[1], [0], [0], [1], [0, 0, 1, 1], [], []>} : vector<8x8xf32>, vector<8x32xf32>, vector<8x32xf32> -> vector<8x32xf32>
    %1289 = arith.addf %1254, %1288 : vector<8x32xf32>
    %c42_803 = arith.constant 42 : index
    %c0_804 = arith.constant 0 : index
    %c0_805 = arith.constant 0 : index
    %1290 = vector.load %arg2[%c42_803, %c0_804, %c0_805] : memref<48x32x8xf32, #tpu.memory_space<vmem>>, vector<1x32x8xf32>
    %1291 = vector.shape_cast %1290 : vector<1x32x8xf32> to vector<32x8xf32>
    %cst_806 = arith.constant dense<0.000000e+00> : vector<10x8xf32>
    %1292 = tpu.matmul %8, %1291, %cst_806 {dimension_numbers = #tpu.dot_dimension_numbers<[1], [0], [0], [1], [0, 0, 1, 1], [], []>} : vector<10x32xf32>, vector<32x8xf32>, vector<10x8xf32> -> vector<10x8xf32>
    %c42_807 = arith.constant 42 : index
    %c0_808 = arith.constant 0 : index
    %c0_809 = arith.constant 0 : index
    %1293 = vector.load %arg3[%c42_807, %c0_808, %c0_809] : memref<48x1x8xf32, #tpu.memory_space<vmem>>, vector<1x1x8xf32>
    %1294 = vector.shape_cast %1293 : vector<1x1x8xf32> to vector<1x8xf32>
    %1295 = vector.broadcast %1294 : vector<1x8xf32> to vector<10x8xf32>
    %1296 = arith.addf %1292, %1295 : vector<10x8xf32>
    %c46_810 = arith.constant 46 : index
    %c0_811 = arith.constant 0 : index
    %c0_812 = arith.constant 0 : index
    %1297 = vector.load %arg2[%c46_810, %c0_811, %c0_812] : memref<48x32x8xf32, #tpu.memory_space<vmem>>, vector<1x32x8xf32>
    %1298 = vector.shape_cast %1297 : vector<1x32x8xf32> to vector<32x8xf32>
    %cst_813 = arith.constant dense<0.000000e+00> : vector<10x8xf32>
    %1299 = tpu.matmul %8, %1298, %cst_813 {dimension_numbers = #tpu.dot_dimension_numbers<[1], [0], [0], [1], [0, 0, 1, 1], [], []>} : vector<10x32xf32>, vector<32x8xf32>, vector<10x8xf32> -> vector<10x8xf32>
    %c46_814 = arith.constant 46 : index
    %c0_815 = arith.constant 0 : index
    %c0_816 = arith.constant 0 : index
    %1300 = vector.load %arg3[%c46_814, %c0_815, %c0_816] : memref<48x1x8xf32, #tpu.memory_space<vmem>>, vector<1x1x8xf32>
    %1301 = vector.shape_cast %1300 : vector<1x1x8xf32> to vector<1x8xf32>
    %1302 = vector.broadcast %1301 : vector<1x8xf32> to vector<10x8xf32>
    %1303 = arith.addf %1299, %1302 : vector<10x8xf32>
    %1304 = vector.extract_strided_slice %1074 {offsets = [8, 0], sizes = [8, 8], strides = [1, 1]} : vector<16x8xf32> to vector<8x8xf32>
    "tpu.trace_start"() <{level = 10 : i32, message = "td,sd->ts"}> : () -> ()
    %cst_817 = arith.constant dense<0.000000e+00> : vector<8x10xf32>
    %1305 = tpu.matmul %1304, %1296, %cst_817 {dimension_numbers = #tpu.dot_dimension_numbers<[1], [1], [0], [0], [0, 0, 1, 0], [], []>} : vector<8x8xf32>, vector<10x8xf32>, vector<8x10xf32> -> vector<8x10xf32>
    "tpu.trace_stop"() : () -> ()
    %cst_818 = arith.constant dense<0xFF800000> : vector<8xf32>
    %1306 = vector.multi_reduction <maximumf>, %1305, %cst_818 [1] : vector<8x10xf32> to vector<8xf32>
    %1307 = vector.shape_cast %1306 : vector<8xf32> to vector<8x1xf32>
    %1308 = vector.broadcast %1307 : vector<8x1xf32> to vector<8x10xf32>
    %1309 = arith.subf %1305, %1308 : vector<8x10xf32>
    %1310 = math.exp %1309 : vector<8x10xf32>
    %cst_819 = arith.constant dense<0.000000e+00> : vector<8xf32>
    %1311 = vector.multi_reduction <add>, %1310, %cst_819 [1] : vector<8x10xf32> to vector<8xf32>
    %1312 = vector.shape_cast %1311 : vector<8xf32> to vector<8x1xf32>
    %1313 = tpu.reciprocal %1312 {approx = true} : vector<8x1xf32> -> vector<8x1xf32>
    %1314 = arith.mulf %1312, %1313 : vector<8x1xf32>
    %cst_820 = arith.constant 2.000000e+00 : f32
    %1315 = vector.broadcast %cst_820 : f32 to vector<8x1xf32>
    %1316 = arith.subf %1315, %1314 : vector<8x1xf32>
    %1317 = arith.mulf %1313, %1316 : vector<8x1xf32>
    %1318 = vector.broadcast %1317 : vector<8x1xf32> to vector<8x10xf32>
    %1319 = arith.mulf %1310, %1318 : vector<8x10xf32>
    %cst_821 = arith.constant dense<0.000000e+00> : vector<8x8xf32>
    %1320 = tpu.matmul %1319, %1303, %cst_821 {dimension_numbers = #tpu.dot_dimension_numbers<[1], [0], [0], [1], [0, 0, 1, 1], [], []>} : vector<8x10xf32>, vector<10x8xf32>, vector<8x8xf32> -> vector<8x8xf32>
    %c14_822 = arith.constant 14 : index
    %c0_823 = arith.constant 0 : index
    %c0_824 = arith.constant 0 : index
    %1321 = vector.load %arg4[%c14_822, %c0_823, %c0_824] : memref<16x8x32xf32, #tpu.memory_space<vmem>>, vector<1x8x32xf32>
    %1322 = vector.shape_cast %1321 : vector<1x8x32xf32> to vector<8x32xf32>
    %cst_825 = arith.constant dense<0.000000e+00> : vector<8x32xf32>
    %1323 = tpu.matmul %1320, %1322, %cst_825 {dimension_numbers = #tpu.dot_dimension_numbers<[1], [0], [0], [1], [0, 0, 1, 1], [], []>} : vector<8x8xf32>, vector<8x32xf32>, vector<8x32xf32> -> vector<8x32xf32>
    %1324 = arith.addf %1289, %1323 : vector<8x32xf32>
    %c43_826 = arith.constant 43 : index
    %c0_827 = arith.constant 0 : index
    %c0_828 = arith.constant 0 : index
    %1325 = vector.load %arg2[%c43_826, %c0_827, %c0_828] : memref<48x32x8xf32, #tpu.memory_space<vmem>>, vector<1x32x8xf32>
    %1326 = vector.shape_cast %1325 : vector<1x32x8xf32> to vector<32x8xf32>
    %cst_829 = arith.constant dense<0.000000e+00> : vector<10x8xf32>
    %1327 = tpu.matmul %8, %1326, %cst_829 {dimension_numbers = #tpu.dot_dimension_numbers<[1], [0], [0], [1], [0, 0, 1, 1], [], []>} : vector<10x32xf32>, vector<32x8xf32>, vector<10x8xf32> -> vector<10x8xf32>
    %c43_830 = arith.constant 43 : index
    %c0_831 = arith.constant 0 : index
    %c0_832 = arith.constant 0 : index
    %1328 = vector.load %arg3[%c43_830, %c0_831, %c0_832] : memref<48x1x8xf32, #tpu.memory_space<vmem>>, vector<1x1x8xf32>
    %1329 = vector.shape_cast %1328 : vector<1x1x8xf32> to vector<1x8xf32>
    %1330 = vector.broadcast %1329 : vector<1x8xf32> to vector<10x8xf32>
    %1331 = arith.addf %1327, %1330 : vector<10x8xf32>
    %c47_833 = arith.constant 47 : index
    %c0_834 = arith.constant 0 : index
    %c0_835 = arith.constant 0 : index
    %1332 = vector.load %arg2[%c47_833, %c0_834, %c0_835] : memref<48x32x8xf32, #tpu.memory_space<vmem>>, vector<1x32x8xf32>
    %1333 = vector.shape_cast %1332 : vector<1x32x8xf32> to vector<32x8xf32>
    %cst_836 = arith.constant dense<0.000000e+00> : vector<10x8xf32>
    %1334 = tpu.matmul %8, %1333, %cst_836 {dimension_numbers = #tpu.dot_dimension_numbers<[1], [0], [0], [1], [0, 0, 1, 1], [], []>} : vector<10x32xf32>, vector<32x8xf32>, vector<10x8xf32> -> vector<10x8xf32>
    %c47_837 = arith.constant 47 : index
    %c0_838 = arith.constant 0 : index
    %c0_839 = arith.constant 0 : index
    %1335 = vector.load %arg3[%c47_837, %c0_838, %c0_839] : memref<48x1x8xf32, #tpu.memory_space<vmem>>, vector<1x1x8xf32>
    %1336 = vector.shape_cast %1335 : vector<1x1x8xf32> to vector<1x8xf32>
    %1337 = vector.broadcast %1336 : vector<1x8xf32> to vector<10x8xf32>
    %1338 = arith.addf %1334, %1337 : vector<10x8xf32>
    %1339 = vector.extract_strided_slice %1081 {offsets = [8, 0], sizes = [8, 8], strides = [1, 1]} : vector<16x8xf32> to vector<8x8xf32>
    "tpu.trace_start"() <{level = 10 : i32, message = "td,sd->ts"}> : () -> ()
    %cst_840 = arith.constant dense<0.000000e+00> : vector<8x10xf32>
    %1340 = tpu.matmul %1339, %1331, %cst_840 {dimension_numbers = #tpu.dot_dimension_numbers<[1], [1], [0], [0], [0, 0, 1, 0], [], []>} : vector<8x8xf32>, vector<10x8xf32>, vector<8x10xf32> -> vector<8x10xf32>
    "tpu.trace_stop"() : () -> ()
    %cst_841 = arith.constant dense<0xFF800000> : vector<8xf32>
    %1341 = vector.multi_reduction <maximumf>, %1340, %cst_841 [1] : vector<8x10xf32> to vector<8xf32>
    %1342 = vector.shape_cast %1341 : vector<8xf32> to vector<8x1xf32>
    %1343 = vector.broadcast %1342 : vector<8x1xf32> to vector<8x10xf32>
    %1344 = arith.subf %1340, %1343 : vector<8x10xf32>
    %1345 = math.exp %1344 : vector<8x10xf32>
    %cst_842 = arith.constant dense<0.000000e+00> : vector<8xf32>
    %1346 = vector.multi_reduction <add>, %1345, %cst_842 [1] : vector<8x10xf32> to vector<8xf32>
    %1347 = vector.shape_cast %1346 : vector<8xf32> to vector<8x1xf32>
    %1348 = tpu.reciprocal %1347 {approx = true} : vector<8x1xf32> -> vector<8x1xf32>
    %1349 = arith.mulf %1347, %1348 : vector<8x1xf32>
    %cst_843 = arith.constant 2.000000e+00 : f32
    %1350 = vector.broadcast %cst_843 : f32 to vector<8x1xf32>
    %1351 = arith.subf %1350, %1349 : vector<8x1xf32>
    %1352 = arith.mulf %1348, %1351 : vector<8x1xf32>
    %1353 = vector.broadcast %1352 : vector<8x1xf32> to vector<8x10xf32>
    %1354 = arith.mulf %1345, %1353 : vector<8x10xf32>
    %cst_844 = arith.constant dense<0.000000e+00> : vector<8x8xf32>
    %1355 = tpu.matmul %1354, %1338, %cst_844 {dimension_numbers = #tpu.dot_dimension_numbers<[1], [0], [0], [1], [0, 0, 1, 1], [], []>} : vector<8x10xf32>, vector<10x8xf32>, vector<8x8xf32> -> vector<8x8xf32>
    %c15_845 = arith.constant 15 : index
    %c0_846 = arith.constant 0 : index
    %c0_847 = arith.constant 0 : index
    %1356 = vector.load %arg4[%c15_845, %c0_846, %c0_847] : memref<16x8x32xf32, #tpu.memory_space<vmem>>, vector<1x8x32xf32>
    %1357 = vector.shape_cast %1356 : vector<1x8x32xf32> to vector<8x32xf32>
    %cst_848 = arith.constant dense<0.000000e+00> : vector<8x32xf32>
    %1358 = tpu.matmul %1355, %1357, %cst_848 {dimension_numbers = #tpu.dot_dimension_numbers<[1], [0], [0], [1], [0, 0, 1, 1], [], []>} : vector<8x8xf32>, vector<8x32xf32>, vector<8x32xf32> -> vector<8x32xf32>
    %1359 = arith.addf %1324, %1358 : vector<8x32xf32>
    %1360 = tpu.concatenate %1220, %1359 in 0 : vector<8x32xf32>, vector<8x32xf32> -> vector<16x32xf32>
    %1361 = vector.extract_strided_slice %718 {offsets = [1, 0], sizes = [1, 32], strides = [1, 1]} : vector<9x32xf32> to vector<1x32xf32>
    %1362 = vector.broadcast %1361 : vector<1x32xf32> to vector<16x32xf32>
    %1363 = arith.addf %1360, %1362 : vector<16x32xf32>
    %1364 = arith.addf %1053, %1363 : vector<16x32xf32>
    %1365 = vector.extract_strided_slice %718 {offsets = [5, 0], sizes = [1, 32], strides = [1, 1]} : vector<9x32xf32> to vector<1x32xf32>
    %1366 = vector.extract_strided_slice %718 {offsets = [6, 0], sizes = [1, 32], strides = [1, 1]} : vector<9x32xf32> to vector<1x32xf32>
    %cst_849 = arith.constant dense<0.000000e+00> : vector<16xf32>
    %1367 = vector.multi_reduction <add>, %1364, %cst_849 [1] : vector<16x32xf32> to vector<16xf32>
    %1368 = vector.shape_cast %1367 : vector<16xf32> to vector<16x1xf32>
    %cst_850 = arith.constant 3.200000e+01 : f32
    %1369 = vector.broadcast %cst_850 : f32 to vector<16x1xf32>
    %1370 = arith.divf %1368, %1369 : vector<16x1xf32>
    %1371 = vector.broadcast %1370 : vector<16x1xf32> to vector<16x32xf32>
    %1372 = arith.subf %1364, %1371 : vector<16x32xf32>
    %1373 = arith.mulf %1372, %1372 : vector<16x32xf32>
    %cst_851 = arith.constant dense<0.000000e+00> : vector<16xf32>
    %1374 = vector.multi_reduction <add>, %1373, %cst_851 [1] : vector<16x32xf32> to vector<16xf32>
    %1375 = vector.shape_cast %1374 : vector<16xf32> to vector<16x1xf32>
    %cst_852 = arith.constant 3.200000e+01 : f32
    %1376 = vector.broadcast %cst_852 : f32 to vector<16x1xf32>
    %1377 = arith.divf %1375, %1376 : vector<16x1xf32>
    %cst_853 = arith.constant 9.99999974E-6 : f32
    %1378 = vector.broadcast %cst_853 : f32 to vector<16x1xf32>
    %1379 = arith.addf %1377, %1378 : vector<16x1xf32>
    %1380 = math.rsqrt %1379 : vector<16x1xf32>
    %1381 = vector.broadcast %1380 : vector<16x1xf32> to vector<16x32xf32>
    %1382 = arith.mulf %1372, %1381 : vector<16x32xf32>
    %1383 = vector.broadcast %1365 : vector<1x32xf32> to vector<16x32xf32>
    %1384 = arith.mulf %1382, %1383 : vector<16x32xf32>
    %1385 = vector.broadcast %1366 : vector<1x32xf32> to vector<16x32xf32>
    %1386 = arith.addf %1384, %1385 : vector<16x32xf32>
    %c1_854 = arith.constant 1 : index
    %c0_855 = arith.constant 0 : index
    %c0_856 = arith.constant 0 : index
    %1387 = vector.load %arg6[%c1_854, %c0_855, %c0_856] : memref<2x32x64xf32, #tpu.memory_space<vmem>>, vector<1x32x64xf32>
    %1388 = vector.shape_cast %1387 : vector<1x32x64xf32> to vector<32x64xf32>
    %cst_857 = arith.constant dense<0.000000e+00> : vector<16x64xf32>
    %1389 = tpu.matmul %1386, %1388, %cst_857 {dimension_numbers = #tpu.dot_dimension_numbers<[1], [0], [0], [1], [0, 0, 1, 1], [], []>} : vector<16x32xf32>, vector<32x64xf32>, vector<16x64xf32> -> vector<16x64xf32>
    %c1_858 = arith.constant 1 : index
    %c0_859 = arith.constant 0 : index
    %c0_860 = arith.constant 0 : index
    %1390 = vector.load %arg8[%c1_858, %c0_859, %c0_860] : memref<2x1x64xf32, #tpu.memory_space<vmem>>, vector<1x1x64xf32>
    %1391 = vector.shape_cast %1390 : vector<1x1x64xf32> to vector<1x64xf32>
    %1392 = vector.broadcast %1391 : vector<1x64xf32> to vector<16x64xf32>
    %1393 = arith.addf %1389, %1392 : vector<16x64xf32>
    %cst_861 = arith.constant 0.000000e+00 : f32
    %1394 = vector.broadcast %cst_861 : f32 to vector<16x64xf32>
    %1395 = arith.maximumf %1393, %1394 : vector<16x64xf32>
    %c1_862 = arith.constant 1 : index
    %c0_863 = arith.constant 0 : index
    %c0_864 = arith.constant 0 : index
    %1396 = vector.load %arg7[%c1_862, %c0_863, %c0_864] : memref<2x64x32xf32, #tpu.memory_space<vmem>>, vector<1x64x32xf32>
    %1397 = vector.shape_cast %1396 : vector<1x64x32xf32> to vector<64x32xf32>
    %cst_865 = arith.constant dense<0.000000e+00> : vector<16x32xf32>
    %1398 = tpu.matmul %1395, %1397, %cst_865 {dimension_numbers = #tpu.dot_dimension_numbers<[1], [0], [0], [1], [0, 0, 1, 1], [], []>} : vector<16x64xf32>, vector<64x32xf32>, vector<16x32xf32> -> vector<16x32xf32>
    %1399 = vector.extract_strided_slice %718 {offsets = [2, 0], sizes = [1, 32], strides = [1, 1]} : vector<9x32xf32> to vector<1x32xf32>
    %1400 = vector.broadcast %1399 : vector<1x32xf32> to vector<16x32xf32>
    %1401 = arith.addf %1398, %1400 : vector<16x32xf32>
    %1402 = arith.addf %1386, %1401 : vector<16x32xf32>
    %1403 = vector.extract_strided_slice %718 {offsets = [7, 0], sizes = [1, 32], strides = [1, 1]} : vector<9x32xf32> to vector<1x32xf32>
    %1404 = vector.extract_strided_slice %718 {offsets = [8, 0], sizes = [1, 32], strides = [1, 1]} : vector<9x32xf32> to vector<1x32xf32>
    %cst_866 = arith.constant dense<0.000000e+00> : vector<16xf32>
    %1405 = vector.multi_reduction <add>, %1402, %cst_866 [1] : vector<16x32xf32> to vector<16xf32>
    %1406 = vector.shape_cast %1405 : vector<16xf32> to vector<16x1xf32>
    %cst_867 = arith.constant 3.200000e+01 : f32
    %1407 = vector.broadcast %cst_867 : f32 to vector<16x1xf32>
    %1408 = arith.divf %1406, %1407 : vector<16x1xf32>
    %1409 = vector.broadcast %1408 : vector<16x1xf32> to vector<16x32xf32>
    %1410 = arith.subf %1402, %1409 : vector<16x32xf32>
    %1411 = arith.mulf %1410, %1410 : vector<16x32xf32>
    %cst_868 = arith.constant dense<0.000000e+00> : vector<16xf32>
    %1412 = vector.multi_reduction <add>, %1411, %cst_868 [1] : vector<16x32xf32> to vector<16xf32>
    %1413 = vector.shape_cast %1412 : vector<16xf32> to vector<16x1xf32>
    %cst_869 = arith.constant 3.200000e+01 : f32
    %1414 = vector.broadcast %cst_869 : f32 to vector<16x1xf32>
    %1415 = arith.divf %1413, %1414 : vector<16x1xf32>
    %cst_870 = arith.constant 9.99999974E-6 : f32
    %1416 = vector.broadcast %cst_870 : f32 to vector<16x1xf32>
    %1417 = arith.addf %1415, %1416 : vector<16x1xf32>
    %1418 = math.rsqrt %1417 : vector<16x1xf32>
    %1419 = vector.broadcast %1418 : vector<16x1xf32> to vector<16x32xf32>
    %1420 = arith.mulf %1410, %1419 : vector<16x32xf32>
    %1421 = vector.broadcast %1403 : vector<1x32xf32> to vector<16x32xf32>
    %1422 = arith.mulf %1420, %1421 : vector<16x32xf32>
    %1423 = vector.broadcast %1404 : vector<1x32xf32> to vector<16x32xf32>
    %1424 = arith.addf %1422, %1423 : vector<16x32xf32>
    %1425 = vector.extract_strided_slice %1424 {offsets = [0, 0], sizes = [8, 32], strides = [1, 1]} : vector<16x32xf32> to vector<8x32xf32>
    %c0_871 = arith.constant 0 : index
    %c0_872 = arith.constant 0 : index
    %c0_873 = arith.constant 0 : index
    %1426 = vector.load %arg9[%c0_871, %c0_872, %c0_873] : memref<2x8x32xf32, #tpu.memory_space<vmem>>, vector<1x8x32xf32>
    %1427 = vector.shape_cast %1426 : vector<1x8x32xf32> to vector<8x32xf32>
    %1428 = vector.shape_cast %1425 : vector<8x32xf32> to vector<1x8x32xf32>
    tpu.vector_store %arg9[%c0_871, %c0_872, %c0_873], %1428 {strides = array<i32>} : memref<2x8x32xf32, #tpu.memory_space<vmem>>, vector<1x8x32xf32>,
    %1429 = vector.extract_strided_slice %1424 {offsets = [8, 0], sizes = [8, 32], strides = [1, 1]} : vector<16x32xf32> to vector<8x32xf32>
    %c1_874 = arith.constant 1 : index
    %c0_875 = arith.constant 0 : index
    %c0_876 = arith.constant 0 : index
    %1430 = vector.load %arg9[%c1_874, %c0_875, %c0_876] : memref<2x8x32xf32, #tpu.memory_space<vmem>>, vector<1x8x32xf32>
    %1431 = vector.shape_cast %1430 : vector<1x8x32xf32> to vector<8x32xf32>
    %1432 = vector.shape_cast %1429 : vector<8x32xf32> to vector<1x8x32xf32>
    tpu.vector_store %arg9[%c1_874, %c0_875, %c0_876], %1432 {strides = array<i32>} : memref<2x8x32xf32, #tpu.memory_space<vmem>>, vector<1x8x32xf32>,
    return
  }
}

</mosaic_0001>

<bundles_post_ra>
// kernel: decoder_forward.1
= control target key start
LH: loop header
LB: loop body
LE: loop exit
PB: predicated region body
PF: predicated region fallthrough
CT: control target
= control target key end

     0   :  { %vm51_vm0 = vcmask 261120   ;;  %s9473_s0 = inlined_call_operand.vmem [shape: f32[2,8,32], index: 0, kind: input, shape index: {}]   ;;  %s9474_s1 = inlined_call_operand.vmem [shape: f32[2,10,32], index: 1, kind: input, shape index: {}]   ;;  %s9475_s2 = inlined_call_operand.vmem [shape: f32[48,32,8], index: 2, kind: input, shape index: {}]   ;;  %s9476_s3 = inlined_call_operand.vmem [shape: f32[48,1,8], index: 3, kind: input, shape index: {}]   ;;  %s9477_s4 = inlined_call_operand.vmem [shape: f32[16,8,32], index: 4, kind: input, shape index: {}]   ;;  %s9478_s5 = inlined_call_operand.vmem [shape: f32[2,9,32], index: 5, kind: input, shape index: {}]   ;;  %s9479_s6 = inlined_call_operand.vmem [shape: f32[2,32,64], index: 6, kind: input, shape index: {}]   ;;  %s9480_s7 = inlined_call_operand.vmem [shape: f32[2,64,32], index: 7, kind: input, shape index: {}]   ;;  %s9481_s8 = inlined_call_operand.vmem [shape: f32[2,1,64], index: 8, kind: input, shape index: {}]   ;;  %s9482_s9 = inlined_call_operand.hbm [shape: f32[2,8,32], index: 9, kind: output, shape index: {}]  }
   0x1   :  { %v46_v0 = vld [vmem:[%s9475_s2 + $0x18] sm:$0xff]  ;;  %v45_v1 = vld [vmem:[%s9475_s2 + $0x10] sm:$0xff]  ;;  %v44_v2 = vld [vmem:[%s9475_s2 + $0x8] sm:$0xff] }
   0x2   :  { %70 = vmatpush.msra.mxu0 %v46_v0  ;;  %6724 = vmatpush.msra.mxu2 %v46_v0  ;;  %v5993_v3 = vld [vmem:[%s9475_s2 + $0x38] sm:$0xff]  ;;  %v43_v4 = vld [vmem:[%s9475_s2] sm:$0xff]  ;;  %v5992_v5 = vld [vmem:[%s9475_s2 + $0x30] sm:$0xff] }
   0x3   :  { %103 = vmatpush.msra.mxu1 %v5993_v3  ;;  %6728 = vmatpush.msra.mxu3 %v5993_v3  ;;  %v7082_v6 = vld [vmem:[%s9473_s0] sm:$0xff]  ;;  %v7087_v7 = vld [vmem:[%s9475_s2 + $0x98] sm:$0xff]  ;;  %v5991_v8 = vld [vmem:[%s9475_s2 + $0x28] sm:$0xff] }
   0x4   :  { %71 = vmatpush.msra.mxu0 %v45_v1  ;;  %6725 = vmatpush.msra.mxu2 %v45_v1  ;;  %v7095_v9 = vld [vmem:[%s9475_s2 + $0x90] sm:$0xff]  ;;  %v5990_v10 = vld [vmem:[%s9475_s2 + $0x20] sm:$0xff]  ;;  %v7103_v11 = vld [vmem:[%s9473_s0 + $0x8] sm:$0xff] }
   0x5   :  { %104 = vmatpush.msra.mxu1 %v5992_v5  ;;  %6729 = vmatpush.msra.mxu3 %v5992_v5  ;;  %v6000_v12 = vld [vmem:[%s9475_s2 + $0x58] sm:$0xff]  ;;  %v5999_v13 = vld [vmem:[%s9475_s2 + $0x50] sm:$0xff]  ;;  %v7116_v14 = vld [vmem:[%s9475_s2 + $0x88] sm:$0xff] }
   0x6   :  { %72 = vmatpush.msra.mxu0 %v44_v2  ;;  %6726 = vmatpush.msra.mxu2 %v44_v2  ;;  %v5998_v15 = vld [vmem:[%s9475_s2 + $0x48] sm:$0xff]  ;;  %v7127_v16 = vld [vmem:[%s9475_s2 + $0x80] sm:$0xff]  ;;  %v7138_v18 = vld [vmem:[%s9475_s2 + $0xb8] sm:$0xff] }
   0x7   :  { %105 = vmatpush.msra.mxu1 %v5991_v8  ;;  %v5997_v17 = vld [vmem:[%s9475_s2 + $0x40] sm:$0xff]  ;;  %6730 = vmatpush.msra.mxu3 %v5991_v8  ;;  %v7144_v19 = vld [vmem:[%s9475_s2 + $0xb0] sm:$0xff]  ;;  %v7154_v20 = vld [vmem:[%s9475_s2 + $0xa8] sm:$0xff] }
   0x8   :  { %73 = vmatpush.msra.mxu0 %v43_v4  ;;  %6727 = vmatpush.msra.mxu2 %v43_v4  ;;  %v7162_v21 = vld [vmem:[%s9475_s2 + $0xa0] sm:$0xff] }
   0x9   :  { %5988 = vmatmul.msk.f32.vlgmr.msra.gmra.mxu0 %vm51_vm0, %v7082_v6  ;;  %5989 = vmatmul.msk.f32.vlgmr.msra.gmra.mxu2 %vm51_vm0, %v7103_v11 }
   0xa   :  { %202 = vmatpush.msrb.mxu0 %v7087_v7  ;;  %106 = vmatpush.msra.mxu1 %v5990_v10 }
   0xb   :  { %136 = vmatpush.msrb.mxu2 %v6000_v12  ;;  %5995 = vmatmul.msk.f32.vlgmr.msra.gmra.mxu1 %vm51_vm0, %v7082_v6 }
   0xc   :  { %203 = vmatpush.msrb.mxu0 %v7095_v9  ;;  %6731 = vmatpush.msra.mxu3 %v5990_v10 }
   0xd   :  { %137 = vmatpush.msrb.mxu2 %v5999_v13  ;;  %5996 = vmatmul.msk.f32.vlgmr.msra.gmra.mxu3 %vm51_vm0, %v7103_v11 }
   0xe   :  { %204 = vmatpush.msrb.mxu0 %v7116_v14 }
   0xf   :  { %138 = vmatpush.msrb.mxu2 %v5998_v15 }
  0x10   :  { %205 = vmatpush.msrb.mxu0 %v7127_v16 }
  0x11   :  { %6016 = vmatmul.msk.f32.vlgmr.msrb.gmra.mxu0 %vm51_vm0, %v7082_v6  ;;  %139 = vmatpush.msrb.mxu2 %v5997_v17 }
  0x12   :  { %327 = vmatpush.msra.mxu0 %v7138_v18  ;;  %6002 = vmatmul.msk.f32.vlgmr.msrb.gmra.mxu2 %vm51_vm0, %v7082_v6 }
  0x14   :  { %328 = vmatpush.msra.mxu0 %v7144_v19 }
  0x16   :  { %329 = vmatpush.msra.mxu0 %v7154_v20 }
  0x18   :  { %330 = vmatpush.msra.mxu0 %v7162_v21 }
  0x19   :  { %6031 = vmatmul.msk.f32.vlgmr.msra.gmra.mxu0 %vm51_vm0, %v7082_v6 }
  0x1a   :  { %6003 = vmatmul.msk.f32.gmra.mxu2 %vm51_vm0, %v7103_v11 }
  0x1b   :  { %14 = vsyncpa [#allocation3], 0  ;;  %v6737_v23 = vld [vmem:[%s9476_s3 + $0x4] ss:$0 sm:$0xff]  ;;  %v7177_v24 = vld [vmem:[%s9476_s3] ss:$0 sm:$0xff] }
  0x1c   :  { %vm240_vm1 = vcmask 64512   ;;  %v6738_v28 = vld [vmem:[%s9476_s3 + $0x5] ss:$0 sm:$0xff]  ;;  %v7188_v29 = vld [vmem:[%s9476_s3 + $0x1] ss:$0 sm:$0xff]  ;;  %v7204_v41 = vld [vmem:[%s9475_s2 + $0x118] sm:$0xff] }
  0x1d   :  { %v7209_v42 = vld [vmem:[%s9475_s2 + $0x110] sm:$0xff]  ;;  %232 = vmatpush.msrb.mxu1 %v7204_v41  ;;  %v7216_v43 = vld [vmem:[%s9475_s2 + $0x108] sm:$0xff]  ;;  %v7222_v44 = vld [vmem:[%s9475_s2 + $0x100] sm:$0xff]  ;;  %vm1649_vm9 = vcmask 80896   ;;  %vm1667_vm10 = vcmask 1041408   ;;  %vm2929_vm14 = vcmask 523264  }
  0x1e   :  { %v7227_v45 = vld [vmem:[%s9475_s2 + $0x138] sm:$0xff]  ;;  %v7235_v46 = vld [vmem:[%s9475_s2 + $0x130] sm:$0xff]  ;;  %v7241_v47 = vld [vmem:[%s9475_s2 + $0x128] sm:$0xff]  ;;  %s5973_s11 = sshll.u32 %s9482_s9, 4  ;;  %s7009_s12 = smov 128   ;;  %s5974_s11 = int_to_ptr.hbm [resolvable:$true] %s5973_s11 }
  0x1f   :  { %233 = vmatpush.msrb.mxu1 %v7209_v42  ;;  %v7248_v48 = vld [vmem:[%s9475_s2 + $0x120] sm:$0xff]  ;;  %v6007_v49 = vld [vmem:[%s9475_s2 + $0x78] sm:$0xff]  ;;  %v6006_v50 = vld [vmem:[%s9475_s2 + $0x70] sm:$0xff]  ;;  %s7010_s13 = smov 8  }
  0x20   :  { %169 = vmatpush.msrb.mxu3 %v6007_v49  ;;  %v6005_v51 = vld [vmem:[%s9475_s2 + $0x68] sm:$0xff]  ;;  %v6004_v52 = vld [vmem:[%s9475_s2 + $0x60] sm:$0xff]  ;;  %v7280_v3 = vld [vmem:[%s9475_s2 + $0xd8] sm:$0xff] }
  0x21   :  { %234 = vmatpush.msrb.mxu1 %v7216_v43  ;;  %v6741_v63 = vld [vmem:[%s9476_s3 + $0x8] ss:$0 sm:$0xff]  ;;  %v6742_v2 = vld [vmem:[%s9476_s3 + $0x9] ss:$0 sm:$0xff]  ;;  %v7286_v8 = vld [vmem:[%s9475_s2 + $0xd0] sm:$0xff] }
  0x22   :  { %170 = vmatpush.msrb.mxu3 %v6006_v50  ;;  %v7292_v10 = vld [vmem:[%s9475_s2 + $0xc8] sm:$0xff]  ;;  %v7298_v12 = vld [vmem:[%s9475_s2 + $0xc0] sm:$0xff] }
  0x23   :  { %235 = vmatpush.msrb.mxu1 %v7222_v44 }
  0x24   :  { %6022 = vmatmul.msk.f32.vlgmr.msrb.gmra.mxu1 %vm51_vm0, %v7082_v6  ;;  %171 = vmatpush.msrb.mxu3 %v6005_v51 }
  0x25   :  { %357 = vmatpush.msra.mxu1 %v7227_v45 }
  0x26   :  { %172 = vmatpush.msrb.mxu3 %v6004_v52 }
  0x27   :  { %358 = vmatpush.msra.mxu1 %v7235_v46  ;;  %6009 = vmatmul.msk.f32.vlgmr.msrb.gmra.mxu3 %vm51_vm0, %v7082_v6 }
  0x29   :  { %359 = vmatpush.msra.mxu1 %v7241_v47 }
  0x2b   :  { %360 = vmatpush.msra.mxu1 %v7248_v48 }
  0x2c   :  { %6037 = vmatmul.msk.f32.vlgmr.msra.gmra.mxu1 %vm51_vm0, %v7082_v6 }
  0x2f   :  { %6010 = vmatmul.msk.f32.gmra.mxu3 %vm51_vm0, %v7103_v11 }
  0x86   :  { %v75_v22 = vpop.f32.mrf.mxu0 }
  0x87   :  { %v76_v27 = vadd.f32 %v7177_v24, %v75_v22 }
  0x88   :  { %v108_v30 = vpop.f32.mrf.mxu1 }
  0x89   :  { %v109_v33 = vadd.f32 %v7188_v29, %v108_v30 }
  0x8c   :  { %v7193_v34 = vpop.f32.mrf.mxu2 }
  0x8e   :  { %v207_v25 = vpop.f32.mrf.mxu0 }
  0x8f   :  { %v208_v26 = vadd.f32 %v6737_v23, %v207_v25 }
  0x91   :  { %6023 = vmatpush.xpose.msk.msra.mxu2 %vm240_vm1, %v208_v26 }
  0x94   :  { %6024 = vmatmul.msk.f32.vlgmr.msra.gmra.mxu2 %vm240_vm1, %v76_v27 }
  0x95   :  { %v7195_v35 = vpop.f32.mrf.mxu2 }
  0x96   :  { %v332_v31 = vpop.f32.mrf.mxu0 }
  0x97   :  { %v333_v32 = vadd.f32 %v6738_v28, %v332_v31 }
  0x99   :  { %6038 = vmatpush.xpose.msk.msrb.mxu2 %vm240_vm1, %v333_v32 }
  0x9c   :  { %6039 = vmatmul.msk.f32.vlgmr.msrb.gmra.mxu2 %vm240_vm1, %v109_v33  ;;  %v7308_v33 = vld [vmem:[%s9477_s4] sm:$0xff] }
  0x9d   :  { %v7197_v36 = vpop.f32.mrf.mxu2  ;;  %498 = vmatpush.msra.mxu2 %v7280_v3  ;;  %471 = vmatpush.msrb.mxu1 %v7308_v33 }
  0x9f   :  { %499 = vmatpush.msra.mxu2 %v7286_v8 }
  0xa1   :  { %v237_v0 = vpop.f32.mrf.mxu1  ;;  %500 = vmatpush.msra.mxu2 %v7292_v10 }
  0xa2   :  { %v238_v1 = vadd.f32 %v6741_v63, %v237_v0  ;;  %v7372_v63 = vld [vmem:[%s9475_s2 + $0xf0] sm:$0xff]  ;;  %v7378_v0 = vld [vmem:[%s9475_s2 + $0xe8] sm:$0xff] }
  0xa3   :  { %501 = vmatpush.msra.mxu2 %v7298_v12 }
  0xa4   :  { %299 = vmatpush.msra.mxu3 %v238_v1  ;;  %6049 = vmatmul.msk.f32.vlgmr.msra.gmra.mxu2 %vm51_vm0, %v7082_v6  ;;  %v7385_v1 = vld [vmem:[%s9475_s2 + $0xe0] sm:$0xff] }
  0xa9   :  { %v362_v4 = vpop.f32.mrf.mxu1 }
  0xaa   :  { %v363_v5 = vadd.f32 %v6742_v2, %v362_v4 }
  0xac   :  { %423 = vmatpush.msrb.mxu3 %v363_v5 }
 0x117   :  { %v264_v37 = vpop.f32.mrf.mxu2 }
 0x118   :  { %v267_v38 = vsel %vm240_vm1, %v264_v37, -inf }
 0x119   :  { %268 = vmax.xlane.f32.xlu0 %v267_v38  ;;  %v7316_v38 = vld [vmem:[%s9477_s4 + $0x8] sm:$0xff] }
 0x11a   :  { %448 = vmatpush.msrb.mxu0 %v7316_v38 }
 0x11f   :  { %v388_v39 = vpop.f32.mrf.mxu2 }
 0x120   :  { %v391_v40 = vsel %vm240_vm1, %v388_v39, -inf }
 0x121   :  { %392 = vmax.xlane.f32.xlu0 %v391_v40 }
 0x127   :  { %v503_v40 = vpop.f32.mrf.mxu2 }
 0x18c   :  { %v269_v53 = vpop.xlane.xlu0 %268 }
 0x18d   :  { %v270_v54 = vsub.f32 %v264_v37, %v269_v53  ;;  %v7311_v37 = vpop.f32.mrf.mxu3 }
 0x18f   :  { %v271_v55 = vmul.f32 1.442695, %v270_v54  ;;  %v7330_v54 = vld [vmem:[%s9476_s3 + $0x2] ss:$0 sm:$0xff] }
 0x191   :  { %6820 = vpow2.f32 %v271_v55  ;;  %v142_v55 = vadd.f32 %v7330_v54, %v7195_v35  ;;  %v7353_v35 = vld [vmem:[%s9475_s2 + $0x148] sm:$0xff] }
 0x194   :  { %v393_v56 = vpop.xlane.xlu0 %392 }
 0x195   :  { %v394_v57 = vsub.f32 %v388_v39, %v393_v56  ;;  %v6744_v39 = vld [vmem:[%s9476_s3 + $0x6] ss:$0 sm:$0xff]  ;;  %v174_v49 = vpop.f32.mrf.mxu3  ;;  %v7338_v56 = vld [vmem:[%s9475_s2 + $0x158] sm:$0xff] }
 0x196   :  { %v504_v50 = vadd.f32 %v6744_v39, %v503_v40 }
 0x197   :  { %v6821_v58 = vpop.eup %6820  ;;  %v395_v59 = vmul.f32 1.442695, %v394_v57 }
 0x198   :  { %v273_v60 = vsel %vm240_vm1, %v6821_v58, 0.0  ;;  %6056 = vmatpush.xpose.msk.msra.mxu0 %vm240_vm1, %v504_v50  ;;  %v7403_v50 = vld [vmem:[%s9476_s3 + $0x3] ss:$0 sm:$0xff] }
 0x199   :  { %6822 = vpow2.f32 %v395_v59  ;;  %274 = vadd.xlane.f32.xlu1 %v273_v60  ;;  %v7347_v60 = vld [vmem:[%s9475_s2 + $0x150] sm:$0xff] }
 0x19d   :  { %v7323_v51 = vpop.f32.mrf.mxu3 }
 0x19f   :  { %v6823_v61 = vpop.eup %6822 }
 0x1a0   :  { %v397_v62 = vsel %vm240_vm1, %v6823_v61, 0.0 }
 0x1a1   :  { %398 = vadd.xlane.f32.xlu1 %v397_v62  ;;  %v7364_v62 = vld [vmem:[%s9475_s2 + $0xf8] sm:$0xff] }
 0x20c   :  { %v275_v13 = vpop.xlane.xlu1 %274 }
 0x20d   :  { %6824 = vrcp.f32 %v275_v13 }
 0x213   :  { %v6825_v15 = vpop.eup %6824 }
 0x214   :  { %v277_v17 = vmul.f32 %v6825_v15, %v275_v13  ;;  %v399_v22 = vpop.xlane.xlu1 %398 }
 0x215   :  { %6826 = vrcp.f32 %v399_v22 }
 0x216   :  { %v278_v23 = vsub.f32 2.0, %v277_v17  ;;  %v6745_v17 = vld [vmem:[%s9476_s3 + $0xa] ss:$0 sm:$0xff] }
 0x218   :  { %v279_v25 = vmul.f32 %v6825_v15, %v278_v23 }
 0x21a   :  { %v280_v26 = vmul.f32 %v6821_v58, %v279_v25  ;;  %v6746_v25 = vld [vmem:[%s9476_s3 + $0x7] ss:$0 sm:$0xff] }
 0x21b   :  { %v6827_v27 = vpop.eup %6826 }
 0x21c   :  { %v401_v28 = vmul.f32 %v6827_v27, %v399_v22  ;;  %6025 = vmatmul.msk.f32.vlgmr.msra.gmra.mxu3 %vm240_vm1, %v280_v26 }
 0x21d   :  { %528 = vmatpush.msra.mxu3 %v7338_v56 }
 0x21e   :  { %v402_v30 = vsub.f32 2.0, %v401_v28 }
 0x21f   :  { %529 = vmatpush.msra.mxu3 %v7347_v60 }
 0x220   :  { %v403_v31 = vmul.f32 %v6827_v27, %v402_v30 }
 0x221   :  { %530 = vmatpush.msra.mxu3 %v7353_v35 }
 0x222   :  { %v404_v32 = vmul.f32 %v6823_v61, %v403_v31  ;;  %v7359_v61 = vld [vmem:[%s9475_s2 + $0x140] sm:$0xff] }
 0x223   :  { %531 = vmatpush.msra.mxu3 %v7359_v61 }
 0x224   :  { %6040 = vmatmul.msk.f32.vlgmr.msrb.gmra.mxu3 %vm240_vm1, %v404_v32 }
 0x225   :  { %647 = vmatpush.msrb.mxu3 %v7364_v62 }
 0x227   :  { %648 = vmatpush.msrb.mxu3 %v7372_v63 }
 0x229   :  { %649 = vmatpush.msrb.mxu3 %v7378_v0 }
 0x22b   :  { %650 = vmatpush.msrb.mxu3 %v7385_v1 }
 0x22c   :  { %6055 = vmatmul.msk.f32.vlgmr.msra.gmra.mxu3 %vm51_vm0, %v7082_v6 }
 0x234   :  { %6066 = vmatmul.msk.f32.vlgmr.msrb.gmra.mxu3 %vm51_vm0, %v7082_v6 }
 0x29f   :  { %v301_v52 = vpop.f32.mrf.mxu3 }
 0x2a0   :  { %6043 = vmatmul.msk.f32.vlgmr.msrb.gmra.mxu1 %vm240_vm1, %v301_v52  ;;  %v175_v52 = vadd.f32 %v7403_v50, %v174_v49 }
 0x2a7   :  { %v425_v53 = vpop.f32.mrf.mxu3 }
 0x2a8   :  { %6042 = vmatmul.msk.f32.vlgmr.msrb.gmra.mxu0 %vm240_vm1, %v425_v53 }
 0x2af   :  { %v533_v22 = vpop.f32.mrf.mxu3 }
 0x2b0   :  { %6057 = vmatmul.msk.f32.vlgmr.msra.gmra.mxu0 %vm240_vm1, %v142_v55  ;;  %v534_v23 = vadd.f32 %v6745_v17, %v533_v22  ;;  %v79_v22 = vadd.f32 %v7177_v24, %v7193_v34  ;;  %v6076_v24 = vld [vmem:[%s9477_s4 + $0x18] sm:$0xff] }
 0x2b1   :  { %768 = vmatpush.msra.mxu3 %v6076_v24 }
 0x2b2   :  { %594 = vmatpush.msra.mxu1 %v534_v23  ;;  %v112_v23 = vadd.f32 %v7188_v29, %v7311_v37 }
 0x2b7   :  { %v652_v26 = vpop.f32.mrf.mxu3 }
 0x2b8   :  { %v653_v27 = vadd.f32 %v6746_v25, %v652_v26 }
 0x2ba   :  { %6073 = vmatpush.xpose.msk.msrb.mxu1 %vm240_vm1, %v653_v27 }
 0x325   :  { %v7341_v57 = vpop.f32.mrf.mxu0 }
 0x32d   :  { %v559_v58 = vpop.f32.mrf.mxu0 }
 0x32e   :  { %v562_v59 = vsel %vm240_vm1, %v559_v58, -inf }
 0x32f   :  { %563 = vmax.xlane.f32.xlu2 %v562_v59 }
 0x3a2   :  { %v564_v2 = vpop.xlane.xlu2 %563 }
 0x3a3   :  { %v565_v4 = vsub.f32 %v559_v58, %v564_v2  ;;  %v6749_v2 = vld [vmem:[%s9476_s3 + $0x5] ss:$0 sm:$0xff] }
 0x3a5   :  { %v566_v5 = vmul.f32 1.442695, %v565_v4 }
 0x3a7   :  { %6828 = vpow2.f32 %v566_v5 }
 0x3ad   :  { %v6829_v13 = vpop.eup %6828 }
 0x3ae   :  { %v568_v15 = vsel %vm240_vm1, %v6829_v13, 0.0 }
 0x3af   :  { %569 = vadd.xlane.f32.xlu2 %v568_v15 }
 0x422   :  { %v570_v28 = vpop.xlane.xlu2 %569 }
 0x423   :  { %6830 = vrcp.f32 %v570_v28 }
 0x429   :  { %v6831_v30 = vpop.eup %6830 }
 0x42a   :  { %v572_v31 = vmul.f32 %v6831_v30, %v570_v28 }
 0x42c   :  { %v573_v32 = vsub.f32 2.0, %v572_v31 }
 0x42e   :  { %v574_v39 = vmul.f32 %v6831_v30, %v573_v32 }
 0x430   :  { %v575_v40 = vmul.f32 %v6829_v13, %v574_v39 }
 0x432   :  { %6058 = vmatmul.msk.f32.vlgmr.msra.gmra.mxu1 %vm240_vm1, %v575_v40 }
 0x433   :  { %822 = vmatpush.msra.mxu1 %v7204_v41  ;;  %v7422_v41 = vld [vmem:[%s9477_s4 + $0x10] sm:$0xff] }
 0x434   :  { %619 = vmatpush.msrb.mxu2 %v7422_v41 }
 0x435   :  { %823 = vmatpush.msra.mxu1 %v7209_v42  ;;  %v7425_v42 = vpop.f32.mrf.mxu1 }
 0x437   :  { %824 = vmatpush.msra.mxu1 %v7216_v43 }
 0x439   :  { %825 = vmatpush.msra.mxu1 %v7222_v44 }
 0x43a   :  { %6074 = vmatmul.msk.f32.vlgmr.msrb.gmra.mxu1 %vm240_vm1, %v175_v52  ;;  %v6750_v52 = vld [vmem:[%s9476_s3 + $0x8] ss:$0 sm:$0xff] }
 0x43b   :  { %942 = vmatpush.msrb.mxu1 %v7227_v45 }
 0x43d   :  { %943 = vmatpush.msrb.mxu1 %v7235_v46  ;;  %v7432_v46 = vld [vmem:[%s9475_s2 + $0x178] sm:$0xff] }
 0x43e   :  { %677 = vmatpush.msrb.mxu0 %v7432_v46 }
 0x43f   :  { %944 = vmatpush.msrb.mxu1 %v7241_v47  ;;  %v7438_v47 = vld [vmem:[%s9475_s2 + $0x170] sm:$0xff] }
 0x440   :  { %678 = vmatpush.msrb.mxu0 %v7438_v47 }
 0x441   :  { %945 = vmatpush.msrb.mxu1 %v7248_v48  ;;  %v7444_v48 = vld [vmem:[%s9475_s2 + $0x168] sm:$0xff] }
 0x442   :  { %6089 = vmatmul.msk.f32.vlgmr.msra.gmra.mxu1 %vm51_vm0, %v7103_v11  ;;  %679 = vmatpush.msrb.mxu0 %v7444_v48 }
 0x443   :  { %1055 = vmatpush.msra.mxu1 %v7308_v33  ;;  %v7449_v33 = vld [vmem:[%s9475_s2 + $0x160] sm:$0xff] }
 0x444   :  { %680 = vmatpush.msrb.mxu0 %v7449_v33 }
 0x445   :  { %6072 = vmatmul.msk.f32.vlgmr.msrb.gmra.mxu0 %vm51_vm0, %v7082_v6 }
 0x446   :  { %794 = vmatpush.msra.mxu0 %v7087_v7 }
 0x448   :  { %795 = vmatpush.msra.mxu0 %v7095_v9 }
 0x44a   :  { %6104 = vmatmul.msk.f32.vlgmr.msrb.gmra.mxu1 %vm51_vm0, %v7103_v11  ;;  %796 = vmatpush.msra.mxu0 %v7116_v14 }
 0x44c   :  { %797 = vmatpush.msra.mxu0 %v7127_v16 }
 0x44d   :  { %6083 = vmatmul.msk.f32.vlgmr.msra.gmra.mxu0 %vm51_vm0, %v7103_v11 }
 0x44e   :  { %914 = vmatpush.msrb.mxu0 %v7138_v18  ;;  %v6747_v18 = vld [vmem:[%s9476_s3 + $0xb] ss:$0 sm:$0xff] }
 0x450   :  { %915 = vmatpush.msrb.mxu0 %v7144_v19 }
 0x452   :  { %916 = vmatpush.msrb.mxu0 %v7154_v20 }
 0x454   :  { %917 = vmatpush.msrb.mxu0 %v7162_v21  ;;  %v6748_v21 = vld [vmem:[%s9476_s3 + $0x4] ss:$0 sm:$0xff] }
 0x455   :  { %6098 = vmatmul.msk.f32.vlgmr.msrb.gmra.mxu0 %vm51_vm0, %v7103_v11 }
 0x456   :  { %1032 = vmatpush.msra.mxu0 %v7316_v38 }
 0x4af   :  { %v596_v43 = vpop.f32.mrf.mxu1 }
 0x4b0   :  { %6060 = vmatmul.msk.f32.vlgmr.msrb.gmra.mxu2 %vm240_vm1, %v596_v43 }
 0x4b7   :  { %v708_v44 = vpop.f32.mrf.mxu1 }
 0x4b8   :  { %v711_v45 = vsel %vm240_vm1, %v708_v44, -inf }
 0x4b9   :  { %712 = vmax.xlane.f32.xlu0 %v711_v45 }
 0x4c2   :  { %v682_v19 = vpop.f32.mrf.mxu0 }
 0x4c3   :  { %v683_v20 = vadd.f32 %v6747_v18, %v682_v19 }
 0x4c5   :  { %743 = vmatpush.msra.mxu2 %v683_v20 }
 0x4ca   :  { %v799_v38 = vpop.f32.mrf.mxu0 }
 0x4cb   :  { %v800_v53 = vadd.f32 %v6748_v21, %v799_v38 }
 0x4cd   :  { %6090 = vmatpush.xpose.msk.msrb.mxu2 %vm240_vm1, %v800_v53 }
 0x4d2   :  { %v919_v5 = vpop.f32.mrf.mxu0 }
 0x4d3   :  { %v920_v15 = vadd.f32 %v6749_v2, %v919_v5 }
 0x52c   :  { %v713_v7 = vpop.xlane.xlu0 %712 }
 0x52d   :  { %v714_v9 = vsub.f32 %v708_v44, %v713_v7  ;;  %v6751_v44 = vld [vmem:[%s9476_s3 + $0x9] ss:$0 sm:$0xff] }
 0x52f   :  { %v715_v14 = vmul.f32 1.442695, %v714_v9 }
 0x531   :  { %6832 = vpow2.f32 %v715_v14 }
 0x533   :  { %v7497_v34 = vpop.f32.mrf.mxu2 }
 0x537   :  { %v6833_v16 = vpop.eup %6832 }
 0x538   :  { %v717_v49 = vsel %vm240_vm1, %v6833_v16, 0.0 }
 0x539   :  { %718 = vadd.xlane.f32.xlu1 %v717_v49 }
 0x5ac   :  { %v719_v55 = vpop.xlane.xlu1 %718 }
 0x5ad   :  { %6834 = vrcp.f32 %v719_v55 }
 0x5b3   :  { %v6835_v58 = vpop.eup %6834 }
 0x5b4   :  { %v721_v59 = vmul.f32 %v6835_v58, %v719_v55 }
 0x5b6   :  { %v722_v4 = vsub.f32 2.0, %v721_v59 }
 0x5b8   :  { %v723_v13 = vmul.f32 %v6835_v58, %v722_v4 }
 0x5ba   :  { %v724_v17 = vmul.f32 %v6833_v16, %v723_v13 }
 0x5bc   :  { %6075 = vmatmul.msk.f32.vlgmr.msra.gmra.mxu2 %vm240_vm1, %v724_v17  ;;  %v6753_v17 = vld [vmem:[%s9476_s3 + $0xa] ss:$0 sm:$0xff] }
 0x5bd   :  { %6105 = vmatpush.xpose.msk.msra.mxu2 %vm240_vm1, %v920_v15 }
 0x5c4   :  { %6091 = vmatmul.msk.f32.vlgmr.msrb.gmra.mxu2 %vm240_vm1, %v79_v22 }
 0x5c5   :  { %1080 = vmatpush.msrb.mxu2 %v7280_v3 }
 0x5c7   :  { %1081 = vmatpush.msrb.mxu2 %v7286_v8 }
 0x5c9   :  { %1082 = vmatpush.msrb.mxu2 %v7292_v10 }
 0x5cb   :  { %1083 = vmatpush.msrb.mxu2 %v7298_v12 }
 0x5cc   :  { %6106 = vmatmul.msk.f32.vlgmr.msra.gmra.mxu2 %vm240_vm1, %v112_v23 }
 0x5cd   :  { %1198 = vmatpush.msra.mxu2 %v7422_v41  ;;  %v827_v41 = vpop.f32.mrf.mxu1 }
 0x5ce   :  { %v828_v43 = vadd.f32 %v6750_v52, %v827_v41 }
 0x5d0   :  { %888 = vmatpush.msrb.mxu3 %v828_v43 }
 0x5d4   :  { %6116 = vmatmul.msk.f32.vlgmr.msrb.gmra.mxu2 %vm51_vm0, %v7103_v11 }
 0x5d5   :  { %v947_v45 = vpop.f32.mrf.mxu1 }
 0x5d6   :  { %v948_v7 = vadd.f32 %v6751_v44, %v947_v45 }
 0x63f   :  { %v745_v3 = vpop.f32.mrf.mxu2 }
 0x640   :  { %6077 = vmatmul.msk.f32.vlgmr.msra.gmra.mxu3 %vm240_vm1, %v745_v3 }
 0x641   :  { %1008 = vmatpush.msra.mxu3 %v948_v7 }
 0x647   :  { %v853_v29 = vpop.f32.mrf.mxu2 }
 0x648   :  { %v856_v8 = vsel %vm240_vm1, %v853_v29, -inf }
 0x649   :  { %857 = vmax.xlane.f32.xlu2 %v856_v8 }
 0x64f   :  { %v973_v10 = vpop.f32.mrf.mxu2 }
 0x650   :  { %v976_v12 = vsel %vm240_vm1, %v973_v10, -inf }
 0x651   :  { %977 = vmax.xlane.f32.xlu0 %v976_v12 }
 0x6bc   :  { %v858_v37 = vpop.xlane.xlu2 %857 }
 0x6bd   :  { %v859_v25 = vsub.f32 %v853_v29, %v858_v37 }
 0x6bf   :  { %v860_v26 = vmul.f32 1.442695, %v859_v25  ;;  %v178_v25 = vadd.f32 %v7403_v50, %v7323_v51 }
 0x6c1   :  { %6836 = vpow2.f32 %v860_v26 }
 0x6c4   :  { %v978_v27 = vpop.xlane.xlu0 %977 }
 0x6c5   :  { %v979_v28 = vsub.f32 %v973_v10, %v978_v27 }
 0x6c7   :  { %v6837_v30 = vpop.eup %6836  ;;  %v980_v31 = vmul.f32 1.442695, %v979_v28 }
 0x6c8   :  { %v862_v32 = vsel %vm240_vm1, %v6837_v30, 0.0 }
 0x6c9   :  { %6838 = vpow2.f32 %v980_v31  ;;  %863 = vadd.xlane.f32.xlu1 %v862_v32  ;;  %v7007_v31 = vmov 32.0  }
 0x6cf   :  { %v6839_v39 = vpop.eup %6838 }
 0x6d0   :  { %v982_v40 = vsel %vm240_vm1, %v6839_v39, 0.0 }
 0x6d1   :  { %983 = vadd.xlane.f32.xlu2 %v982_v40 }
 0x73c   :  { %v864_v9 = vpop.xlane.xlu1 %863 }
 0x73d   :  { %6840 = vrcp.f32 %v864_v9 }
 0x743   :  { %v6841_v14 = vpop.eup %6840 }
 0x744   :  { %v866_v16 = vmul.f32 %v6841_v14, %v864_v9  ;;  %v984_v49 = vpop.xlane.xlu2 %983 }
 0x745   :  { %6842 = vrcp.f32 %v984_v49 }
 0x746   :  { %v867_v18 = vsub.f32 2.0, %v866_v16 }
 0x748   :  { %v868_v19 = vmul.f32 %v6841_v14, %v867_v18 }
 0x74a   :  { %v869_v20 = vmul.f32 %v6837_v30, %v868_v19  ;;  %v6755_v19 = vld [vmem:[%s9476_s3 + $0xb] ss:$0 sm:$0xff] }
 0x74b   :  { %v6843_v21 = vpop.eup %6842 }
 0x74c   :  { %v986_v38 = vmul.f32 %v6843_v21, %v984_v49  ;;  %6092 = vmatmul.msk.f32.vlgmr.msrb.gmra.mxu3 %vm240_vm1, %v869_v20 }
 0x74d   :  { %1108 = vmatpush.msrb.mxu3 %v7338_v56  ;;  %v6752_v56 = vld [vmem:[%s9476_s3 + $0x6] ss:$0 sm:$0xff] }
 0x74e   :  { %v987_v53 = vsub.f32 2.0, %v986_v38  ;;  %v6148_v38 = vld [vmem:[%s9475_s2 + $0x198] sm:$0xff] }
 0x74f   :  { %1109 = vmatpush.msrb.mxu3 %v7347_v60  ;;  %v1085_v60 = vpop.f32.mrf.mxu2 }
 0x750   :  { %v988_v55 = vmul.f32 %v6843_v21, %v987_v53  ;;  %v6155_v53 = vld [vmem:[%s9475_s2 + $0x1b8] sm:$0xff] }
 0x751   :  { %1110 = vmatpush.msrb.mxu3 %v7353_v35  ;;  %v1086_v35 = vadd.f32 %v6752_v56, %v1085_v60  ;;  %v6154_v56 = vld [vmem:[%s9475_s2 + $0x1b0] sm:$0xff] }
 0x752   :  { %v989_v58 = vmul.f32 %v6839_v39, %v988_v55  ;;  %v6162_v55 = vld [vmem:[%s9475_s2 + $0x1d8] sm:$0xff]  ;;  %v6161_v60 = vld [vmem:[%s9475_s2 + $0x1d0] sm:$0xff] }
 0x753   :  { %1111 = vmatpush.msrb.mxu3 %v7359_v61  ;;  %6123 = vmatpush.xpose.msk.msrb.mxu0 %vm240_vm1, %v1086_v35  ;;  %v770_v61 = vpop.f32.mrf.mxu3 }
 0x754   :  { %6107 = vmatmul.msk.f32.vlgmr.msra.gmra.mxu3 %vm240_vm1, %v989_v58  ;;  %v6147_v58 = vld [vmem:[%s9475_s2 + $0x190] sm:$0xff] }
 0x755   :  { %1224 = vmatpush.msra.mxu3 %v7364_v62 }
 0x757   :  { %1225 = vmatpush.msra.mxu3 %v7372_v63 }
 0x759   :  { %1226 = vmatpush.msra.mxu3 %v7378_v0  ;;  %v145_v0 = vadd.f32 %v7330_v54, %v7197_v36  ;;  %v7547_v36 = vld [vmem:[%s9478_s5] sm:$0xff] }
 0x75b   :  { %1227 = vmatpush.msra.mxu3 %v7385_v1 }
 0x75c   :  { %6122 = vmatmul.msk.f32.vlgmr.msrb.gmra.mxu3 %vm51_vm0, %v7103_v11 }
 0x75d   :  { %1342 = vmatpush.msrb.mxu3 %v6076_v24  ;;  %v6754_v24 = vld [vmem:[%s9476_s3 + $0x7] ss:$0 sm:$0xff] }
 0x764   :  { %6133 = vmatmul.msk.f32.vlgmr.msra.gmra.mxu3 %vm51_vm0, %v7103_v11 }
 0x7cf   :  { %v890_v62 = vpop.f32.mrf.mxu3 }
 0x7d0   :  { %6110 = vmatmul.msk.f32.vlgmr.msra.gmra.mxu1 %vm240_vm1, %v890_v62  ;;  %v6153_v62 = vld [vmem:[%s9475_s2 + $0x1a8] sm:$0xff] }
 0x7d7   :  { %v1010_v63 = vpop.f32.mrf.mxu3 }
 0x7d8   :  { %6109 = vmatmul.msk.f32.vlgmr.msra.gmra.mxu0 %vm240_vm1, %v1010_v63  ;;  %v6160_v63 = vld [vmem:[%s9475_s2 + $0x1c8] sm:$0xff] }
 0x7d9   :  { %1252 = vmatpush.msra.mxu0 %v7432_v46 }
 0x7db   :  { %1253 = vmatpush.msra.mxu0 %v7438_v47 }
 0x7dd   :  { %1254 = vmatpush.msra.mxu0 %v7444_v48  ;;  %v474_v48 = vadd.f32 %v7425_v42, %v7341_v57 }
 0x7df   :  { %1255 = vmatpush.msra.mxu0 %v7449_v33  ;;  %v1348_v33 = vperm.slane %v7547_v36, 0  ;;  %v1113_v22 = vpop.f32.mrf.mxu3 }
 0x7e0   :  { %6124 = vmatmul.msk.f32.vlgmr.msrb.gmra.mxu0 %vm240_vm1, %v145_v0  ;;  %v1114_v23 = vadd.f32 %v6753_v17, %v1113_v22  ;;  %v6145_v0 = vld [vmem:[%s9475_s2 + $0x180] sm:$0xff] }
 0x7e1   :  { %1438 = vmatpush.msrb.mxu0 %v6148_v38 }
 0x7e2   :  { %1174 = vmatpush.msrb.mxu1 %v1114_v23 }
 0x7e3   :  { %1439 = vmatpush.msrb.mxu0 %v6147_v58 }
 0x7e8   :  { %6139 = vmatmul.msk.f32.vlgmr.msra.gmra.mxu0 %vm51_vm0, %v7103_v11  ;;  %v624_v11 = vadd.f32 %v7497_v34, %v474_v48  ;;  %v1229_v34 = vpop.f32.mrf.mxu3 }
 0x7e9   :  { %v1230_v3 = vadd.f32 %v6754_v24, %v1229_v34  ;;  %v1404_v24 = vperm.slane %v7547_v36, 3 }
 0x7ea   :  { %v773_v54 = vadd.f32 %v770_v61, %v624_v11  ;;  %v6146_v61 = vld [vmem:[%s9475_s2 + $0x188] sm:$0xff] }
 0x7eb   :  { %6140 = vmatpush.xpose.msk.msra.mxu1 %vm240_vm1, %v1230_v3  ;;  %1440 = vmatpush.msrb.mxu0 %v6146_v61  ;;  %v7697_v61 = vld [vmem:[%s9474_s1 + $0x8] sm:$0x3] }
 0x7ec   :  { %v1349_v13 = vadd.f32 %v1348_v33, %v773_v54 }
 0x7ed   :  { %1441 = vmatpush.msrb.mxu0 %v6145_v0 }
 0x7ee   :  { %v1351_v57 = vadd.f32 %v1349_v13, %v7082_v6 }
 0x7f0   :  { %v1353_v42 = vsel %vm51_vm0, %v1351_v57, 0.0 }
 0x84d   :  { %v7567_v26 = vpop.f32.mrf.mxu1 }
 0x855   :  { %v7539_v1 = vpop.f32.mrf.mxu0 }
 0x85d   :  { %v1139_v59 = vpop.f32.mrf.mxu0 }
 0x85e   :  { %v1142_v2 = vsel %vm240_vm1, %v1139_v59, -inf }
 0x85f   :  { %1143 = vmax.xlane.f32.xlu0 %v1142_v2  ;;  %v6159_v2 = vld [vmem:[%s9475_s2 + $0x1c0] sm:$0xff] }
 0x865   :  { %v1257_v20 = vpop.f32.mrf.mxu0 }
 0x866   :  { %v1258_v21 = vadd.f32 %v6755_v19, %v1257_v20 }
 0x868   :  { %1318 = vmatpush.msrb.mxu2 %v1258_v21 }
 0x8d2   :  { %v1144_v46 = vpop.xlane.xlu0 %1143 }
 0x8d3   :  { %v1145_v47 = vsub.f32 %v1139_v59, %v1144_v46  ;;  %v6152_v59 = vld [vmem:[%s9475_s2 + $0x1a0] sm:$0xff] }
 0x8d5   :  { %v1146_v4 = vmul.f32 1.442695, %v1145_v47 }
 0x8d7   :  { %6844 = vpow2.f32 %v1146_v4 }
 0x8dd   :  { %v6845_v5 = vpop.eup %6844 }
 0x8de   :  { %v1148_v15 = vsel %vm240_vm1, %v6845_v5, 0.0 }
 0x8df   :  { %1149 = vadd.xlane.f32.xlu1 %v1148_v15 }
 0x8e7   :  { %1354 = vadd.xlane.f32.xlu1 %v1353_v42 }
 0x952   :  { %v1150_v29 = vpop.xlane.xlu1 %1149 }
 0x953   :  { %6846 = vrcp.f32 %v1150_v29 }
 0x954   :  { %6848 = vrcp.f32 %v7007_v31 }
 0x959   :  { %v6847_v6 = vpop.eup %6846 }
 0x95a   :  { %v1152_v8 = vmul.f32 %v6847_v6, %v1150_v29  ;;  %v6849_v32 = vpop.eup %6848  ;;  %v1355_v45 = vpop.xlane.xlu1 %1354  ;;  %v1407_v29 = vperm.slane %v7547_v36, 4  ;;  %v7655_v36 = vld [vmem:[%s9475_s2 + $0x218] sm:$0xff] }
 0x95b   :  { %v1360_v39 = vmul.f32 32.0, %v6849_v32  ;;  %vm1364_vm2 = vweird.f32 %v6849_v32  ;;  %1576 = vmatpush.msra.mxu0 %v7655_v36 }
 0x95c   :  { %v1153_v10 = vsub.f32 2.0, %v1152_v8 }
 0x95d   :  { %v1361_v40 = vsub.f32 1.0, %v1360_v39 }
 0x95e   :  { %v1154_v12 = vmul.f32 %v6847_v6, %v1153_v10  ;;  %v6169_v10 = vld [vmem:[%s9475_s2 + $0x1f8] sm:$0xff] }
 0x95f   :  { %v1362_v52 = vmul.f32 %v6849_v32, %v1361_v40  ;;  %1537 = vmatpush.msra.mxu3 %v6169_v10 }
 0x960   :  { %v1155_v37 = vmul.f32 %v6845_v5, %v1154_v12  ;;  %v6168_v12 = vld [vmem:[%s9475_s2 + $0x1f0] sm:$0xff] }
 0x961   :  { %v1363_v43 = vadd.f32 %v6849_v32, %v1362_v52  ;;  %1538 = vmatpush.msra.mxu3 %v6168_v12  ;;  %v6974_v52 = vld [vmem:[%s9473_s0 + $0x8] sm:$0xff] }
 0x962   :  { %6125 = vmatmul.msk.f32.vlgmr.msrb.gmra.mxu1 %vm240_vm1, %v1155_v37  ;;  %v6167_v37 = vld [vmem:[%s9475_s2 + $0x1e8] sm:$0xff] }
 0x963   :  { %v7571_v44 = vsel %vm1364_vm2, %v6849_v32, %v1363_v43  ;;  %1471 = vmatpush.msrb.mxu1 %v6155_v53  ;;  %1539 = vmatpush.msra.mxu3 %v6167_v37  ;;  %v7783_v12 = vld [vmem:[%s9476_s3 + $0xd] ss:$0 sm:$0xff] }
 0x964   :  { %v1366_v7 = vmul.f32 %v7571_v44, %v1355_v45 }
 0x965   :  { %1472 = vmatpush.msrb.mxu1 %v6154_v56 }
 0x966   :  { %v1368_v14 = vsub.f32 %v1351_v57, %v1366_v7 }
 0x967   :  { %1473 = vmatpush.msrb.mxu1 %v6153_v62 }
 0x968   :  { %v1370_v49 = vmul.f32 %v1368_v14, %v1368_v14 }
 0x969   :  { %1474 = vmatpush.msrb.mxu1 %v6152_v59  ;;  %v6760_v59 = vld [vmem:[%s9476_s3 + $0x10] ss:$0 sm:$0xff] }
 0x96a   :  { %6141 = vmatmul.msk.f32.vlgmr.msra.gmra.mxu1 %vm240_vm1, %v178_v25  ;;  %v1372_v18 = vsel %vm51_vm0, %v1370_v49, 0.0  ;;  %v6166_v25 = vld [vmem:[%s9475_s2 + $0x1e0] sm:$0xff] }
 0x96b   :  { %1540 = vmatpush.msra.mxu3 %v6166_v25 }
 0x9df   :  { %v1176_v27 = vpop.f32.mrf.mxu1 }
 0x9e0   :  { %6127 = vmatmul.msk.f32.vlgmr.msra.gmra.mxu2 %vm240_vm1, %v1176_v27 }
 0x9e1   :  { %1504 = vmatpush.msra.mxu2 %v6162_v55 }
 0x9e3   :  { %1505 = vmatpush.msra.mxu2 %v6161_v60 }
 0x9e5   :  { %1506 = vmatpush.msra.mxu2 %v6160_v63 }
 0x9e7   :  { %v1283_v28 = vpop.f32.mrf.mxu1  ;;  %1507 = vmatpush.msra.mxu2 %v6159_v2 }
 0x9e8   :  { %v1286_v30 = vsel %vm240_vm1, %v1283_v28, -inf }
 0x9e9   :  { %1287 = vmax.xlane.f32.xlu2 %v1286_v30  ;;  %v1058_v30 = vadd.f32 %v7567_v26, %v7539_v1 }
 0xa5c   :  { %v1288_v41 = vpop.xlane.xlu2 %1287 }
 0xa5d   :  { %v1289_v51 = vsub.f32 %v1283_v28, %v1288_v41 }
 0xa5f   :  { %v1290_v50 = vmul.f32 1.442695, %v1289_v51 }
 0xa61   :  { %6850 = vpow2.f32 %v1290_v50 }
 0xa63   :  { %v1200_v27 = vpop.f32.mrf.mxu2 }
 0xa64   :  { %v1203_v31 = vadd.f32 %v1200_v27, %v1058_v30 }
 0xa67   :  { %v6851_v9 = vpop.eup %6850 }
 0xa68   :  { %v1292_v16 = vsel %vm240_vm1, %v6851_v9, 0.0 }
 0xa69   :  { %1293 = vadd.xlane.f32.xlu0 %v1292_v16  ;;  %v7673_v16 = vld [vmem:[%s9475_s2 + $0x200] sm:$0xff] }
 0xa71   :  { %1373 = vadd.xlane.f32.xlu0 %v1372_v18 }
 0xadc   :  { %v1294_v35 = vpop.xlane.xlu0 %1293 }
 0xadd   :  { %6852 = vrcp.f32 %v1294_v35 }
 0xae3   :  { %v6853_v46 = vpop.eup %6852 }
 0xae4   :  { %v1296_v47 = vmul.f32 %v6853_v46, %v1294_v35  ;;  %v1374_v4 = vpop.xlane.xlu0 %1373  ;;  %v7690_v35 = vld [vmem:[%s9474_s1] sm:$0xff] }
 0xae5   :  { %v1378_v48 = vmul.f32 %v1374_v4, %v7571_v44 }
 0xae6   :  { %v1297_v11 = vsub.f32 2.0, %v1296_v47  ;;  %v7710_v47 = vld [vmem:[%s9476_s3 + $0xc] ss:$0 sm:$0xff] }
 0xae7   :  { %v1380_v54 = vadd.f32 1e-05, %v1378_v48  ;;  %v7715_v48 = vld [vmem:[%s9475_s2 + $0x238] sm:$0xff] }
 0xae8   :  { %v1298_v5 = vmul.f32 %v6853_v46, %v1297_v11 }
 0xae9   :  { %6854 = vrsqrt.f32 %v1380_v54  ;;  %vm1388_vm4 = vweird.f32 %v1380_v54 }
 0xaea   :  { %v1299_v13 = vmul.f32 %v6851_v9, %v1298_v5  ;;  %v7666_v9 = vld [vmem:[%s9475_s2 + $0x208] sm:$0xff] }
 0xaeb   :  { %v7729_v5 = vld [vmem:[%s9475_s2 + $0x228] sm:$0xff] }
 0xaec   :  { %6142 = vmatmul.msk.f32.vlgmr.msrb.gmra.mxu2 %vm240_vm1, %v1299_v13  ;;  %v7735_v13 = vld [vmem:[%s9475_s2 + $0x220] sm:$0xff] }
 0xaef   :  { %v6855_v15 = vpop.eup %6854 }
 0xaf0   :  { %v1383_v57 = vmul.f32 %v6855_v15, %v1380_v54  ;;  %vm1389_vm3 = vweird.f32 %v6855_v15  ;;  %v7723_v54 = vld [vmem:[%s9475_s2 + $0x230] sm:$0xff] }
 0xaf1   :  { %vm1390_vm5 = vmor %vm1388_vm4, %vm1389_vm3 }
 0xaf2   :  { %v1384_v42 = vmul.f32 %v6855_v15, %v1383_v57 }
 0xaf4   :  { %v1385_v17 = vmul.f32 0.5, %v1384_v42  ;;  %v7750_v42 = vld [vmem:[%s9475_s2 + $0x298] sm:$0xff] }
 0xaf5   :  { %1609 = vmatpush.msra.mxu1 %v7750_v42 }
 0xaf6   :  { %v1386_v22 = vsub.f32 1.5, %v1385_v17  ;;  %v7755_v17 = vld [vmem:[%s9475_s2 + $0x290] sm:$0xff] }
 0xaf7   :  { %1610 = vmatpush.msra.mxu1 %v7755_v17 }
 0xaf8   :  { %v1387_v23 = vmul.f32 %v6855_v15, %v1386_v22  ;;  %v7761_v22 = vld [vmem:[%s9475_s2 + $0x288] sm:$0xff] }
 0xaf9   :  { %1611 = vmatpush.msra.mxu1 %v7761_v22 }
 0xafa   :  { %v1391_v34 = vsel %vm1390_vm5, %v6855_v15, %v1387_v23  ;;  %v7767_v23 = vld [vmem:[%s9475_s2 + $0x280] sm:$0xff] }
 0xafb   :  { %v1402_v3 = vmul.f32 %v1391_v34, %v1368_v14  ;;  %1612 = vmatpush.msra.mxu1 %v7767_v23 }
 0xafd   :  { %v1405_v6 = vmul.f32 %v1404_v24, %v1402_v3 }
 0xaff   :  { %v7619_v8 = vadd.f32 %v1407_v29, %v1405_v6 }
 0xb01   :  { %6150 = vmatmul.msk.f32.vlgmr.msrb.gmra.mxu0 %vm51_vm0, %v7619_v8  ;;  %6157 = vmatmul.msk.f32.vlgmr.msrb.gmra.mxu1 %vm51_vm0, %v7619_v8 }
 0xb02   :  { %6164 = vmatmul.msk.f32.vlgmr.msra.gmra.mxu2 %vm51_vm0, %v7619_v8 }
 0xb6f   :  { %v1320_v28 = vpop.f32.mrf.mxu2 }
 0xb70   :  { %6144 = vmatmul.msk.f32.vlgmr.msrb.gmra.mxu3 %vm240_vm1, %v1320_v28 }
 0xb78   :  { %6171 = vmatmul.msk.f32.vlgmr.msra.gmra.mxu3 %vm51_vm0, %v7619_v8 }
 0xb7e   :  { %v1443_v62 = vpop.f32.mrf.mxu0  ;;  %v1476_v37 = vpop.f32.mrf.mxu1 }
 0xb7f   :  { %v1444_v11 = vadd.f32 %v7710_v47, %v1443_v62  ;;  %v1477_v27 = vadd.f32 %v7783_v12, %v1476_v37 }
 0xb85   :  { %v7743_v15 = vpop.f32.mrf.mxu2 }
 0xbf3   :  { %v1344_v32 = vpop.f32.mrf.mxu3 }
 0xbf4   :  { %v1347_v39 = vadd.f32 %v1344_v32, %v1203_v31 }
 0xbf6   :  { %v1350_v40 = vadd.f32 %v1348_v33, %v1347_v39  ;;  %v7660_v33 = vld [vmem:[%s9475_s2 + $0x210] sm:$0xff] }
 0xbf7   :  { %1577 = vmatpush.msra.mxu0 %v7660_v33 }
 0xbf8   :  { %v1352_v41 = vadd.f32 %v6974_v52, %v1350_v40 }
 0xbf9   :  { %1578 = vmatpush.msra.mxu0 %v7666_v9 }
 0xbfa   :  { %v1356_v43 = vsel %vm51_vm0, %v1352_v41, 0.0 }
 0xbfb   :  { %1357 = vadd.xlane.f32.xlu2 %v1356_v43  ;;  %1579 = vmatpush.msra.mxu0 %v7673_v16 }
 0xc6e   :  { %v1358_v51 = vpop.xlane.xlu2 %1357 }
 0xc6f   :  { %v1367_v50 = vmul.f32 %v7571_v44, %v1358_v51  ;;  %v6762_v51 = vld [vmem:[%s9476_s3 + $0x14] ss:$0 sm:$0xff] }
 0xc71   :  { %v1369_v45 = vsub.f32 %v1352_v41, %v1367_v50 }
 0xc73   :  { %v1371_v7 = vmul.f32 %v1369_v45, %v1369_v45 }
 0xc75   :  { %v1375_v1 = vsel %vm51_vm0, %v1371_v7, 0.0 }
 0xc76   :  { %1376 = vadd.xlane.f32.xlu1 %v1375_v1  ;;  %v7799_v1 = vld [vmem:[%s9475_s2 + $0x2b8] sm:$0xff] }
 0xce9   :  { %v1377_v26 = vpop.xlane.xlu1 %1376 }
 0xcea   :  { %v1379_v14 = vmul.f32 %v1377_v26, %v7571_v44  ;;  %v7804_v26 = vld [vmem:[%s9475_s2 + $0x2b0] sm:$0xff] }
 0xcec   :  { %v1381_v49 = vadd.f32 1e-05, %v1379_v14  ;;  %v7810_v14 = vld [vmem:[%s9475_s2 + $0x2a8] sm:$0xff] }
 0xcee   :  { %6856 = vrsqrt.f32 %v1381_v49  ;;  %vm1398_vm7 = vweird.f32 %v1381_v49 }
 0xcf4   :  { %v6857_v18 = vpop.eup %6856 }
 0xcf5   :  { %v1393_v19 = vmul.f32 %v6857_v18, %v1381_v49  ;;  %vm1399_vm6 = vweird.f32 %v6857_v18  ;;  %v7816_v49 = vld [vmem:[%s9475_s2 + $0x2a0] sm:$0xff] }
 0xcf6   :  { %vm1400_vm8 = vmor %vm1398_vm7, %vm1399_vm6 }
 0xcf7   :  { %v1394_v20 = vmul.f32 %v6857_v18, %v1393_v19  ;;  %v7823_v19 = vld [vmem:[%s9475_s2 + $0x258] sm:$0xff] }
 0xcf9   :  { %v1395_v21 = vmul.f32 0.5, %v1394_v20  ;;  %v7828_v20 = vld [vmem:[%s9475_s2 + $0x250] sm:$0xff] }
 0xcfb   :  { %v1396_v38 = vsub.f32 1.5, %v1395_v21  ;;  %v7834_v21 = vld [vmem:[%s9475_s2 + $0x248] sm:$0xff] }
 0xcfd   :  { %v1397_v53 = vmul.f32 %v6857_v18, %v1396_v38 }
 0xcff   :  { %v1401_v55 = vsel %vm1400_vm8, %v6857_v18, %v1397_v53 }
 0xd00   :  { %v1403_v58 = vmul.f32 %v1401_v55, %v1369_v45  ;;  %v7840_v55 = vld [vmem:[%s9475_s2 + $0x240] sm:$0xff] }
 0xd02   :  { %v1406_v56 = vmul.f32 %v1404_v24, %v1403_v58 }
 0xd04   :  { %v7677_v60 = vadd.f32 %v1407_v29, %v1406_v56  ;;  %v6761_v29 = vld [vmem:[%s9476_s3 + $0x11] ss:$0 sm:$0xff] }
 0xd06   :  { %6151 = vmatmul.msk.f32.gmra.mxu0 %vm51_vm0, %v7677_v60  ;;  %6158 = vmatmul.msk.f32.gmra.mxu1 %vm51_vm0, %v7677_v60 }
 0xd07   :  { %6165 = vmatmul.msk.f32.gmra.mxu2 %vm51_vm0, %v7677_v60  ;;  %6172 = vmatmul.msk.f32.gmra.mxu3 %vm51_vm0, %v7677_v60 }
 0xd0e   :  { %6178 = vmatmul.msk.f32.vlgmr.msra.gmra.mxu0 %vm51_vm0, %v7690_v35  ;;  %6185 = vmatmul.msk.f32.vlgmr.msra.gmra.mxu1 %vm51_vm0, %v7690_v35 }
 0xd16   :  { %6179 = vmatmul.msk.f32.gmra.mxu0 %vm51_vm0, %v7697_v61  ;;  %6186 = vmatmul.msk.f32.gmra.mxu1 %vm51_vm0, %v7697_v61 }
 0xd83   :  { %v7701_v63 = vpop.f32.mrf.mxu0  ;;  %v7790_v41 = vpop.f32.mrf.mxu1 }
 0xd8a   :  { %v7745_v57 = vpop.f32.mrf.mxu2 }
 0xd8b   :  { %v1581_v0 = vpop.f32.mrf.mxu0  ;;  %v1614_v43 = vpop.f32.mrf.mxu1 }
 0xd8c   :  { %v1582_v4 = vadd.f32 %v6760_v59, %v1581_v0  ;;  %v1615_v7 = vadd.f32 %v6762_v51, %v1614_v43 }
 0xd93   :  { %v1584_v2 = vpop.f32.mrf.mxu0  ;;  %v1617_v50 = vpop.f32.mrf.mxu1 }
 0xd94   :  { %v1585_v46 = vadd.f32 %v6760_v59, %v1584_v2  ;;  %v1618_v45 = vadd.f32 %v6762_v51, %v1617_v50 }
 0xd96   :  { %6187 = vmatpush.xpose.msk.msrb.mxu2 %vm240_vm1, %v1585_v46  ;;  %6190 = vmatpush.msk.msrb.mxu3 %vm1667_vm10, %v1618_v45  ;;  %v7876_v45 = vld [vmem:[%s9477_s4 + $0x20] sm:$0xff] }
 0xd98   :  { %1686 = vmatpush.msrb.mxu3 %v1615_v7 }
 0xd9a   :  { %6188 = vmatpush.xpose.msk.msrb.mxu2 %vm240_vm1, %v1582_v4  ;;  %1748 = vmatpush.msra.mxu3 %v7799_v1 }
 0xd9c   :  { %1749 = vmatpush.msra.mxu3 %v7804_v26 }
 0xd9d   :  { %6189 = vmatmul.msk.f32.vlgmr.msrb.gmra.mxu2 %vm240_vm1, %v1444_v11  ;;  %v7854_v11 = vpop.f32.mrf.mxu3 }
 0xd9e   :  { %1715 = vmatpush.msra.mxu2 %v7715_v48  ;;  %1750 = vmatpush.msra.mxu3 %v7810_v14 }
 0xda0   :  { %1716 = vmatpush.msra.mxu2 %v7723_v54  ;;  %1751 = vmatpush.msra.mxu3 %v7816_v49 }
 0xda2   :  { %1717 = vmatpush.msra.mxu2 %v7729_v5 }
 0xda4   :  { %1718 = vmatpush.msra.mxu2 %v7735_v13 }
 0xda5   :  { %6198 = vmatmul.msk.f32.vlgmr.msra.gmra.mxu2 %vm51_vm0, %v7690_v35 }
 0xda6   :  { %1898 = vmatpush.msrb.mxu2 %v7823_v19 }
 0xda8   :  { %1899 = vmatpush.msrb.mxu2 %v7828_v20 }
 0xdaa   :  { %1900 = vmatpush.msrb.mxu2 %v7834_v21 }
 0xdac   :  { %1901 = vmatpush.msrb.mxu2 %v7840_v55 }
 0xdad   :  { %6199 = vmatmul.msk.f32.gmra.mxu2 %vm51_vm0, %v7697_v61 }
 0xdb5   :  { %6220 = vmatmul.msk.f32.vlgmr.msrb.gmra.mxu2 %vm51_vm0, %v7690_v35 }
 0xdbd   :  { %6221 = vmatmul.msk.f32.gmra.mxu2 %vm51_vm0, %v7697_v61 }
 0xe20   :  { %v1646_v24 = vpop.f32.mrf.mxu2 }
 0xe21   :  { %v1650_v34 = vsel %vm1649_vm9, %v1646_v24, -inf }
 0xe22   :  { %1651 = vmax.xlane.f32.xlu2 %v1650_v34 }
 0xe28   :  { %v1720_v3 = vpop.f32.mrf.mxu2 }
 0xe29   :  { %v1721_v25 = vadd.f32 %v6761_v29, %v1720_v3  ;;  %v7861_v3 = vld [vmem:[%s9477_s4 + $0x28] sm:$0xff] }
 0xe30   :  { %v1723_v6 = vpop.f32.mrf.mxu2 }
 0xe31   :  { %v1724_v10 = vadd.f32 %v6761_v29, %v1723_v6  ;;  %v6764_v6 = vld [vmem:[%s9476_s3 + $0x12] ss:$0 sm:$0xff] }
 0xe33   :  { %6207 = vmatpush.xpose.msk.msrb.mxu0 %vm240_vm1, %v1724_v10 }
 0xe37   :  { %6208 = vmatpush.xpose.msk.msrb.mxu0 %vm240_vm1, %v1721_v25 }
 0xe38   :  { %v1903_v34 = vpop.f32.mrf.mxu2 }
 0xe3a   :  { %6209 = vmatmul.msk.f32.vlgmr.msrb.gmra.mxu0 %vm240_vm1, %v1477_v27 }
 0xe3b   :  { %1848 = vmatpush.msra.mxu0 %v7861_v3 }
 0xe40   :  { %v1906_v37 = vpop.f32.mrf.mxu2 }
 0xe41   :  { %v1907_v25 = vadd.f32 %v6764_v6, %v1906_v37 }
 0xe43   :  { %6229 = vmatpush.xpose.msk.msrb.mxu0 %vm240_vm1, %v1907_v25 }
 0xe95   :  { %v1652_v28 = vpop.xlane.xlu2 %1651 }
 0xe96   :  { %v1653_v30 = vsub.f32 %v1646_v24, %v1652_v28  ;;  %v7856_v24 = vpop.f32.mrf.mxu3  ;;  %v1904_v28 = vadd.f32 %v6764_v6, %v1903_v34 }
 0xe98   :  { %v1654_v31 = vmul.f32 1.442695, %v1653_v30  ;;  %6230 = vmatpush.xpose.msk.msrb.mxu0 %vm240_vm1, %v1904_v28  ;;  %v7929_v28 = vld [vmem:[%s9475_s2 + $0x278] sm:$0xff] }
 0xe9a   :  { %6858 = vpow2.f32 %v1654_v31 }
 0xea0   :  { %v6859_v32 = vpop.eup %6858 }
 0xea1   :  { %v1656_v39 = vsel %vm1649_vm9, %v6859_v32, 0.0 }
 0xea2   :  { %1657 = vadd.xlane.f32.xlu0 %v1656_v39  ;;  %v6763_v39 = vld [vmem:[%s9476_s3 + $0x15] ss:$0 sm:$0xff] }
 0xeb7   :  { %v1785_v40 = vpop.f32.mrf.mxu0 }
 0xeb8   :  { %v1788_v52 = vsel %vm1649_vm9, %v1785_v40, -inf }
 0xeb9   :  { %1789 = vmax.xlane.f32.xlu1 %v1788_v52 }
 0xf15   :  { %v1658_v18 = vpop.xlane.xlu0 %1657 }
 0xf16   :  { %6860 = vrcp.f32 %v1658_v18 }
 0xf1c   :  { %v6861_v38 = vpop.eup %6860 }
 0xf1d   :  { %v1660_v53 = vmul.f32 %v6861_v38, %v1658_v18  ;;  %v7885_v18 = vld [vmem:[%s9476_s3 + $0xe] ss:$0 sm:$0xff] }
 0xf1f   :  { %v1661_v58 = vsub.f32 2.0, %v1660_v53  ;;  %v7893_v53 = vld [vmem:[%s9475_s2 + $0x2d8] sm:$0xff] }
 0xf21   :  { %v1662_v56 = vmul.f32 %v6861_v38, %v1661_v58  ;;  %v1510_v38 = vadd.f32 %v7885_v18, %v7743_v15  ;;  %v7898_v58 = vld [vmem:[%s9475_s2 + $0x2d0] sm:$0xff]  ;;  %v7910_v15 = vld [vmem:[%s9475_s2 + $0x2c0] sm:$0xff] }
 0xf23   :  { %v1663_v62 = vmul.f32 %v6859_v32, %v1662_v56  ;;  %v7904_v56 = vld [vmem:[%s9475_s2 + $0x2c8] sm:$0xff] }
 0xf25   :  { %6191 = vmatmul.msk.f32.vlgmr.msrb.gmra.mxu3 %vm1649_vm9, %v1663_v62 }
 0xf26   :  { %1931 = vmatpush.msrb.mxu3 %v7893_v53 }
 0xf28   :  { %1932 = vmatpush.msrb.mxu3 %v7898_v58 }
 0xf2a   :  { %1933 = vmatpush.msrb.mxu3 %v7904_v56 }
 0xf2c   :  { %v1790_v0 = vpop.xlane.xlu1 %1789  ;;  %1934 = vmatpush.msrb.mxu3 %v7910_v15 }
 0xf2d   :  { %v1791_v59 = vsub.f32 %v1785_v40, %v1790_v0  ;;  %6205 = vmatmul.msk.f32.vlgmr.msra.gmra.mxu3 %vm51_vm0, %v7690_v35 }
 0xf2f   :  { %v1792_v2 = vmul.f32 1.442695, %v1791_v59 }
 0xf31   :  { %6862 = vpow2.f32 %v1792_v2 }
 0xf35   :  { %6206 = vmatmul.msk.f32.gmra.mxu3 %vm51_vm0, %v7697_v61 }
 0xf37   :  { %v6863_v46 = vpop.eup %6862 }
 0xf38   :  { %v1794_v4 = vsel %vm1649_vm9, %v6863_v46, 0.0 }
 0xf39   :  { %1795 = vadd.xlane.f32.xlu2 %v1794_v4 }
 0xf3d   :  { %6227 = vmatmul.msk.f32.vlgmr.msrb.gmra.mxu3 %vm51_vm0, %v7690_v35 }
 0xf45   :  { %6228 = vmatmul.msk.f32.gmra.mxu3 %vm51_vm0, %v7697_v61 }
 0xfa8   :  { %v1688_v29 = vpop.f32.mrf.mxu3 }
 0xfac   :  { %v1796_v10 = vpop.xlane.xlu2 %1795 }
 0xfad   :  { %6864 = vrcp.f32 %v1796_v10 }
 0xfb0   :  { %v1753_v27 = vpop.f32.mrf.mxu3 }
 0xfb1   :  { %v1754_v51 = vadd.f32 %v6763_v39, %v1753_v27 }
 0xfb3   :  { %v6865_v30 = vpop.eup %6864 }
 0xfb4   :  { %v1798_v31 = vmul.f32 %v6865_v30, %v1796_v10 }
 0xfb6   :  { %v1799_v32 = vsub.f32 2.0, %v1798_v31  ;;  %v7940_v31 = vld [vmem:[%s9475_s2 + $0x268] sm:$0xff] }
 0xfb8   :  { %v1800_v40 = vmul.f32 %v6865_v30, %v1799_v32  ;;  %v1756_v52 = vpop.f32.mrf.mxu3  ;;  %v7934_v30 = vld [vmem:[%s9475_s2 + $0x270] sm:$0xff]  ;;  %v7946_v32 = vld [vmem:[%s9475_s2 + $0x260] sm:$0xff] }
 0xfb9   :  { %v1757_v43 = vadd.f32 %v6763_v39, %v1756_v52 }
 0xfba   :  { %v1801_v50 = vmul.f32 %v6863_v46, %v1800_v40  ;;  %v6765_v46 = vld [vmem:[%s9476_s3 + $0x16] ss:$0 sm:$0xff] }
 0xfbb   :  { %6210 = vmatpush.msk.msrb.mxu1 %vm1667_vm10, %v1757_v43 }
 0xfbd   :  { %1823 = vmatpush.msrb.mxu1 %v1754_v51 }
 0xfbe   :  { %6211 = vmatmul.msk.f32.vlgmr.msrb.gmra.mxu1 %vm1649_vm9, %v1801_v50 }
 0xfbf   :  { %1871 = vmatpush.msra.mxu1 %v7876_v45 }
 0xfc0   :  { %v1936_v2 = vpop.f32.mrf.mxu3 }
 0xfc1   :  { %v1937_v6 = vadd.f32 %v6765_v46, %v1936_v2 }
 0xfc6   :  { %6214 = vmatmul.msk.f32.vlgmr.msra.gmra.mxu1 %vm240_vm1, %v1688_v29 }
 0xfc8   :  { %v1939_v34 = vpop.f32.mrf.mxu3 }
 0xfc9   :  { %v1940_v10 = vadd.f32 %v6765_v46, %v1939_v34  ;;  %v7989_v34 = vld [vmem:[%s9475_s2 + $0x2f0] sm:$0xff] }
 0xfcb   :  { %6232 = vmatpush.msk.msrb.mxu1 %vm1667_vm10, %v1940_v10 }
 0xfcd   :  { %2006 = vmatpush.msrb.mxu1 %v1937_v6 }
 0xfcf   :  { %2059 = vmatpush.msra.mxu1 %v7929_v28 }
 0xfd1   :  { %2060 = vmatpush.msra.mxu1 %v7934_v30 }
 0xfd3   :  { %2061 = vmatpush.msra.mxu1 %v7940_v31 }
 0xfd5   :  { %2062 = vmatpush.msra.mxu1 %v7946_v32 }
0x103b   :  { %v1825_v7 = vpop.f32.mrf.mxu1 }
0x103c   :  { %6213 = vmatmul.msk.f32.vlgmr.msra.gmra.mxu0 %vm240_vm1, %v1825_v7  ;;  %v7962_v7 = vld [vmem:[%s9477_s4 + $0x30] sm:$0xff] }
0x103d   :  { %2031 = vmatpush.msra.mxu0 %v7962_v7 }
0x1044   :  { %6231 = vmatmul.msk.f32.vlgmr.msrb.gmra.mxu0 %vm240_vm1, %v1510_v38 }
0x10b9   :  { %v7918_v62 = vpop.f32.mrf.mxu0 }
0x10c1   :  { %v1968_v0 = vpop.f32.mrf.mxu0 }
0x10c2   :  { %v1971_v59 = vsel %vm1649_vm9, %v1968_v0, -inf }
0x10c3   :  { %1972 = vmax.xlane.f32.xlu0 %v1971_v59  ;;  %v7975_v59 = vld [vmem:[%s9476_s3 + $0xf] ss:$0 sm:$0xff] }
0x10c4   :  { %v1543_v46 = vadd.f32 %v7975_v59, %v7854_v11  ;;  %v8001_v11 = vld [vmem:[%s9475_s2 + $0x2e0] sm:$0xff] }
0x1136   :  { %v1973_v4 = vpop.xlane.xlu0 %1972 }
0x1137   :  { %v1974_v29 = vsub.f32 %v1968_v0, %v1973_v4  ;;  %v7984_v4 = vld [vmem:[%s9475_s2 + $0x2f8] sm:$0xff] }
0x1138   :  { %2092 = vmatpush.msra.mxu2 %v7984_v4 }
0x1139   :  { %v1975_v37 = vmul.f32 1.442695, %v1974_v29  ;;  %v7995_v29 = vld [vmem:[%s9475_s2 + $0x2e8] sm:$0xff] }
0x113a   :  { %2093 = vmatpush.msra.mxu2 %v7989_v34 }
0x113b   :  { %6866 = vpow2.f32 %v1975_v37 }
0x113c   :  { %2094 = vmatpush.msra.mxu2 %v7995_v29 }
0x113e   :  { %2095 = vmatpush.msra.mxu2 %v8001_v11 }
0x113f   :  { %6248 = vmatmul.msk.f32.vlgmr.msra.gmra.mxu2 %vm51_vm0, %v7690_v35 }
0x1141   :  { %v6867_v25 = vpop.eup %6866 }
0x1142   :  { %v1977_v27 = vsel %vm1649_vm9, %v6867_v25, 0.0 }
0x1143   :  { %1978 = vadd.xlane.f32.xlu1 %v1977_v27 }
0x1147   :  { %6249 = vmatmul.msk.f32.gmra.mxu2 %vm51_vm0, %v7697_v61 }
0x11b6   :  { %v1979_v39 = vpop.xlane.xlu1 %1978 }
0x11b7   :  { %6868 = vrcp.f32 %v1979_v39 }
0x11bd   :  { %v6869_v40 = vpop.eup %6868 }
0x11be   :  { %v1981_v52 = vmul.f32 %v6869_v40, %v1979_v39 }
0x11c0   :  { %v1982_v43 = vsub.f32 2.0, %v1981_v52 }
0x11c2   :  { %v1983_v51 = vmul.f32 %v6869_v40, %v1982_v43  ;;  %v2097_v37 = vpop.f32.mrf.mxu2 }
0x11c4   :  { %v1984_v50 = vmul.f32 %v6867_v25, %v1983_v51  ;;  %v6767_v25 = vld [vmem:[%s9476_s3 + $0x17] ss:$0 sm:$0xff] }
0x11c5   :  { %v2098_v52 = vadd.f32 %v6767_v25, %v2097_v37 }
0x11c6   :  { %6233 = vmatmul.msk.f32.vlgmr.msrb.gmra.mxu1 %vm1649_vm9, %v1984_v50  ;;  %v8022_v50 = vld [vmem:[%s9474_s1 + $0x10] sm:$0xff] }
0x11c7   :  { %2255 = vmatpush.msrb.mxu1 %v7750_v42  ;;  %v7965_v42 = vpop.f32.mrf.mxu1 }
0x11c9   :  { %2256 = vmatpush.msrb.mxu1 %v7755_v17 }
0x11ca   :  { %v2100_v39 = vpop.f32.mrf.mxu2 }
0x11cb   :  { %2257 = vmatpush.msrb.mxu1 %v7761_v22  ;;  %v2101_v43 = vadd.f32 %v6767_v25, %v2100_v39 }
0x11cd   :  { %2258 = vmatpush.msrb.mxu1 %v7767_v23  ;;  %v6766_v23 = vld [vmem:[%s9476_s3 + $0x13] ss:$0 sm:$0xff]  ;;  %6253 = vmatpush.msk.msrb.mxu0 %vm1667_vm10, %v2101_v43 }
0x11ce   :  { %6241 = vmatmul.msk.f32.vlgmr.msra.gmra.mxu1 %vm51_vm0, %v7690_v35 }
0x11cf   :  { %2167 = vmatpush.msrb.mxu0 %v2098_v52 }
0x11d6   :  { %6242 = vmatmul.msk.f32.gmra.mxu1 %vm51_vm0, %v7697_v61 }
0x11de   :  { %6269 = vmatmul.msk.f32.vlgmr.msrb.gmra.mxu1 %vm51_vm0, %v8022_v50 }
0x1243   :  { %v2008_v17 = vpop.f32.mrf.mxu1 }
0x1244   :  { %6235 = vmatmul.msk.f32.vlgmr.msra.gmra.mxu0 %vm240_vm1, %v2008_v17 }
0x1245   :  { %2224 = vmatpush.msra.mxu0 %v7655_v36  ;;  %v8029_v36 = vld [vmem:[%s9474_s1 + $0x18] sm:$0x3] }
0x1246   :  { %6270 = vmatmul.msk.f32.gmra.mxu1 %vm51_vm0, %v8029_v36 }
0x1247   :  { %2225 = vmatpush.msra.mxu0 %v7660_v33 }
0x1249   :  { %2226 = vmatpush.msra.mxu0 %v7666_v9 }
0x124b   :  { %v2064_v22 = vpop.f32.mrf.mxu1  ;;  %2227 = vmatpush.msra.mxu0 %v7673_v16 }
0x124c   :  { %v2065_v2 = vadd.f32 %v6766_v23, %v2064_v22 }
0x1253   :  { %v2067_v38 = vpop.f32.mrf.mxu1 }
0x1254   :  { %v2068_v0 = vadd.f32 %v6766_v23, %v2067_v38  ;;  %v8041_v38 = vld [vmem:[%s9477_s4 + $0x38] sm:$0xff] }
0x1256   :  { %6250 = vmatpush.xpose.msk.msra.mxu3 %vm240_vm1, %v2068_v0 }
0x125a   :  { %6251 = vmatpush.xpose.msk.msra.mxu3 %vm240_vm1, %v2065_v2 }
0x125d   :  { %6252 = vmatmul.msk.f32.vlgmr.msra.gmra.mxu3 %vm240_vm1, %v1543_v46 }
0x125e   :  { %2192 = vmatpush.msrb.mxu3 %v8041_v38 }
0x12c1   :  { %v8044_v0 = vpop.f32.mrf.mxu0 }
0x12e0   :  { %v2129_v6 = vpop.f32.mrf.mxu3 }
0x12e1   :  { %v2132_v10 = vsel %vm1649_vm9, %v2129_v6, -inf }
0x12e2   :  { %2133 = vmax.xlane.f32.xlu2 %v2132_v10 }
0x1355   :  { %v2134_v27 = vpop.xlane.xlu2 %2133 }
0x1356   :  { %v2135_v40 = vsub.f32 %v2129_v6, %v2134_v27  ;;  %v6768_v6 = vld [vmem:[%s9476_s3 + $0x10] ss:$0 sm:$0xff]  ;;  %v1447_v27 = vadd.f32 %v7710_v47, %v7701_v63 }
0x1358   :  { %v2136_v51 = vmul.f32 1.442695, %v2135_v40 }
0x135a   :  { %6870 = vpow2.f32 %v2136_v51 }
0x1360   :  { %v6871_v35 = vpop.eup %6870 }
0x1361   :  { %v2138_v61 = vsel %vm1649_vm9, %v6871_v35, 0.0 }
0x1362   :  { %2139 = vadd.xlane.f32.xlu0 %v2138_v61 }
0x13d5   :  { %v2140_v33 = vpop.xlane.xlu0 %2139 }
0x13d6   :  { %6872 = vrcp.f32 %v2140_v33 }
0x13dc   :  { %v6873_v9 = vpop.eup %6872 }
0x13dd   :  { %v2142_v16 = vmul.f32 %v6873_v9, %v2140_v33 }
0x13df   :  { %v2143_v17 = vsub.f32 2.0, %v2142_v16 }
0x13e1   :  { %v2144_v22 = vmul.f32 %v6873_v9, %v2143_v17 }
0x13e3   :  { %v2145_v23 = vmul.f32 %v6871_v35, %v2144_v22 }
0x13e5   :  { %6254 = vmatmul.msk.f32.vlgmr.msrb.gmra.mxu0 %vm1649_vm9, %v2145_v23 }
0x13ed   :  { %6262 = vmatmul.msk.f32.vlgmr.msra.gmra.mxu0 %vm51_vm0, %v8022_v50 }
0x13f5   :  { %6263 = vmatmul.msk.f32.gmra.mxu0 %vm51_vm0, %v8029_v36 }
0x1462   :  { %v2169_v2 = vpop.f32.mrf.mxu0 }
0x1463   :  { %6256 = vmatmul.msk.f32.vlgmr.msrb.gmra.mxu3 %vm240_vm1, %v2169_v2 }
0x146a   :  { %v2229_v46 = vpop.f32.mrf.mxu0 }
0x146b   :  { %v2230_v25 = vadd.f32 %v6768_v6, %v2229_v46 }
0x1472   :  { %v2232_v10 = vpop.f32.mrf.mxu0 }
0x1473   :  { %v2233_v37 = vadd.f32 %v6768_v6, %v2232_v10 }
0x1475   :  { %6271 = vmatpush.xpose.msk.msrb.mxu2 %vm240_vm1, %v2233_v37 }
0x1479   :  { %6272 = vmatpush.xpose.msk.msrb.mxu2 %vm240_vm1, %v2230_v25  ;;  %v6771_v25 = vld [vmem:[%s9476_s3 + $0x15] ss:$0 sm:$0xff] }
0x147c   :  { %6273 = vmatmul.msk.f32.vlgmr.msrb.gmra.mxu2 %vm240_vm1, %v1447_v27 }
0x147d   :  { %2356 = vmatpush.msra.mxu2 %v7715_v48 }
0x147f   :  { %2357 = vmatpush.msra.mxu2 %v7723_v54  ;;  %v6769_v54 = vld [vmem:[%s9476_s3 + $0x11] ss:$0 sm:$0xff] }
0x1481   :  { %2358 = vmatpush.msra.mxu2 %v7729_v5 }
0x1483   :  { %2359 = vmatpush.msra.mxu2 %v7735_v13 }
0x1484   :  { %6282 = vmatmul.msk.f32.vlgmr.msra.gmra.mxu2 %vm51_vm0, %v8022_v50 }
0x1485   :  { %2534 = vmatpush.msrb.mxu2 %v7823_v19 }
0x1487   :  { %2535 = vmatpush.msrb.mxu2 %v7828_v20  ;;  %v1480_v20 = vadd.f32 %v7783_v12, %v7790_v41 }
0x1489   :  { %2536 = vmatpush.msrb.mxu2 %v7834_v21 }
0x148b   :  { %2537 = vmatpush.msrb.mxu2 %v7840_v55 }
0x148c   :  { %6283 = vmatmul.msk.f32.gmra.mxu2 %vm51_vm0, %v8029_v36 }
0x148d   :  { %2721 = vmatpush.msra.mxu2 %v7984_v4 }
0x148f   :  { %2722 = vmatpush.msra.mxu2 %v7989_v34  ;;  %v2260_v34 = vpop.f32.mrf.mxu1 }
0x1491   :  { %2723 = vmatpush.msra.mxu2 %v7995_v29  ;;  %v6770_v29 = vld [vmem:[%s9476_s3 + $0x14] ss:$0 sm:$0xff] }
0x1492   :  { %v2261_v52 = vadd.f32 %v6770_v29, %v2260_v34 }
0x1493   :  { %2724 = vmatpush.msra.mxu2 %v8001_v11 }
0x1494   :  { %6304 = vmatmul.msk.f32.vlgmr.msrb.gmra.mxu2 %vm51_vm0, %v8022_v50 }
0x1497   :  { %v2263_v40 = vpop.f32.mrf.mxu1 }
0x1498   :  { %v2264_v12 = vadd.f32 %v6770_v29, %v2263_v40 }
0x149a   :  { %6274 = vmatpush.msk.msra.mxu3 %vm1667_vm10, %v2264_v12 }
0x149c   :  { %6305 = vmatmul.msk.f32.gmra.mxu2 %vm51_vm0, %v8029_v36  ;;  %2330 = vmatpush.msra.mxu3 %v2261_v52  ;;  %v8146_v52 = vld [vmem:[%s9478_s5] sm:$0xff] }
0x149d   :  { %v2826_v12 = vperm.slane %v8146_v52, 1 }
0x149e   :  { %2387 = vmatpush.msrb.mxu3 %v7799_v1 }
0x14a0   :  { %2388 = vmatpush.msrb.mxu3 %v7804_v26 }
0x14a2   :  { %2389 = vmatpush.msrb.mxu3 %v7810_v14 }
0x14a4   :  { %6332 = vmatmul.msk.f32.vlgmr.msra.gmra.mxu2 %vm51_vm0, %v8022_v50  ;;  %2390 = vmatpush.msrb.mxu3 %v7816_v49 }
0x14ac   :  { %6333 = vmatmul.msk.f32.gmra.mxu2 %vm51_vm0, %v8029_v36 }
0x14ff   :  { %v2292_v63 = vpop.f32.mrf.mxu2 }
0x1500   :  { %v2295_v47 = vsel %vm1649_vm9, %v2292_v63, -inf }
0x1501   :  { %2296 = vmax.xlane.f32.xlu1 %v2295_v47 }
0x1507   :  { %v2361_v48 = vpop.f32.mrf.mxu2 }
0x1508   :  { %v2362_v19 = vadd.f32 %v6769_v54, %v2361_v48 }
0x150f   :  { %v2364_v5 = vpop.f32.mrf.mxu2 }
0x1510   :  { %v2365_v13 = vadd.f32 %v6769_v54, %v2364_v5 }
0x1512   :  { %6291 = vmatpush.xpose.msk.msrb.mxu0 %vm240_vm1, %v2365_v13  ;;  %v1513_v13 = vadd.f32 %v7885_v18, %v7745_v57 }
0x1516   :  { %6292 = vmatpush.xpose.msk.msrb.mxu0 %vm240_vm1, %v2362_v19 }
0x1519   :  { %6293 = vmatmul.msk.f32.vlgmr.msrb.gmra.mxu0 %vm240_vm1, %v1480_v20 }
0x151a   :  { %2486 = vmatpush.msra.mxu0 %v7861_v3 }
0x1574   :  { %v2297_v21 = vpop.xlane.xlu1 %2296 }
0x1575   :  { %v2298_v55 = vsub.f32 %v2292_v63, %v2297_v21 }
0x1577   :  { %v2299_v4 = vmul.f32 1.442695, %v2298_v55 }
0x1579   :  { %6874 = vpow2.f32 %v2299_v4 }
0x157f   :  { %v6875_v11 = vpop.eup %6874 }
0x1580   :  { %v2301_v39 = vsel %vm1649_vm9, %v6875_v11, 0.0 }
0x1581   :  { %2302 = vadd.xlane.f32.xlu2 %v2301_v39 }
0x1596   :  { %v2424_v41 = vpop.f32.mrf.mxu0 }
0x1597   :  { %v2427_v3 = vsel %vm1649_vm9, %v2424_v41, -inf }
0x1598   :  { %2428 = vmax.xlane.f32.xlu0 %v2427_v3 }
0x15f4   :  { %v2303_v43 = vpop.xlane.xlu2 %2302 }
0x15f5   :  { %6876 = vrcp.f32 %v2303_v43 }
0x15fb   :  { %v6877_v51 = vpop.eup %6876 }
0x15fc   :  { %v2305_v35 = vmul.f32 %v6877_v51, %v2303_v43 }
0x15fe   :  { %v2306_v61 = vsub.f32 2.0, %v2305_v35 }
0x1600   :  { %v2307_v33 = vmul.f32 %v6877_v51, %v2306_v61 }
0x1602   :  { %v2308_v9 = vmul.f32 %v6875_v11, %v2307_v33  ;;  %v1874_v11 = vadd.f32 %v7965_v42, %v7918_v62  ;;  %v6774_v33 = vld [vmem:[%s9476_s3 + $0x13] ss:$0 sm:$0xff] }
0x1604   :  { %6275 = vmatmul.msk.f32.vlgmr.msra.gmra.mxu3 %vm1649_vm9, %v2308_v9  ;;  %v2036_v39 = vadd.f32 %v8044_v0, %v1874_v11 }
0x1605   :  { %2565 = vmatpush.msra.mxu3 %v7893_v53  ;;  %v2194_v53 = vpop.f32.mrf.mxu3 }
0x1606   :  { %v2197_v40 = vadd.f32 %v2194_v53, %v2036_v39  ;;  %v2878_v39 = vperm.slane %v8146_v52, 6 }
0x1607   :  { %2566 = vmatpush.msra.mxu3 %v7898_v58  ;;  %v2539_v58 = vpop.f32.mrf.mxu2 }
0x1608   :  { %v2827_v62 = vadd.f32 %v2826_v12, %v2197_v40 }
0x1609   :  { %2567 = vmatpush.msra.mxu3 %v7904_v56 }
0x160a   :  { %v2829_v42 = vadd.f32 %v2827_v62, %v7619_v8 }
0x160b   :  { %v2429_v1 = vpop.xlane.xlu0 %2428  ;;  %2568 = vmatpush.msra.mxu3 %v7910_v15  ;;  %v6772_v15 = vld [vmem:[%s9476_s3 + $0x12] ss:$0 sm:$0xff] }
0x160c   :  { %v2430_v26 = vsub.f32 %v2424_v41, %v2429_v1  ;;  %6289 = vmatmul.msk.f32.vlgmr.msrb.gmra.mxu3 %vm51_vm0, %v8022_v50  ;;  %v2540_v46 = vadd.f32 %v6772_v15, %v2539_v58 }
0x160e   :  { %v2431_v14 = vmul.f32 1.442695, %v2430_v26 }
0x160f   :  { %v2542_v22 = vpop.f32.mrf.mxu2 }
0x1610   :  { %6878 = vpow2.f32 %v2431_v14  ;;  %v2543_v23 = vadd.f32 %v6772_v15, %v2542_v22 }
0x1612   :  { %6313 = vmatpush.xpose.msk.msrb.mxu0 %vm240_vm1, %v2543_v23 }
0x1614   :  { %6290 = vmatmul.msk.f32.gmra.mxu3 %vm51_vm0, %v8029_v36 }
0x1616   :  { %v6879_v49 = vpop.eup %6878  ;;  %6314 = vmatpush.xpose.msk.msrb.mxu0 %vm240_vm1, %v2540_v46 }
0x1617   :  { %v2433_v16 = vsel %vm1649_vm9, %v6879_v49, 0.0 }
0x1618   :  { %2434 = vadd.xlane.f32.xlu1 %v2433_v16  ;;  %v6775_v16 = vld [vmem:[%s9476_s3 + $0x17] ss:$0 sm:$0xff] }
0x161c   :  { %6311 = vmatmul.msk.f32.vlgmr.msra.gmra.mxu3 %vm51_vm0, %v8022_v50 }
0x1624   :  { %6312 = vmatmul.msk.f32.gmra.mxu3 %vm51_vm0, %v8029_v36 }
0x1687   :  { %v2332_v56 = vpop.f32.mrf.mxu3 }
0x168b   :  { %v2435_v17 = vpop.xlane.xlu1 %2434 }
0x168c   :  { %6880 = vrcp.f32 %v2435_v17 }
0x168f   :  { %v2392_v2 = vpop.f32.mrf.mxu3 }
0x1690   :  { %v2393_v48 = vadd.f32 %v6771_v25, %v2392_v2 }
0x1692   :  { %v6881_v6 = vpop.eup %6880 }
0x1693   :  { %v2437_v10 = vmul.f32 %v6881_v6, %v2435_v17 }
0x1695   :  { %v2438_v37 = vsub.f32 2.0, %v2437_v10  ;;  %v2884_v10 = vld [vmem:[%s9479_s6 + $0x18] sm:$0xff] }
0x1697   :  { %v2439_v27 = vmul.f32 %v6881_v6, %v2438_v37  ;;  %v2395_v63 = vpop.f32.mrf.mxu3 }
0x1698   :  { %v2396_v47 = vadd.f32 %v6771_v25, %v2395_v63  ;;  %v2883_v25 = vld [vmem:[%s9479_s6 + $0x10] sm:$0xff]  ;;  %v2881_v63 = vld [vmem:[%s9479_s6] sm:$0xff] }
0x1699   :  { %v2440_v54 = vmul.f32 %v6879_v49, %v2439_v27  ;;  %v2726_v49 = vpop.f32.mrf.mxu2  ;;  %v2882_v27 = vld [vmem:[%s9479_s6 + $0x8] sm:$0xff] }
0x169a   :  { %6294 = vmatpush.msk.msra.mxu1 %vm1667_vm10, %v2396_v47  ;;  %v2727_v58 = vadd.f32 %v6775_v16, %v2726_v49 }
0x169c   :  { %2462 = vmatpush.msra.mxu1 %v2393_v48 }
0x169d   :  { %6295 = vmatmul.msk.f32.vlgmr.msra.gmra.mxu1 %vm1649_vm9, %v2440_v54 }
0x169e   :  { %2509 = vmatpush.msrb.mxu1 %v7876_v45  ;;  %v6773_v45 = vld [vmem:[%s9476_s3 + $0x16] ss:$0 sm:$0xff] }
0x169f   :  { %v2570_v55 = vpop.f32.mrf.mxu3 }
0x16a0   :  { %v2571_v34 = vadd.f32 %v6773_v45, %v2570_v55 }
0x16a1   :  { %v2729_v53 = vpop.f32.mrf.mxu2 }
0x16a5   :  { %6298 = vmatmul.msk.f32.vlgmr.msrb.gmra.mxu1 %vm240_vm1, %v2332_v56  ;;  %v2730_v56 = vadd.f32 %v6775_v16, %v2729_v53 }
0x16a7   :  { %v2573_v4 = vpop.f32.mrf.mxu3 }
0x16a8   :  { %v2574_v29 = vadd.f32 %v6773_v45, %v2573_v4 }
0x16aa   :  { %6316 = vmatpush.msk.msra.mxu1 %vm1667_vm10, %v2574_v29 }
0x16ac   :  { %2640 = vmatpush.msra.mxu1 %v2571_v34 }
0x16ae   :  { %2690 = vmatpush.msrb.mxu1 %v7929_v28 }
0x16b0   :  { %2691 = vmatpush.msrb.mxu1 %v7934_v30 }
0x16b2   :  { %2692 = vmatpush.msrb.mxu1 %v7940_v31  ;;  %v2831_v31 = vsel %vm51_vm0, %v2829_v42, 0.0 }
0x16b4   :  { %2693 = vmatpush.msrb.mxu1 %v7946_v32 }
0x171a   :  { %v2464_v5 = vpop.f32.mrf.mxu1 }
0x171b   :  { %6297 = vmatmul.msk.f32.vlgmr.msra.gmra.mxu0 %vm240_vm1, %v2464_v5 }
0x171c   :  { %2664 = vmatpush.msra.mxu0 %v7962_v7 }
0x1722   :  { %v8160_v32 = vpop.f32.mrf.mxu1 }
0x1723   :  { %6315 = vmatmul.msk.f32.vlgmr.msrb.gmra.mxu0 %vm240_vm1, %v1513_v13 }
0x1724   :  { %6337 = vmatpush.msk.msrb.mxu0 %vm1667_vm10, %v2730_v56 }
0x1726   :  { %2796 = vmatpush.msrb.mxu0 %v2727_v58  ;;  %v2928_v58 = vperm.slane %v8146_v52, 2 }
0x1798   :  { %v8130_v19 = vpop.f32.mrf.mxu0 }
0x17a0   :  { %v2602_v20 = vpop.f32.mrf.mxu0 }
0x17a1   :  { %v2605_v21 = vsel %vm1649_vm9, %v2602_v20, -inf }
0x17a2   :  { %2606 = vmax.xlane.f32.xlu2 %v2605_v21 }
0x1815   :  { %v2607_v7 = vpop.xlane.xlu2 %2606 }
0x1816   :  { %v2608_v57 = vsub.f32 %v2602_v20, %v2607_v7 }
0x1818   :  { %v2609_v18 = vmul.f32 1.442695, %v2608_v57 }
0x181a   :  { %6882 = vpow2.f32 %v2609_v18  ;;  %v2875_v18 = vperm.slane %v8146_v52, 5 }
0x1820   :  { %v6883_v28 = vpop.eup %6882 }
0x1821   :  { %v2611_v30 = vsel %vm1649_vm9, %v6883_v28, 0.0 }
0x1822   :  { %2612 = vadd.xlane.f32.xlu0 %v2611_v30  ;;  %v2927_v30 = vld [vmem:[%s9480_s7 + $0x38] sm:$0xff] }
0x182a   :  { %2832 = vadd.xlane.f32.xlu0 %v2831_v31  ;;  %v2925_v31 = vld [vmem:[%s9480_s7 + $0x28] sm:$0xff] }
0x1895   :  { %v2613_v0 = vpop.xlane.xlu0 %2612 }
0x1896   :  { %6884 = vrcp.f32 %v2613_v0 }
0x189c   :  { %v6885_v41 = vpop.eup %6884 }
0x189d   :  { %v2615_v3 = vmul.f32 %v6885_v41, %v2613_v0  ;;  %v2924_v0 = vld [vmem:[%s9480_s7 + $0x20] sm:$0xff] }
0x189f   :  { %v2616_v43 = vsub.f32 2.0, %v2615_v3  ;;  %v2922_v3 = vld [vmem:[%s9480_s7 + $0x10] sm:$0xff] }
0x18a1   :  { %v2617_v51 = vmul.f32 %v6885_v41, %v2616_v43  ;;  %v2923_v41 = vld [vmem:[%s9480_s7 + $0x18] sm:$0xff]  ;;  %v2921_v43 = vld [vmem:[%s9480_s7 + $0x8] sm:$0xff] }
0x18a3   :  { %v2618_v35 = vmul.f32 %v6883_v28, %v2617_v51 }
0x18a5   :  { %6317 = vmatmul.msk.f32.vlgmr.msra.gmra.mxu1 %vm1649_vm9, %v2618_v35  ;;  %v2920_v35 = vld [vmem:[%s9480_s7] sm:$0xff] }
0x18a6   :  { %2944 = vmatpush.msra.mxu1 %v2927_v30 }
0x18ad   :  { %6325 = vmatmul.msk.f32.vlgmr.msrb.gmra.mxu1 %vm51_vm0, %v8022_v50  ;;  %v1546_v50 = vadd.f32 %v7975_v59, %v7856_v24 }
0x18b5   :  { %6326 = vmatmul.msk.f32.gmra.mxu1 %vm51_vm0, %v8029_v36 }
0x1922   :  { %v2642_v8 = vpop.f32.mrf.mxu1 }
0x1923   :  { %6319 = vmatmul.msk.f32.vlgmr.msra.gmra.mxu0 %vm240_vm1, %v2642_v8 }
0x1924   :  { %2907 = vmatpush.msra.mxu0 %v2884_v10 }
0x1926   :  { %2908 = vmatpush.msra.mxu0 %v2883_v25  ;;  %v6350_v25 = vld [vmem:[%s9475_s2 + $0x318] sm:$0xff] }
0x1927   :  { %3042 = vmatpush.msrb.mxu2 %v6350_v25  ;;  %v8375_v25 = vld [vmem:[%s9475_s2 + $0x388] sm:$0xff] }
0x1928   :  { %2909 = vmatpush.msra.mxu0 %v2882_v27  ;;  %v6357_v27 = vld [vmem:[%s9475_s2 + $0x338] sm:$0xff] }
0x192a   :  { %v2695_v61 = vpop.f32.mrf.mxu1  ;;  %2910 = vmatpush.msra.mxu0 %v2881_v63  ;;  %v6364_v63 = vld [vmem:[%s9475_s2 + $0x358] sm:$0xff] }
0x192b   :  { %v2696_v26 = vadd.f32 %v6774_v33, %v2695_v61  ;;  %v8229_v61 = vld [vmem:[%s9481_s8] ss:$0 sm:$0xff] }
0x1932   :  { %v2698_v9 = vpop.f32.mrf.mxu1 }
0x1933   :  { %v2699_v1 = vadd.f32 %v6774_v33, %v2698_v9 }
0x1935   :  { %6334 = vmatpush.xpose.msk.msrb.mxu3 %vm240_vm1, %v2699_v1 }
0x1939   :  { %6335 = vmatpush.xpose.msk.msrb.mxu3 %vm240_vm1, %v2696_v26  ;;  %v2512_v26 = vadd.f32 %v8160_v32, %v8130_v19 }
0x193c   :  { %6336 = vmatmul.msk.f32.vlgmr.msrb.gmra.mxu3 %vm240_vm1, %v1546_v50 }
0x193d   :  { %2820 = vmatpush.msra.mxu3 %v8041_v38  ;;  %v2833_v38 = vpop.xlane.xlu0 %2832 }
0x193e   :  { %v2837_v17 = vmul.f32 %v2833_v38, %v7571_v44 }
0x193f   :  { %3075 = vmatpush.msrb.mxu3 %v6357_v27 }
0x1940   :  { %v2839_v23 = vsub.f32 %v2829_v42, %v2837_v17  ;;  %v2926_v42 = vld [vmem:[%s9480_s7 + $0x30] sm:$0xff] }
0x1941   :  { %2945 = vmatpush.msra.mxu1 %v2926_v42 }
0x1942   :  { %v2841_v46 = vmul.f32 %v2839_v23, %v2839_v23 }
0x1943   :  { %2946 = vmatpush.msra.mxu1 %v2925_v31 }
0x1944   :  { %v2843_v6 = vsel %vm51_vm0, %v2841_v46, 0.0 }
0x1945   :  { %2947 = vmatpush.msra.mxu1 %v2924_v0 }
0x1947   :  { %2948 = vmatpush.msra.mxu1 %v2923_v41 }
0x1949   :  { %2949 = vmatpush.msra.mxu1 %v2922_v3 }
0x194b   :  { %2950 = vmatpush.msra.mxu1 %v2921_v43 }
0x194d   :  { %2951 = vmatpush.msra.mxu1 %v2920_v35 }
0x19a0   :  { %v2666_v51 = vpop.f32.mrf.mxu0 }
0x19a1   :  { %v2669_v50 = vadd.f32 %v2666_v51, %v2512_v26 }
0x19bf   :  { %v2758_v36 = vpop.f32.mrf.mxu3 }
0x19c0   :  { %v2761_v14 = vsel %vm1649_vm9, %v2758_v36, -inf }
0x19c1   :  { %2762 = vmax.xlane.f32.xlu1 %v2761_v14 }
0x1a34   :  { %v2763_v15 = vpop.xlane.xlu1 %2762 }
0x1a35   :  { %v2764_v24 = vsub.f32 %v2758_v36, %v2763_v15 }
0x1a37   :  { %v2765_v59 = vmul.f32 1.442695, %v2764_v24 }
0x1a39   :  { %6886 = vpow2.f32 %v2765_v59 }
0x1a3f   :  { %v6887_v22 = vpop.eup %6886 }
0x1a40   :  { %v2767_v2 = vsel %vm1649_vm9, %v6887_v22, 0.0 }
0x1a41   :  { %2768 = vadd.xlane.f32.xlu2 %v2767_v2 }
0x1a49   :  { %2844 = vadd.xlane.f32.xlu2 %v2843_v6 }
0x1ab4   :  { %v2769_v37 = vpop.xlane.xlu2 %2768 }
0x1ab5   :  { %6888 = vrcp.f32 %v2769_v37 }
0x1abb   :  { %v6889_v47 = vpop.eup %6888 }
0x1abc   :  { %v2771_v48 = vmul.f32 %v6889_v47, %v2769_v37  ;;  %v2845_v54 = vpop.xlane.xlu2 %2844 }
0x1abd   :  { %v2849_v5 = vmul.f32 %v2845_v54, %v7571_v44  ;;  %v6363_v54 = vld [vmem:[%s9475_s2 + $0x350] sm:$0xff] }
0x1abe   :  { %v2772_v13 = vsub.f32 2.0, %v2771_v48  ;;  %v6356_v48 = vld [vmem:[%s9475_s2 + $0x330] sm:$0xff] }
0x1abf   :  { %v2851_v20 = vadd.f32 1e-05, %v2849_v5  ;;  %3076 = vmatpush.msrb.mxu3 %v6356_v48  ;;  %v8393_v48 = vld [vmem:[%s9475_s2 + $0x428] sm:$0xff] }
0x1ac0   :  { %v2773_v21 = vmul.f32 %v6889_v47, %v2772_v13  ;;  %v6349_v47 = vld [vmem:[%s9475_s2 + $0x310] sm:$0xff]  ;;  %v6348_v13 = vld [vmem:[%s9475_s2 + $0x308] sm:$0xff] }
0x1ac1   :  { %6890 = vrsqrt.f32 %v2851_v20  ;;  %vm2859_vm12 = vweird.f32 %v2851_v20  ;;  %3043 = vmatpush.msrb.mxu2 %v6349_v47  ;;  %v8388_v47 = vld [vmem:[%s9475_s2 + $0x3a8] sm:$0xff] }
0x1ac2   :  { %v2774_v55 = vmul.f32 %v6887_v22, %v2773_v21  ;;  %v6362_v21 = vld [vmem:[%s9475_s2 + $0x348] sm:$0xff] }
0x1ac3   :  { %3044 = vmatpush.msrb.mxu2 %v6348_v13 }
0x1ac4   :  { %6338 = vmatmul.msk.f32.vlgmr.msrb.gmra.mxu0 %vm1649_vm9, %v2774_v55 }
0x1ac5   :  { %3108 = vmatpush.msrb.mxu0 %v6364_v63  ;;  %v8383_v63 = vld [vmem:[%s9475_s2 + $0x408] sm:$0xff] }
0x1ac7   :  { %v6891_v45 = vpop.eup %6890  ;;  %3109 = vmatpush.msrb.mxu0 %v6363_v54  ;;  %v8400_v54 = vld [vmem:[%s9475_s2 + $0x380] sm:$0xff] }
0x1ac8   :  { %v2854_v4 = vmul.f32 %v6891_v45, %v2851_v20  ;;  %vm2860_vm11 = vweird.f32 %v6891_v45  ;;  %v6355_v20 = vld [vmem:[%s9475_s2 + $0x328] sm:$0xff] }
0x1ac9   :  { %vm2861_vm13 = vmor %vm2859_vm12, %vm2860_vm11  ;;  %3077 = vmatpush.msrb.mxu3 %v6355_v20  ;;  %3110 = vmatpush.msrb.mxu0 %v6362_v21  ;;  %v8412_v20 = vld [vmem:[%s9475_s2 + $0x3a0] sm:$0xff] }
0x1aca   :  { %v2855_v34 = vmul.f32 %v6891_v45, %v2854_v4  ;;  %v6354_v4 = vld [vmem:[%s9475_s2 + $0x320] sm:$0xff] }
0x1acb   :  { %3078 = vmatpush.msrb.mxu3 %v6354_v4  ;;  %v8417_v21 = vld [vmem:[%s9475_s2 + $0x420] sm:$0xff] }
0x1acc   :  { %v2856_v29 = vmul.f32 0.5, %v2855_v34  ;;  %v6361_v34 = vld [vmem:[%s9475_s2 + $0x340] sm:$0xff] }
0x1acd   :  { %3111 = vmatpush.msrb.mxu0 %v6361_v34 }
0x1ace   :  { %v2857_v7 = vsub.f32 1.5, %v2856_v29 }
0x1ad0   :  { %v2858_v57 = vmul.f32 %v6891_v45, %v2857_v7 }
0x1ad2   :  { %v2862_v11 = vsel %vm2861_vm13, %v6891_v45, %v2858_v57  ;;  %v6347_v45 = vld [vmem:[%s9475_s2 + $0x300] sm:$0xff] }
0x1ad3   :  { %v2873_v40 = vmul.f32 %v2862_v11, %v2839_v23  ;;  %3045 = vmatpush.msrb.mxu2 %v6347_v45 }
0x1ad5   :  { %v2876_v28 = vmul.f32 %v2875_v18, %v2873_v40 }
0x1ad7   :  { %v2879_v62 = vadd.f32 %v2878_v39, %v2876_v28 }
0x1ad9   :  { %6341 = vmatmul.msk.f32.vlgmr.msra.gmra.mxu0 %vm51_vm0, %v2879_v62 }
0x1b41   :  { %v2798_v8 = vpop.f32.mrf.mxu0 }
0x1b42   :  { %6340 = vmatmul.msk.f32.vlgmr.msra.gmra.mxu3 %vm240_vm1, %v2798_v8 }
0x1b56   :  { %v2912_v33 = vpop.f32.mrf.mxu0 }
0x1b57   :  { %v2913_v9 = vadd.f32 %v8229_v61, %v2912_v33  ;;  %v3005_v33 = vperm.slane %v8146_v52, 7 }
0x1b59   :  { %v2918_v1 = vmax.f32 %v2913_v9, 0.0 }
0x1b5b   :  { %6343 = vmatmul.msk.f32.vlgmr.msra.gmra.mxu1 %vm2929_vm14, %v2918_v1 }
0x1bc5   :  { %v2822_v36 = vpop.f32.mrf.mxu3 }
0x1bc6   :  { %v2825_v14 = vadd.f32 %v2822_v36, %v2669_v50  ;;  %v6371_v50 = vld [vmem:[%s9475_s2 + $0x378] sm:$0xff]  ;;  %v6370_v36 = vld [vmem:[%s9475_s2 + $0x370] sm:$0xff] }
0x1bc7   :  { %3141 = vmatpush.msrb.mxu1 %v6371_v50 }
0x1bc8   :  { %v2828_v49 = vadd.f32 %v2826_v12, %v2825_v14  ;;  %v6369_v14 = vld [vmem:[%s9475_s2 + $0x368] sm:$0xff] }
0x1bc9   :  { %3142 = vmatpush.msrb.mxu1 %v6370_v36 }
0x1bca   :  { %v2830_v16 = vadd.f32 %v2828_v49, %v7677_v60  ;;  %v6368_v49 = vld [vmem:[%s9475_s2 + $0x360] sm:$0xff] }
0x1bcb   :  { %3143 = vmatpush.msrb.mxu1 %v6369_v14 }
0x1bcc   :  { %v2834_v53 = vsel %vm51_vm0, %v2830_v16, 0.0 }
0x1bcd   :  { %2835 = vadd.xlane.f32.xlu1 %v2834_v53  ;;  %3144 = vmatpush.msrb.mxu1 %v6368_v49 }
0x1bd8   :  { %v2953_v56 = vpop.f32.mrf.mxu1 }
0x1bd9   :  { %v2954_v15 = vadd.f32 %v2953_v56, %v2928_v58 }
0x1bdb   :  { %v2959_v24 = vadd.f32 %v2954_v15, %v2879_v62 }
0x1bdd   :  { %v2961_v19 = vsel %vm51_vm0, %v2959_v24, 0.0 }
0x1bde   :  { %2962 = vadd.xlane.f32.xlu1 %v2961_v19 }
0x1c40   :  { %v2836_v32 = vpop.xlane.xlu1 %2835 }
0x1c41   :  { %v2838_v59 = vmul.f32 %v2836_v32, %v7571_v44 }
0x1c43   :  { %v2840_v38 = vsub.f32 %v2830_v16, %v2838_v59 }
0x1c45   :  { %v2842_v12 = vmul.f32 %v2840_v38, %v2840_v38 }
0x1c47   :  { %v2846_v60 = vsel %vm51_vm0, %v2842_v12, 0.0 }
0x1c48   :  { %2847 = vadd.xlane.f32.xlu0 %v2846_v60 }
0x1c51   :  { %v2963_v17 = vpop.xlane.xlu1 %2962 }
0x1c52   :  { %v2967_v22 = vmul.f32 %v2963_v17, %v7571_v44  ;;  %v8331_v17 = vld [vmem:[%s9475_s2 + $0x398] sm:$0xff] }
0x1c53   :  { %3174 = vmatpush.msra.mxu2 %v8331_v17 }
0x1c54   :  { %v2969_v23 = vsub.f32 %v2959_v24, %v2967_v22  ;;  %v8341_v22 = vld [vmem:[%s9475_s2 + $0x3b8] sm:$0xff] }
0x1c55   :  { %3299 = vmatpush.msra.mxu0 %v8341_v22 }
0x1c56   :  { %v2971_v2 = vmul.f32 %v2969_v23, %v2969_v23 }
0x1c58   :  { %v2973_v46 = vsel %vm51_vm0, %v2971_v2, 0.0  ;;  %v8353_v2 = vld [vmem:[%s9475_s2 + $0x390] sm:$0xff] }
0x1c59   :  { %2974 = vadd.xlane.f32.xlu0 %v2973_v46  ;;  %v8358_v46 = vld [vmem:[%s9475_s2 + $0x410] sm:$0xff]  ;;  %3175 = vmatpush.msra.mxu2 %v8353_v2 }
0x1c5b   :  { %3176 = vmatpush.msra.mxu2 %v8375_v25 }
0x1c5d   :  { %3177 = vmatpush.msra.mxu2 %v8400_v54 }
0x1cbb   :  { %v2848_v6 = vpop.xlane.xlu0 %2847 }
0x1cbc   :  { %v2850_v10 = vmul.f32 %v2848_v6, %v7571_v44 }
0x1cbe   :  { %v2852_v37 = vadd.f32 1e-05, %v2850_v10  ;;  %v8365_v10 = vld [vmem:[%s9475_s2 + $0x3b0] sm:$0xff] }
0x1cbf   :  { %3300 = vmatpush.msra.mxu0 %v8365_v10 }
0x1cc0   :  { %6892 = vrsqrt.f32 %v2852_v37  ;;  %vm2869_vm2 = vweird.f32 %v2852_v37 }
0x1cc1   :  { %3301 = vmatpush.msra.mxu0 %v8388_v47 }
0x1cc3   :  { %3302 = vmatpush.msra.mxu0 %v8412_v20 }
0x1cc6   :  { %v6893_v5 = vpop.eup %6892 }
0x1cc7   :  { %v2864_v55 = vmul.f32 %v6893_v5, %v2852_v37  ;;  %vm2870_vm15 = vweird.f32 %v6893_v5  ;;  %v8370_v37 = vld [vmem:[%s9475_s2 + $0x430] sm:$0xff] }
0x1cc8   :  { %vm2871_vm3 = vmor %vm2869_vm2, %vm2870_vm15 }
0x1cc9   :  { %v2865_v29 = vmul.f32 %v6893_v5, %v2864_v55 }
0x1ccb   :  { %v2866_v7 = vmul.f32 0.5, %v2865_v29 }
0x1ccc   :  { %v2975_v57 = vpop.xlane.xlu0 %2974 }
0x1ccd   :  { %v2867_v11 = vsub.f32 1.5, %v2866_v7  ;;  %v2979_v40 = vmul.f32 %v2975_v57, %v7571_v44 }
0x1ccf   :  { %v2868_v28 = vmul.f32 %v6893_v5, %v2867_v11  ;;  %v2981_v62 = vadd.f32 1e-05, %v2979_v40 }
0x1cd1   :  { %v2872_v30 = vsel %vm2871_vm3, %v6893_v5, %v2868_v28  ;;  %6894 = vrsqrt.f32 %v2981_v62  ;;  %vm2989_vm5 = vweird.f32 %v2981_v62  ;;  %v8405_v5 = vld [vmem:[%s9475_s2 + $0x400] sm:$0xff] }
0x1cd2   :  { %v2874_v42 = vmul.f32 %v2872_v30, %v2840_v38 }
0x1cd4   :  { %v2877_v31 = vmul.f32 %v2875_v18, %v2874_v42  ;;  %v8294_v18 = vld [vmem:[%s9478_s5 + $0x8] ss:$0 sm:$0xff] }
0x1cd6   :  { %v2880_v0 = vadd.f32 %v2878_v39, %v2877_v31 }
0x1cd7   :  { %v6895_v41 = vpop.eup %6894 }
0x1cd8   :  { %v2984_v3 = vmul.f32 %v6895_v41, %v2981_v62  ;;  %6342 = vmatmul.msk.f32.gmra.mxu0 %vm51_vm0, %v2880_v0  ;;  %vm2990_vm4 = vweird.f32 %v6895_v41 }
0x1cd9   :  { %vm2991_vm6 = vmor %vm2989_vm5, %vm2990_vm4 }
0x1cda   :  { %v2985_v43 = vmul.f32 %v6895_v41, %v2984_v3 }
0x1cdc   :  { %v2986_v51 = vmul.f32 0.5, %v2985_v43  ;;  %v6784_v43 = vld [vmem:[%s9476_s3 + $0x1c] ss:$0 sm:$0xff] }
0x1cde   :  { %v2987_v35 = vsub.f32 1.5, %v2986_v51  ;;  %v6785_v51 = vld [vmem:[%s9476_s3 + $0x20] ss:$0 sm:$0xff] }
0x1ce0   :  { %v2988_v8 = vmul.f32 %v6895_v41, %v2987_v35  ;;  %v6782_v35 = vld [vmem:[%s9476_s3 + $0x1d] ss:$0 sm:$0xff] }
0x1ce2   :  { %v2992_v9 = vsel %vm2991_vm6, %v6895_v41, %v2988_v8  ;;  %v6783_v8 = vld [vmem:[%s9476_s3 + $0x21] ss:$0 sm:$0xff] }
0x1ce3   :  { %v3003_v39 = vmul.f32 %v2992_v9, %v2969_v23  ;;  %v8348_v23 = vld [vmem:[%s9475_s2 + $0x438] sm:$0xff] }
0x1ce4   :  { %3329 = vmatpush.msra.mxu1 %v8348_v23 }
0x1ce5   :  { %v3006_v1 = vmul.f32 %v3005_v33, %v3003_v39 }
0x1ce6   :  { %3330 = vmatpush.msra.mxu1 %v8370_v37 }
0x1ce7   :  { %v8299_v26 = vadd.f32 %v8294_v18, %v3006_v1 }
0x1ce8   :  { %3331 = vmatpush.msra.mxu1 %v8393_v48 }
0x1ce9   :  { %6352 = vmatmul.msk.f32.vlgmr.msrb.gmra.mxu2 %vm51_vm0, %v8299_v26  ;;  %6359 = vmatmul.msk.f32.vlgmr.msrb.gmra.mxu3 %vm51_vm0, %v8299_v26 }
0x1cea   :  { %6366 = vmatmul.msk.f32.vlgmr.msrb.gmra.mxu0 %vm51_vm0, %v8299_v26  ;;  %3332 = vmatpush.msra.mxu1 %v8417_v21 }
0x1d55   :  { %v2915_v16 = vpop.f32.mrf.mxu0 }
0x1d56   :  { %v2916_v53 = vadd.f32 %v8229_v61, %v2915_v16 }
0x1d58   :  { %v2919_v56 = vmax.f32 %v2916_v53, 0.0  ;;  %v8481_v53 = vld [vmem:[%s9475_s2 + $0x3d8] sm:$0xff] }
0x1d5a   :  { %6344 = vmatmul.msk.f32.gmra.mxu1 %vm2929_vm14, %v2919_v56  ;;  %v8487_v56 = vld [vmem:[%s9475_s2 + $0x3d0] sm:$0xff] }
0x1d62   :  { %6373 = vmatmul.msk.f32.vlgmr.msrb.gmra.mxu1 %vm51_vm0, %v8299_v26 }
0x1d67   :  { %v8446_v52 = vpop.f32.mrf.mxu0 }
0x1d6c   :  { %v3047_v30 = vpop.f32.mrf.mxu2  ;;  %v3080_v42 = vpop.f32.mrf.mxu3 }
0x1dd7   :  { %v2956_v15 = vpop.f32.mrf.mxu1 }
0x1dd8   :  { %v2957_v24 = vadd.f32 %v2956_v15, %v2928_v58  ;;  %v8336_v58 = vld [vmem:[%s9475_s2 + $0x418] sm:$0xff] }
0x1dd9   :  { %3204 = vmatpush.msra.mxu3 %v8336_v58  ;;  %v8493_v15 = vld [vmem:[%s9476_s3 + $0x19] ss:$0 sm:$0xff] }
0x1dda   :  { %v2960_v19 = vadd.f32 %v2957_v24, %v2880_v0  ;;  %v8498_v24 = vld [vmem:[%s9475_s2 + $0x3c8] sm:$0xff] }
0x1ddb   :  { %3205 = vmatpush.msra.mxu3 %v8358_v46 }
0x1ddc   :  { %v2964_v32 = vsel %vm51_vm0, %v2960_v19, 0.0 }
0x1ddd   :  { %2965 = vadd.xlane.f32.xlu2 %v2964_v32  ;;  %3206 = vmatpush.msra.mxu3 %v8383_v63  ;;  %v3081_v32 = vadd.f32 %v8493_v15, %v3080_v42 }
0x1ddf   :  { %3207 = vmatpush.msra.mxu3 %v8405_v5  ;;  %v8448_v62 = vpop.f32.mrf.mxu1 }
0x1e50   :  { %v2966_v59 = vpop.xlane.xlu2 %2965 }
0x1e51   :  { %v2968_v38 = vmul.f32 %v2966_v59, %v7571_v44  ;;  %v8515_v59 = vld [vmem:[%s9477_s4 + $0x48] sm:$0xff] }
0x1e52   :  { %3420 = vmatpush.msrb.mxu0 %v8515_v59 }
0x1e53   :  { %v2970_v12 = vsub.f32 %v2960_v19, %v2968_v38  ;;  %v8504_v19 = vld [vmem:[%s9475_s2 + $0x3c0] sm:$0xff] }
0x1e55   :  { %v2972_v60 = vmul.f32 %v2970_v12, %v2970_v12 }
0x1e57   :  { %v2976_v61 = vsel %vm51_vm0, %v2972_v60, 0.0 }
0x1e58   :  { %2977 = vadd.xlane.f32.xlu1 %v2976_v61 }
0x1ecb   :  { %v2978_v6 = vpop.xlane.xlu1 %2977 }
0x1ecc   :  { %v2980_v27 = vmul.f32 %v2978_v6, %v7571_v44  ;;  %v6786_v6 = vld [vmem:[%s9476_s3 + $0x1e] ss:$0 sm:$0xff] }
0x1ece   :  { %v2982_v13 = vadd.f32 1e-05, %v2980_v27 }
0x1ed0   :  { %6896 = vrsqrt.f32 %v2982_v13  ;;  %vm2999_vm8 = vweird.f32 %v2982_v13 }
0x1ed6   :  { %v6897_v55 = vpop.eup %6896 }
0x1ed7   :  { %v2994_v45 = vmul.f32 %v6897_v55, %v2982_v13  ;;  %vm3000_vm7 = vweird.f32 %v6897_v55 }
0x1ed8   :  { %vm3001_vm11 = vmor %vm2999_vm8, %vm3000_vm7 }
0x1ed9   :  { %v2995_v4 = vmul.f32 %v6897_v55, %v2994_v45 }
0x1edb   :  { %v2996_v34 = vmul.f32 0.5, %v2995_v4 }
0x1edd   :  { %v2997_v29 = vsub.f32 1.5, %v2996_v34 }
0x1edf   :  { %v2998_v7 = vmul.f32 %v6897_v55, %v2997_v29 }
0x1ee1   :  { %v3002_v57 = vsel %vm3001_vm11, %v6897_v55, %v2998_v7 }
0x1ee2   :  { %v3004_v11 = vmul.f32 %v3002_v57, %v2970_v12 }
0x1ee4   :  { %v3007_v40 = vmul.f32 %v3005_v33, %v3004_v11 }
0x1ee6   :  { %v8428_v28 = vadd.f32 %v8294_v18, %v3007_v40  ;;  %v8473_v18 = vld [vmem:[%s9476_s3 + $0x18] ss:$0 sm:$0xff] }
0x1ee7   :  { %v3048_v16 = vadd.f32 %v8473_v18, %v3047_v30 }
0x1ee8   :  { %6353 = vmatmul.msk.f32.gmra.mxu2 %vm51_vm0, %v8428_v28  ;;  %6360 = vmatmul.msk.f32.gmra.mxu3 %vm51_vm0, %v8428_v28 }
0x1ee9   :  { %6367 = vmatmul.msk.f32.gmra.mxu0 %vm51_vm0, %v8428_v28  ;;  %6374 = vmatmul.msk.f32.gmra.mxu1 %vm51_vm0, %v8428_v28 }
0x1ef0   :  { %6380 = vmatmul.msk.f32.vlgmr.msra.gmra.mxu2 %vm51_vm0, %v8299_v26  ;;  %6386 = vmatmul.msk.f32.vlgmr.msra.gmra.mxu3 %vm51_vm0, %v8299_v26 }
0x1ef1   :  { %6396 = vmatmul.msk.f32.vlgmr.msra.gmra.mxu0 %vm51_vm0, %v8299_v26  ;;  %6402 = vmatmul.msk.f32.vlgmr.msra.gmra.mxu1 %vm51_vm0, %v8299_v26 }
0x1f66   :  { %v8450_v31 = vpop.f32.mrf.mxu0  ;;  %v8452_v0 = vpop.f32.mrf.mxu1 }
0x1f6b   :  { %v8454_v41 = vpop.f32.mrf.mxu2  ;;  %v8456_v3 = vpop.f32.mrf.mxu3 }
0x1f6e   :  { %v3304_v33 = vpop.f32.mrf.mxu0  ;;  %v3334_v9 = vpop.f32.mrf.mxu1 }
0x1f6f   :  { %v3305_v14 = vadd.f32 %v6782_v35, %v3304_v33  ;;  %v3335_v49 = vadd.f32 %v6783_v8, %v3334_v9 }
0x1f73   :  { %v3179_v39 = vpop.f32.mrf.mxu2  ;;  %v3209_v1 = vpop.f32.mrf.mxu3 }
0x1f74   :  { %v3180_v50 = vadd.f32 %v6784_v43, %v3179_v39  ;;  %v3210_v36 = vadd.f32 %v6785_v51, %v3209_v1  ;;  %v8529_v39 = vld [vmem:[%s9475_s2 + $0x458] sm:$0xff] }
0x1f76   :  { %6387 = vmatpush.xpose.msk.msrb.mxu2 %vm240_vm1, %v3180_v50  ;;  %3270 = vmatpush.msrb.mxu3 %v3210_v36  ;;  %v8535_v36 = vld [vmem:[%s9475_s2 + $0x450] sm:$0xff] }
0x1f78   :  { %3395 = vmatpush.msra.mxu3 %v3335_v49  ;;  %v8541_v49 = vld [vmem:[%s9475_s2 + $0x448] sm:$0xff] }
0x1f79   :  { %6388 = vmatmul.msk.f32.vlgmr.msrb.gmra.mxu2 %vm240_vm1, %v3048_v16 }
0x1f7a   :  { %6403 = vmatpush.xpose.msk.msra.mxu2 %vm240_vm1, %v3305_v14 }
0x1f7e   :  { %3470 = vmatpush.msrb.mxu2 %v8481_v53 }
0x1f80   :  { %3471 = vmatpush.msrb.mxu2 %v8487_v56 }
0x1f81   :  { %6404 = vmatmul.msk.f32.vlgmr.msra.gmra.mxu2 %vm240_vm1, %v3081_v32  ;;  %v8547_v32 = vld [vmem:[%s9475_s2 + $0x440] sm:$0xff] }
0x1f82   :  { %3472 = vmatpush.msrb.mxu2 %v8498_v24 }
0x1f84   :  { %3473 = vmatpush.msrb.mxu2 %v8504_v19 }
0x1f89   :  { %6414 = vmatmul.msk.f32.vlgmr.msrb.gmra.mxu2 %vm51_vm0, %v8299_v26 }
0x1ffc   :  { %v3235_v38 = vpop.f32.mrf.mxu2 }
0x1ffd   :  { %v3238_v12 = vsel %vm240_vm1, %v3235_v38, -inf }
0x1ffe   :  { %3239 = vmax.xlane.f32.xlu2 %v3238_v12  ;;  %v8553_v12 = vld [vmem:[%s9475_s2 + $0x3f8] sm:$0xff] }
0x2004   :  { %v3360_v60 = vpop.f32.mrf.mxu2 }
0x2005   :  { %v3363_v61 = vsel %vm240_vm1, %v3360_v60, -inf }
0x2006   :  { %3364 = vmax.xlane.f32.xlu0 %v3363_v61  ;;  %v8566_v61 = vld [vmem:[%s9475_s2 + $0x3e8] sm:$0xff] }
0x200c   :  { %v3475_v27 = vpop.f32.mrf.mxu2 }
0x200d   :  { %v3476_v13 = vadd.f32 %v6786_v6, %v3475_v27  ;;  %v8572_v6 = vld [vmem:[%s9475_s2 + $0x3e0] sm:$0xff] }
0x200e   :  { %v8583_v27 = vld [vmem:[%s9477_s4 + $0x40] sm:$0xff] }
0x200f   :  { %6421 = vmatpush.xpose.msk.msra.mxu0 %vm240_vm1, %v3476_v13  ;;  %3443 = vmatpush.msrb.mxu1 %v8583_v27 }
0x2071   :  { %v3240_v55 = vpop.xlane.xlu2 %3239 }
0x2072   :  { %v3241_v45 = vsub.f32 %v3235_v38, %v3240_v55  ;;  %v8590_v55 = vld [vmem:[%s9475_s2 + $0x478] sm:$0xff] }
0x2074   :  { %v3242_v4 = vmul.f32 1.442695, %v3241_v45 }
0x2076   :  { %6898 = vpow2.f32 %v3242_v4  ;;  %v8596_v4 = vld [vmem:[%s9475_s2 + $0x470] sm:$0xff] }
0x2079   :  { %v3365_v34 = vpop.xlane.xlu0 %3364 }
0x207a   :  { %v3366_v29 = vsub.f32 %v3360_v60, %v3365_v34  ;;  %v8560_v60 = vld [vmem:[%s9475_s2 + $0x3f0] sm:$0xff]  ;;  %v8602_v34 = vld [vmem:[%s9476_s3 + $0x1a] ss:$0 sm:$0xff] }
0x207c   :  { %v6899_v7 = vpop.eup %6898  ;;  %v3367_v57 = vmul.f32 1.442695, %v3366_v29  ;;  %v8607_v29 = vld [vmem:[%s9475_s2 + $0x468] sm:$0xff] }
0x207d   :  { %v3244_v11 = vsel %vm240_vm1, %v6899_v7, 0.0 }
0x207e   :  { %6900 = vpow2.f32 %v3367_v57  ;;  %3245 = vadd.xlane.f32.xlu1 %v3244_v11  ;;  %v8616_v57 = vld [vmem:[%s9475_s2 + $0x460] sm:$0xff]  ;;  %v3114_v11 = vadd.f32 %v8602_v34, %v8446_v52 }
0x2084   :  { %v6901_v40 = vpop.eup %6900 }
0x2085   :  { %v3369_v30 = vsel %vm240_vm1, %v6901_v40, 0.0 }
0x2086   :  { %3370 = vadd.xlane.f32.xlu2 %v3369_v30 }
0x20f1   :  { %v3246_v42 = vpop.xlane.xlu1 %3245 }
0x20f2   :  { %6902 = vrcp.f32 %v3246_v42 }
0x20f8   :  { %v6903_v43 = vpop.eup %6902 }
0x20f9   :  { %v3248_v51 = vmul.f32 %v6903_v43, %v3246_v42  ;;  %v3371_v35 = vpop.xlane.xlu2 %3370  ;;  %v6788_v42 = vld [vmem:[%s9476_s3 + $0x1f] ss:$0 sm:$0xff] }
0x20fa   :  { %6904 = vrcp.f32 %v3371_v35 }
0x20fb   :  { %v3249_v8 = vsub.f32 2.0, %v3248_v51 }
0x20fd   :  { %v3250_v33 = vmul.f32 %v6903_v43, %v3249_v8 }
0x20ff   :  { %v3251_v9 = vmul.f32 %v6899_v7, %v3250_v33  ;;  %v6787_v7 = vld [vmem:[%s9476_s3 + $0x22] ss:$0 sm:$0xff] }
0x2100   :  { %v6905_v1 = vpop.eup %6904 }
0x2101   :  { %v3373_v50 = vmul.f32 %v6905_v1, %v3371_v35  ;;  %6389 = vmatmul.msk.f32.vlgmr.msrb.gmra.mxu3 %vm240_vm1, %v3251_v9 }
0x2102   :  { %3500 = vmatpush.msrb.mxu3 %v8529_v39 }
0x2103   :  { %v3374_v14 = vsub.f32 2.0, %v3373_v50 }
0x2104   :  { %3501 = vmatpush.msrb.mxu3 %v8535_v36 }
0x2105   :  { %v3375_v16 = vmul.f32 %v6905_v1, %v3374_v14 }
0x2106   :  { %3502 = vmatpush.msrb.mxu3 %v8541_v49 }
0x2107   :  { %v3376_v38 = vmul.f32 %v6901_v40, %v3375_v16 }
0x2108   :  { %3503 = vmatpush.msrb.mxu3 %v8547_v32 }
0x2109   :  { %6405 = vmatmul.msk.f32.vlgmr.msra.gmra.mxu3 %vm240_vm1, %v3376_v38  ;;  %v8660_v38 = vld [vmem:[%s9476_s3 + $0x1b] ss:$0 sm:$0xff] }
0x210a   :  { %3619 = vmatpush.msra.mxu3 %v8553_v12 }
0x210c   :  { %3620 = vmatpush.msra.mxu3 %v8560_v60 }
0x210e   :  { %3621 = vmatpush.msra.mxu3 %v8566_v61 }
0x2110   :  { %3622 = vmatpush.msra.mxu3 %v8572_v6 }
0x2111   :  { %6420 = vmatmul.msk.f32.vlgmr.msrb.gmra.mxu3 %vm51_vm0, %v8299_v26 }
0x2119   :  { %6431 = vmatmul.msk.f32.vlgmr.msra.gmra.mxu3 %vm51_vm0, %v8299_v26 }
0x2184   :  { %v3272_v13 = vpop.f32.mrf.mxu3 }
0x2185   :  { %6408 = vmatmul.msk.f32.vlgmr.msrb.gmra.mxu1 %vm240_vm1, %v3272_v13  ;;  %v3147_v13 = vadd.f32 %v8660_v38, %v8448_v62  ;;  %v6792_v62 = vld [vmem:[%s9476_s3 + $0x20] ss:$0 sm:$0xff] }
0x218c   :  { %v3397_v45 = vpop.f32.mrf.mxu3 }
0x218d   :  { %6407 = vmatmul.msk.f32.vlgmr.msrb.gmra.mxu0 %vm240_vm1, %v3397_v45 }
0x218e   :  { %3649 = vmatpush.msrb.mxu0 %v8590_v55 }
0x2190   :  { %3650 = vmatpush.msrb.mxu0 %v8596_v4 }
0x2192   :  { %3651 = vmatpush.msrb.mxu0 %v8607_v29 }
0x2194   :  { %v3505_v40 = vpop.f32.mrf.mxu3  ;;  %3652 = vmatpush.msrb.mxu0 %v8616_v57 }
0x2195   :  { %v3506_v30 = vadd.f32 %v6787_v7, %v3505_v40  ;;  %6422 = vmatmul.msk.f32.vlgmr.msra.gmra.mxu0 %vm240_vm1, %v3114_v11 }
0x2196   :  { %3766 = vmatpush.msra.mxu0 %v8331_v17  ;;  %v8645_v17 = vld [vmem:[%s9477_s4 + $0x50] sm:$0xff] }
0x2197   :  { %3566 = vmatpush.msra.mxu1 %v3506_v30  ;;  %3591 = vmatpush.msra.mxu2 %v8645_v17 }
0x2198   :  { %3767 = vmatpush.msra.mxu0 %v8353_v2 }
0x219a   :  { %3768 = vmatpush.msra.mxu0 %v8375_v25  ;;  %v6789_v25 = vld [vmem:[%s9476_s3 + $0x23] ss:$0 sm:$0xff] }
0x219c   :  { %v3624_v43 = vpop.f32.mrf.mxu3  ;;  %3769 = vmatpush.msra.mxu0 %v8400_v54 }
0x219d   :  { %v3625_v52 = vadd.f32 %v6788_v42, %v3624_v43  ;;  %6437 = vmatmul.msk.f32.vlgmr.msrb.gmra.mxu0 %vm51_vm0, %v8299_v26 }
0x219e   :  { %3886 = vmatpush.msrb.mxu0 %v8341_v22 }
0x219f   :  { %6438 = vmatpush.xpose.msk.msrb.mxu1 %vm240_vm1, %v3625_v52 }
0x21a0   :  { %3887 = vmatpush.msrb.mxu0 %v8365_v10 }
0x21a2   :  { %3888 = vmatpush.msrb.mxu0 %v8388_v47 }
0x21a4   :  { %3889 = vmatpush.msrb.mxu0 %v8412_v20 }
0x21a5   :  { %6448 = vmatmul.msk.f32.vlgmr.msra.gmra.mxu0 %vm51_vm0, %v8428_v28 }
0x21a6   :  { %4004 = vmatpush.msra.mxu0 %v8515_v59 }
0x21ad   :  { %6464 = vmatmul.msk.f32.vlgmr.msrb.gmra.mxu0 %vm51_vm0, %v8428_v28 }
0x220a   :  { %v8648_v22 = vpop.f32.mrf.mxu0 }
0x2212   :  { %v3531_v2 = vpop.f32.mrf.mxu0 }
0x2213   :  { %v3534_v10 = vsel %vm240_vm1, %v3531_v2, -inf }
0x2214   :  { %3535 = vmax.xlane.f32.xlu0 %v3534_v10 }
0x221a   :  { %v3654_v47 = vpop.f32.mrf.mxu0 }
0x221b   :  { %v3655_v54 = vadd.f32 %v6789_v25, %v3654_v47  ;;  %v6791_v25 = vld [vmem:[%s9476_s3 + $0x1d] ss:$0 sm:$0xff] }
0x221d   :  { %3715 = vmatpush.msrb.mxu2 %v3655_v54 }
0x2287   :  { %v3536_v20 = vpop.xlane.xlu0 %3535 }
0x2288   :  { %v3537_v59 = vsub.f32 %v3531_v2, %v3536_v20 }
0x228a   :  { %v3538_v51 = vmul.f32 1.442695, %v3537_v59 }
0x228c   :  { %6906 = vpow2.f32 %v3538_v51  ;;  %v3051_v51 = vadd.f32 %v8473_v18, %v8454_v41  ;;  %v6793_v18 = vld [vmem:[%s9476_s3 + $0x21] ss:$0 sm:$0xff] }
0x2292   :  { %v6907_v35 = vpop.eup %6906 }
0x2293   :  { %v3540_v8 = vsel %vm240_vm1, %v6907_v35, 0.0 }
0x2294   :  { %3541 = vadd.xlane.f32.xlu1 %v3540_v8  ;;  %v6794_v8 = vld [vmem:[%s9476_s3 + $0x1e] ss:$0 sm:$0xff] }
0x2307   :  { %v3542_v33 = vpop.xlane.xlu1 %3541 }
0x2308   :  { %6908 = vrcp.f32 %v3542_v33 }
0x230e   :  { %v6909_v9 = vpop.eup %6908 }
0x230f   :  { %v3544_v1 = vmul.f32 %v6909_v9, %v3542_v33 }
0x2311   :  { %v3545_v50 = vsub.f32 2.0, %v3544_v1 }
0x2313   :  { %v3546_v14 = vmul.f32 %v6909_v9, %v3545_v50 }
0x2315   :  { %v3547_v16 = vmul.f32 %v6907_v35, %v3546_v14  ;;  %v3084_v35 = vadd.f32 %v8493_v15, %v8456_v3 }
0x2317   :  { %6423 = vmatmul.msk.f32.vlgmr.msra.gmra.mxu1 %vm240_vm1, %v3547_v16 }
0x2318   :  { %3794 = vmatpush.msra.mxu1 %v8336_v58  ;;  %v8680_v58 = vld [vmem:[%s9477_s4 + $0x58] sm:$0xff] }
0x2319   :  { %3740 = vmatpush.msrb.mxu3 %v8680_v58 }
0x231a   :  { %3795 = vmatpush.msra.mxu1 %v8358_v46  ;;  %v6790_v46 = vld [vmem:[%s9476_s3 + $0x1c] ss:$0 sm:$0xff] }
0x231c   :  { %3796 = vmatpush.msra.mxu1 %v8383_v63 }
0x231e   :  { %3797 = vmatpush.msra.mxu1 %v8405_v5 }
0x231f   :  { %6439 = vmatmul.msk.f32.vlgmr.msrb.gmra.mxu1 %vm240_vm1, %v3147_v13 }
0x2320   :  { %3914 = vmatpush.msrb.mxu1 %v8348_v23  ;;  %v8683_v23 = vpop.f32.mrf.mxu1 }
0x2322   :  { %3915 = vmatpush.msrb.mxu1 %v8370_v37  ;;  %v3771_v37 = vpop.f32.mrf.mxu0 }
0x2323   :  { %v3772_v63 = vadd.f32 %v6790_v46, %v3771_v37 }
0x2324   :  { %3916 = vmatpush.msrb.mxu1 %v8393_v48 }
0x2326   :  { %3917 = vmatpush.msrb.mxu1 %v8417_v21 }
0x2327   :  { %6454 = vmatmul.msk.f32.vlgmr.msra.gmra.mxu1 %vm51_vm0, %v8428_v28 }
0x2328   :  { %4027 = vmatpush.msra.mxu1 %v8583_v27 }
0x232a   :  { %v3891_v47 = vpop.f32.mrf.mxu0 }
0x232b   :  { %v3892_v59 = vadd.f32 %v6791_v25, %v3891_v47 }
0x232f   :  { %6470 = vmatmul.msk.f32.vlgmr.msrb.gmra.mxu1 %vm51_vm0, %v8428_v28 }
0x2394   :  { %v3568_v48 = vpop.f32.mrf.mxu1 }
0x2395   :  { %6425 = vmatmul.msk.f32.vlgmr.msra.gmra.mxu2 %vm240_vm1, %v3568_v48 }
0x2396   :  { %6455 = vmatpush.xpose.msk.msra.mxu2 %vm240_vm1, %v3772_v63 }
0x239c   :  { %v3680_v5 = vpop.f32.mrf.mxu1 }
0x239d   :  { %v3683_v21 = vsel %vm240_vm1, %v3680_v5, -inf }
0x239e   :  { %3684 = vmax.xlane.f32.xlu2 %v3683_v21 }
0x23a4   :  { %v3799_v27 = vpop.f32.mrf.mxu1 }
0x23a5   :  { %v3800_v45 = vadd.f32 %v6792_v62, %v3799_v27 }
0x23a7   :  { %3860 = vmatpush.msra.mxu3 %v3800_v45 }
0x2411   :  { %v3685_v7 = vpop.xlane.xlu2 %3684 }
0x2412   :  { %v3686_v11 = vsub.f32 %v3680_v5, %v3685_v7 }
0x2414   :  { %v3687_v40 = vmul.f32 1.442695, %v3686_v11 }
0x2416   :  { %6910 = vpow2.f32 %v3687_v40 }
0x2418   :  { %v8713_v41 = vpop.f32.mrf.mxu2 }
0x241c   :  { %v6911_v30 = vpop.eup %6910 }
0x241d   :  { %v3689_v42 = vsel %vm240_vm1, %v6911_v30, 0.0 }
0x241e   :  { %3690 = vadd.xlane.f32.xlu0 %v3689_v42 }
0x2491   :  { %v3691_v43 = vpop.xlane.xlu0 %3690 }
0x2492   :  { %6912 = vrcp.f32 %v3691_v43 }
0x2498   :  { %v6913_v52 = vpop.eup %6912 }
0x2499   :  { %v3693_v2 = vmul.f32 %v6913_v52, %v3691_v43 }
0x249b   :  { %v3694_v10 = vsub.f32 2.0, %v3693_v2 }
0x249d   :  { %v3695_v54 = vmul.f32 %v6913_v52, %v3694_v10 }
0x249f   :  { %v3696_v20 = vmul.f32 %v6911_v30, %v3695_v54 }
0x24a1   :  { %6440 = vmatmul.msk.f32.vlgmr.msrb.gmra.mxu2 %vm240_vm1, %v3696_v20  ;;  %v3446_v20 = vadd.f32 %v8683_v23, %v8648_v22 }
0x24a2   :  { %6471 = vmatpush.xpose.msk.msrb.mxu2 %vm240_vm1, %v3892_v59  ;;  %v8771_v59 = vld [vmem:[%s9478_s5 + $0x10] sm:$0xff] }
0x24a9   :  { %6456 = vmatmul.msk.f32.vlgmr.msra.gmra.mxu2 %vm240_vm1, %v3051_v51  ;;  %v3596_v51 = vadd.f32 %v8713_v41, %v3446_v20 }
0x24aa   :  { %4052 = vmatpush.msra.mxu2 %v8481_v53  ;;  %v3919_v53 = vpop.f32.mrf.mxu1 }
0x24ac   :  { %4053 = vmatpush.msra.mxu2 %v8487_v56  ;;  %v3920_v56 = vadd.f32 %v6793_v18, %v3919_v53  ;;  %v4320_v18 = vperm.slane %v8771_v59, 0 }
0x24ae   :  { %4054 = vmatpush.msra.mxu2 %v8498_v24 }
0x24b0   :  { %4055 = vmatpush.msra.mxu2 %v8504_v19 }
0x24b1   :  { %6472 = vmatmul.msk.f32.vlgmr.msrb.gmra.mxu2 %vm240_vm1, %v3084_v35 }
0x24b2   :  { %4170 = vmatpush.msrb.mxu2 %v8645_v17 }
0x24b9   :  { %6482 = vmatmul.msk.f32.vlgmr.msra.gmra.mxu2 %vm51_vm0, %v8428_v28 }
0x2524   :  { %v3717_v24 = vpop.f32.mrf.mxu2 }
0x2525   :  { %6442 = vmatmul.msk.f32.vlgmr.msrb.gmra.mxu3 %vm240_vm1, %v3717_v24 }
0x2526   :  { %3980 = vmatpush.msrb.mxu3 %v3920_v56 }
0x252c   :  { %v3825_v3 = vpop.f32.mrf.mxu2 }
0x252d   :  { %v3828_v15 = vsel %vm240_vm1, %v3825_v3, -inf }
0x252e   :  { %3829 = vmax.xlane.f32.xlu1 %v3828_v15 }
0x2534   :  { %v3945_v19 = vpop.f32.mrf.mxu2 }
0x2535   :  { %v3948_v17 = vsel %vm240_vm1, %v3945_v19, -inf }
0x2536   :  { %3949 = vmax.xlane.f32.xlu2 %v3948_v17 }
0x253c   :  { %v4057_v33 = vpop.f32.mrf.mxu2 }
0x253d   :  { %v4058_v9 = vadd.f32 %v6794_v8, %v4057_v33  ;;  %v3150_v33 = vadd.f32 %v8660_v38, %v8452_v0 }
0x253f   :  { %6489 = vmatpush.xpose.msk.msrb.mxu0 %vm240_vm1, %v4058_v9 }
0x25a1   :  { %v3830_v1 = vpop.xlane.xlu1 %3829 }
0x25a2   :  { %v3831_v50 = vsub.f32 %v3825_v3, %v3830_v1 }
0x25a4   :  { %v3832_v14 = vmul.f32 1.442695, %v3831_v50 }
0x25a6   :  { %6914 = vpow2.f32 %v3832_v14 }
0x25a9   :  { %v3950_v16 = vpop.xlane.xlu2 %3949 }
0x25aa   :  { %v3951_v13 = vsub.f32 %v3945_v19, %v3950_v16 }
0x25ac   :  { %v6915_v46 = vpop.eup %6914  ;;  %v3952_v37 = vmul.f32 1.442695, %v3951_v13 }
0x25ad   :  { %v3834_v63 = vsel %vm240_vm1, %v6915_v46, 0.0 }
0x25ae   :  { %6916 = vpow2.f32 %v3952_v37  ;;  %3835 = vadd.xlane.f32.xlu0 %v3834_v63 }
0x25b4   :  { %v6917_v48 = vpop.eup %6916 }
0x25b5   :  { %v3954_v5 = vsel %vm240_vm1, %v6917_v48, 0.0 }
0x25b6   :  { %3955 = vadd.xlane.f32.xlu1 %v3954_v5 }
0x2621   :  { %v3836_v21 = vpop.xlane.xlu0 %3835 }
0x2622   :  { %6918 = vrcp.f32 %v3836_v21 }
0x2628   :  { %v6919_v62 = vpop.eup %6918 }
0x2629   :  { %v3838_v27 = vmul.f32 %v6919_v62, %v3836_v21  ;;  %v3956_v45 = vpop.xlane.xlu1 %3955  ;;  %v6514_v21 = vld [vmem:[%s9475_s2 + $0x498] sm:$0xff] }
0x262a   :  { %6920 = vrcp.f32 %v3956_v45 }
0x262b   :  { %v3839_v7 = vsub.f32 2.0, %v3838_v27  ;;  %v6528_v27 = vld [vmem:[%s9475_s2 + $0x4d8] sm:$0xff] }
0x262d   :  { %v3840_v11 = vmul.f32 %v6919_v62, %v3839_v7  ;;  %v6521_v62 = vld [vmem:[%s9475_s2 + $0x4b8] sm:$0xff]  ;;  %v6513_v7 = vld [vmem:[%s9475_s2 + $0x490] sm:$0xff] }
0x262f   :  { %v3841_v40 = vmul.f32 %v6915_v46, %v3840_v11  ;;  %v6520_v11 = vld [vmem:[%s9475_s2 + $0x4b0] sm:$0xff] }
0x2630   :  { %v6921_v30 = vpop.eup %6920 }
0x2631   :  { %v3958_v42 = vmul.f32 %v6921_v30, %v3956_v45  ;;  %6457 = vmatmul.msk.f32.vlgmr.msra.gmra.mxu3 %vm240_vm1, %v3841_v40  ;;  %v6527_v40 = vld [vmem:[%s9475_s2 + $0x4d0] sm:$0xff] }
0x2632   :  { %4080 = vmatpush.msra.mxu3 %v8529_v39  ;;  %v3742_v39 = vpop.f32.mrf.mxu3 }
0x2633   :  { %v3959_v43 = vsub.f32 2.0, %v3958_v42  ;;  %v3745_v35 = vadd.f32 %v3742_v39, %v3596_v51  ;;  %v6519_v42 = vld [vmem:[%s9475_s2 + $0x4a8] sm:$0xff]  ;;  %v6525_v39 = vld [vmem:[%s9475_s2 + $0x4c0] sm:$0xff] }
0x2634   :  { %4081 = vmatpush.msra.mxu3 %v8535_v36 }
0x2635   :  { %v3960_v52 = vmul.f32 %v6921_v30, %v3959_v43  ;;  %v4321_v56 = vadd.f32 %v4320_v18, %v3745_v35  ;;  %v6512_v30 = vld [vmem:[%s9475_s2 + $0x488] sm:$0xff] }
0x2636   :  { %4082 = vmatpush.msra.mxu3 %v8541_v49  ;;  %v6526_v43 = vld [vmem:[%s9475_s2 + $0x4c8] sm:$0xff] }
0x2637   :  { %v3961_v2 = vmul.f32 %v6917_v48, %v3960_v52  ;;  %v4323_v22 = vadd.f32 %v4321_v56, %v8299_v26  ;;  %v6511_v52 = vld [vmem:[%s9475_s2 + $0x480] sm:$0xff]  ;;  %v6534_v56 = vld [vmem:[%s9475_s2 + $0x4f0] sm:$0xff] }
0x2638   :  { %4083 = vmatpush.msra.mxu3 %v8547_v32  ;;  %v6795_v32 = vld [vmem:[%s9476_s3 + $0x22] ss:$0 sm:$0xff] }
0x2639   :  { %6473 = vmatmul.msk.f32.vlgmr.msrb.gmra.mxu3 %vm240_vm1, %v3961_v2  ;;  %v4325_v23 = vsel %vm51_vm0, %v4323_v22, 0.0  ;;  %v6518_v2 = vld [vmem:[%s9475_s2 + $0x4a0] sm:$0xff] }
0x263a   :  { %4196 = vmatpush.msrb.mxu3 %v8553_v12  ;;  %v3117_v12 = vadd.f32 %v8602_v34, %v8450_v31 }
0x263c   :  { %4197 = vmatpush.msrb.mxu3 %v8560_v60 }
0x263e   :  { %4198 = vmatpush.msrb.mxu3 %v8566_v61 }
0x2640   :  { %4199 = vmatpush.msrb.mxu3 %v8572_v6  ;;  %v6796_v6 = vld [vmem:[%s9476_s3 + $0x1f] ss:$0 sm:$0xff] }
0x2641   :  { %6488 = vmatmul.msk.f32.vlgmr.msra.gmra.mxu3 %vm51_vm0, %v8428_v28 }
0x2642   :  { %4314 = vmatpush.msra.mxu3 %v8680_v58 }
0x2649   :  { %6499 = vmatmul.msk.f32.vlgmr.msrb.gmra.mxu3 %vm51_vm0, %v8428_v28 }
0x26b4   :  { %v3862_v36 = vpop.f32.mrf.mxu3 }
0x26b5   :  { %6476 = vmatmul.msk.f32.vlgmr.msra.gmra.mxu1 %vm240_vm1, %v3862_v36 }
0x26bc   :  { %v3982_v49 = vpop.f32.mrf.mxu3 }
0x26bd   :  { %6475 = vmatmul.msk.f32.vlgmr.msra.gmra.mxu0 %vm240_vm1, %v3982_v49 }
0x26be   :  { %4224 = vmatpush.msra.mxu0 %v8590_v55 }
0x26c0   :  { %4225 = vmatpush.msra.mxu0 %v8596_v4 }
0x26c2   :  { %4226 = vmatpush.msra.mxu0 %v8607_v29 }
0x26c4   :  { %v4085_v60 = vpop.f32.mrf.mxu3  ;;  %4227 = vmatpush.msra.mxu0 %v8616_v57  ;;  %v6797_v57 = vld [vmem:[%s9476_s3 + $0x23] ss:$0 sm:$0xff] }
0x26c5   :  { %v4086_v61 = vadd.f32 %v6795_v32, %v4085_v60  ;;  %6490 = vmatmul.msk.f32.vlgmr.msrb.gmra.mxu0 %vm240_vm1, %v3117_v12 }
0x26c6   :  { %4403 = vmatpush.msrb.mxu0 %v6514_v21 }
0x26c7   :  { %4146 = vmatpush.msrb.mxu1 %v4086_v61 }
0x26c8   :  { %4404 = vmatpush.msrb.mxu0 %v6513_v7 }
0x26ca   :  { %4405 = vmatpush.msrb.mxu0 %v6512_v30 }
0x26cc   :  { %v4201_v55 = vpop.f32.mrf.mxu3  ;;  %4406 = vmatpush.msrb.mxu0 %v6511_v52  ;;  %v6802_v52 = vld [vmem:[%s9476_s3 + $0x28] ss:$0 sm:$0xff] }
0x26cd   :  { %v4202_v4 = vadd.f32 %v6796_v6, %v4201_v55  ;;  %6505 = vmatmul.msk.f32.vlgmr.msra.gmra.mxu0 %vm51_vm0, %v8428_v28 }
0x26cf   :  { %6506 = vmatpush.xpose.msk.msra.mxu1 %vm240_vm1, %v4202_v4 }
0x2732   :  { %v8784_v9 = vpop.f32.mrf.mxu1 }
0x273a   :  { %v8760_v29 = vpop.f32.mrf.mxu0 }
0x2742   :  { %v4111_v31 = vpop.f32.mrf.mxu0 }
0x2743   :  { %v4114_v34 = vsel %vm240_vm1, %v4111_v31, -inf }
0x2744   :  { %4115 = vmax.xlane.f32.xlu2 %v4114_v34 }
0x274a   :  { %v4229_v58 = vpop.f32.mrf.mxu0 }
0x274b   :  { %v4230_v10 = vadd.f32 %v6797_v57, %v4229_v58 }
0x274d   :  { %4290 = vmatpush.msra.mxu2 %v4230_v10 }
0x27b7   :  { %v4116_v25 = vpop.xlane.xlu2 %4115 }
0x27b8   :  { %v4117_v47 = vsub.f32 %v4111_v31, %v4116_v25  ;;  %v4369_v25 = vperm.slane %v8771_v59, 3 }
0x27ba   :  { %v4118_v54 = vmul.f32 1.442695, %v4117_v47 }
0x27bc   :  { %6922 = vpow2.f32 %v4118_v54  ;;  %v4372_v54 = vperm.slane %v8771_v59, 4 }
0x27c2   :  { %v6923_v53 = vpop.eup %6922 }
0x27c3   :  { %v4120_v24 = vsel %vm240_vm1, %v6923_v53, 0.0 }
0x27c4   :  { %4121 = vadd.xlane.f32.xlu0 %v4120_v24  ;;  %v6533_v24 = vld [vmem:[%s9475_s2 + $0x4e8] sm:$0xff] }
0x27cc   :  { %4326 = vadd.xlane.f32.xlu0 %v4325_v23 }
0x2837   :  { %v4122_v3 = vpop.xlane.xlu0 %4121 }
0x2838   :  { %6924 = vrcp.f32 %v4122_v3 }
0x283e   :  { %v6925_v15 = vpop.eup %6924 }
0x283f   :  { %v4124_v19 = vmul.f32 %v6925_v15, %v4122_v3  ;;  %v4327_v46 = vpop.xlane.xlu0 %4326 }
0x2840   :  { %v4331_v37 = vmul.f32 %v4327_v46, %v7571_v44  ;;  %v8883_v46 = vld [vmem:[%s9475_s2 + $0x500] sm:$0xff] }
0x2841   :  { %v4125_v41 = vsub.f32 2.0, %v4124_v19 }
0x2842   :  { %v4333_v0 = vsub.f32 %v4323_v22, %v4331_v37  ;;  %v6532_v22 = vld [vmem:[%s9475_s2 + $0x4e0] sm:$0xff] }
0x2843   :  { %v4126_v17 = vmul.f32 %v6925_v15, %v4125_v41  ;;  %v4030_v15 = vadd.f32 %v8784_v9, %v8760_v29  ;;  %v8865_v29 = vld [vmem:[%s9475_s2 + $0x518] sm:$0xff] }
0x2844   :  { %v4335_v48 = vmul.f32 %v4333_v0, %v4333_v0  ;;  %4535 = vmatpush.msra.mxu0 %v8865_v29 }
0x2845   :  { %v4127_v8 = vmul.f32 %v6923_v53, %v4126_v17  ;;  %v6535_v53 = vld [vmem:[%s9475_s2 + $0x4f8] sm:$0xff] }
0x2846   :  { %v4337_v5 = vsel %vm51_vm0, %v4335_v48, 0.0  ;;  %4502 = vmatpush.msrb.mxu3 %v6535_v53  ;;  %v8993_v53 = vld [vmem:[%s9476_s3 + $0x25] ss:$0 sm:$0xff] }
0x2847   :  { %6491 = vmatmul.msk.f32.vlgmr.msrb.gmra.mxu1 %vm240_vm1, %v4127_v8 }
0x2848   :  { %4436 = vmatpush.msrb.mxu1 %v6521_v62  ;;  %4503 = vmatpush.msrb.mxu3 %v6534_v56 }
0x284a   :  { %4437 = vmatpush.msrb.mxu1 %v6520_v11  ;;  %4504 = vmatpush.msrb.mxu3 %v6533_v24  ;;  %v8900_v11 = vld [vmem:[%s9474_s1] sm:$0xff] }
0x284c   :  { %4438 = vmatpush.msrb.mxu1 %v6519_v42  ;;  %4505 = vmatpush.msrb.mxu3 %v6532_v22 }
0x284e   :  { %4439 = vmatpush.msrb.mxu1 %v6518_v2 }
0x284f   :  { %6507 = vmatmul.msk.f32.vlgmr.msra.gmra.mxu1 %vm240_vm1, %v3150_v33 }
0x28c4   :  { %v4148_v26 = vpop.f32.mrf.mxu1 }
0x28c5   :  { %6493 = vmatmul.msk.f32.vlgmr.msrb.gmra.mxu2 %vm240_vm1, %v4148_v26 }
0x28c6   :  { %4469 = vmatpush.msrb.mxu2 %v6528_v27 }
0x28c8   :  { %4470 = vmatpush.msrb.mxu2 %v6527_v40  ;;  %v8907_v40 = vld [vmem:[%s9474_s1 + $0x8] sm:$0x3] }
0x28ca   :  { %4471 = vmatpush.msrb.mxu2 %v6526_v43 }
0x28cc   :  { %v4255_v1 = vpop.f32.mrf.mxu1  ;;  %4472 = vmatpush.msrb.mxu2 %v6525_v39 }
0x28cd   :  { %v4258_v50 = vsel %vm240_vm1, %v4255_v1, -inf }
0x28ce   :  { %4259 = vmax.xlane.f32.xlu1 %v4258_v50 }
0x2941   :  { %v4260_v14 = vpop.xlane.xlu1 %4259 }
0x2942   :  { %v4261_v16 = vsub.f32 %v4255_v1, %v4260_v14 }
0x2944   :  { %v4262_v13 = vmul.f32 1.442695, %v4261_v16 }
0x2946   :  { %6926 = vpow2.f32 %v4262_v13 }
0x2948   :  { %v4172_v23 = vpop.f32.mrf.mxu2 }
0x2949   :  { %v4175_v19 = vadd.f32 %v4172_v23, %v4030_v15 }
0x294c   :  { %v6927_v63 = vpop.eup %6926 }
0x294d   :  { %v4264_v38 = vsel %vm240_vm1, %v6927_v63, 0.0 }
0x294e   :  { %4265 = vadd.xlane.f32.xlu2 %v4264_v38 }
0x2956   :  { %4338 = vadd.xlane.f32.xlu2 %v4337_v5 }
0x29c1   :  { %v4266_v45 = vpop.xlane.xlu2 %4265 }
0x29c2   :  { %6928 = vrcp.f32 %v4266_v45 }
0x29c8   :  { %v6929_v36 = vpop.eup %6928 }
0x29c9   :  { %v4268_v49 = vmul.f32 %v6929_v36, %v4266_v45  ;;  %v4339_v32 = vpop.xlane.xlu2 %4338 }
0x29ca   :  { %v4343_v12 = vmul.f32 %v4339_v32, %v7571_v44  ;;  %v8925_v32 = vld [vmem:[%s9475_s2 + $0x538] sm:$0xff] }
0x29cb   :  { %v4269_v60 = vsub.f32 2.0, %v4268_v49 }
0x29cc   :  { %v4345_v61 = vadd.f32 1e-05, %v4343_v12 }
0x29cd   :  { %v4270_v6 = vmul.f32 %v6929_v36, %v4269_v60  ;;  %v8920_v36 = vld [vmem:[%s9476_s3 + $0x24] ss:$0 sm:$0xff]  ;;  %v8933_v60 = vld [vmem:[%s9475_s2 + $0x530] sm:$0xff] }
0x29ce   :  { %6930 = vrsqrt.f32 %v4345_v61  ;;  %vm4353_vm13 = vweird.f32 %v4345_v61 }
0x29cf   :  { %v4271_v55 = vmul.f32 %v6927_v63, %v4270_v6  ;;  %v8945_v6 = vld [vmem:[%s9475_s2 + $0x520] sm:$0xff] }
0x29d1   :  { %6508 = vmatmul.msk.f32.vlgmr.msra.gmra.mxu2 %vm240_vm1, %v4271_v55 }
0x29d4   :  { %v6931_v4 = vpop.eup %6930 }
0x29d5   :  { %v4348_v31 = vmul.f32 %v6931_v4, %v4345_v61  ;;  %vm4354_vm12 = vweird.f32 %v6931_v4  ;;  %v8939_v61 = vld [vmem:[%s9475_s2 + $0x528] sm:$0xff] }
0x29d6   :  { %vm4355_vm15 = vmor %vm4353_vm13, %vm4354_vm12 }
0x29d7   :  { %v4349_v34 = vmul.f32 %v6931_v4, %v4348_v31  ;;  %v8960_v31 = vld [vmem:[%s9475_s2 + $0x598] sm:$0xff] }
0x29d8   :  { %4568 = vmatpush.msra.mxu1 %v8960_v31 }
0x29d9   :  { %v4350_v57 = vmul.f32 0.5, %v4349_v34  ;;  %v8965_v34 = vld [vmem:[%s9475_s2 + $0x590] sm:$0xff] }
0x29da   :  { %4569 = vmatpush.msra.mxu1 %v8965_v34 }
0x29db   :  { %v4351_v58 = vsub.f32 1.5, %v4350_v57  ;;  %v8971_v57 = vld [vmem:[%s9475_s2 + $0x588] sm:$0xff] }
0x29dc   :  { %4570 = vmatpush.msra.mxu1 %v8971_v57 }
0x29dd   :  { %v4352_v10 = vmul.f32 %v6931_v4, %v4351_v58  ;;  %v8977_v58 = vld [vmem:[%s9475_s2 + $0x580] sm:$0xff] }
0x29de   :  { %4571 = vmatpush.msra.mxu1 %v8977_v58 }
0x29df   :  { %v4356_v47 = vsel %vm4355_vm15, %v6931_v4, %v4352_v10 }
0x29e0   :  { %v4367_v20 = vmul.f32 %v4356_v47, %v4333_v0 }
0x29e2   :  { %v4370_v51 = vmul.f32 %v4369_v25, %v4367_v20 }
0x29e4   :  { %v8831_v35 = vadd.f32 %v4372_v54, %v4370_v51 }
0x29e6   :  { %6516 = vmatmul.msk.f32.vlgmr.msrb.gmra.mxu0 %vm51_vm0, %v8831_v35  ;;  %6523 = vmatmul.msk.f32.vlgmr.msrb.gmra.mxu1 %vm51_vm0, %v8831_v35 }
0x29e7   :  { %6530 = vmatmul.msk.f32.vlgmr.msrb.gmra.mxu2 %vm51_vm0, %v8831_v35 }
0x2a54   :  { %v4292_v3 = vpop.f32.mrf.mxu2 }
0x2a55   :  { %6510 = vmatmul.msk.f32.vlgmr.msra.gmra.mxu3 %vm240_vm1, %v4292_v3 }
0x2a5d   :  { %6537 = vmatmul.msk.f32.vlgmr.msrb.gmra.mxu3 %vm51_vm0, %v8831_v35 }
0x2a63   :  { %v4408_v30 = vpop.f32.mrf.mxu0  ;;  %v4441_v56 = vpop.f32.mrf.mxu1 }
0x2a64   :  { %v4409_v12 = vadd.f32 %v8920_v36, %v4408_v30  ;;  %v4442_v22 = vadd.f32 %v8993_v53, %v4441_v56 }
0x2a6a   :  { %v8953_v55 = vpop.f32.mrf.mxu2 }
0x2ad8   :  { %v4316_v41 = vpop.f32.mrf.mxu3 }
0x2ad9   :  { %v4319_v17 = vadd.f32 %v4316_v41, %v4175_v19 }
0x2adb   :  { %v4322_v8 = vadd.f32 %v4320_v18, %v4319_v17  ;;  %v8876_v18 = vld [vmem:[%s9475_s2 + $0x508] sm:$0xff] }
0x2add   :  { %v4324_v33 = vadd.f32 %v4322_v8, %v8428_v28  ;;  %v8870_v28 = vld [vmem:[%s9475_s2 + $0x510] sm:$0xff] }
0x2ade   :  { %4536 = vmatpush.msra.mxu0 %v8870_v28 }
0x2adf   :  { %v4328_v26 = vsel %vm51_vm0, %v4324_v33, 0.0 }
0x2ae0   :  { %4329 = vadd.xlane.f32.xlu1 %v4328_v26  ;;  %4537 = vmatpush.msra.mxu0 %v8876_v18 }
0x2ae2   :  { %4538 = vmatpush.msra.mxu0 %v8883_v46 }
0x2b53   :  { %v4330_v1 = vpop.xlane.xlu1 %4329 }
0x2b54   :  { %v4332_v50 = vmul.f32 %v4330_v1, %v7571_v44 }
0x2b56   :  { %v4334_v14 = vsub.f32 %v4324_v33, %v4332_v50  ;;  %v6804_v33 = vld [vmem:[%s9476_s3 + $0x2c] ss:$0 sm:$0xff] }
0x2b58   :  { %v4336_v16 = vmul.f32 %v4334_v14, %v4334_v14 }
0x2b5a   :  { %v4340_v13 = vsel %vm51_vm0, %v4336_v16, 0.0 }
0x2b5b   :  { %4341 = vadd.xlane.f32.xlu0 %v4340_v13  ;;  %v9009_v13 = vld [vmem:[%s9475_s2 + $0x5b8] sm:$0xff] }
0x2bce   :  { %v4342_v59 = vpop.xlane.xlu0 %4341 }
0x2bcf   :  { %v4344_v9 = vmul.f32 %v4342_v59, %v7571_v44  ;;  %v9014_v59 = vld [vmem:[%s9475_s2 + $0x5b0] sm:$0xff] }
0x2bd1   :  { %v4346_v37 = vadd.f32 1e-05, %v4344_v9  ;;  %v9020_v9 = vld [vmem:[%s9475_s2 + $0x5a8] sm:$0xff] }
0x2bd3   :  { %6932 = vrsqrt.f32 %v4346_v37  ;;  %vm4363_vm3 = vweird.f32 %v4346_v37 }
0x2bd9   :  { %v6933_v63 = vpop.eup %6932 }
0x2bda   :  { %v4358_v0 = vmul.f32 %v6933_v63, %v4346_v37  ;;  %vm4364_vm2 = vweird.f32 %v6933_v63  ;;  %v9026_v37 = vld [vmem:[%s9475_s2 + $0x5a0] sm:$0xff] }
0x2bdb   :  { %vm4365_vm4 = vmor %vm4363_vm3, %vm4364_vm2 }
0x2bdc   :  { %v4359_v38 = vmul.f32 %v6933_v63, %v4358_v0  ;;  %v9033_v0 = vld [vmem:[%s9475_s2 + $0x558] sm:$0xff] }
0x2bde   :  { %v4360_v48 = vmul.f32 0.5, %v4359_v38  ;;  %v9038_v38 = vld [vmem:[%s9475_s2 + $0x550] sm:$0xff] }
0x2be0   :  { %v4361_v5 = vsub.f32 1.5, %v4360_v48  ;;  %v9044_v48 = vld [vmem:[%s9475_s2 + $0x548] sm:$0xff] }
0x2be2   :  { %v4362_v21 = vmul.f32 %v6933_v63, %v4361_v5 }
0x2be4   :  { %v4366_v62 = vsel %vm4365_vm4, %v6933_v63, %v4362_v21 }
0x2be5   :  { %v4368_v27 = vmul.f32 %v4366_v62, %v4334_v14  ;;  %v9050_v62 = vld [vmem:[%s9475_s2 + $0x540] sm:$0xff] }
0x2be7   :  { %v4371_v45 = vmul.f32 %v4369_v25, %v4368_v27 }
0x2be9   :  { %v8887_v7 = vadd.f32 %v4372_v54, %v4371_v45  ;;  %v6803_v54 = vld [vmem:[%s9476_s3 + $0x29] ss:$0 sm:$0xff] }
0x2beb   :  { %6517 = vmatmul.msk.f32.gmra.mxu0 %vm51_vm0, %v8887_v7  ;;  %6524 = vmatmul.msk.f32.gmra.mxu1 %vm51_vm0, %v8887_v7 }
0x2bec   :  { %6531 = vmatmul.msk.f32.gmra.mxu2 %vm51_vm0, %v8887_v7  ;;  %6538 = vmatmul.msk.f32.gmra.mxu3 %vm51_vm0, %v8887_v7 }
0x2bf3   :  { %6544 = vmatmul.msk.f32.vlgmr.msra.gmra.mxu0 %vm51_vm0, %v8900_v11  ;;  %6551 = vmatmul.msk.f32.vlgmr.msra.gmra.mxu1 %vm51_vm0, %v8900_v11 }
0x2bfb   :  { %6545 = vmatmul.msk.f32.gmra.mxu0 %vm51_vm0, %v8907_v40  ;;  %6552 = vmatmul.msk.f32.gmra.mxu1 %vm51_vm0, %v8907_v40 }
0x2c68   :  { %v8911_v42 = vpop.f32.mrf.mxu0  ;;  %v8998_v15 = vpop.f32.mrf.mxu1 }
0x2c6f   :  { %v8955_v4 = vpop.f32.mrf.mxu2 }
0x2c70   :  { %v4540_v43 = vpop.f32.mrf.mxu0  ;;  %v4573_v41 = vpop.f32.mrf.mxu1 }
0x2c71   :  { %v4541_v49 = vadd.f32 %v6802_v52, %v4540_v43  ;;  %v4574_v1 = vadd.f32 %v6804_v33, %v4573_v41 }
0x2c78   :  { %v4543_v2 = vpop.f32.mrf.mxu0  ;;  %v4576_v26 = vpop.f32.mrf.mxu1 }
0x2c79   :  { %v4544_v39 = vadd.f32 %v6802_v52, %v4543_v2  ;;  %v4577_v50 = vadd.f32 %v6804_v33, %v4576_v26 }
0x2c7b   :  { %6553 = vmatpush.xpose.msk.msra.mxu2 %vm240_vm1, %v4544_v39  ;;  %6556 = vmatpush.msk.msra.mxu3 %vm1667_vm10, %v4577_v50 }
0x2c7d   :  { %4643 = vmatpush.msra.mxu3 %v4574_v1 }
0x2c7f   :  { %6554 = vmatpush.xpose.msk.msra.mxu2 %vm240_vm1, %v4541_v49  ;;  %4705 = vmatpush.msrb.mxu3 %v9009_v13 }
0x2c81   :  { %4706 = vmatpush.msrb.mxu3 %v9014_v59 }
0x2c82   :  { %6555 = vmatmul.msk.f32.vlgmr.msra.gmra.mxu2 %vm240_vm1, %v4409_v12  ;;  %v9064_v12 = vpop.f32.mrf.mxu3 }
0x2c83   :  { %4672 = vmatpush.msrb.mxu2 %v8925_v32  ;;  %4707 = vmatpush.msrb.mxu3 %v9020_v9 }
0x2c85   :  { %4673 = vmatpush.msrb.mxu2 %v8933_v60  ;;  %4708 = vmatpush.msrb.mxu3 %v9026_v37 }
0x2c87   :  { %4674 = vmatpush.msrb.mxu2 %v8939_v61 }
0x2c89   :  { %4675 = vmatpush.msrb.mxu2 %v8945_v6 }
0x2c8a   :  { %6564 = vmatmul.msk.f32.vlgmr.msrb.gmra.mxu2 %vm51_vm0, %v8900_v11 }
0x2c8b   :  { %4855 = vmatpush.msra.mxu2 %v9033_v0 }
0x2c8d   :  { %4856 = vmatpush.msra.mxu2 %v9038_v38 }
0x2c8f   :  { %4857 = vmatpush.msra.mxu2 %v9044_v48 }
0x2c91   :  { %4858 = vmatpush.msra.mxu2 %v9050_v62 }
0x2c92   :  { %6565 = vmatmul.msk.f32.gmra.mxu2 %vm51_vm0, %v8907_v40 }
0x2c9a   :  { %6586 = vmatmul.msk.f32.vlgmr.msra.gmra.mxu2 %vm51_vm0, %v8900_v11 }
0x2ca2   :  { %6587 = vmatmul.msk.f32.gmra.mxu2 %vm51_vm0, %v8907_v40 }
0x2d05   :  { %v4605_v10 = vpop.f32.mrf.mxu2 }
0x2d06   :  { %v4608_v25 = vsel %vm1649_vm9, %v4605_v10, -inf }
0x2d07   :  { %4609 = vmax.xlane.f32.xlu1 %v4608_v25 }
0x2d0d   :  { %v4677_v47 = vpop.f32.mrf.mxu2 }
0x2d0e   :  { %v4678_v24 = vadd.f32 %v6803_v54, %v4677_v47  ;;  %v9071_v47 = vld [vmem:[%s9477_s4 + $0x68] sm:$0xff] }
0x2d15   :  { %v4680_v20 = vpop.f32.mrf.mxu2 }
0x2d16   :  { %v4681_v51 = vadd.f32 %v6803_v54, %v4680_v20  ;;  %v6806_v20 = vld [vmem:[%s9476_s3 + $0x2a] ss:$0 sm:$0xff] }
0x2d18   :  { %6573 = vmatpush.xpose.msk.msrb.mxu0 %vm240_vm1, %v4681_v51 }
0x2d1c   :  { %6574 = vmatpush.xpose.msk.msrb.mxu0 %vm240_vm1, %v4678_v24 }
0x2d1d   :  { %v4860_v25 = vpop.f32.mrf.mxu2 }
0x2d1f   :  { %6575 = vmatmul.msk.f32.vlgmr.msrb.gmra.mxu0 %vm240_vm1, %v4442_v22 }
0x2d20   :  { %4805 = vmatpush.msra.mxu0 %v9071_v47 }
0x2d25   :  { %v4863_v56 = vpop.f32.mrf.mxu2 }
0x2d26   :  { %v4864_v24 = vadd.f32 %v6806_v20, %v4863_v56 }
0x2d28   :  { %6595 = vmatpush.xpose.msk.msrb.mxu0 %vm240_vm1, %v4864_v24 }
0x2d7a   :  { %v4610_v23 = vpop.xlane.xlu1 %4609 }
0x2d7b   :  { %v4611_v3 = vsub.f32 %v4605_v10, %v4610_v23  ;;  %v9066_v10 = vpop.f32.mrf.mxu3  ;;  %v4861_v23 = vadd.f32 %v6806_v20, %v4860_v25 }
0x2d7d   :  { %v4612_v19 = vmul.f32 1.442695, %v4611_v3  ;;  %6596 = vmatpush.xpose.msk.msrb.mxu0 %vm240_vm1, %v4861_v23  ;;  %v9139_v23 = vld [vmem:[%s9475_s2 + $0x578] sm:$0xff] }
0x2d7f   :  { %6934 = vpow2.f32 %v4612_v19 }
0x2d85   :  { %v6935_v17 = vpop.eup %6934 }
0x2d86   :  { %v4614_v8 = vsel %vm1649_vm9, %v6935_v17, 0.0 }
0x2d87   :  { %4615 = vadd.xlane.f32.xlu2 %v4614_v8 }
0x2d9c   :  { %v4742_v14 = vpop.f32.mrf.mxu0 }
0x2d9d   :  { %v4745_v16 = vsel %vm1649_vm9, %v4742_v14, -inf }
0x2d9e   :  { %4746 = vmax.xlane.f32.xlu0 %v4745_v16 }
0x2dfa   :  { %v4616_v63 = vpop.xlane.xlu2 %4615 }
0x2dfb   :  { %6936 = vrcp.f32 %v4616_v63 }
0x2e01   :  { %v6937_v5 = vpop.eup %6936 }
0x2e02   :  { %v4618_v21 = vmul.f32 %v6937_v5, %v4616_v63  ;;  %v9095_v63 = vld [vmem:[%s9476_s3 + $0x26] ss:$0 sm:$0xff] }
0x2e04   :  { %v4619_v27 = vsub.f32 2.0, %v4618_v21  ;;  %v9103_v21 = vld [vmem:[%s9475_s2 + $0x5d8] sm:$0xff] }
0x2e06   :  { %v4620_v45 = vmul.f32 %v6937_v5, %v4619_v27  ;;  %v4475_v5 = vadd.f32 %v9095_v63, %v8953_v55  ;;  %v9108_v27 = vld [vmem:[%s9475_s2 + $0x5d0] sm:$0xff]  ;;  %v9120_v55 = vld [vmem:[%s9475_s2 + $0x5c0] sm:$0xff] }
0x2e08   :  { %v4621_v30 = vmul.f32 %v6935_v17, %v4620_v45  ;;  %v6805_v17 = vld [vmem:[%s9476_s3 + $0x2d] ss:$0 sm:$0xff] }
0x2e09   :  { %v9114_v45 = vld [vmem:[%s9475_s2 + $0x5c8] sm:$0xff] }
0x2e0a   :  { %6557 = vmatmul.msk.f32.vlgmr.msra.gmra.mxu3 %vm1649_vm9, %v4621_v30 }
0x2e0b   :  { %4888 = vmatpush.msra.mxu3 %v9103_v21 }
0x2e0d   :  { %4889 = vmatpush.msra.mxu3 %v9108_v27 }
0x2e0f   :  { %4890 = vmatpush.msra.mxu3 %v9114_v45 }
0x2e11   :  { %v4747_v43 = vpop.xlane.xlu0 %4746  ;;  %4891 = vmatpush.msra.mxu3 %v9120_v55 }
0x2e12   :  { %v4748_v52 = vsub.f32 %v4742_v14, %v4747_v43  ;;  %6571 = vmatmul.msk.f32.vlgmr.msrb.gmra.mxu3 %vm51_vm0, %v8900_v11  ;;  %v9086_v14 = vld [vmem:[%s9477_s4 + $0x60] sm:$0xff] }
0x2e14   :  { %v4749_v2 = vmul.f32 1.442695, %v4748_v52 }
0x2e16   :  { %6938 = vpow2.f32 %v4749_v2 }
0x2e1a   :  { %6572 = vmatmul.msk.f32.gmra.mxu3 %vm51_vm0, %v8907_v40 }
0x2e1c   :  { %v6939_v39 = vpop.eup %6938 }
0x2e1d   :  { %v4751_v49 = vsel %vm1649_vm9, %v6939_v39, 0.0 }
0x2e1e   :  { %4752 = vadd.xlane.f32.xlu1 %v4751_v49 }
0x2e22   :  { %6593 = vmatmul.msk.f32.vlgmr.msra.gmra.mxu3 %vm51_vm0, %v8900_v11 }
0x2e2a   :  { %6594 = vmatmul.msk.f32.gmra.mxu3 %vm51_vm0, %v8907_v40 }
0x2e8d   :  { %v4645_v54 = vpop.f32.mrf.mxu3 }
0x2e91   :  { %v4753_v51 = vpop.xlane.xlu1 %4752 }
0x2e92   :  { %6940 = vrcp.f32 %v4753_v51 }
0x2e95   :  { %v4710_v22 = vpop.f32.mrf.mxu3 }
0x2e96   :  { %v4711_v1 = vadd.f32 %v6805_v17, %v4710_v22 }
0x2e98   :  { %v6941_v3 = vpop.eup %6940 }
0x2e99   :  { %v4755_v19 = vmul.f32 %v6941_v3, %v4753_v51 }
0x2e9b   :  { %v4756_v41 = vsub.f32 2.0, %v4755_v19  ;;  %v9150_v19 = vld [vmem:[%s9475_s2 + $0x568] sm:$0xff] }
0x2e9d   :  { %v4757_v8 = vmul.f32 %v6941_v3, %v4756_v41  ;;  %v4713_v33 = vpop.f32.mrf.mxu3  ;;  %v9144_v3 = vld [vmem:[%s9475_s2 + $0x570] sm:$0xff]  ;;  %v9156_v41 = vld [vmem:[%s9475_s2 + $0x560] sm:$0xff] }
0x2e9e   :  { %v4714_v26 = vadd.f32 %v6805_v17, %v4713_v33 }
0x2e9f   :  { %v4758_v50 = vmul.f32 %v6939_v39, %v4757_v8  ;;  %v6807_v39 = vld [vmem:[%s9476_s3 + $0x2e] ss:$0 sm:$0xff] }
0x2ea0   :  { %6576 = vmatpush.msk.msrb.mxu1 %vm1667_vm10, %v4714_v26 }
0x2ea2   :  { %4780 = vmatpush.msrb.mxu1 %v4711_v1 }
0x2ea3   :  { %6577 = vmatmul.msk.f32.vlgmr.msrb.gmra.mxu1 %vm1649_vm9, %v4758_v50 }
0x2ea4   :  { %4828 = vmatpush.msra.mxu1 %v9086_v14 }
0x2ea5   :  { %v4893_v2 = vpop.f32.mrf.mxu3 }
0x2ea6   :  { %v4894_v20 = vadd.f32 %v6807_v39, %v4893_v2 }
0x2eab   :  { %6580 = vmatmul.msk.f32.vlgmr.msra.gmra.mxu1 %vm240_vm1, %v4645_v54 }
0x2ead   :  { %v4896_v25 = vpop.f32.mrf.mxu3 }
0x2eae   :  { %v4897_v51 = vadd.f32 %v6807_v39, %v4896_v25  ;;  %v9199_v39 = vld [vmem:[%s9476_s3 + $0x27] ss:$0 sm:$0xff] }
0x2eaf   :  { %v4508_v25 = vadd.f32 %v9199_v39, %v9064_v12  ;;  %v6609_v12 = vld [vmem:[%s9475_s2 + $0x5e0] sm:$0xff] }
0x2eb0   :  { %6598 = vmatpush.msk.msrb.mxu1 %vm1667_vm10, %v4897_v51  ;;  %v9219_v51 = vld [vmem:[%s9475_s2 + $0x5e8] sm:$0xff] }
0x2eb2   :  { %4963 = vmatpush.msrb.mxu1 %v4894_v20  ;;  %v9213_v20 = vld [vmem:[%s9475_s2 + $0x5f0] sm:$0xff] }
0x2eb4   :  { %5016 = vmatpush.msra.mxu1 %v9139_v23 }
0x2eb6   :  { %5017 = vmatpush.msra.mxu1 %v9144_v3 }
0x2eb8   :  { %5018 = vmatpush.msra.mxu1 %v9150_v19 }
0x2eba   :  { %5019 = vmatpush.msra.mxu1 %v9156_v41 }
0x2f20   :  { %v4782_v16 = vpop.f32.mrf.mxu1 }
0x2f21   :  { %6579 = vmatmul.msk.f32.vlgmr.msra.gmra.mxu0 %vm240_vm1, %v4782_v16  ;;  %v9172_v16 = vld [vmem:[%s9474_s1 + $0x10] sm:$0xff] }
0x2f29   :  { %6597 = vmatmul.msk.f32.vlgmr.msrb.gmra.mxu0 %vm240_vm1, %v4475_v5 }
0x2f9e   :  { %v9128_v30 = vpop.f32.mrf.mxu0 }
0x2fa6   :  { %v4925_v43 = vpop.f32.mrf.mxu0 }
0x2fa7   :  { %v4928_v52 = vsel %vm1649_vm9, %v4925_v43, -inf }
0x2fa8   :  { %4929 = vmax.xlane.f32.xlu2 %v4928_v52 }
0x301b   :  { %v4930_v49 = vpop.xlane.xlu2 %4929 }
0x301c   :  { %v4931_v54 = vsub.f32 %v4925_v43, %v4930_v49  ;;  %v6808_v43 = vld [vmem:[%s9476_s3 + $0x2b] ss:$0 sm:$0xff] }
0x301e   :  { %v4932_v56 = vmul.f32 1.442695, %v4931_v54  ;;  %v9208_v54 = vld [vmem:[%s9475_s2 + $0x5f8] sm:$0xff] }
0x301f   :  { %5049 = vmatpush.msrb.mxu2 %v9208_v54 }
0x3020   :  { %6942 = vpow2.f32 %v4932_v56 }
0x3021   :  { %5050 = vmatpush.msrb.mxu2 %v9213_v20 }
0x3023   :  { %5051 = vmatpush.msrb.mxu2 %v9219_v51 }
0x3025   :  { %5052 = vmatpush.msrb.mxu2 %v6609_v12 }
0x3026   :  { %v6943_v24 = vpop.eup %6942  ;;  %6614 = vmatmul.msk.f32.vlgmr.msrb.gmra.mxu2 %vm51_vm0, %v8900_v11 }
0x3027   :  { %v4934_v22 = vsel %vm1649_vm9, %v6943_v24, 0.0 }
0x3028   :  { %4935 = vadd.xlane.f32.xlu0 %v4934_v22 }
0x302e   :  { %6615 = vmatmul.msk.f32.gmra.mxu2 %vm51_vm0, %v8907_v40 }
0x309b   :  { %v4936_v17 = vpop.xlane.xlu0 %4935 }
0x309c   :  { %6944 = vrcp.f32 %v4936_v17 }
0x30a2   :  { %v6945_v8 = vpop.eup %6944 }
0x30a3   :  { %v4938_v33 = vmul.f32 %v6945_v8, %v4936_v17  ;;  %v6809_v17 = vld [vmem:[%s9476_s3 + $0x2f] ss:$0 sm:$0xff] }
0x30a5   :  { %v4939_v26 = vsub.f32 2.0, %v4938_v33 }
0x30a7   :  { %v4940_v1 = vmul.f32 %v6945_v8, %v4939_v26 }
0x30a9   :  { %v4941_v50 = vmul.f32 %v6943_v24, %v4940_v1  ;;  %v5054_v22 = vpop.f32.mrf.mxu2 }
0x30aa   :  { %v5055_v1 = vadd.f32 %v6809_v17, %v5054_v22 }
0x30ab   :  { %6599 = vmatmul.msk.f32.vlgmr.msrb.gmra.mxu1 %vm1649_vm9, %v4941_v50 }
0x30ac   :  { %5206 = vmatpush.msrb.mxu1 %v8960_v31  ;;  %v9179_v31 = vld [vmem:[%s9474_s1 + $0x18] sm:$0x3] }
0x30ae   :  { %5207 = vmatpush.msrb.mxu1 %v8965_v34  ;;  %v9186_v34 = vld [vmem:[%s9477_s4 + $0x70] sm:$0xff] }
0x30af   :  { %4988 = vmatpush.msra.mxu0 %v9186_v34 }
0x30b0   :  { %5208 = vmatpush.msrb.mxu1 %v8971_v57  ;;  %v9189_v57 = vpop.f32.mrf.mxu1 }
0x30b1   :  { %v5057_v33 = vpop.f32.mrf.mxu2 }
0x30b2   :  { %5209 = vmatpush.msrb.mxu1 %v8977_v58  ;;  %v5058_v50 = vadd.f32 %v6809_v17, %v5057_v33 }
0x30b3   :  { %6607 = vmatmul.msk.f32.vlgmr.msra.gmra.mxu1 %vm51_vm0, %v8900_v11 }
0x30b4   :  { %6619 = vmatpush.msk.msrb.mxu0 %vm1667_vm10, %v5058_v50 }
0x30b6   :  { %5124 = vmatpush.msrb.mxu0 %v5055_v1 }
0x30bb   :  { %6608 = vmatmul.msk.f32.gmra.mxu1 %vm51_vm0, %v8907_v40 }
0x30c3   :  { %6635 = vmatmul.msk.f32.vlgmr.msrb.gmra.mxu1 %vm51_vm0, %v9172_v16 }
0x30cb   :  { %6636 = vmatmul.msk.f32.gmra.mxu1 %vm51_vm0, %v9179_v31 }
0x3128   :  { %v4965_v58 = vpop.f32.mrf.mxu1 }
0x3129   :  { %6601 = vmatmul.msk.f32.vlgmr.msra.gmra.mxu0 %vm240_vm1, %v4965_v58 }
0x312a   :  { %5175 = vmatpush.msra.mxu0 %v8865_v29  ;;  %v9248_v29 = vld [vmem:[%s9477_s4 + $0x78] sm:$0xff] }
0x312c   :  { %5176 = vmatpush.msra.mxu0 %v8870_v28 }
0x312e   :  { %5177 = vmatpush.msra.mxu0 %v8876_v18 }
0x3130   :  { %v5021_v5 = vpop.f32.mrf.mxu1  ;;  %5178 = vmatpush.msra.mxu0 %v8883_v46 }
0x3131   :  { %v5022_v49 = vadd.f32 %v6808_v43, %v5021_v5 }
0x3138   :  { %v5024_v52 = vpop.f32.mrf.mxu1 }
0x3139   :  { %v5025_v2 = vadd.f32 %v6808_v43, %v5024_v52 }
0x313b   :  { %6616 = vmatpush.xpose.msk.msrb.mxu3 %vm240_vm1, %v5025_v2 }
0x313f   :  { %6617 = vmatpush.xpose.msk.msrb.mxu3 %vm240_vm1, %v5022_v49 }
0x3142   :  { %6618 = vmatmul.msk.f32.vlgmr.msrb.gmra.mxu3 %vm240_vm1, %v4508_v25 }
0x3143   :  { %5149 = vmatpush.msra.mxu3 %v9248_v29 }
0x31a6   :  { %v9251_v28 = vpop.f32.mrf.mxu0 }
0x31c5   :  { %v5086_v56 = vpop.f32.mrf.mxu3 }
0x31c6   :  { %v5089_v24 = vsel %vm1649_vm9, %v5086_v56, -inf }
0x31c7   :  { %5090 = vmax.xlane.f32.xlu1 %v5089_v24 }
0x323a   :  { %v5091_v8 = vpop.xlane.xlu1 %5090 }
0x323b   :  { %v5092_v26 = vsub.f32 %v5086_v56, %v5091_v8  ;;  %v6810_v56 = vld [vmem:[%s9476_s3 + $0x28] ss:$0 sm:$0xff]  ;;  %v4412_v8 = vadd.f32 %v8920_v36, %v8911_v42 }
0x323d   :  { %v5093_v58 = vmul.f32 1.442695, %v5092_v26 }
0x323f   :  { %6946 = vpow2.f32 %v5093_v58 }
0x3245   :  { %v6947_v11 = vpop.eup %6946 }
0x3246   :  { %v5095_v40 = vsel %vm1649_vm9, %v6947_v11, 0.0 }
0x3247   :  { %5096 = vadd.xlane.f32.xlu2 %v5095_v40 }
0x32ba   :  { %v5097_v5 = vpop.xlane.xlu2 %5096 }
0x32bb   :  { %6948 = vrcp.f32 %v5097_v5 }
0x32c1   :  { %v6949_v43 = vpop.eup %6948 }
0x32c2   :  { %v5099_v52 = vmul.f32 %v6949_v43, %v5097_v5 }
0x32c4   :  { %v5100_v2 = vsub.f32 2.0, %v5099_v52 }
0x32c6   :  { %v5101_v49 = vmul.f32 %v6949_v43, %v5100_v2 }
0x32c8   :  { %v5102_v25 = vmul.f32 %v6947_v11, %v5101_v49 }
0x32ca   :  { %6620 = vmatmul.msk.f32.vlgmr.msrb.gmra.mxu0 %vm1649_vm9, %v5102_v25 }
0x32d2   :  { %6628 = vmatmul.msk.f32.vlgmr.msra.gmra.mxu0 %vm51_vm0, %v9172_v16 }
0x32da   :  { %6629 = vmatmul.msk.f32.gmra.mxu0 %vm51_vm0, %v9179_v31 }
0x3347   :  { %v5126_v18 = vpop.f32.mrf.mxu0 }
0x3348   :  { %6622 = vmatmul.msk.f32.vlgmr.msra.gmra.mxu3 %vm240_vm1, %v5126_v18 }
0x334f   :  { %v5180_v46 = vpop.f32.mrf.mxu0 }
0x3350   :  { %v5181_v17 = vadd.f32 %v6810_v56, %v5180_v46 }
0x3357   :  { %v5183_v24 = vpop.f32.mrf.mxu0 }
0x3358   :  { %v5184_v22 = vadd.f32 %v6810_v56, %v5183_v24 }
0x335a   :  { %6637 = vmatpush.xpose.msk.msra.mxu2 %vm240_vm1, %v5184_v22 }
0x335e   :  { %6638 = vmatpush.xpose.msk.msra.mxu2 %vm240_vm1, %v5181_v17  ;;  %v6813_v17 = vld [vmem:[%s9476_s3 + $0x2d] ss:$0 sm:$0xff] }
0x3361   :  { %6639 = vmatmul.msk.f32.vlgmr.msra.gmra.mxu2 %vm240_vm1, %v4412_v8 }
0x3362   :  { %5307 = vmatpush.msrb.mxu2 %v8925_v32 }
0x3364   :  { %5308 = vmatpush.msrb.mxu2 %v8933_v60  ;;  %v6811_v60 = vld [vmem:[%s9476_s3 + $0x29] ss:$0 sm:$0xff] }
0x3366   :  { %5309 = vmatpush.msrb.mxu2 %v8939_v61 }
0x3368   :  { %5310 = vmatpush.msrb.mxu2 %v8945_v6 }
0x3369   :  { %6648 = vmatmul.msk.f32.vlgmr.msrb.gmra.mxu2 %vm51_vm0, %v9172_v16 }
0x336a   :  { %5485 = vmatpush.msra.mxu2 %v9033_v0 }
0x336c   :  { %5486 = vmatpush.msra.mxu2 %v9038_v38  ;;  %v4445_v38 = vadd.f32 %v8993_v53, %v8998_v15 }
0x336e   :  { %5487 = vmatpush.msra.mxu2 %v9044_v48 }
0x3370   :  { %5488 = vmatpush.msra.mxu2 %v9050_v62 }
0x3371   :  { %6649 = vmatmul.msk.f32.gmra.mxu2 %vm51_vm0, %v9179_v31 }
0x3372   :  { %5672 = vmatpush.msrb.mxu2 %v9208_v54 }
0x3374   :  { %5673 = vmatpush.msrb.mxu2 %v9213_v20  ;;  %v5211_v20 = vpop.f32.mrf.mxu1 }
0x3376   :  { %5674 = vmatpush.msrb.mxu2 %v9219_v51  ;;  %v6812_v51 = vld [vmem:[%s9476_s3 + $0x2c] ss:$0 sm:$0xff] }
0x3377   :  { %v5212_v1 = vadd.f32 %v6812_v51, %v5211_v20  ;;  %v4831_v20 = vadd.f32 %v9189_v57, %v9128_v30 }
0x3378   :  { %5675 = vmatpush.msrb.mxu2 %v6609_v12 }
0x3379   :  { %6670 = vmatmul.msk.f32.vlgmr.msra.gmra.mxu2 %vm51_vm0, %v9172_v16 }
0x337c   :  { %v5214_v26 = vpop.f32.mrf.mxu1 }
0x337d   :  { %v5215_v53 = vadd.f32 %v6812_v51, %v5214_v26 }
0x337f   :  { %6640 = vmatpush.msk.msrb.mxu3 %vm1667_vm10, %v5215_v53 }
0x3381   :  { %6671 = vmatmul.msk.f32.gmra.mxu2 %vm51_vm0, %v9179_v31  ;;  %5281 = vmatpush.msrb.mxu3 %v5212_v1  ;;  %v6815_v1 = vld [vmem:[%s9476_s3 + $0x2e] ss:$0 sm:$0xff] }
0x3383   :  { %5338 = vmatpush.msra.mxu3 %v9009_v13 }
0x3385   :  { %5339 = vmatpush.msra.mxu3 %v9014_v59 }
0x3387   :  { %5340 = vmatpush.msra.mxu3 %v9020_v9 }
0x3389   :  { %6698 = vmatmul.msk.f32.vlgmr.msrb.gmra.mxu2 %vm51_vm0, %v9172_v16  ;;  %5341 = vmatpush.msra.mxu3 %v9026_v37 }
0x3391   :  { %6699 = vmatmul.msk.f32.gmra.mxu2 %vm51_vm0, %v9179_v31 }
0x33e4   :  { %v5243_v42 = vpop.f32.mrf.mxu2 }
0x33e5   :  { %v5246_v36 = vsel %vm1649_vm9, %v5243_v42, -inf }
0x33e6   :  { %5247 = vmax.xlane.f32.xlu0 %v5246_v36 }
0x33ec   :  { %v5312_v32 = vpop.f32.mrf.mxu2 }
0x33ed   :  { %v5313_v0 = vadd.f32 %v6811_v60, %v5312_v32 }
0x33f4   :  { %v5315_v61 = vpop.f32.mrf.mxu2 }
0x33f5   :  { %v5316_v6 = vadd.f32 %v6811_v60, %v5315_v61 }
0x33f7   :  { %6657 = vmatpush.xpose.msk.msrb.mxu0 %vm240_vm1, %v5316_v6  ;;  %v4478_v6 = vadd.f32 %v9095_v63, %v8955_v4  ;;  %v9345_v4 = vld [vmem:[%s9478_s5 + $0x10] sm:$0xff] }
0x33f8   :  { %v5777_v63 = vperm.slane %v9345_v4, 1 }
0x33fb   :  { %6658 = vmatpush.xpose.msk.msrb.mxu0 %vm240_vm1, %v5313_v0 }
0x33fe   :  { %6659 = vmatmul.msk.f32.vlgmr.msrb.gmra.mxu0 %vm240_vm1, %v4445_v38 }
0x33ff   :  { %5437 = vmatpush.msra.mxu0 %v9071_v47 }
0x3459   :  { %v5248_v48 = vpop.xlane.xlu0 %5247 }
0x345a   :  { %v5249_v62 = vsub.f32 %v5243_v42, %v5248_v48 }
0x345c   :  { %v5250_v54 = vmul.f32 1.442695, %v5249_v62 }
0x345e   :  { %6950 = vpow2.f32 %v5250_v54 }
0x3464   :  { %v6951_v12 = vpop.eup %6950 }
0x3465   :  { %v5252_v33 = vsel %vm1649_vm9, %v6951_v12, 0.0 }
0x3466   :  { %5253 = vadd.xlane.f32.xlu1 %v5252_v33 }
0x347b   :  { %v5375_v15 = vpop.f32.mrf.mxu0 }
0x347c   :  { %v5378_v47 = vsel %vm1649_vm9, %v5375_v15, -inf }
0x347d   :  { %5379 = vmax.xlane.f32.xlu2 %v5378_v47 }
0x34d9   :  { %v5254_v50 = vpop.xlane.xlu1 %5253 }
0x34da   :  { %6952 = vrcp.f32 %v5254_v50 }
0x34e0   :  { %v6953_v58 = vpop.eup %6952 }
0x34e1   :  { %v5256_v11 = vmul.f32 %v6953_v58, %v5254_v50 }
0x34e3   :  { %v5257_v40 = vsub.f32 2.0, %v5256_v11 }
0x34e5   :  { %v5258_v5 = vmul.f32 %v6953_v58, %v5257_v40 }
0x34e7   :  { %v5259_v43 = vmul.f32 %v6951_v12, %v5258_v5 }
0x34e9   :  { %6641 = vmatmul.msk.f32.vlgmr.msrb.gmra.mxu3 %vm1649_vm9, %v5259_v43 }
0x34ea   :  { %5516 = vmatpush.msrb.mxu3 %v9103_v21  ;;  %v5151_v21 = vpop.f32.mrf.mxu3 }
0x34ec   :  { %5517 = vmatpush.msrb.mxu3 %v9108_v27  ;;  %v5490_v27 = vpop.f32.mrf.mxu2 }
0x34ee   :  { %5518 = vmatpush.msrb.mxu3 %v9114_v45 }
0x34f0   :  { %v5380_v13 = vpop.xlane.xlu2 %5379  ;;  %5519 = vmatpush.msrb.mxu3 %v9120_v55  ;;  %v6814_v55 = vld [vmem:[%s9476_s3 + $0x2a] ss:$0 sm:$0xff] }
0x34f1   :  { %v5381_v59 = vsub.f32 %v5375_v15, %v5380_v13  ;;  %6655 = vmatmul.msk.f32.vlgmr.msra.gmra.mxu3 %vm51_vm0, %v9172_v16  ;;  %v5491_v46 = vadd.f32 %v6814_v55, %v5490_v27 }
0x34f3   :  { %v5382_v9 = vmul.f32 1.442695, %v5381_v59 }
0x34f4   :  { %v5493_v49 = vpop.f32.mrf.mxu2 }
0x34f5   :  { %6954 = vpow2.f32 %v5382_v9  ;;  %v5494_v25 = vadd.f32 %v6814_v55, %v5493_v49 }
0x34f7   :  { %6679 = vmatpush.xpose.msk.msrb.mxu0 %vm240_vm1, %v5494_v25  ;;  %v6817_v25 = vld [vmem:[%s9476_s3 + $0x2f] ss:$0 sm:$0xff] }
0x34f9   :  { %6656 = vmatmul.msk.f32.gmra.mxu3 %vm51_vm0, %v9179_v31 }
0x34fb   :  { %v6955_v37 = vpop.eup %6954  ;;  %6680 = vmatpush.xpose.msk.msrb.mxu0 %vm240_vm1, %v5491_v46 }
0x34fc   :  { %v5384_v52 = vsel %vm1649_vm9, %v6955_v37, 0.0 }
0x34fd   :  { %5385 = vadd.xlane.f32.xlu0 %v5384_v52 }
0x3501   :  { %6677 = vmatmul.msk.f32.vlgmr.msrb.gmra.mxu3 %vm51_vm0, %v9172_v16 }
0x3509   :  { %6678 = vmatmul.msk.f32.gmra.mxu3 %vm51_vm0, %v9179_v31 }
0x356c   :  { %v5283_v45 = vpop.f32.mrf.mxu3 }
0x3570   :  { %v5386_v2 = vpop.xlane.xlu0 %5385 }
0x3571   :  { %6956 = vrcp.f32 %v5386_v2 }
0x3574   :  { %v5343_v18 = vpop.f32.mrf.mxu3 }
0x3575   :  { %v5344_v32 = vadd.f32 %v6813_v17, %v5343_v18 }
0x3577   :  { %v6957_v56 = vpop.eup %6956 }
0x3578   :  { %v5388_v24 = vmul.f32 %v6957_v56, %v5386_v2 }
0x357a   :  { %v5389_v22 = vsub.f32 2.0, %v5388_v24  ;;  %v6710_v24 = vld [vmem:[%s9479_s6 + $0x38] sm:$0xff] }
0x357c   :  { %v5390_v8 = vmul.f32 %v6957_v56, %v5389_v22  ;;  %v5346_v42 = vpop.f32.mrf.mxu3 }
0x357d   :  { %v5347_v36 = vadd.f32 %v6813_v17, %v5346_v42  ;;  %v6709_v17 = vld [vmem:[%s9479_s6 + $0x30] sm:$0xff]  ;;  %v6707_v42 = vld [vmem:[%s9479_s6 + $0x20] sm:$0xff] }
0x357e   :  { %v5391_v60 = vmul.f32 %v6955_v37, %v5390_v8  ;;  %v6708_v8 = vld [vmem:[%s9479_s6 + $0x28] sm:$0xff] }
0x357f   :  { %6660 = vmatpush.msk.msra.mxu1 %vm1667_vm10, %v5347_v36 }
0x3581   :  { %5413 = vmatpush.msra.mxu1 %v5344_v32 }
0x3582   :  { %6661 = vmatmul.msk.f32.vlgmr.msra.gmra.mxu1 %vm1649_vm9, %v5391_v60 }
0x3583   :  { %5460 = vmatpush.msrb.mxu1 %v9086_v14 }
0x358a   :  { %6664 = vmatmul.msk.f32.vlgmr.msrb.gmra.mxu1 %vm240_vm1, %v5283_v45 }
0x35ff   :  { %v5415_v61 = vpop.f32.mrf.mxu1 }
0x3600   :  { %6663 = vmatmul.msk.f32.vlgmr.msra.gmra.mxu0 %vm240_vm1, %v5415_v61 }
0x3601   :  { %5615 = vmatpush.msra.mxu0 %v9186_v34  ;;  %v4993_v34 = vadd.f32 %v9251_v28, %v4831_v20  ;;  %v5521_v28 = vpop.f32.mrf.mxu3 }
0x3602   :  { %v5522_v15 = vadd.f32 %v6815_v1, %v5521_v28 }
0x3603   :  { %v5154_v51 = vadd.f32 %v5151_v21, %v4993_v34 }
0x3605   :  { %v5778_v33 = vadd.f32 %v5777_v63, %v5154_v51 }
0x3607   :  { %v5780_v30 = vadd.f32 %v5778_v33, %v8831_v35  ;;  %v5826_v33 = vperm.slane %v9345_v4, 5 }
0x3608   :  { %6681 = vmatmul.msk.f32.vlgmr.msrb.gmra.mxu0 %vm240_vm1, %v4478_v6 }
0x3609   :  { %v5782_v57 = vsel %vm51_vm0, %v5780_v30, 0.0  ;;  %v5524_v53 = vpop.f32.mrf.mxu3 }
0x360a   :  { %v5525_v47 = vadd.f32 %v6815_v1, %v5524_v53  ;;  %v6721_v53 = vld [vmem:[%s9480_s7 + $0x78] sm:$0xff] }
0x360c   :  { %6682 = vmatpush.msk.msra.mxu1 %vm1667_vm10, %v5525_v47  ;;  %v6719_v47 = vld [vmem:[%s9480_s7 + $0x68] sm:$0xff] }
0x360e   :  { %5591 = vmatpush.msra.mxu1 %v5522_v15  ;;  %v6720_v15 = vld [vmem:[%s9480_s7 + $0x70] sm:$0xff] }
0x3610   :  { %5641 = vmatpush.msrb.mxu1 %v9139_v23  ;;  %v9366_v23 = vpop.f32.mrf.mxu1 }
0x3612   :  { %5642 = vmatpush.msrb.mxu1 %v9144_v3 }
0x3614   :  { %5643 = vmatpush.msrb.mxu1 %v9150_v19 }
0x3616   :  { %5644 = vmatpush.msrb.mxu1 %v9156_v41  ;;  %v6816_v41 = vld [vmem:[%s9476_s3 + $0x2b] ss:$0 sm:$0xff] }
0x367d   :  { %v9336_v0 = vpop.f32.mrf.mxu0 }
0x3685   :  { %v5553_v38 = vpop.f32.mrf.mxu0 }
0x3686   :  { %v5556_v48 = vsel %vm1649_vm9, %v5553_v38, -inf }
0x3687   :  { %5557 = vmax.xlane.f32.xlu1 %v5556_v48 }
0x36fa   :  { %v5558_v62 = vpop.xlane.xlu1 %5557 }
0x36fb   :  { %v5559_v14 = vsub.f32 %v5553_v38, %v5558_v62 }
0x36fd   :  { %v5560_v54 = vmul.f32 1.442695, %v5559_v14 }
0x36ff   :  { %6958 = vpow2.f32 %v5560_v54 }
0x3705   :  { %v6959_v12 = vpop.eup %6958 }
0x3706   :  { %v5562_v26 = vsel %vm1649_vm9, %v6959_v12, 0.0 }
0x3707   :  { %5563 = vadd.xlane.f32.xlu2 %v5562_v26 }
0x370f   :  { %5783 = vadd.xlane.f32.xlu2 %v5782_v57 }
0x377a   :  { %v5564_v35 = vpop.xlane.xlu2 %5563 }
0x377b   :  { %6960 = vrcp.f32 %v5564_v35 }
0x3781   :  { %v6961_v50 = vpop.eup %6960 }
0x3782   :  { %v5566_v58 = vmul.f32 %v6961_v50, %v5564_v35  ;;  %v5784_v27 = vpop.xlane.xlu2 %5783  ;;  %v6718_v35 = vld [vmem:[%s9480_s7 + $0x60] sm:$0xff] }
0x3783   :  { %v5788_v45 = vmul.f32 %v5784_v27, %v7571_v44  ;;  %v5882_v27 = vperm.slane %v9345_v4, 2 }
0x3784   :  { %v5567_v11 = vsub.f32 2.0, %v5566_v58  ;;  %v6716_v58 = vld [vmem:[%s9480_s7 + $0x50] sm:$0xff] }
0x3785   :  { %v5790_v2 = vsub.f32 %v5780_v30, %v5788_v45  ;;  %v5829_v30 = vperm.slane %v9345_v4, 6 }
0x3786   :  { %v5568_v40 = vmul.f32 %v6961_v50, %v5567_v11  ;;  %v6717_v50 = vld [vmem:[%s9480_s7 + $0x58] sm:$0xff]  ;;  %v6715_v11 = vld [vmem:[%s9480_s7 + $0x48] sm:$0xff] }
0x3788   :  { %v5569_v5 = vmul.f32 %v6959_v12, %v5568_v40 }
0x378a   :  { %6683 = vmatmul.msk.f32.vlgmr.msra.gmra.mxu1 %vm1649_vm9, %v5569_v5  ;;  %v6714_v5 = vld [vmem:[%s9480_s7 + $0x40] sm:$0xff] }
0x378b   :  { %5897 = vmatpush.msra.mxu1 %v6721_v53 }
0x378d   :  { %5898 = vmatpush.msra.mxu1 %v6720_v15 }
0x378f   :  { %5899 = vmatpush.msra.mxu1 %v6719_v47 }
0x3791   :  { %5900 = vmatpush.msra.mxu1 %v6718_v35 }
0x3792   :  { %6691 = vmatmul.msk.f32.vlgmr.msrb.gmra.mxu1 %vm51_vm0, %v9172_v16  ;;  %v4511_v16 = vadd.f32 %v9199_v39, %v9066_v10  ;;  %v5792_v10 = vmul.f32 %v5790_v2, %v5790_v2 }
0x3793   :  { %5901 = vmatpush.msra.mxu1 %v6717_v50 }
0x3794   :  { %v5794_v39 = vsel %vm51_vm0, %v5792_v10, 0.0 }
0x3795   :  { %5902 = vmatpush.msra.mxu1 %v6716_v58 }
0x3797   :  { %5903 = vmatpush.msra.mxu1 %v6715_v11 }
0x3799   :  { %5904 = vmatpush.msra.mxu1 %v6714_v5 }
0x379a   :  { %6692 = vmatmul.msk.f32.gmra.mxu1 %vm51_vm0, %v9179_v31 }
0x3807   :  { %v5593_v3 = vpop.f32.mrf.mxu1 }
0x3808   :  { %6685 = vmatmul.msk.f32.vlgmr.msra.gmra.mxu0 %vm240_vm1, %v5593_v3 }
0x380f   :  { %v5646_v19 = vpop.f32.mrf.mxu1 }
0x3810   :  { %v5647_v59 = vadd.f32 %v6816_v41, %v5646_v19  ;;  %v9435_v19 = vld [vmem:[%s9481_s8 + $0x1] ss:$0 sm:$0xff] }
0x3817   :  { %v5649_v43 = vpop.f32.mrf.mxu1 }
0x3818   :  { %v5650_v13 = vadd.f32 %v6816_v41, %v5649_v43 }
0x381a   :  { %6700 = vmatpush.xpose.msk.msra.mxu3 %vm240_vm1, %v5650_v13 }
0x381e   :  { %6701 = vmatpush.xpose.msk.msra.mxu3 %vm240_vm1, %v5647_v59  ;;  %v5463_v59 = vadd.f32 %v9366_v23, %v9336_v0 }
0x3821   :  { %6702 = vmatmul.msk.f32.vlgmr.msra.gmra.mxu3 %vm240_vm1, %v4511_v16 }
0x3822   :  { %5771 = vmatpush.msrb.mxu3 %v9248_v29  ;;  %v5677_v29 = vpop.f32.mrf.mxu2 }
0x3823   :  { %v5678_v46 = vadd.f32 %v6817_v25, %v5677_v29 }
0x382a   :  { %v5680_v18 = vpop.f32.mrf.mxu2 }
0x382b   :  { %v5681_v56 = vadd.f32 %v6817_v25, %v5680_v18 }
0x382d   :  { %6703 = vmatpush.msk.msrb.mxu0 %vm1667_vm10, %v5681_v56 }
0x382f   :  { %5747 = vmatpush.msrb.mxu0 %v5678_v46 }
0x3831   :  { %5860 = vmatpush.msra.mxu0 %v6710_v24 }
0x3833   :  { %5861 = vmatpush.msra.mxu0 %v6709_v17 }
0x3835   :  { %5862 = vmatpush.msra.mxu0 %v6708_v8 }
0x3837   :  { %5863 = vmatpush.msra.mxu0 %v6707_v42 }
0x3885   :  { %v5617_v40 = vpop.f32.mrf.mxu0 }
0x3886   :  { %v5620_v16 = vadd.f32 %v5617_v40, %v5463_v59 }
0x38a4   :  { %v5709_v31 = vpop.f32.mrf.mxu3 }
0x38a5   :  { %v5712_v9 = vsel %vm1649_vm9, %v5709_v31, -inf }
0x38a6   :  { %5713 = vmax.xlane.f32.xlu0 %v5712_v9 }
0x3919   :  { %v5714_v37 = vpop.xlane.xlu0 %5713 }
0x391a   :  { %v5715_v52 = vsub.f32 %v5709_v31, %v5714_v37 }
0x391c   :  { %v5716_v21 = vmul.f32 1.442695, %v5715_v52 }
0x391e   :  { %6962 = vpow2.f32 %v5716_v21 }
0x3924   :  { %v6963_v55 = vpop.eup %6962 }
0x3925   :  { %v5718_v49 = vsel %vm1649_vm9, %v6963_v55, 0.0 }
0x3926   :  { %5719 = vadd.xlane.f32.xlu1 %v5718_v49 }
0x392e   :  { %5795 = vadd.xlane.f32.xlu1 %v5794_v39 }
0x3999   :  { %v5720_v22 = vpop.xlane.xlu1 %5719 }
0x399a   :  { %6964 = vrcp.f32 %v5720_v22 }
0x39a0   :  { %v6965_v36 = vpop.eup %6964 }
0x39a1   :  { %v5722_v32 = vmul.f32 %v6965_v36, %v5720_v22  ;;  %v5796_v60 = vpop.xlane.xlu1 %5795 }
0x39a2   :  { %v5800_v61 = vmul.f32 %v5796_v60, %v7571_v44 }
0x39a3   :  { %v5723_v6 = vsub.f32 2.0, %v5722_v32 }
0x39a4   :  { %v5802_v38 = vadd.f32 1e-05, %v5800_v61 }
0x39a5   :  { %v5724_v48 = vmul.f32 %v6965_v36, %v5723_v6 }
0x39a6   :  { %6966 = vrsqrt.f32 %v5802_v38  ;;  %vm5810_vm5 = vweird.f32 %v5802_v38 }
0x39a7   :  { %v5725_v62 = vmul.f32 %v6963_v55, %v5724_v48 }
0x39a9   :  { %6704 = vmatmul.msk.f32.vlgmr.msrb.gmra.mxu0 %vm1649_vm9, %v5725_v62 }
0x39ac   :  { %v6967_v14 = vpop.eup %6966 }
0x39ad   :  { %v5805_v54 = vmul.f32 %v6967_v14, %v5802_v38  ;;  %vm5811_vm10 = vweird.f32 %v6967_v14 }
0x39ae   :  { %vm5812_vm6 = vmor %vm5810_vm5, %vm5811_vm10 }
0x39af   :  { %v5806_v20 = vmul.f32 %v6967_v14, %v5805_v54 }
0x39b1   :  { %v5807_v34 = vmul.f32 0.5, %v5806_v20 }
0x39b3   :  { %v5808_v51 = vsub.f32 1.5, %v5807_v34 }
0x39b5   :  { %v5809_v12 = vmul.f32 %v6967_v14, %v5808_v51 }
0x39b7   :  { %v5813_v26 = vsel %vm5812_vm6, %v6967_v14, %v5809_v12 }
0x39b8   :  { %v5824_v57 = vmul.f32 %v5813_v26, %v5790_v2 }
0x39ba   :  { %v5827_v28 = vmul.f32 %v5826_v33, %v5824_v57 }
0x39bc   :  { %v5830_v1 = vadd.f32 %v5829_v30, %v5827_v28  ;;  %v5958_v28 = vperm.slane %v9345_v4, 7 }
0x39be   :  { %6712 = vmatmul.msk.f32.vlgmr.msra.gmra.mxu0 %vm51_vm0, %v5830_v1 }
0x3a26   :  { %v5749_v3 = vpop.f32.mrf.mxu0 }
0x3a27   :  { %6706 = vmatmul.msk.f32.vlgmr.msrb.gmra.mxu3 %vm240_vm1, %v5749_v3 }
0x3a3b   :  { %v5865_v41 = vpop.f32.mrf.mxu0 }
0x3a3c   :  { %v5866_v43 = vadd.f32 %v9435_v19, %v5865_v41 }
0x3a3e   :  { %v5871_v13 = vmax.f32 %v5866_v43, 0.0 }
0x3a40   :  { %6722 = vmatmul.msk.f32.vlgmr.msra.gmra.mxu1 %vm2929_vm14, %v5871_v13 }
0x3aaa   :  { %v5773_v31 = vpop.f32.mrf.mxu3 }
0x3aab   :  { %v5776_v9 = vadd.f32 %v5773_v31, %v5620_v16 }
0x3aad   :  { %v5779_v37 = vadd.f32 %v5777_v63, %v5776_v9 }
0x3aaf   :  { %v5781_v52 = vadd.f32 %v5779_v37, %v8887_v7 }
0x3ab1   :  { %v5785_v21 = vsel %vm51_vm0, %v5781_v52, 0.0 }
0x3ab2   :  { %5786 = vadd.xlane.f32.xlu0 %v5785_v21 }
0x3abd   :  { %v5906_v45 = vpop.f32.mrf.mxu1 }
0x3abe   :  { %v5907_v55 = vadd.f32 %v5906_v45, %v5882_v27 }
0x3ac0   :  { %v5912_v2 = vadd.f32 %v5907_v55, %v5830_v1 }
0x3ac2   :  { %v5914_v49 = vsel %vm51_vm0, %v5912_v2, 0.0 }
0x3ac3   :  { %5915 = vadd.xlane.f32.xlu0 %v5914_v49 }
0x3b25   :  { %v5787_v0 = vpop.xlane.xlu0 %5786 }
0x3b26   :  { %v5789_v23 = vmul.f32 %v5787_v0, %v7571_v44 }
0x3b28   :  { %v5791_v10 = vsub.f32 %v5781_v52, %v5789_v23 }
0x3b2a   :  { %v5793_v39 = vmul.f32 %v5791_v10, %v5791_v10 }
0x3b2c   :  { %v5797_v63 = vsel %vm51_vm0, %v5793_v39, 0.0 }
0x3b2d   :  { %5798 = vadd.xlane.f32.xlu2 %v5797_v63 }
0x3b36   :  { %v5916_v7 = vpop.xlane.xlu0 %5915 }
0x3b37   :  { %v5920_v29 = vmul.f32 %v5916_v7, %v7571_v44 }
0x3b39   :  { %v5922_v25 = vsub.f32 %v5912_v2, %v5920_v29 }
0x3b3b   :  { %v5924_v18 = vmul.f32 %v5922_v25, %v5922_v25 }
0x3b3d   :  { %v5926_v46 = vsel %vm51_vm0, %v5924_v18, 0.0 }
0x3b3e   :  { %5927 = vadd.xlane.f32.xlu2 %v5926_v46 }
0x3ba0   :  { %v5799_v56 = vpop.xlane.xlu2 %5798 }
0x3ba1   :  { %v5801_v24 = vmul.f32 %v5799_v56, %v7571_v44 }
0x3ba3   :  { %v5803_v22 = vadd.f32 1e-05, %v5801_v24 }
0x3ba5   :  { %6968 = vrsqrt.f32 %v5803_v22  ;;  %vm5820_vm9 = vweird.f32 %v5803_v22 }
0x3bab   :  { %v6969_v17 = vpop.eup %6968 }
0x3bac   :  { %v5815_v8 = vmul.f32 %v6969_v17, %v5803_v22  ;;  %vm5821_vm1 = vweird.f32 %v6969_v17 }
0x3bad   :  { %vm5822_vm7 = vmor %vm5820_vm9, %vm5821_vm1 }
0x3bae   :  { %v5816_v42 = vmul.f32 %v6969_v17, %v5815_v8 }
0x3bb0   :  { %v5817_v36 = vmul.f32 0.5, %v5816_v42 }
0x3bb1   :  { %v5928_v32 = vpop.xlane.xlu2 %5927 }
0x3bb2   :  { %v5818_v60 = vsub.f32 1.5, %v5817_v36  ;;  %v5932_v61 = vmul.f32 %v5928_v32, %v7571_v44 }
0x3bb4   :  { %v5819_v6 = vmul.f32 %v6969_v17, %v5818_v60  ;;  %v5934_v38 = vadd.f32 1e-05, %v5932_v61 }
0x3bb6   :  { %v5823_v48 = vsel %vm5822_vm7, %v6969_v17, %v5819_v6  ;;  %6970 = vrsqrt.f32 %v5934_v38  ;;  %vm5942_vm11 = vweird.f32 %v5934_v38 }
0x3bb7   :  { %v5825_v62 = vmul.f32 %v5823_v48, %v5791_v10 }
0x3bb9   :  { %v5828_v14 = vmul.f32 %v5826_v33, %v5825_v62  ;;  %v6819_v33 = vld [vmem:[%s9478_s5 + $0x18] ss:$0 sm:$0xff]  ;;  %s7008_s5 = smov [#allocation2]  }
0x3bba   :  { %s5971_s29 = sshll.u32 %s7008_s5, 4  ;;  %s5972_s29 = int_to_ptr.vmem [resolvable:$true] %s5971_s29 }
0x3bbb   :  { %v5831_v54 = vadd.f32 %v5829_v30, %v5828_v14 }
0x3bbc   :  { %v6971_v20 = vpop.eup %6970 }
0x3bbd   :  { %v5937_v34 = vmul.f32 %v6971_v20, %v5934_v38  ;;  %6713 = vmatmul.msk.f32.gmra.mxu0 %vm51_vm0, %v5831_v54  ;;  %vm5943_vm8 = vweird.f32 %v6971_v20 }
0x3bbe   :  { %vm5944_vm12 = vmor %vm5942_vm11, %vm5943_vm8 }
0x3bbf   :  { %v5938_v51 = vmul.f32 %v6971_v20, %v5937_v34 }
0x3bc1   :  { %v5939_v12 = vmul.f32 0.5, %v5938_v51 }
0x3bc3   :  { %v5940_v26 = vsub.f32 1.5, %v5939_v12 }
0x3bc5   :  { %v5941_v57 = vmul.f32 %v6971_v20, %v5940_v26 }
0x3bc7   :  { %v5945_v1 = vsel %vm5944_vm12, %v6971_v20, %v5941_v57 }
0x3bc8   :  { %v5956_v53 = vmul.f32 %v5945_v1, %v5922_v25 }
0x3bca   :  { %v5959_v30 = vmul.f32 %v5958_v28, %v5956_v53 }
0x3bcc   :  { %v5962_v15 = vadd.f32 %v6819_v33, %v5959_v30 }
0x3bce   :  { %5964 = vst.msk [vmem:[#allocation2] sm:$0xff] %vm51_vm0, %v5962_v15 }
0x3c3a   :  { %v5868_v47 = vpop.f32.mrf.mxu0 }
0x3c3b   :  { %v5869_v35 = vadd.f32 %v9435_v19, %v5868_v47 }
0x3c3d   :  { %v5872_v50 = vmax.f32 %v5869_v35, 0.0 }
0x3c3f   :  { %6723 = vmatmul.msk.f32.gmra.mxu1 %vm2929_vm14, %v5872_v50 }
0x3cbc   :  { %v5909_v58 = vpop.f32.mrf.mxu1 }
0x3cbd   :  { %v5910_v11 = vadd.f32 %v5909_v58, %v5882_v27 }
0x3cbf   :  { %v5913_v4 = vadd.f32 %v5910_v11, %v5831_v54 }
0x3cc1   :  { %v5917_v40 = vsel %vm51_vm0, %v5913_v4, 0.0 }
0x3cc2   :  { %5918 = vadd.xlane.f32.xlu1 %v5917_v40 }
0x3d35   :  { %v5919_v5 = vpop.xlane.xlu1 %5918 }
0x3d36   :  { %v5921_v3 = vmul.f32 %v5919_v5, %v7571_v44 }
0x3d38   :  { %v5923_v41 = vsub.f32 %v5913_v4, %v5921_v3 }
0x3d3a   :  { %v5925_v43 = vmul.f32 %v5923_v41, %v5923_v41 }
0x3d3c   :  { %v5929_v13 = vsel %vm51_vm0, %v5925_v43, 0.0 }
0x3d3d   :  { %5930 = vadd.xlane.f32.xlu0 %v5929_v13 }
0x3db0   :  { %v5931_v59 = vpop.xlane.xlu0 %5930 }
0x3db1   :  { %v5933_v19 = vmul.f32 %v5931_v59, %v7571_v44 }
0x3db3   :  { %v5935_v16 = vadd.f32 1e-05, %v5933_v19 }
0x3db5   :  { %6972 = vrsqrt.f32 %v5935_v16  ;;  %vm5952_vm13 = vweird.f32 %v5935_v16 }
0x3dbb   :  { %v6973_v31 = vpop.eup %6972 }
0x3dbc   :  { %v5947_v9 = vmul.f32 %v6973_v31, %v5935_v16  ;;  %vm5953_vm14 = vweird.f32 %v6973_v31 }
0x3dbd   :  { %vm5954_vm15 = vmor %vm5952_vm13, %vm5953_vm14 }
0x3dbe   :  { %v5948_v37 = vmul.f32 %v6973_v31, %v5947_v9 }
0x3dc0   :  { %v5949_v52 = vmul.f32 0.5, %v5948_v37 }
0x3dc2   :  { %v5950_v21 = vsub.f32 1.5, %v5949_v52 }
0x3dc4   :  { %v5951_v27 = vmul.f32 %v6973_v31, %v5950_v21 }
0x3dc6   :  { %v5955_v45 = vsel %vm5954_vm15, %v6973_v31, %v5951_v27 }
0x3dc7   :  { %v5957_v55 = vmul.f32 %v5955_v45, %v5923_v41 }
0x3dc9   :  { %v5960_v44 = vmul.f32 %v5958_v28, %v5957_v55 }
0x3dcb   :  { %v5963_v2 = vadd.f32 %v6819_v33, %v5960_v44 }
0x3dcd   :  { %5966 = vst.msk [vmem:[#allocation2 + $0x8] sm:$0xff] %vm51_vm0, %v5963_v2 }
0x3dce   :  { %5979 = dma.vmem_to_hbm [thread:$0]  %s5972_s29, 256, %s5974_s11, [#allocation3], %s7009_s12, %s7009_s12, %s7010_s13  }
0x3dcf   :  { %7005 = dma.done.wait [#allocation3], 256  }
0x3dd0   :  { %7006 = vsyncadd [#allocation3], 4294967040 }
0x3dd1   :  { %5984 = vsyncpa [#allocation3], 1 }

</bundles_post_ra>
